<compile_context>
chip_gen: v5e
topology: v5e:2x2
jax: 0.10.0
libtpu: 0.0.40
codegen_flags: <defaults>
</compile_context>

<pallas_src>
import functools
import math

import jax
import jax.numpy as jnp
from jax.experimental import pallas as pl
from jax.experimental.pallas import tpu as pltpu

_VMEM = pl.BlockSpec(memory_space=pltpu.MemorySpace.VMEM)
EPS = 1e-5

# Residual stage config (static): (in_ch, out_ch, [(use_11conv, stride), ...])
RES_CFG = [
    (64, 64, [(False, 1), (False, 1)]),     # block2 (first_block=True)
    (64, 128, [(True, 2), (False, 1)]),     # block3
    (128, 224, [(True, 2), (False, 1)]),    # block4
]


# ----------------------------- Pallas kernels -----------------------------
def _fused_conv_bn_kernel(*refs, residual, relu, eps):
    """im2col-matmul (+bias) -> batch-stat BN -> [+shortcut | +1x1 side conv] -> [ReLU].

    `residual` is a static flag: "none" | "slab" | "conv".
    All matmuls take bf16 operands with f32 accumulation; BN math is f32.
    """
    if residual == "conv":
        p_ref, w_ref, b_ref, g_ref, bt_ref, sp_ref, sw_ref, sb_ref, o_ref = refs
    elif residual == "slab":
        p_ref, w_ref, b_ref, g_ref, bt_ref, s_ref, o_ref = refs
    else:
        p_ref, w_ref, b_ref, g_ref, bt_ref, o_ref = refs

    acc = jnp.dot(p_ref[...], w_ref[...], preferred_element_type=jnp.float32)
    acc = acc + b_ref[...]                                # conv bias (f32)

    # Training-mode BatchNorm2d: per-channel batch stats over rows (= N*H*W),
    # biased variance, single pass over the in-VMEM accumulator.
    rows = acc.shape[0]
    inv_n = 1.0 / rows
    s1 = jnp.sum(acc, axis=0, keepdims=True)
    s2 = jnp.sum(acc * acc, axis=0, keepdims=True)
    mean = s1 * inv_n
    var = jnp.maximum(s2 * inv_n - mean * mean, 0.0)
    scale = g_ref[...] * jax.lax.rsqrt(var + eps)         # folded gamma*rsqrt
    shift = bt_ref[...] - mean * scale                    # folded beta - mean*scale
    y = acc * scale + shift

    if residual == "conv":
        side = jnp.dot(sp_ref[...], sw_ref[...], preferred_element_type=jnp.float32)
        y = y + side + sb_ref[...]
    elif residual == "slab":
        y = y + s_ref[...].astype(jnp.float32)
    if relu:
        y = jnp.maximum(y, 0.0)
    o_ref[...] = y.astype(o_ref.dtype)


def _max_reduce_kernel(p_ref, o_ref):
    # p_ref: (KH*KW, rows, C) -> max over window taps.
    o_ref[...] = jnp.max(p_ref[...], axis=0)


def _pool_fc_kernel(x_ref, w_ref, b_ref, o_ref):
    # x_ref: (N, H*W, C). AdaptiveAvgPool2d((1,1)) + Flatten + Linear fused.
    pooled = jnp.mean(x_ref[...].astype(jnp.float32), axis=1)          # (N, C)
    out = jnp.dot(pooled, w_ref[...], preferred_element_type=jnp.float32) + b_ref[...]
    o_ref[...] = out.astype(o_ref.dtype)


# ----------------------------- kernel wrappers -----------------------------
def fused_conv_bn(patches, conv_p, bn_p, *, relu, shortcut=None, side=None):
    w, b = conv_p
    g, bt = bn_p
    args = [patches, w, b, g, bt]
    residual = "none"
    if side is not None:
        args += list(side)          # (side_patches, side_w, side_b)
        residual = "conv"
    elif shortcut is not None:
        args.append(shortcut)       # identity shortcut slab (rows, Cout) bf16
        residual = "slab"
    rows, cout = patches.shape[0], w.shape[1]
    return pl.pallas_call(
        functools.partial(_fused_conv_bn_kernel, residual=residual, relu=relu, eps=EPS),
        out_shape=jax.ShapeDtypeStruct((rows, cout), jnp.bfloat16),
        in_specs=[_VMEM] * len(args),
        out_specs=_VMEM,
    )(*args)


# ----------------------------- glue (im2col etc.) -----------------------------
def _window_slices(x, kh, kw, stride):
    n, hp, wp, c = x.shape
    ho = (hp - kh) // stride + 1
    wo = (wp - kw) // stride + 1
    cols = []
    for i in range(kh):
        for j in range(kw):
            cols.append(x[:, i:i + stride * ho:stride, j:j + stride * wo:stride, :])
    return cols, (n, ho, wo, c)


def im2col(x, k, stride, pad):
    if pad > 0:
        x = jnp.pad(x, ((0, 0), (pad, pad), (pad, pad), (0, 0)))
    cols, (n, ho, wo, c) = _window_slices(x, k, k, stride)
    patches = jnp.stack(cols, axis=3)                 # (N, Ho, Wo, k*k, C)
    return patches.reshape(n * ho * wo, k * k * c), (n, ho, wo)


def conv_bn(x, conv_p, bn_p, k, stride, pad, *, relu=True, shortcut=None, side=None):
    patches, (n, ho, wo) = im2col(x, k, stride, pad)
    out = fused_conv_bn(patches, conv_p, bn_p, relu=relu, shortcut=shortcut, side=side)
    return out.reshape(n, ho, wo, conv_p[0].shape[1])


def maxpool_3x3_s2_p1(x):
    xp = jnp.pad(x, ((0, 0), (1, 1), (1, 1), (0, 0)), constant_values=-jnp.inf)
    cols, (n, ho, wo, c) = _window_slices(xp, 3, 3, 2)
    patches = jnp.stack(cols, axis=0).reshape(9, n * ho * wo, c)
    out = pl.pallas_call(
        _max_reduce_kernel,
        out_shape=jax.ShapeDtypeStruct((n * ho * wo, c), x.dtype),
        in_specs=[_VMEM],
        out_specs=_VMEM,
    )(patches)
    return out.reshape(n, ho, wo, c)


# ----------------------------- parameters -----------------------------
def _conv_init(key, cin, cout, k):
    wk, bk = jax.random.split(key)
    fan_in = cin * k * k
    bound = math.sqrt(2.0) * math.sqrt(3.0 / fan_in)          # kaiming_uniform (relu gain)
    w = jax.random.uniform(wk, (k, k, cin, cout), jnp.float32, -bound, bound)
    w = w.reshape(k * k * cin, cout).astype(jnp.bfloat16)     # bf16 im2col weight matrix
    bb = 1.0 / math.sqrt(fan_in)
    b = jax.random.uniform(bk, (1, cout), jnp.float32, -bb, bb)
    return w, b


def _bn_init(c):
    return jnp.ones((1, c), jnp.float32), jnp.zeros((1, c), jnp.float32)


def _res_init(key, cin, cout, use_11):
    k1, k2, k3 = jax.random.split(key, 3)
    p = {
        "conv1": _conv_init(k1, cin, cout, 3),
        "bn1": _bn_init(cout),
        "conv2": _conv_init(k2, cout, cout, 3),
        "bn2": _bn_init(cout),
    }
    if use_11:
        p["side"] = _conv_init(k3, cin, cout, 1)
    return p


def init_params(key):
    keys = jax.random.split(key, 8)
    params = {
        "conv1": _conv_init(keys[0], 1, 64, 7),
        "bn1": _bn_init(64),
        "res": [],
    }
    ki = 1
    for cin, cout, blocks in RES_CFG:
        stage = []
        c = cin
        for use_11, _stride in blocks:
            stage.append(_res_init(keys[ki], c, cout, use_11))
            ki += 1
            c = cout
        params["res"].append(stage)
    # final Linear(224, 30): xavier_uniform weight, default-style bias (kept f32)
    wk, bk = jax.random.split(keys[7])
    xb = math.sqrt(6.0 / (224 + 30))
    wfc = jax.random.uniform(wk, (224, 30), jnp.float32, -xb, xb)
    bb = 1.0 / math.sqrt(224)
    bfc = jax.random.uniform(bk, (1, 30), jnp.float32, -bb, bb)
    params["fc"] = (wfc, bfc)
    return params


# ----------------------------- model forward -----------------------------
def residual_block(x, p, use_11, stride):
    # conv1 + BN1 + ReLU: one fused kernel.
    y = conv_bn(x, p["conv1"], p["bn1"], 3, stride, 1, relu=True)
    if use_11:
        # 1x1 stride-s side conv fused into conv2's kernel as a second matmul.
        sw, sb = p["side"]
        sp = x[:, ::stride, ::stride, :]
        n, ho, wo, cin = sp.shape
        side = (sp.reshape(n * ho * wo, cin), sw, sb)
        return conv_bn(y, p["conv2"], p["bn2"], 3, 1, 1, relu=True, side=side)
    # identity shortcut slab fused into conv2's kernel (add + ReLU epilogue).
    n, h, w, c = x.shape
    return conv_bn(y, p["conv2"], p["bn2"], 3, 1, 1, relu=True,
                   shortcut=x.reshape(n * h * w, c))


@jax.jit
def keypoint_forward(params, x_nchw):
    if x_nchw.ndim == 3:                         # mirror torch.unsqueeze(x, 0)
        x_nchw = x_nchw[None]
    x = jnp.transpose(x_nchw, (0, 2, 3, 1)).astype(jnp.bfloat16)   # NCHW -> NHWC, bf16
    # block1: conv7x7/s2 + BN + ReLU fused, then 3x3/s2/p1 maxpool.
    x = conv_bn(x, params["conv1"], params["bn1"], 7, 2, 3, relu=True)
    x = maxpool_3x3_s2_p1(x)
    # blocks 2-4 (2 fused kernels per residual block)
    for (_cin, _cout, blocks), stage in zip(RES_CFG, params["res"]):
        for (use_11, stride), p in zip(blocks, stage):
            x = residual_block(x, p, use_11, stride)
    # AdaptiveAvgPool2d((1,1)) + Flatten + Linear(224, 30): one fused kernel.
    n, h, w, c = x.shape
    wfc, bfc = params["fc"]
    return pl.pallas_call(
        _pool_fc_kernel,
        out_shape=jax.ShapeDtypeStruct((n, wfc.shape[1]), jnp.float32),
        in_specs=[_VMEM, _VMEM, _VMEM],
        out_specs=_VMEM,
    )(x.reshape(n, h * w, c), wfc, bfc)


if __name__ == "__main__":
    root = jax.random.PRNGKey(0)
    pkey, xkey = jax.random.split(root)
    params = init_params(pkey)
    # Small input consistent with the module: 1-channel images, spatial 16
    # (survives the 16x total downsampling: 16 -> 8 -> 4 -> 2 -> 1).
    x = jax.random.normal(xkey, (2, 1, 16, 16), jnp.float32)
    out = keypoint_forward(params, x)
    out = jax.block_until_ready(out)
    assert out.shape == (2, 30) and out.dtype == jnp.float32
    print("KERNEL_OK")
</pallas_src>

<mosaic_0001>
module attributes {stable_mosaic.version = 11 : i64} {
  func.func @_fused_conv_bn_kernel(%arg0: memref<128x49xbf16, #tpu.memory_space<vmem>>, %arg1: memref<49x64xbf16, #tpu.memory_space<vmem>>, %arg2: memref<1x64xf32, #tpu.memory_space<vmem>>, %arg3: memref<1x64xf32, #tpu.memory_space<vmem>>, %arg4: memref<1x64xf32, #tpu.memory_space<vmem>>, %arg5: memref<128x64xbf16, #tpu.memory_space<vmem>>) attributes {dimension_semantics = [], scalar_prefetch = 0 : i64, scratch_operands = 0 : i64, tpu.core_type = #tpu.core_type<tc>} {
    %c0 = arith.constant 0 : index
    %c0_0 = arith.constant 0 : index
    %0 = vector.load %arg0[%c0, %c0_0] : memref<128x49xbf16, #tpu.memory_space<vmem>>, vector<128x49xbf16>
    %c0_1 = arith.constant 0 : index
    %c0_2 = arith.constant 0 : index
    %1 = vector.load %arg1[%c0_1, %c0_2] : memref<49x64xbf16, #tpu.memory_space<vmem>>, vector<49x64xbf16>
    %cst = arith.constant dense<0.000000e+00> : vector<128x64xf32>
    %2 = tpu.matmul %0, %1, %cst {dimension_numbers = #tpu.dot_dimension_numbers<[1], [0], [0], [1], [0, 0, 1, 1], [], []>} : vector<128x49xbf16>, vector<49x64xbf16>, vector<128x64xf32> -> vector<128x64xf32>
    %c0_3 = arith.constant 0 : index
    %c0_4 = arith.constant 0 : index
    %3 = vector.load %arg2[%c0_3, %c0_4] : memref<1x64xf32, #tpu.memory_space<vmem>>, vector<1x64xf32>
    %4 = vector.broadcast %3 : vector<1x64xf32> to vector<128x64xf32>
    %5 = arith.addf %2, %4 : vector<128x64xf32>
    %cst_5 = arith.constant dense<0.000000e+00> : vector<64xf32>
    %6 = vector.multi_reduction <add>, %5, %cst_5 [0] : vector<128x64xf32> to vector<64xf32>
    %7 = vector.shape_cast %6 : vector<64xf32> to vector<1x64xf32>
    %8 = arith.mulf %5, %5 : vector<128x64xf32>
    %cst_6 = arith.constant dense<0.000000e+00> : vector<64xf32>
    %9 = vector.multi_reduction <add>, %8, %cst_6 [0] : vector<128x64xf32> to vector<64xf32>
    %10 = vector.shape_cast %9 : vector<64xf32> to vector<1x64xf32>
    %cst_7 = arith.constant 7.812500e-03 : f32
    %11 = vector.broadcast %cst_7 : f32 to vector<1x64xf32>
    %12 = arith.mulf %7, %11 : vector<1x64xf32>
    %cst_8 = arith.constant 7.812500e-03 : f32
    %13 = vector.broadcast %cst_8 : f32 to vector<1x64xf32>
    %14 = arith.mulf %10, %13 : vector<1x64xf32>
    %15 = arith.mulf %12, %12 : vector<1x64xf32>
    %16 = arith.subf %14, %15 : vector<1x64xf32>
    %cst_9 = arith.constant 0.000000e+00 : f32
    %17 = vector.broadcast %cst_9 : f32 to vector<1x64xf32>
    %18 = arith.maximumf %16, %17 : vector<1x64xf32>
    %c0_10 = arith.constant 0 : index
    %c0_11 = arith.constant 0 : index
    %19 = vector.load %arg3[%c0_10, %c0_11] : memref<1x64xf32, #tpu.memory_space<vmem>>, vector<1x64xf32>
    %cst_12 = arith.constant 9.99999974E-6 : f32
    %20 = vector.broadcast %cst_12 : f32 to vector<1x64xf32>
    %21 = arith.addf %18, %20 : vector<1x64xf32>
    %22 = math.rsqrt %21 : vector<1x64xf32>
    %23 = arith.mulf %19, %22 : vector<1x64xf32>
    %c0_13 = arith.constant 0 : index
    %c0_14 = arith.constant 0 : index
    %24 = vector.load %arg4[%c0_13, %c0_14] : memref<1x64xf32, #tpu.memory_space<vmem>>, vector<1x64xf32>
    %25 = arith.mulf %12, %23 : vector<1x64xf32>
    %26 = arith.subf %24, %25 : vector<1x64xf32>
    %27 = vector.broadcast %23 : vector<1x64xf32> to vector<128x64xf32>
    %28 = arith.mulf %5, %27 : vector<128x64xf32>
    %29 = vector.broadcast %26 : vector<1x64xf32> to vector<128x64xf32>
    %30 = arith.addf %28, %29 : vector<128x64xf32>
    %cst_15 = arith.constant 0.000000e+00 : f32
    %31 = vector.broadcast %cst_15 : f32 to vector<128x64xf32>
    %32 = arith.maximumf %30, %31 : vector<128x64xf32>
    %33 = arith.truncf %32 : vector<128x64xf32> to vector<128x64xbf16>
    %c0_16 = arith.constant 0 : index
    %c0_17 = arith.constant 0 : index
    %34 = vector.load %arg5[%c0_16, %c0_17] : memref<128x64xbf16, #tpu.memory_space<vmem>>, vector<128x64xbf16>
    tpu.vector_store %arg5[%c0_16, %c0_17], %33 {strides = array<i32>} : memref<128x64xbf16, #tpu.memory_space<vmem>>, vector<128x64xbf16>,
    return
  }
}

module attributes {stable_mosaic.version = 11 : i64} {
  func.func @_max_reduce_kernel(%arg0: memref<9x32x64xbf16, #tpu.memory_space<vmem>>, %arg1: memref<32x64xbf16, #tpu.memory_space<vmem>>) attributes {dimension_semantics = [], scalar_prefetch = 0 : i64, scratch_operands = 0 : i64, tpu.core_type = #tpu.core_type<tc>} {
    %c0 = arith.constant 0 : index
    %c0_0 = arith.constant 0 : index
    %c0_1 = arith.constant 0 : index
    %0 = vector.load %arg0[%c0, %c0_0, %c0_1] : memref<9x32x64xbf16, #tpu.memory_space<vmem>>, vector<9x32x64xbf16>
    %cst = arith.constant dense<0xFF80> : vector<32x64xbf16>
    %1 = vector.multi_reduction <maximumf>, %0, %cst [0] : vector<9x32x64xbf16> to vector<32x64xbf16>
    %c0_2 = arith.constant 0 : index
    %c0_3 = arith.constant 0 : index
    %2 = vector.load %arg1[%c0_2, %c0_3] : memref<32x64xbf16, #tpu.memory_space<vmem>>, vector<32x64xbf16>
    tpu.vector_store %arg1[%c0_2, %c0_3], %1 {strides = array<i32>} : memref<32x64xbf16, #tpu.memory_space<vmem>>, vector<32x64xbf16>,
    return
  }
}

module attributes {stable_mosaic.version = 11 : i64} {
  func.func @_fused_conv_bn_kernel(%arg0: memref<32x576xbf16, #tpu.memory_space<vmem>>, %arg1: memref<576x64xbf16, #tpu.memory_space<vmem>>, %arg2: memref<1x64xf32, #tpu.memory_space<vmem>>, %arg3: memref<1x64xf32, #tpu.memory_space<vmem>>, %arg4: memref<1x64xf32, #tpu.memory_space<vmem>>, %arg5: memref<32x64xbf16, #tpu.memory_space<vmem>>) attributes {dimension_semantics = [], scalar_prefetch = 0 : i64, scratch_operands = 0 : i64, tpu.core_type = #tpu.core_type<tc>} {
    %c0 = arith.constant 0 : index
    %c0_0 = arith.constant 0 : index
    %0 = vector.load %arg0[%c0, %c0_0] : memref<32x576xbf16, #tpu.memory_space<vmem>>, vector<32x576xbf16>
    %c0_1 = arith.constant 0 : index
    %c0_2 = arith.constant 0 : index
    %1 = vector.load %arg1[%c0_1, %c0_2] : memref<576x64xbf16, #tpu.memory_space<vmem>>, vector<576x64xbf16>
    %cst = arith.constant dense<0.000000e+00> : vector<32x64xf32>
    %2 = tpu.matmul %0, %1, %cst {dimension_numbers = #tpu.dot_dimension_numbers<[1], [0], [0], [1], [0, 0, 1, 1], [], []>} : vector<32x576xbf16>, vector<576x64xbf16>, vector<32x64xf32> -> vector<32x64xf32>
    %c0_3 = arith.constant 0 : index
    %c0_4 = arith.constant 0 : index
    %3 = vector.load %arg2[%c0_3, %c0_4] : memref<1x64xf32, #tpu.memory_space<vmem>>, vector<1x64xf32>
    %4 = vector.broadcast %3 : vector<1x64xf32> to vector<32x64xf32>
    %5 = arith.addf %2, %4 : vector<32x64xf32>
    %cst_5 = arith.constant dense<0.000000e+00> : vector<64xf32>
    %6 = vector.multi_reduction <add>, %5, %cst_5 [0] : vector<32x64xf32> to vector<64xf32>
    %7 = vector.shape_cast %6 : vector<64xf32> to vector<1x64xf32>
    %8 = arith.mulf %5, %5 : vector<32x64xf32>
    %cst_6 = arith.constant dense<0.000000e+00> : vector<64xf32>
    %9 = vector.multi_reduction <add>, %8, %cst_6 [0] : vector<32x64xf32> to vector<64xf32>
    %10 = vector.shape_cast %9 : vector<64xf32> to vector<1x64xf32>
    %cst_7 = arith.constant 3.125000e-02 : f32
    %11 = vector.broadcast %cst_7 : f32 to vector<1x64xf32>
    %12 = arith.mulf %7, %11 : vector<1x64xf32>
    %cst_8 = arith.constant 3.125000e-02 : f32
    %13 = vector.broadcast %cst_8 : f32 to vector<1x64xf32>
    %14 = arith.mulf %10, %13 : vector<1x64xf32>
    %15 = arith.mulf %12, %12 : vector<1x64xf32>
    %16 = arith.subf %14, %15 : vector<1x64xf32>
    %cst_9 = arith.constant 0.000000e+00 : f32
    %17 = vector.broadcast %cst_9 : f32 to vector<1x64xf32>
    %18 = arith.maximumf %16, %17 : vector<1x64xf32>
    %c0_10 = arith.constant 0 : index
    %c0_11 = arith.constant 0 : index
    %19 = vector.load %arg3[%c0_10, %c0_11] : memref<1x64xf32, #tpu.memory_space<vmem>>, vector<1x64xf32>
    %cst_12 = arith.constant 9.99999974E-6 : f32
    %20 = vector.broadcast %cst_12 : f32 to vector<1x64xf32>
    %21 = arith.addf %18, %20 : vector<1x64xf32>
    %22 = math.rsqrt %21 : vector<1x64xf32>
    %23 = arith.mulf %19, %22 : vector<1x64xf32>
    %c0_13 = arith.constant 0 : index
    %c0_14 = arith.constant 0 : index
    %24 = vector.load %arg4[%c0_13, %c0_14] : memref<1x64xf32, #tpu.memory_space<vmem>>, vector<1x64xf32>
    %25 = arith.mulf %12, %23 : vector<1x64xf32>
    %26 = arith.subf %24, %25 : vector<1x64xf32>
    %27 = vector.broadcast %23 : vector<1x64xf32> to vector<32x64xf32>
    %28 = arith.mulf %5, %27 : vector<32x64xf32>
    %29 = vector.broadcast %26 : vector<1x64xf32> to vector<32x64xf32>
    %30 = arith.addf %28, %29 : vector<32x64xf32>
    %cst_15 = arith.constant 0.000000e+00 : f32
    %31 = vector.broadcast %cst_15 : f32 to vector<32x64xf32>
    %32 = arith.maximumf %30, %31 : vector<32x64xf32>
    %33 = arith.truncf %32 : vector<32x64xf32> to vector<32x64xbf16>
    %c0_16 = arith.constant 0 : index
    %c0_17 = arith.constant 0 : index
    %34 = vector.load %arg5[%c0_16, %c0_17] : memref<32x64xbf16, #tpu.memory_space<vmem>>, vector<32x64xbf16>
    tpu.vector_store %arg5[%c0_16, %c0_17], %33 {strides = array<i32>} : memref<32x64xbf16, #tpu.memory_space<vmem>>, vector<32x64xbf16>,
    return
  }
}

module attributes {stable_mosaic.version = 11 : i64} {
  func.func @_fused_conv_bn_kernel(%arg0: memref<32x576xbf16, #tpu.memory_space<vmem>>, %arg1: memref<576x64xbf16, #tpu.memory_space<vmem>>, %arg2: memref<1x64xf32, #tpu.memory_space<vmem>>, %arg3: memref<1x64xf32, #tpu.memory_space<vmem>>, %arg4: memref<1x64xf32, #tpu.memory_space<vmem>>, %arg5: memref<32x64xbf16, #tpu.memory_space<vmem>>, %arg6: memref<32x64xbf16, #tpu.memory_space<vmem>>) attributes {dimension_semantics = [], scalar_prefetch = 0 : i64, scratch_operands = 0 : i64, tpu.core_type = #tpu.core_type<tc>} {
    %c0 = arith.constant 0 : index
    %c0_0 = arith.constant 0 : index
    %0 = vector.load %arg0[%c0, %c0_0] : memref<32x576xbf16, #tpu.memory_space<vmem>>, vector<32x576xbf16>
    %c0_1 = arith.constant 0 : index
    %c0_2 = arith.constant 0 : index
    %1 = vector.load %arg1[%c0_1, %c0_2] : memref<576x64xbf16, #tpu.memory_space<vmem>>, vector<576x64xbf16>
    %cst = arith.constant dense<0.000000e+00> : vector<32x64xf32>
    %2 = tpu.matmul %0, %1, %cst {dimension_numbers = #tpu.dot_dimension_numbers<[1], [0], [0], [1], [0, 0, 1, 1], [], []>} : vector<32x576xbf16>, vector<576x64xbf16>, vector<32x64xf32> -> vector<32x64xf32>
    %c0_3 = arith.constant 0 : index
    %c0_4 = arith.constant 0 : index
    %3 = vector.load %arg2[%c0_3, %c0_4] : memref<1x64xf32, #tpu.memory_space<vmem>>, vector<1x64xf32>
    %4 = vector.broadcast %3 : vector<1x64xf32> to vector<32x64xf32>
    %5 = arith.addf %2, %4 : vector<32x64xf32>
    %cst_5 = arith.constant dense<0.000000e+00> : vector<64xf32>
    %6 = vector.multi_reduction <add>, %5, %cst_5 [0] : vector<32x64xf32> to vector<64xf32>
    %7 = vector.shape_cast %6 : vector<64xf32> to vector<1x64xf32>
    %8 = arith.mulf %5, %5 : vector<32x64xf32>
    %cst_6 = arith.constant dense<0.000000e+00> : vector<64xf32>
    %9 = vector.multi_reduction <add>, %8, %cst_6 [0] : vector<32x64xf32> to vector<64xf32>
    %10 = vector.shape_cast %9 : vector<64xf32> to vector<1x64xf32>
    %cst_7 = arith.constant 3.125000e-02 : f32
    %11 = vector.broadcast %cst_7 : f32 to vector<1x64xf32>
    %12 = arith.mulf %7, %11 : vector<1x64xf32>
    %cst_8 = arith.constant 3.125000e-02 : f32
    %13 = vector.broadcast %cst_8 : f32 to vector<1x64xf32>
    %14 = arith.mulf %10, %13 : vector<1x64xf32>
    %15 = arith.mulf %12, %12 : vector<1x64xf32>
    %16 = arith.subf %14, %15 : vector<1x64xf32>
    %cst_9 = arith.constant 0.000000e+00 : f32
    %17 = vector.broadcast %cst_9 : f32 to vector<1x64xf32>
    %18 = arith.maximumf %16, %17 : vector<1x64xf32>
    %c0_10 = arith.constant 0 : index
    %c0_11 = arith.constant 0 : index
    %19 = vector.load %arg3[%c0_10, %c0_11] : memref<1x64xf32, #tpu.memory_space<vmem>>, vector<1x64xf32>
    %cst_12 = arith.constant 9.99999974E-6 : f32
    %20 = vector.broadcast %cst_12 : f32 to vector<1x64xf32>
    %21 = arith.addf %18, %20 : vector<1x64xf32>
    %22 = math.rsqrt %21 : vector<1x64xf32>
    %23 = arith.mulf %19, %22 : vector<1x64xf32>
    %c0_13 = arith.constant 0 : index
    %c0_14 = arith.constant 0 : index
    %24 = vector.load %arg4[%c0_13, %c0_14] : memref<1x64xf32, #tpu.memory_space<vmem>>, vector<1x64xf32>
    %25 = arith.mulf %12, %23 : vector<1x64xf32>
    %26 = arith.subf %24, %25 : vector<1x64xf32>
    %27 = vector.broadcast %23 : vector<1x64xf32> to vector<32x64xf32>
    %28 = arith.mulf %5, %27 : vector<32x64xf32>
    %29 = vector.broadcast %26 : vector<1x64xf32> to vector<32x64xf32>
    %30 = arith.addf %28, %29 : vector<32x64xf32>
    %c0_15 = arith.constant 0 : index
    %c0_16 = arith.constant 0 : index
    %31 = vector.load %arg5[%c0_15, %c0_16] : memref<32x64xbf16, #tpu.memory_space<vmem>>, vector<32x64xbf16>
    %32 = arith.extf %31 : vector<32x64xbf16> to vector<32x64xf32>
    %33 = arith.addf %30, %32 : vector<32x64xf32>
    %cst_17 = arith.constant 0.000000e+00 : f32
    %34 = vector.broadcast %cst_17 : f32 to vector<32x64xf32>
    %35 = arith.maximumf %33, %34 : vector<32x64xf32>
    %36 = arith.truncf %35 : vector<32x64xf32> to vector<32x64xbf16>
    %c0_18 = arith.constant 0 : index
    %c0_19 = arith.constant 0 : index
    %37 = vector.load %arg6[%c0_18, %c0_19] : memref<32x64xbf16, #tpu.memory_space<vmem>>, vector<32x64xbf16>
    tpu.vector_store %arg6[%c0_18, %c0_19], %36 {strides = array<i32>} : memref<32x64xbf16, #tpu.memory_space<vmem>>, vector<32x64xbf16>,
    return
  }
}

module attributes {stable_mosaic.version = 11 : i64} {
  func.func @_fused_conv_bn_kernel(%arg0: memref<8x576xbf16, #tpu.memory_space<vmem>>, %arg1: memref<576x128xbf16, #tpu.memory_space<vmem>>, %arg2: memref<1x128xf32, #tpu.memory_space<vmem>>, %arg3: memref<1x128xf32, #tpu.memory_space<vmem>>, %arg4: memref<1x128xf32, #tpu.memory_space<vmem>>, %arg5: memref<8x128xbf16, #tpu.memory_space<vmem>>) attributes {dimension_semantics = [], scalar_prefetch = 0 : i64, scratch_operands = 0 : i64, tpu.core_type = #tpu.core_type<tc>} {
    %c0 = arith.constant 0 : index
    %c0_0 = arith.constant 0 : index
    %0 = vector.load %arg0[%c0, %c0_0] : memref<8x576xbf16, #tpu.memory_space<vmem>>, vector<8x576xbf16>
    %c0_1 = arith.constant 0 : index
    %c0_2 = arith.constant 0 : index
    %1 = vector.load %arg1[%c0_1, %c0_2] : memref<576x128xbf16, #tpu.memory_space<vmem>>, vector<576x128xbf16>
    %cst = arith.constant dense<0.000000e+00> : vector<8x128xf32>
    %2 = tpu.matmul %0, %1, %cst {dimension_numbers = #tpu.dot_dimension_numbers<[1], [0], [0], [1], [0, 0, 1, 1], [], []>} : vector<8x576xbf16>, vector<576x128xbf16>, vector<8x128xf32> -> vector<8x128xf32>
    %c0_3 = arith.constant 0 : index
    %c0_4 = arith.constant 0 : index
    %3 = vector.load %arg2[%c0_3, %c0_4] : memref<1x128xf32, #tpu.memory_space<vmem>>, vector<1x128xf32>
    %4 = vector.broadcast %3 : vector<1x128xf32> to vector<8x128xf32>
    %5 = arith.addf %2, %4 : vector<8x128xf32>
    %cst_5 = arith.constant dense<0.000000e+00> : vector<128xf32>
    %6 = vector.multi_reduction <add>, %5, %cst_5 [0] : vector<8x128xf32> to vector<128xf32>
    %7 = vector.shape_cast %6 : vector<128xf32> to vector<1x128xf32>
    %8 = arith.mulf %5, %5 : vector<8x128xf32>
    %cst_6 = arith.constant dense<0.000000e+00> : vector<128xf32>
    %9 = vector.multi_reduction <add>, %8, %cst_6 [0] : vector<8x128xf32> to vector<128xf32>
    %10 = vector.shape_cast %9 : vector<128xf32> to vector<1x128xf32>
    %cst_7 = arith.constant 1.250000e-01 : f32
    %11 = vector.broadcast %cst_7 : f32 to vector<1x128xf32>
    %12 = arith.mulf %7, %11 : vector<1x128xf32>
    %cst_8 = arith.constant 1.250000e-01 : f32
    %13 = vector.broadcast %cst_8 : f32 to vector<1x128xf32>
    %14 = arith.mulf %10, %13 : vector<1x128xf32>
    %15 = arith.mulf %12, %12 : vector<1x128xf32>
    %16 = arith.subf %14, %15 : vector<1x128xf32>
    %cst_9 = arith.constant 0.000000e+00 : f32
    %17 = vector.broadcast %cst_9 : f32 to vector<1x128xf32>
    %18 = arith.maximumf %16, %17 : vector<1x128xf32>
    %c0_10 = arith.constant 0 : index
    %c0_11 = arith.constant 0 : index
    %19 = vector.load %arg3[%c0_10, %c0_11] : memref<1x128xf32, #tpu.memory_space<vmem>>, vector<1x128xf32>
    %cst_12 = arith.constant 9.99999974E-6 : f32
    %20 = vector.broadcast %cst_12 : f32 to vector<1x128xf32>
    %21 = arith.addf %18, %20 : vector<1x128xf32>
    %22 = math.rsqrt %21 : vector<1x128xf32>
    %23 = arith.mulf %19, %22 : vector<1x128xf32>
    %c0_13 = arith.constant 0 : index
    %c0_14 = arith.constant 0 : index
    %24 = vector.load %arg4[%c0_13, %c0_14] : memref<1x128xf32, #tpu.memory_space<vmem>>, vector<1x128xf32>
    %25 = arith.mulf %12, %23 : vector<1x128xf32>
    %26 = arith.subf %24, %25 : vector<1x128xf32>
    %27 = vector.broadcast %23 : vector<1x128xf32> to vector<8x128xf32>
    %28 = arith.mulf %5, %27 : vector<8x128xf32>
    %29 = vector.broadcast %26 : vector<1x128xf32> to vector<8x128xf32>
    %30 = arith.addf %28, %29 : vector<8x128xf32>
    %cst_15 = arith.constant 0.000000e+00 : f32
    %31 = vector.broadcast %cst_15 : f32 to vector<8x128xf32>
    %32 = arith.maximumf %30, %31 : vector<8x128xf32>
    %33 = arith.truncf %32 : vector<8x128xf32> to vector<8x128xbf16>
    %c0_16 = arith.constant 0 : index
    %c0_17 = arith.constant 0 : index
    %34 = vector.load %arg5[%c0_16, %c0_17] : memref<8x128xbf16, #tpu.memory_space<vmem>>, vector<8x128xbf16>
    tpu.vector_store %arg5[%c0_16, %c0_17], %33 {strides = array<i32>} : memref<8x128xbf16, #tpu.memory_space<vmem>>, vector<8x128xbf16>,
    return
  }
}

module attributes {stable_mosaic.version = 11 : i64} {
  func.func @_fused_conv_bn_kernel(%arg0: memref<8x1152xbf16, #tpu.memory_space<vmem>>, %arg1: memref<1152x128xbf16, #tpu.memory_space<vmem>>, %arg2: memref<1x128xf32, #tpu.memory_space<vmem>>, %arg3: memref<1x128xf32, #tpu.memory_space<vmem>>, %arg4: memref<1x128xf32, #tpu.memory_space<vmem>>, %arg5: memref<8x128xbf16, #tpu.memory_space<vmem>>) attributes {dimension_semantics = [], scalar_prefetch = 0 : i64, scratch_operands = 0 : i64, tpu.core_type = #tpu.core_type<tc>} {
    %c0 = arith.constant 0 : index
    %c0_0 = arith.constant 0 : index
    %0 = vector.load %arg0[%c0, %c0_0] : memref<8x1152xbf16, #tpu.memory_space<vmem>>, vector<8x1152xbf16>
    %c0_1 = arith.constant 0 : index
    %c0_2 = arith.constant 0 : index
    %1 = vector.load %arg1[%c0_1, %c0_2] : memref<1152x128xbf16, #tpu.memory_space<vmem>>, vector<1152x128xbf16>
    %cst = arith.constant dense<0.000000e+00> : vector<8x128xf32>
    %2 = tpu.matmul %0, %1, %cst {dimension_numbers = #tpu.dot_dimension_numbers<[1], [0], [0], [1], [0, 0, 1, 1], [], []>} : vector<8x1152xbf16>, vector<1152x128xbf16>, vector<8x128xf32> -> vector<8x128xf32>
    %c0_3 = arith.constant 0 : index
    %c0_4 = arith.constant 0 : index
    %3 = vector.load %arg2[%c0_3, %c0_4] : memref<1x128xf32, #tpu.memory_space<vmem>>, vector<1x128xf32>
    %4 = vector.broadcast %3 : vector<1x128xf32> to vector<8x128xf32>
    %5 = arith.addf %2, %4 : vector<8x128xf32>
    %cst_5 = arith.constant dense<0.000000e+00> : vector<128xf32>
    %6 = vector.multi_reduction <add>, %5, %cst_5 [0] : vector<8x128xf32> to vector<128xf32>
    %7 = vector.shape_cast %6 : vector<128xf32> to vector<1x128xf32>
    %8 = arith.mulf %5, %5 : vector<8x128xf32>
    %cst_6 = arith.constant dense<0.000000e+00> : vector<128xf32>
    %9 = vector.multi_reduction <add>, %8, %cst_6 [0] : vector<8x128xf32> to vector<128xf32>
    %10 = vector.shape_cast %9 : vector<128xf32> to vector<1x128xf32>
    %cst_7 = arith.constant 1.250000e-01 : f32
    %11 = vector.broadcast %cst_7 : f32 to vector<1x128xf32>
    %12 = arith.mulf %7, %11 : vector<1x128xf32>
    %cst_8 = arith.constant 1.250000e-01 : f32
    %13 = vector.broadcast %cst_8 : f32 to vector<1x128xf32>
    %14 = arith.mulf %10, %13 : vector<1x128xf32>
    %15 = arith.mulf %12, %12 : vector<1x128xf32>
    %16 = arith.subf %14, %15 : vector<1x128xf32>
    %cst_9 = arith.constant 0.000000e+00 : f32
    %17 = vector.broadcast %cst_9 : f32 to vector<1x128xf32>
    %18 = arith.maximumf %16, %17 : vector<1x128xf32>
    %c0_10 = arith.constant 0 : index
    %c0_11 = arith.constant 0 : index
    %19 = vector.load %arg3[%c0_10, %c0_11] : memref<1x128xf32, #tpu.memory_space<vmem>>, vector<1x128xf32>
    %cst_12 = arith.constant 9.99999974E-6 : f32
    %20 = vector.broadcast %cst_12 : f32 to vector<1x128xf32>
    %21 = arith.addf %18, %20 : vector<1x128xf32>
    %22 = math.rsqrt %21 : vector<1x128xf32>
    %23 = arith.mulf %19, %22 : vector<1x128xf32>
    %c0_13 = arith.constant 0 : index
    %c0_14 = arith.constant 0 : index
    %24 = vector.load %arg4[%c0_13, %c0_14] : memref<1x128xf32, #tpu.memory_space<vmem>>, vector<1x128xf32>
    %25 = arith.mulf %12, %23 : vector<1x128xf32>
    %26 = arith.subf %24, %25 : vector<1x128xf32>
    %27 = vector.broadcast %23 : vector<1x128xf32> to vector<8x128xf32>
    %28 = arith.mulf %5, %27 : vector<8x128xf32>
    %29 = vector.broadcast %26 : vector<1x128xf32> to vector<8x128xf32>
    %30 = arith.addf %28, %29 : vector<8x128xf32>
    %cst_15 = arith.constant 0.000000e+00 : f32
    %31 = vector.broadcast %cst_15 : f32 to vector<8x128xf32>
    %32 = arith.maximumf %30, %31 : vector<8x128xf32>
    %33 = arith.truncf %32 : vector<8x128xf32> to vector<8x128xbf16>
    %c0_16 = arith.constant 0 : index
    %c0_17 = arith.constant 0 : index
    %34 = vector.load %arg5[%c0_16, %c0_17] : memref<8x128xbf16, #tpu.memory_space<vmem>>, vector<8x128xbf16>
    tpu.vector_store %arg5[%c0_16, %c0_17], %33 {strides = array<i32>} : memref<8x128xbf16, #tpu.memory_space<vmem>>, vector<8x128xbf16>,
    return
  }
}

module attributes {stable_mosaic.version = 11 : i64} {
  func.func @_fused_conv_bn_kernel(%arg0: memref<8x1152xbf16, #tpu.memory_space<vmem>>, %arg1: memref<1152x128xbf16, #tpu.memory_space<vmem>>, %arg2: memref<1x128xf32, #tpu.memory_space<vmem>>, %arg3: memref<1x128xf32, #tpu.memory_space<vmem>>, %arg4: memref<1x128xf32, #tpu.memory_space<vmem>>, %arg5: memref<8x64xbf16, #tpu.memory_space<vmem>>, %arg6: memref<64x128xbf16, #tpu.memory_space<vmem>>, %arg7: memref<1x128xf32, #tpu.memory_space<vmem>>, %arg8: memref<8x128xbf16, #tpu.memory_space<vmem>>) attributes {dimension_semantics = [], scalar_prefetch = 0 : i64, scratch_operands = 0 : i64, tpu.core_type = #tpu.core_type<tc>} {
    %c0 = arith.constant 0 : index
    %c0_0 = arith.constant 0 : index
    %0 = vector.load %arg0[%c0, %c0_0] : memref<8x1152xbf16, #tpu.memory_space<vmem>>, vector<8x1152xbf16>
    %c0_1 = arith.constant 0 : index
    %c0_2 = arith.constant 0 : index
    %1 = vector.load %arg1[%c0_1, %c0_2] : memref<1152x128xbf16, #tpu.memory_space<vmem>>, vector<1152x128xbf16>
    %cst = arith.constant dense<0.000000e+00> : vector<8x128xf32>
    %2 = tpu.matmul %0, %1, %cst {dimension_numbers = #tpu.dot_dimension_numbers<[1], [0], [0], [1], [0, 0, 1, 1], [], []>} : vector<8x1152xbf16>, vector<1152x128xbf16>, vector<8x128xf32> -> vector<8x128xf32>
    %c0_3 = arith.constant 0 : index
    %c0_4 = arith.constant 0 : index
    %3 = vector.load %arg2[%c0_3, %c0_4] : memref<1x128xf32, #tpu.memory_space<vmem>>, vector<1x128xf32>
    %4 = vector.broadcast %3 : vector<1x128xf32> to vector<8x128xf32>
    %5 = arith.addf %2, %4 : vector<8x128xf32>
    %cst_5 = arith.constant dense<0.000000e+00> : vector<128xf32>
    %6 = vector.multi_reduction <add>, %5, %cst_5 [0] : vector<8x128xf32> to vector<128xf32>
    %7 = vector.shape_cast %6 : vector<128xf32> to vector<1x128xf32>
    %8 = arith.mulf %5, %5 : vector<8x128xf32>
    %cst_6 = arith.constant dense<0.000000e+00> : vector<128xf32>
    %9 = vector.multi_reduction <add>, %8, %cst_6 [0] : vector<8x128xf32> to vector<128xf32>
    %10 = vector.shape_cast %9 : vector<128xf32> to vector<1x128xf32>
    %cst_7 = arith.constant 1.250000e-01 : f32
    %11 = vector.broadcast %cst_7 : f32 to vector<1x128xf32>
    %12 = arith.mulf %7, %11 : vector<1x128xf32>
    %cst_8 = arith.constant 1.250000e-01 : f32
    %13 = vector.broadcast %cst_8 : f32 to vector<1x128xf32>
    %14 = arith.mulf %10, %13 : vector<1x128xf32>
    %15 = arith.mulf %12, %12 : vector<1x128xf32>
    %16 = arith.subf %14, %15 : vector<1x128xf32>
    %cst_9 = arith.constant 0.000000e+00 : f32
    %17 = vector.broadcast %cst_9 : f32 to vector<1x128xf32>
    %18 = arith.maximumf %16, %17 : vector<1x128xf32>
    %c0_10 = arith.constant 0 : index
    %c0_11 = arith.constant 0 : index
    %19 = vector.load %arg3[%c0_10, %c0_11] : memref<1x128xf32, #tpu.memory_space<vmem>>, vector<1x128xf32>
    %cst_12 = arith.constant 9.99999974E-6 : f32
    %20 = vector.broadcast %cst_12 : f32 to vector<1x128xf32>
    %21 = arith.addf %18, %20 : vector<1x128xf32>
    %22 = math.rsqrt %21 : vector<1x128xf32>
    %23 = arith.mulf %19, %22 : vector<1x128xf32>
    %c0_13 = arith.constant 0 : index
    %c0_14 = arith.constant 0 : index
    %24 = vector.load %arg4[%c0_13, %c0_14] : memref<1x128xf32, #tpu.memory_space<vmem>>, vector<1x128xf32>
    %25 = arith.mulf %12, %23 : vector<1x128xf32>
    %26 = arith.subf %24, %25 : vector<1x128xf32>
    %27 = vector.broadcast %23 : vector<1x128xf32> to vector<8x128xf32>
    %28 = arith.mulf %5, %27 : vector<8x128xf32>
    %29 = vector.broadcast %26 : vector<1x128xf32> to vector<8x128xf32>
    %30 = arith.addf %28, %29 : vector<8x128xf32>
    %c0_15 = arith.constant 0 : index
    %c0_16 = arith.constant 0 : index
    %31 = vector.load %arg5[%c0_15, %c0_16] : memref<8x64xbf16, #tpu.memory_space<vmem>>, vector<8x64xbf16>
    %c0_17 = arith.constant 0 : index
    %c0_18 = arith.constant 0 : index
    %32 = vector.load %arg6[%c0_17, %c0_18] : memref<64x128xbf16, #tpu.memory_space<vmem>>, vector<64x128xbf16>
    %cst_19 = arith.constant dense<0.000000e+00> : vector<8x128xf32>
    %33 = tpu.matmul %31, %32, %cst_19 {dimension_numbers = #tpu.dot_dimension_numbers<[1], [0], [0], [1], [0, 0, 1, 1], [], []>} : vector<8x64xbf16>, vector<64x128xbf16>, vector<8x128xf32> -> vector<8x128xf32>
    %34 = arith.addf %30, %33 : vector<8x128xf32>
    %c0_20 = arith.constant 0 : index
    %c0_21 = arith.constant 0 : index
    %35 = vector.load %arg7[%c0_20, %c0_21] : memref<1x128xf32, #tpu.memory_space<vmem>>, vector<1x128xf32>
    %36 = vector.broadcast %35 : vector<1x128xf32> to vector<8x128xf32>
    %37 = arith.addf %34, %36 : vector<8x128xf32>
    %cst_22 = arith.constant 0.000000e+00 : f32
    %38 = vector.broadcast %cst_22 : f32 to vector<8x128xf32>
    %39 = arith.maximumf %37, %38 : vector<8x128xf32>
    %40 = arith.truncf %39 : vector<8x128xf32> to vector<8x128xbf16>
    %c0_23 = arith.constant 0 : index
    %c0_24 = arith.constant 0 : index
    %41 = vector.load %arg8[%c0_23, %c0_24] : memref<8x128xbf16, #tpu.memory_space<vmem>>, vector<8x128xbf16>
    tpu.vector_store %arg8[%c0_23, %c0_24], %40 {strides = array<i32>} : memref<8x128xbf16, #tpu.memory_space<vmem>>, vector<8x128xbf16>,
    return
  }
}

module attributes {stable_mosaic.version = 11 : i64} {
  func.func @_fused_conv_bn_kernel(%arg0: memref<8x1152xbf16, #tpu.memory_space<vmem>>, %arg1: memref<1152x128xbf16, #tpu.memory_space<vmem>>, %arg2: memref<1x128xf32, #tpu.memory_space<vmem>>, %arg3: memref<1x128xf32, #tpu.memory_space<vmem>>, %arg4: memref<1x128xf32, #tpu.memory_space<vmem>>, %arg5: memref<8x128xbf16, #tpu.memory_space<vmem>>, %arg6: memref<8x128xbf16, #tpu.memory_space<vmem>>) attributes {dimension_semantics = [], scalar_prefetch = 0 : i64, scratch_operands = 0 : i64, tpu.core_type = #tpu.core_type<tc>} {
    %c0 = arith.constant 0 : index
    %c0_0 = arith.constant 0 : index
    %0 = vector.load %arg0[%c0, %c0_0] : memref<8x1152xbf16, #tpu.memory_space<vmem>>, vector<8x1152xbf16>
    %c0_1 = arith.constant 0 : index
    %c0_2 = arith.constant 0 : index
    %1 = vector.load %arg1[%c0_1, %c0_2] : memref<1152x128xbf16, #tpu.memory_space<vmem>>, vector<1152x128xbf16>
    %cst = arith.constant dense<0.000000e+00> : vector<8x128xf32>
    %2 = tpu.matmul %0, %1, %cst {dimension_numbers = #tpu.dot_dimension_numbers<[1], [0], [0], [1], [0, 0, 1, 1], [], []>} : vector<8x1152xbf16>, vector<1152x128xbf16>, vector<8x128xf32> -> vector<8x128xf32>
    %c0_3 = arith.constant 0 : index
    %c0_4 = arith.constant 0 : index
    %3 = vector.load %arg2[%c0_3, %c0_4] : memref<1x128xf32, #tpu.memory_space<vmem>>, vector<1x128xf32>
    %4 = vector.broadcast %3 : vector<1x128xf32> to vector<8x128xf32>
    %5 = arith.addf %2, %4 : vector<8x128xf32>
    %cst_5 = arith.constant dense<0.000000e+00> : vector<128xf32>
    %6 = vector.multi_reduction <add>, %5, %cst_5 [0] : vector<8x128xf32> to vector<128xf32>
    %7 = vector.shape_cast %6 : vector<128xf32> to vector<1x128xf32>
    %8 = arith.mulf %5, %5 : vector<8x128xf32>
    %cst_6 = arith.constant dense<0.000000e+00> : vector<128xf32>
    %9 = vector.multi_reduction <add>, %8, %cst_6 [0] : vector<8x128xf32> to vector<128xf32>
    %10 = vector.shape_cast %9 : vector<128xf32> to vector<1x128xf32>
    %cst_7 = arith.constant 1.250000e-01 : f32
    %11 = vector.broadcast %cst_7 : f32 to vector<1x128xf32>
    %12 = arith.mulf %7, %11 : vector<1x128xf32>
    %cst_8 = arith.constant 1.250000e-01 : f32
    %13 = vector.broadcast %cst_8 : f32 to vector<1x128xf32>
    %14 = arith.mulf %10, %13 : vector<1x128xf32>
    %15 = arith.mulf %12, %12 : vector<1x128xf32>
    %16 = arith.subf %14, %15 : vector<1x128xf32>
    %cst_9 = arith.constant 0.000000e+00 : f32
    %17 = vector.broadcast %cst_9 : f32 to vector<1x128xf32>
    %18 = arith.maximumf %16, %17 : vector<1x128xf32>
    %c0_10 = arith.constant 0 : index
    %c0_11 = arith.constant 0 : index
    %19 = vector.load %arg3[%c0_10, %c0_11] : memref<1x128xf32, #tpu.memory_space<vmem>>, vector<1x128xf32>
    %cst_12 = arith.constant 9.99999974E-6 : f32
    %20 = vector.broadcast %cst_12 : f32 to vector<1x128xf32>
    %21 = arith.addf %18, %20 : vector<1x128xf32>
    %22 = math.rsqrt %21 : vector<1x128xf32>
    %23 = arith.mulf %19, %22 : vector<1x128xf32>
    %c0_13 = arith.constant 0 : index
    %c0_14 = arith.constant 0 : index
    %24 = vector.load %arg4[%c0_13, %c0_14] : memref<1x128xf32, #tpu.memory_space<vmem>>, vector<1x128xf32>
    %25 = arith.mulf %12, %23 : vector<1x128xf32>
    %26 = arith.subf %24, %25 : vector<1x128xf32>
    %27 = vector.broadcast %23 : vector<1x128xf32> to vector<8x128xf32>
    %28 = arith.mulf %5, %27 : vector<8x128xf32>
    %29 = vector.broadcast %26 : vector<1x128xf32> to vector<8x128xf32>
    %30 = arith.addf %28, %29 : vector<8x128xf32>
    %c0_15 = arith.constant 0 : index
    %c0_16 = arith.constant 0 : index
    %31 = vector.load %arg5[%c0_15, %c0_16] : memref<8x128xbf16, #tpu.memory_space<vmem>>, vector<8x128xbf16>
    %32 = arith.extf %31 : vector<8x128xbf16> to vector<8x128xf32>
    %33 = arith.addf %30, %32 : vector<8x128xf32>
    %cst_17 = arith.constant 0.000000e+00 : f32
    %34 = vector.broadcast %cst_17 : f32 to vector<8x128xf32>
    %35 = arith.maximumf %33, %34 : vector<8x128xf32>
    %36 = arith.truncf %35 : vector<8x128xf32> to vector<8x128xbf16>
    %c0_18 = arith.constant 0 : index
    %c0_19 = arith.constant 0 : index
    %37 = vector.load %arg6[%c0_18, %c0_19] : memref<8x128xbf16, #tpu.memory_space<vmem>>, vector<8x128xbf16>
    tpu.vector_store %arg6[%c0_18, %c0_19], %36 {strides = array<i32>} : memref<8x128xbf16, #tpu.memory_space<vmem>>, vector<8x128xbf16>,
    return
  }
}

module attributes {stable_mosaic.version = 11 : i64} {
  func.func @_fused_conv_bn_kernel(%arg0: memref<2x1152xbf16, #tpu.memory_space<vmem>>, %arg1: memref<1152x224xbf16, #tpu.memory_space<vmem>>, %arg2: memref<1x224xf32, #tpu.memory_space<vmem>>, %arg3: memref<1x224xf32, #tpu.memory_space<vmem>>, %arg4: memref<1x224xf32, #tpu.memory_space<vmem>>, %arg5: memref<2x224xbf16, #tpu.memory_space<vmem>>) attributes {dimension_semantics = [], scalar_prefetch = 0 : i64, scratch_operands = 0 : i64, tpu.core_type = #tpu.core_type<tc>} {
    %c0 = arith.constant 0 : index
    %c0_0 = arith.constant 0 : index
    %0 = vector.load %arg0[%c0, %c0_0] : memref<2x1152xbf16, #tpu.memory_space<vmem>>, vector<2x1152xbf16>
    %c0_1 = arith.constant 0 : index
    %c0_2 = arith.constant 0 : index
    %1 = vector.load %arg1[%c0_1, %c0_2] : memref<1152x224xbf16, #tpu.memory_space<vmem>>, vector<1152x224xbf16>
    %cst = arith.constant dense<0.000000e+00> : vector<2x224xf32>
    %2 = tpu.matmul %0, %1, %cst {dimension_numbers = #tpu.dot_dimension_numbers<[1], [0], [0], [1], [0, 0, 1, 1], [], []>} : vector<2x1152xbf16>, vector<1152x224xbf16>, vector<2x224xf32> -> vector<2x224xf32>
    %c0_3 = arith.constant 0 : index
    %c0_4 = arith.constant 0 : index
    %3 = vector.load %arg2[%c0_3, %c0_4] : memref<1x224xf32, #tpu.memory_space<vmem>>, vector<1x224xf32>
    %4 = vector.broadcast %3 : vector<1x224xf32> to vector<2x224xf32>
    %5 = arith.addf %2, %4 : vector<2x224xf32>
    %cst_5 = arith.constant dense<0.000000e+00> : vector<224xf32>
    %6 = vector.multi_reduction <add>, %5, %cst_5 [0] : vector<2x224xf32> to vector<224xf32>
    %7 = vector.shape_cast %6 : vector<224xf32> to vector<1x224xf32>
    %8 = arith.mulf %5, %5 : vector<2x224xf32>
    %cst_6 = arith.constant dense<0.000000e+00> : vector<224xf32>
    %9 = vector.multi_reduction <add>, %8, %cst_6 [0] : vector<2x224xf32> to vector<224xf32>
    %10 = vector.shape_cast %9 : vector<224xf32> to vector<1x224xf32>
    %cst_7 = arith.constant 5.000000e-01 : f32
    %11 = vector.broadcast %cst_7 : f32 to vector<1x224xf32>
    %12 = arith.mulf %7, %11 : vector<1x224xf32>
    %cst_8 = arith.constant 5.000000e-01 : f32
    %13 = vector.broadcast %cst_8 : f32 to vector<1x224xf32>
    %14 = arith.mulf %10, %13 : vector<1x224xf32>
    %15 = arith.mulf %12, %12 : vector<1x224xf32>
    %16 = arith.subf %14, %15 : vector<1x224xf32>
    %cst_9 = arith.constant 0.000000e+00 : f32
    %17 = vector.broadcast %cst_9 : f32 to vector<1x224xf32>
    %18 = arith.maximumf %16, %17 : vector<1x224xf32>
    %c0_10 = arith.constant 0 : index
    %c0_11 = arith.constant 0 : index
    %19 = vector.load %arg3[%c0_10, %c0_11] : memref<1x224xf32, #tpu.memory_space<vmem>>, vector<1x224xf32>
    %cst_12 = arith.constant 9.99999974E-6 : f32
    %20 = vector.broadcast %cst_12 : f32 to vector<1x224xf32>
    %21 = arith.addf %18, %20 : vector<1x224xf32>
    %22 = math.rsqrt %21 : vector<1x224xf32>
    %23 = arith.mulf %19, %22 : vector<1x224xf32>
    %c0_13 = arith.constant 0 : index
    %c0_14 = arith.constant 0 : index
    %24 = vector.load %arg4[%c0_13, %c0_14] : memref<1x224xf32, #tpu.memory_space<vmem>>, vector<1x224xf32>
    %25 = arith.mulf %12, %23 : vector<1x224xf32>
    %26 = arith.subf %24, %25 : vector<1x224xf32>
    %27 = vector.broadcast %23 : vector<1x224xf32> to vector<2x224xf32>
    %28 = arith.mulf %5, %27 : vector<2x224xf32>
    %29 = vector.broadcast %26 : vector<1x224xf32> to vector<2x224xf32>
    %30 = arith.addf %28, %29 : vector<2x224xf32>
    %cst_15 = arith.constant 0.000000e+00 : f32
    %31 = vector.broadcast %cst_15 : f32 to vector<2x224xf32>
    %32 = arith.maximumf %30, %31 : vector<2x224xf32>
    %33 = arith.truncf %32 : vector<2x224xf32> to vector<2x224xbf16>
    %c0_16 = arith.constant 0 : index
    %c0_17 = arith.constant 0 : index
    %34 = vector.load %arg5[%c0_16, %c0_17] : memref<2x224xbf16, #tpu.memory_space<vmem>>, vector<2x224xbf16>
    tpu.vector_store %arg5[%c0_16, %c0_17], %33 {strides = array<i32>} : memref<2x224xbf16, #tpu.memory_space<vmem>>, vector<2x224xbf16>,
    return
  }
}

module attributes {stable_mosaic.version = 11 : i64} {
  func.func @_fused_conv_bn_kernel(%arg0: memref<2x2016xbf16, #tpu.memory_space<vmem>>, %arg1: memref<2016x224xbf16, #tpu.memory_space<vmem>>, %arg2: memref<1x224xf32, #tpu.memory_space<vmem>>, %arg3: memref<1x224xf32, #tpu.memory_space<vmem>>, %arg4: memref<1x224xf32, #tpu.memory_space<vmem>>, %arg5: memref<2x128xbf16, #tpu.memory_space<vmem>>, %arg6: memref<128x224xbf16, #tpu.memory_space<vmem>>, %arg7: memref<1x224xf32, #tpu.memory_space<vmem>>, %arg8: memref<2x224xbf16, #tpu.memory_space<vmem>>) attributes {dimension_semantics = [], scalar_prefetch = 0 : i64, scratch_operands = 0 : i64, tpu.core_type = #tpu.core_type<tc>} {
    %c0 = arith.constant 0 : index
    %c0_0 = arith.constant 0 : index
    %0 = vector.load %arg0[%c0, %c0_0] : memref<2x2016xbf16, #tpu.memory_space<vmem>>, vector<2x2016xbf16>
    %c0_1 = arith.constant 0 : index
    %c0_2 = arith.constant 0 : index
    %1 = vector.load %arg1[%c0_1, %c0_2] : memref<2016x224xbf16, #tpu.memory_space<vmem>>, vector<2016x224xbf16>
    %cst = arith.constant dense<0.000000e+00> : vector<2x224xf32>
    %2 = tpu.matmul %0, %1, %cst {dimension_numbers = #tpu.dot_dimension_numbers<[1], [0], [0], [1], [0, 0, 1, 1], [], []>} : vector<2x2016xbf16>, vector<2016x224xbf16>, vector<2x224xf32> -> vector<2x224xf32>
    %c0_3 = arith.constant 0 : index
    %c0_4 = arith.constant 0 : index
    %3 = vector.load %arg2[%c0_3, %c0_4] : memref<1x224xf32, #tpu.memory_space<vmem>>, vector<1x224xf32>
    %4 = vector.broadcast %3 : vector<1x224xf32> to vector<2x224xf32>
    %5 = arith.addf %2, %4 : vector<2x224xf32>
    %cst_5 = arith.constant dense<0.000000e+00> : vector<224xf32>
    %6 = vector.multi_reduction <add>, %5, %cst_5 [0] : vector<2x224xf32> to vector<224xf32>
    %7 = vector.shape_cast %6 : vector<224xf32> to vector<1x224xf32>
    %8 = arith.mulf %5, %5 : vector<2x224xf32>
    %cst_6 = arith.constant dense<0.000000e+00> : vector<224xf32>
    %9 = vector.multi_reduction <add>, %8, %cst_6 [0] : vector<2x224xf32> to vector<224xf32>
    %10 = vector.shape_cast %9 : vector<224xf32> to vector<1x224xf32>
    %cst_7 = arith.constant 5.000000e-01 : f32
    %11 = vector.broadcast %cst_7 : f32 to vector<1x224xf32>
    %12 = arith.mulf %7, %11 : vector<1x224xf32>
    %cst_8 = arith.constant 5.000000e-01 : f32
    %13 = vector.broadcast %cst_8 : f32 to vector<1x224xf32>
    %14 = arith.mulf %10, %13 : vector<1x224xf32>
    %15 = arith.mulf %12, %12 : vector<1x224xf32>
    %16 = arith.subf %14, %15 : vector<1x224xf32>
    %cst_9 = arith.constant 0.000000e+00 : f32
    %17 = vector.broadcast %cst_9 : f32 to vector<1x224xf32>
    %18 = arith.maximumf %16, %17 : vector<1x224xf32>
    %c0_10 = arith.constant 0 : index
    %c0_11 = arith.constant 0 : index
    %19 = vector.load %arg3[%c0_10, %c0_11] : memref<1x224xf32, #tpu.memory_space<vmem>>, vector<1x224xf32>
    %cst_12 = arith.constant 9.99999974E-6 : f32
    %20 = vector.broadcast %cst_12 : f32 to vector<1x224xf32>
    %21 = arith.addf %18, %20 : vector<1x224xf32>
    %22 = math.rsqrt %21 : vector<1x224xf32>
    %23 = arith.mulf %19, %22 : vector<1x224xf32>
    %c0_13 = arith.constant 0 : index
    %c0_14 = arith.constant 0 : index
    %24 = vector.load %arg4[%c0_13, %c0_14] : memref<1x224xf32, #tpu.memory_space<vmem>>, vector<1x224xf32>
    %25 = arith.mulf %12, %23 : vector<1x224xf32>
    %26 = arith.subf %24, %25 : vector<1x224xf32>
    %27 = vector.broadcast %23 : vector<1x224xf32> to vector<2x224xf32>
    %28 = arith.mulf %5, %27 : vector<2x224xf32>
    %29 = vector.broadcast %26 : vector<1x224xf32> to vector<2x224xf32>
    %30 = arith.addf %28, %29 : vector<2x224xf32>
    %c0_15 = arith.constant 0 : index
    %c0_16 = arith.constant 0 : index
    %31 = vector.load %arg5[%c0_15, %c0_16] : memref<2x128xbf16, #tpu.memory_space<vmem>>, vector<2x128xbf16>
    %c0_17 = arith.constant 0 : index
    %c0_18 = arith.constant 0 : index
    %32 = vector.load %arg6[%c0_17, %c0_18] : memref<128x224xbf16, #tpu.memory_space<vmem>>, vector<128x224xbf16>
    %cst_19 = arith.constant dense<0.000000e+00> : vector<2x224xf32>
    %33 = tpu.matmul %31, %32, %cst_19 {dimension_numbers = #tpu.dot_dimension_numbers<[1], [0], [0], [1], [0, 0, 1, 1], [], []>} : vector<2x128xbf16>, vector<128x224xbf16>, vector<2x224xf32> -> vector<2x224xf32>
    %34 = arith.addf %30, %33 : vector<2x224xf32>
    %c0_20 = arith.constant 0 : index
    %c0_21 = arith.constant 0 : index
    %35 = vector.load %arg7[%c0_20, %c0_21] : memref<1x224xf32, #tpu.memory_space<vmem>>, vector<1x224xf32>
    %36 = vector.broadcast %35 : vector<1x224xf32> to vector<2x224xf32>
    %37 = arith.addf %34, %36 : vector<2x224xf32>
    %cst_22 = arith.constant 0.000000e+00 : f32
    %38 = vector.broadcast %cst_22 : f32 to vector<2x224xf32>
    %39 = arith.maximumf %37, %38 : vector<2x224xf32>
    %40 = arith.truncf %39 : vector<2x224xf32> to vector<2x224xbf16>
    %c0_23 = arith.constant 0 : index
    %c0_24 = arith.constant 0 : index
    %41 = vector.load %arg8[%c0_23, %c0_24] : memref<2x224xbf16, #tpu.memory_space<vmem>>, vector<2x224xbf16>
    tpu.vector_store %arg8[%c0_23, %c0_24], %40 {strides = array<i32>} : memref<2x224xbf16, #tpu.memory_space<vmem>>, vector<2x224xbf16>,
    return
  }
}

module attributes {stable_mosaic.version = 11 : i64} {
  func.func @_fused_conv_bn_kernel(%arg0: memref<2x2016xbf16, #tpu.memory_space<vmem>>, %arg1: memref<2016x224xbf16, #tpu.memory_space<vmem>>, %arg2: memref<1x224xf32, #tpu.memory_space<vmem>>, %arg3: memref<1x224xf32, #tpu.memory_space<vmem>>, %arg4: memref<1x224xf32, #tpu.memory_space<vmem>>, %arg5: memref<2x224xbf16, #tpu.memory_space<vmem>>) attributes {dimension_semantics = [], scalar_prefetch = 0 : i64, scratch_operands = 0 : i64, tpu.core_type = #tpu.core_type<tc>} {
    %c0 = arith.constant 0 : index
    %c0_0 = arith.constant 0 : index
    %0 = vector.load %arg0[%c0, %c0_0] : memref<2x2016xbf16, #tpu.memory_space<vmem>>, vector<2x2016xbf16>
    %c0_1 = arith.constant 0 : index
    %c0_2 = arith.constant 0 : index
    %1 = vector.load %arg1[%c0_1, %c0_2] : memref<2016x224xbf16, #tpu.memory_space<vmem>>, vector<2016x224xbf16>
    %cst = arith.constant dense<0.000000e+00> : vector<2x224xf32>
    %2 = tpu.matmul %0, %1, %cst {dimension_numbers = #tpu.dot_dimension_numbers<[1], [0], [0], [1], [0, 0, 1, 1], [], []>} : vector<2x2016xbf16>, vector<2016x224xbf16>, vector<2x224xf32> -> vector<2x224xf32>
    %c0_3 = arith.constant 0 : index
    %c0_4 = arith.constant 0 : index
    %3 = vector.load %arg2[%c0_3, %c0_4] : memref<1x224xf32, #tpu.memory_space<vmem>>, vector<1x224xf32>
    %4 = vector.broadcast %3 : vector<1x224xf32> to vector<2x224xf32>
    %5 = arith.addf %2, %4 : vector<2x224xf32>
    %cst_5 = arith.constant dense<0.000000e+00> : vector<224xf32>
    %6 = vector.multi_reduction <add>, %5, %cst_5 [0] : vector<2x224xf32> to vector<224xf32>
    %7 = vector.shape_cast %6 : vector<224xf32> to vector<1x224xf32>
    %8 = arith.mulf %5, %5 : vector<2x224xf32>
    %cst_6 = arith.constant dense<0.000000e+00> : vector<224xf32>
    %9 = vector.multi_reduction <add>, %8, %cst_6 [0] : vector<2x224xf32> to vector<224xf32>
    %10 = vector.shape_cast %9 : vector<224xf32> to vector<1x224xf32>
    %cst_7 = arith.constant 5.000000e-01 : f32
    %11 = vector.broadcast %cst_7 : f32 to vector<1x224xf32>
    %12 = arith.mulf %7, %11 : vector<1x224xf32>
    %cst_8 = arith.constant 5.000000e-01 : f32
    %13 = vector.broadcast %cst_8 : f32 to vector<1x224xf32>
    %14 = arith.mulf %10, %13 : vector<1x224xf32>
    %15 = arith.mulf %12, %12 : vector<1x224xf32>
    %16 = arith.subf %14, %15 : vector<1x224xf32>
    %cst_9 = arith.constant 0.000000e+00 : f32
    %17 = vector.broadcast %cst_9 : f32 to vector<1x224xf32>
    %18 = arith.maximumf %16, %17 : vector<1x224xf32>
    %c0_10 = arith.constant 0 : index
    %c0_11 = arith.constant 0 : index
    %19 = vector.load %arg3[%c0_10, %c0_11] : memref<1x224xf32, #tpu.memory_space<vmem>>, vector<1x224xf32>
    %cst_12 = arith.constant 9.99999974E-6 : f32
    %20 = vector.broadcast %cst_12 : f32 to vector<1x224xf32>
    %21 = arith.addf %18, %20 : vector<1x224xf32>
    %22 = math.rsqrt %21 : vector<1x224xf32>
    %23 = arith.mulf %19, %22 : vector<1x224xf32>
    %c0_13 = arith.constant 0 : index
    %c0_14 = arith.constant 0 : index
    %24 = vector.load %arg4[%c0_13, %c0_14] : memref<1x224xf32, #tpu.memory_space<vmem>>, vector<1x224xf32>
    %25 = arith.mulf %12, %23 : vector<1x224xf32>
    %26 = arith.subf %24, %25 : vector<1x224xf32>
    %27 = vector.broadcast %23 : vector<1x224xf32> to vector<2x224xf32>
    %28 = arith.mulf %5, %27 : vector<2x224xf32>
    %29 = vector.broadcast %26 : vector<1x224xf32> to vector<2x224xf32>
    %30 = arith.addf %28, %29 : vector<2x224xf32>
    %cst_15 = arith.constant 0.000000e+00 : f32
    %31 = vector.broadcast %cst_15 : f32 to vector<2x224xf32>
    %32 = arith.maximumf %30, %31 : vector<2x224xf32>
    %33 = arith.truncf %32 : vector<2x224xf32> to vector<2x224xbf16>
    %c0_16 = arith.constant 0 : index
    %c0_17 = arith.constant 0 : index
    %34 = vector.load %arg5[%c0_16, %c0_17] : memref<2x224xbf16, #tpu.memory_space<vmem>>, vector<2x224xbf16>
    tpu.vector_store %arg5[%c0_16, %c0_17], %33 {strides = array<i32>} : memref<2x224xbf16, #tpu.memory_space<vmem>>, vector<2x224xbf16>,
    return
  }
}

module attributes {stable_mosaic.version = 11 : i64} {
  func.func @_fused_conv_bn_kernel(%arg0: memref<2x2016xbf16, #tpu.memory_space<vmem>>, %arg1: memref<2016x224xbf16, #tpu.memory_space<vmem>>, %arg2: memref<1x224xf32, #tpu.memory_space<vmem>>, %arg3: memref<1x224xf32, #tpu.memory_space<vmem>>, %arg4: memref<1x224xf32, #tpu.memory_space<vmem>>, %arg5: memref<2x224xbf16, #tpu.memory_space<vmem>>, %arg6: memref<2x224xbf16, #tpu.memory_space<vmem>>) attributes {dimension_semantics = [], scalar_prefetch = 0 : i64, scratch_operands = 0 : i64, tpu.core_type = #tpu.core_type<tc>} {
    %c0 = arith.constant 0 : index
    %c0_0 = arith.constant 0 : index
    %0 = vector.load %arg0[%c0, %c0_0] : memref<2x2016xbf16, #tpu.memory_space<vmem>>, vector<2x2016xbf16>
    %c0_1 = arith.constant 0 : index
    %c0_2 = arith.constant 0 : index
    %1 = vector.load %arg1[%c0_1, %c0_2] : memref<2016x224xbf16, #tpu.memory_space<vmem>>, vector<2016x224xbf16>
    %cst = arith.constant dense<0.000000e+00> : vector<2x224xf32>
    %2 = tpu.matmul %0, %1, %cst {dimension_numbers = #tpu.dot_dimension_numbers<[1], [0], [0], [1], [0, 0, 1, 1], [], []>} : vector<2x2016xbf16>, vector<2016x224xbf16>, vector<2x224xf32> -> vector<2x224xf32>
    %c0_3 = arith.constant 0 : index
    %c0_4 = arith.constant 0 : index
    %3 = vector.load %arg2[%c0_3, %c0_4] : memref<1x224xf32, #tpu.memory_space<vmem>>, vector<1x224xf32>
    %4 = vector.broadcast %3 : vector<1x224xf32> to vector<2x224xf32>
    %5 = arith.addf %2, %4 : vector<2x224xf32>
    %cst_5 = arith.constant dense<0.000000e+00> : vector<224xf32>
    %6 = vector.multi_reduction <add>, %5, %cst_5 [0] : vector<2x224xf32> to vector<224xf32>
    %7 = vector.shape_cast %6 : vector<224xf32> to vector<1x224xf32>
    %8 = arith.mulf %5, %5 : vector<2x224xf32>
    %cst_6 = arith.constant dense<0.000000e+00> : vector<224xf32>
    %9 = vector.multi_reduction <add>, %8, %cst_6 [0] : vector<2x224xf32> to vector<224xf32>
    %10 = vector.shape_cast %9 : vector<224xf32> to vector<1x224xf32>
    %cst_7 = arith.constant 5.000000e-01 : f32
    %11 = vector.broadcast %cst_7 : f32 to vector<1x224xf32>
    %12 = arith.mulf %7, %11 : vector<1x224xf32>
    %cst_8 = arith.constant 5.000000e-01 : f32
    %13 = vector.broadcast %cst_8 : f32 to vector<1x224xf32>
    %14 = arith.mulf %10, %13 : vector<1x224xf32>
    %15 = arith.mulf %12, %12 : vector<1x224xf32>
    %16 = arith.subf %14, %15 : vector<1x224xf32>
    %cst_9 = arith.constant 0.000000e+00 : f32
    %17 = vector.broadcast %cst_9 : f32 to vector<1x224xf32>
    %18 = arith.maximumf %16, %17 : vector<1x224xf32>
    %c0_10 = arith.constant 0 : index
    %c0_11 = arith.constant 0 : index
    %19 = vector.load %arg3[%c0_10, %c0_11] : memref<1x224xf32, #tpu.memory_space<vmem>>, vector<1x224xf32>
    %cst_12 = arith.constant 9.99999974E-6 : f32
    %20 = vector.broadcast %cst_12 : f32 to vector<1x224xf32>
    %21 = arith.addf %18, %20 : vector<1x224xf32>
    %22 = math.rsqrt %21 : vector<1x224xf32>
    %23 = arith.mulf %19, %22 : vector<1x224xf32>
    %c0_13 = arith.constant 0 : index
    %c0_14 = arith.constant 0 : index
    %24 = vector.load %arg4[%c0_13, %c0_14] : memref<1x224xf32, #tpu.memory_space<vmem>>, vector<1x224xf32>
    %25 = arith.mulf %12, %23 : vector<1x224xf32>
    %26 = arith.subf %24, %25 : vector<1x224xf32>
    %27 = vector.broadcast %23 : vector<1x224xf32> to vector<2x224xf32>
    %28 = arith.mulf %5, %27 : vector<2x224xf32>
    %29 = vector.broadcast %26 : vector<1x224xf32> to vector<2x224xf32>
    %30 = arith.addf %28, %29 : vector<2x224xf32>
    %c0_15 = arith.constant 0 : index
    %c0_16 = arith.constant 0 : index
    %31 = vector.load %arg5[%c0_15, %c0_16] : memref<2x224xbf16, #tpu.memory_space<vmem>>, vector<2x224xbf16>
    %32 = arith.extf %31 : vector<2x224xbf16> to vector<2x224xf32>
    %33 = arith.addf %30, %32 : vector<2x224xf32>
    %cst_17 = arith.constant 0.000000e+00 : f32
    %34 = vector.broadcast %cst_17 : f32 to vector<2x224xf32>
    %35 = arith.maximumf %33, %34 : vector<2x224xf32>
    %36 = arith.truncf %35 : vector<2x224xf32> to vector<2x224xbf16>
    %c0_18 = arith.constant 0 : index
    %c0_19 = arith.constant 0 : index
    %37 = vector.load %arg6[%c0_18, %c0_19] : memref<2x224xbf16, #tpu.memory_space<vmem>>, vector<2x224xbf16>
    tpu.vector_store %arg6[%c0_18, %c0_19], %36 {strides = array<i32>} : memref<2x224xbf16, #tpu.memory_space<vmem>>, vector<2x224xbf16>,
    return
  }
}

module attributes {stable_mosaic.version = 11 : i64} {
  func.func @_pool_fc_kernel(%arg0: memref<2x1x224xbf16, #tpu.memory_space<vmem>>, %arg1: memref<224x30xf32, #tpu.memory_space<vmem>>, %arg2: memref<1x30xf32, #tpu.memory_space<vmem>>, %arg3: memref<2x30xf32, #tpu.memory_space<vmem>>) attributes {dimension_semantics = [], scalar_prefetch = 0 : i64, scratch_operands = 0 : i64, tpu.core_type = #tpu.core_type<tc>} {
    %c0 = arith.constant 0 : index
    %c0_0 = arith.constant 0 : index
    %c0_1 = arith.constant 0 : index
    %0 = vector.load %arg0[%c0, %c0_0, %c0_1] : memref<2x1x224xbf16, #tpu.memory_space<vmem>>, vector<2x1x224xbf16>
    %1 = arith.extf %0 : vector<2x1x224xbf16> to vector<2x1x224xf32>
    %cst = arith.constant dense<0.000000e+00> : vector<2x224xf32>
    %2 = vector.multi_reduction <add>, %1, %cst [1] : vector<2x1x224xf32> to vector<2x224xf32>
    %cst_2 = arith.constant 1.000000e+00 : f32
    %3 = vector.broadcast %cst_2 : f32 to vector<2x224xf32>
    %4 = arith.divf %2, %3 : vector<2x224xf32>
    %c0_3 = arith.constant 0 : index
    %c0_4 = arith.constant 0 : index
    %5 = vector.load %arg1[%c0_3, %c0_4] : memref<224x30xf32, #tpu.memory_space<vmem>>, vector<224x30xf32>
    %cst_5 = arith.constant dense<0.000000e+00> : vector<2x30xf32>
    %6 = tpu.matmul %4, %5, %cst_5 {dimension_numbers = #tpu.dot_dimension_numbers<[1], [0], [0], [1], [0, 0, 1, 1], [], []>} : vector<2x224xf32>, vector<224x30xf32>, vector<2x30xf32> -> vector<2x30xf32>
    %c0_6 = arith.constant 0 : index
    %c0_7 = arith.constant 0 : index
    %7 = vector.load %arg2[%c0_6, %c0_7] : memref<1x30xf32, #tpu.memory_space<vmem>>, vector<1x30xf32>
    %8 = vector.broadcast %7 : vector<1x30xf32> to vector<2x30xf32>
    %9 = arith.addf %6, %8 : vector<2x30xf32>
    %c0_8 = arith.constant 0 : index
    %c0_9 = arith.constant 0 : index
    %10 = vector.load %arg3[%c0_8, %c0_9] : memref<2x30xf32, #tpu.memory_space<vmem>>, vector<2x30xf32>
    tpu.vector_store %arg3[%c0_8, %c0_9], %9 {strides = array<i32>} : memref<2x30xf32, #tpu.memory_space<vmem>>, vector<2x30xf32>,
    return
  }
}

</mosaic_0001>

<bundles_post_ra>
// kernel: keypoint_forward.17
= control target key start
LH: loop header
LB: loop body
LE: loop exit
PB: predicated region body
PF: predicated region fallthrough
CT: control target
= control target key end

     0   :  { %vm134_vm0 = vcmask 1040384   ;;  %v471_v2 = vmov 0   ;;  %vm109_vm1 = vcmask 400384   ;;  %vm189_vm2 = vcmask 523264   ;;  %s762_s1 = inlined_call_operand.vmem [shape: bf16[49,64], index: 1, kind: input, shape index: {}]   ;;  %s763_s2 = inlined_call_operand.vmem [shape: f32[1,64], index: 2, kind: input, shape index: {}]   ;;  %s764_s0 = inlined_call_operand.vmem [shape: bf16[128,49], index: 0, kind: input, shape index: {}]   ;;  %s765_s3 = inlined_call_operand.vmem [shape: f32[1,64], index: 3, kind: input, shape index: {}]   ;;  %s766_s4 = inlined_call_operand.vmem [shape: f32[1,64], index: 4, kind: input, shape index: {}]   ;;  %s767_s5 = inlined_call_operand.vmem [shape: bf16[128,64], index: 5, kind: output, shape index: {}]  }
   0x1   :  { %v43_v0 = vld [vmem:[%s762_s1 + $0x18] sm:$0x1]  ;;  %v136_v3 = vsel %vm134_vm0, 65535, %v471_v2  ;;  %v454_v6 = vld [vmem:[%s762_s1 + $0x10] sm:$0xff]  ;;  %v453_v7 = vld [vmem:[%s762_s1 + $0x8] sm:$0xff]  ;;  %vm371_vm6 = vcmask 519168  }
   0x2   :  { %v101_v1 = vunpack.c.l.b16 %v43_v0  ;;  %v452_v8 = vld [vmem:[%s762_s1] sm:$0xff]  ;;  %v446_v10 = vld [vmem:[%s764_s0 + $0x10] sm:$0xff]  ;;  %v445_v13 = vld [vmem:[%s764_s0 + $0x8] sm:$0xff] }
   0x3   :  { %v444_v9 = vld [vmem:[%s764_s0] sm:$0xff]  ;;  %v450_v12 = vld [vmem:[%s764_s0 + $0x30] sm:$0xff]  ;;  %v447_v14 = vld [vmem:[%s764_s0 + $0x18] sm:$0xff] }
   0x4   :  { %v105_v4 = vpack.c.b16 %v101_v1, %v101_v1  ;;  %v448_v11 = vld [vmem:[%s764_s0 + $0x20] sm:$0xff]  ;;  %v449_v15 = vld [vmem:[%s764_s0 + $0x28] sm:$0xff]  ;;  %v451_v16 = vld [vmem:[%s764_s0 + $0x38] sm:$0xff] }
   0x5   :  { %v551_v23 = vld [vmem:[%s763_s2] ss:$0 sm:$0xff] }
   0x6   :  { %v138_v5 = vand.u32 %v136_v3, %v105_v4 }
   0x8   :  { %144 = vmatpush.bf16.msra.mxu0 %v138_v5  ;;  %455 = vmatpush.bf16.msra.mxu1 %v138_v5 }
   0x9   :  { %456 = vmatpush.bf16.msra.mxu2 %v138_v5  ;;  %457 = vmatpush.bf16.msra.mxu3 %v138_v5 }
   0xc   :  { %145 = vmatpush.bf16.msra.mxu0 %v454_v6  ;;  %458 = vmatpush.bf16.msra.mxu1 %v454_v6 }
   0xd   :  { %459 = vmatpush.bf16.msra.mxu2 %v454_v6  ;;  %460 = vmatpush.bf16.msra.mxu3 %v454_v6 }
  0x10   :  { %146 = vmatpush.bf16.msra.mxu0 %v453_v7  ;;  %461 = vmatpush.bf16.msra.mxu1 %v453_v7 }
  0x11   :  { %462 = vmatpush.bf16.msra.mxu2 %v453_v7  ;;  %463 = vmatpush.bf16.msra.mxu3 %v453_v7 }
  0x14   :  { %147 = vmatpush.bf16.msra.mxu0 %v452_v8  ;;  %464 = vmatpush.bf16.msra.mxu1 %v452_v8 }
  0x15   :  { %465 = vmatpush.bf16.msra.mxu2 %v452_v8  ;;  %466 = vmatpush.bf16.msra.mxu3 %v452_v8 }
  0x17   :  { %436 = vmatmul.msk.bf16.vlgmr.msra.gmra.mxu0 %vm109_vm1, %v444_v9  ;;  %438 = vmatmul.msk.bf16.vlgmr.msra.gmra.mxu1 %vm109_vm1, %v446_v10 }
  0x18   :  { %440 = vmatmul.msk.bf16.vlgmr.msra.gmra.mxu2 %vm109_vm1, %v448_v11  ;;  %442 = vmatmul.msk.bf16.vlgmr.msra.gmra.mxu3 %vm109_vm1, %v450_v12 }
  0x27   :  { %437 = vmatmul.msk.bf16.gmra.mxu0 %vm109_vm1, %v445_v13  ;;  %439 = vmatmul.msk.bf16.gmra.mxu1 %vm109_vm1, %v447_v14 }
  0x28   :  { %441 = vmatmul.msk.bf16.gmra.mxu2 %vm109_vm1, %v449_v15  ;;  %443 = vmatmul.msk.bf16.gmra.mxu3 %vm109_vm1, %v451_v16 }
  0x94   :  { %v149_v17 = vpop.f32.mrf.mxu0  ;;  %v159_v18 = vpop.f32.mrf.mxu1 }
  0x95   :  { %v557_v28 = vadd.f32 %v551_v23, %v149_v17  ;;  %v573_v36 = vadd.f32 %v551_v23, %v159_v18 }
  0x97   :  { %v227_v31 = vmul.f32 %v557_v28, %v557_v28  ;;  %v190_v35 = vsel %vm189_vm2, %v557_v28, 0.0  ;;  %v231_v49 = vmul.f32 %v573_v36, %v573_v36  ;;  %v197_v55 = vsel %vm189_vm2, %v573_v36, 0.0 }
  0x99   :  { %v243_v42 = vsel %vm189_vm2, %v227_v31, 0.0  ;;  %v250_v61 = vsel %vm189_vm2, %v231_v49, 0.0 }
  0x9b   :  { %v169_v19 = vpop.f32.mrf.mxu2  ;;  %v546_v22 = vpop.f32.mrf.mxu3 }
  0x9c   :  { %v151_v20 = vpop.f32.mrf.mxu0  ;;  %v161_v21 = vpop.f32.mrf.mxu1  ;;  %v607_v63 = vadd.f32 %v551_v23, %v169_v19 }
  0x9d   :  { %v554_v24 = vadd.f32 %v551_v23, %v151_v20  ;;  %v580_v43 = vadd.f32 %v551_v23, %v161_v21 }
  0x9e   :  { %v235_v11 = vmul.f32 %v607_v63, %v607_v63  ;;  %v205_v17 = vsel %vm189_vm2, %v607_v63, 0.0 }
  0x9f   :  { %v228_v30 = vmul.f32 %v554_v24, %v554_v24  ;;  %v191_v32 = vsel %vm189_vm2, %v554_v24, 0.0  ;;  %v232_v56 = vmul.f32 %v580_v43, %v580_v43  ;;  %v199_v62 = vsel %vm189_vm2, %v580_v43, 0.0 }
  0xa0   :  { %v192_v39 = vadd.f32 %v191_v32, %v190_v35 }
  0xa1   :  { %v244_v37 = vsel %vm189_vm2, %v228_v30, 0.0  ;;  %v252_v4 = vsel %vm189_vm2, %v232_v56, 0.0  ;;  %v640_v30 = vadd.f32 %v551_v23, %v546_v22 }
  0xa2   :  { %v245_v46 = vadd.f32 %v244_v37, %v243_v42 }
  0xa3   :  { %v171_v25 = vpop.f32.mrf.mxu2  ;;  %v181_v34 = vpop.f32.mrf.mxu3  ;;  %v239_v42 = vmul.f32 %v640_v30, %v640_v30  ;;  %v213_v49 = vsel %vm189_vm2, %v640_v30, 0.0 }
  0xa4   :  { %v154_v26 = vpop.f32.mrf.mxu0  ;;  %v164_v27 = vpop.f32.mrf.mxu1  ;;  %v615_v6 = vadd.f32 %v551_v23, %v171_v25 }
  0xa5   :  { %v560_v29 = vadd.f32 %v551_v23, %v154_v26  ;;  %v589_v50 = vadd.f32 %v551_v23, %v164_v27  ;;  %v258_v26 = vsel %vm189_vm2, %v235_v11, 0.0  ;;  %v266_v56 = vsel %vm189_vm2, %v239_v42, 0.0 }
  0xa6   :  { %v236_v18 = vmul.f32 %v615_v6, %v615_v6  ;;  %v207_v27 = vsel %vm189_vm2, %v615_v6, 0.0 }
  0xa7   :  { %v229_v33 = vmul.f32 %v560_v29, %v560_v29  ;;  %v193_v38 = vsel %vm189_vm2, %v560_v29, 0.0  ;;  %v233_v0 = vmul.f32 %v589_v50, %v589_v50  ;;  %v201_v5 = vsel %vm189_vm2, %v589_v50, 0.0 }
  0xa8   :  { %v194_v47 = vadd.f32 %v193_v38, %v192_v39  ;;  %v260_v35 = vsel %vm189_vm2, %v236_v18, 0.0  ;;  %v648_v38 = vadd.f32 %v551_v23, %v181_v34 }
  0xa9   :  { %v246_v44 = vsel %vm189_vm2, %v229_v33, 0.0  ;;  %v254_v12 = vsel %vm189_vm2, %v233_v0, 0.0 }
  0xaa   :  { %v247_v53 = vadd.f32 %v246_v44, %v245_v46 }
  0xab   :  { %v174_v41 = vpop.f32.mrf.mxu2  ;;  %v184_v3 = vpop.f32.mrf.mxu3 }
  0xac   :  { %v156_v40 = vpop.f32.mrf.mxu0  ;;  %v166_v48 = vpop.f32.mrf.mxu1  ;;  %v625_v14 = vadd.f32 %v551_v23, %v174_v41 }
  0xad   :  { %v584_v45 = vadd.f32 %v551_v23, %v156_v40  ;;  %v601_v58 = vadd.f32 %v551_v23, %v166_v48 }
  0xae   :  { %v237_v31 = vmul.f32 %v625_v14, %v625_v14  ;;  %v209_v37 = vsel %vm189_vm2, %v625_v14, 0.0 }
  0xaf   :  { %v195_v51 = vsel %vm189_vm2, %v584_v45, 0.0  ;;  %v230_v52 = vmul.f32 %v584_v45, %v584_v45  ;;  %v234_v7 = vmul.f32 %v601_v58, %v601_v58  ;;  %v203_v13 = vsel %vm189_vm2, %v601_v58, 0.0 }
  0xb0   :  { %v196_v54 = vadd.f32 %v195_v51, %v194_v47  ;;  %v262_v44 = vsel %vm189_vm2, %v237_v31, 0.0  ;;  %v658_v47 = vadd.f32 %v551_v23, %v184_v3  ;;  %v240_v51 = vmul.f32 %v648_v38, %v648_v38 }
  0xb1   :  { %v248_v57 = vsel %vm189_vm2, %v230_v52, 0.0  ;;  %v256_v19 = vsel %vm189_vm2, %v234_v7, 0.0 }
  0xb2   :  { %v198_v59 = vadd.f32 %v197_v55, %v196_v54  ;;  %v249_v60 = vadd.f32 %v248_v57, %v247_v53  ;;  %v215_v57 = vsel %vm189_vm2, %v648_v38, 0.0  ;;  %v217_v0 = vsel %vm189_vm2, %v658_v47, 0.0 }
  0xb3   :  { %v176_v10 = vpop.f32.mrf.mxu2  ;;  %v186_v22 = vpop.f32.mrf.mxu3 }
  0xb4   :  { %v251_v1 = vadd.f32 %v250_v61, %v249_v60  ;;  %v200_v2 = vadd.f32 %v199_v62, %v198_v59  ;;  %v633_v20 = vadd.f32 %v551_v23, %v176_v10  ;;  %v187_v53 = vadd.f32 %v551_v23, %v186_v22 }
  0xb5   :  { %v241_v59 = vmul.f32 %v658_v47, %v658_v47  ;;  %v268_v62 = vsel %vm189_vm2, %v240_v51, 0.0 }
  0xb6   :  { %v202_v8 = vadd.f32 %v201_v5, %v200_v2  ;;  %v253_v9 = vadd.f32 %v252_v4, %v251_v1  ;;  %v238_v39 = vmul.f32 %v633_v20, %v633_v20  ;;  %v211_v46 = vsel %vm189_vm2, %v633_v20, 0.0 }
  0xb7   :  { %v242_v1 = vmul.f32 %v187_v53, %v187_v53  ;;  %v270_v3 = vsel %vm189_vm2, %v241_v59, 0.0  ;;  %v219_v4 = vsel %vm189_vm2, %v187_v53, 0.0 }
  0xb8   :  { %v204_v15 = vadd.f32 %v203_v13, %v202_v8  ;;  %v255_v16 = vadd.f32 %v254_v12, %v253_v9  ;;  %v264_v52 = vsel %vm189_vm2, %v238_v39, 0.0 }
  0xb9   :  { %v272_v8 = vsel %vm189_vm2, %v242_v1, 0.0 }
  0xba   :  { %v206_v21 = vadd.f32 %v205_v17, %v204_v15  ;;  %v257_v25 = vadd.f32 %v256_v19, %v255_v16 }
  0xbc   :  { %v259_v32 = vadd.f32 %v258_v26, %v257_v25  ;;  %v208_v33 = vadd.f32 %v207_v27, %v206_v21 }
  0xbe   :  { %v210_v40 = vadd.f32 %v209_v37, %v208_v33  ;;  %v261_v41 = vadd.f32 %v260_v35, %v259_v32 }
  0xc0   :  { %v263_v48 = vadd.f32 %v262_v44, %v261_v41  ;;  %v212_v34 = vadd.f32 %v211_v46, %v210_v40  ;;  %v285_v44 = vld [vmem:[%s765_s3] sm:$0x1] }
  0xc2   :  { %v214_v54 = vadd.f32 %v213_v49, %v212_v34  ;;  %v265_v55 = vadd.f32 %v264_v52, %v263_v48  ;;  %v298_v49 = vld [vmem:[%s766_s4] sm:$0x1] }
  0xc4   :  { %v267_v60 = vadd.f32 %v266_v56, %v265_v55  ;;  %v216_v61 = vadd.f32 %v215_v57, %v214_v54 }
  0xc6   :  { %v218_v2 = vadd.f32 %v217_v0, %v216_v61  ;;  %v269_v23 = vadd.f32 %v268_v62, %v267_v60 }
  0xc8   :  { %v271_v5 = vadd.f32 %v270_v3, %v269_v23  ;;  %v220_v7 = vadd.f32 %v219_v4, %v218_v2 }
  0xca   :  { %v221_v9 = vrot.slane %v220_v7, 4  ;;  %v273_v10 = vadd.f32 %v272_v8, %v271_v5 }
  0xcc   :  { %v222_v11 = vadd.f32 %v221_v9, %v220_v7  ;;  %v274_v12 = vrot.slane %v273_v10, 4 }
  0xce   :  { %v223_v13 = vrot.slane %v222_v11, 2  ;;  %v275_v15 = vadd.f32 %v274_v12, %v273_v10 }
  0xd0   :  { %v224_v16 = vadd.f32 %v223_v13, %v222_v11  ;;  %v276_v17 = vrot.slane %v275_v15, 2 }
  0xd2   :  { %v225_v18 = vrot.slane %v224_v16, 1  ;;  %v277_v19 = vadd.f32 %v276_v17, %v275_v15 }
  0xd4   :  { %v226_v21 = vadd.f32 %v225_v18, %v224_v16  ;;  %v278_v25 = vrot.slane %v277_v19, 1 }
  0xd6   :  { %v279_v26 = vadd.f32 %v278_v25, %v277_v19  ;;  %v280_v27 = vmul.f32 0.0078125, %v226_v21 }
  0xd8   :  { %v281_v31 = vmul.f32 0.0078125, %v279_v26  ;;  %v282_v32 = vmul.f32 %v280_v27, %v280_v27 }
  0xda   :  { %v283_v33 = vsub.f32 %v281_v31, %v282_v32 }
  0xdc   :  { %v284_v35 = vmax.f32 %v283_v33, 0.0 }
  0xde   :  { %v286_v37 = vadd.f32 1e-05, %v284_v35 }
  0xe0   :  { %469 = vrsqrt.f32 %v286_v37  ;;  %vm293_vm4 = vweird.f32 %v286_v37 }
  0xe6   :  { %v470_v39 = vpop.eup %469 }
  0xe7   :  { %v288_v40 = vmul.f32 %v470_v39, %v286_v37  ;;  %vm294_vm3 = vweird.f32 %v470_v39 }
  0xe8   :  { %vm295_vm5 = vmor %vm293_vm4, %vm294_vm3 }
  0xe9   :  { %v289_v41 = vmul.f32 %v470_v39, %v288_v40 }
  0xeb   :  { %v290_v22 = vmul.f32 0.5, %v289_v41 }
  0xed   :  { %v291_v42 = vsub.f32 1.5, %v290_v22 }
  0xef   :  { %v292_v46 = vmul.f32 %v470_v39, %v291_v42 }
  0xf1   :  { %v296_v48 = vsel %vm295_vm5, %v470_v39, %v292_v46 }
  0xf2   :  { %v297_v34 = vmul.f32 %v296_v48, %v285_v44 }
  0xf4   :  { %v299_v51 = vmul.f32 %v297_v34, %v280_v27  ;;  %v302_v52 = vperm.slane %v297_v34, 0 }
  0xf6   :  { %v300_v54 = vsub.f32 %v298_v49, %v299_v51  ;;  %v304_v55 = vmul.f32 %v302_v52, %v557_v28  ;;  %v305_v56 = vmul.f32 %v302_v52, %v554_v24  ;;  %v306_v57 = vmul.f32 %v302_v52, %v560_v29 }
  0xf7   :  { %v319_v59 = vmul.f32 %v302_v52, %v187_v53  ;;  %v307_v61 = vmul.f32 %v302_v52, %v584_v45  ;;  %v308_v62 = vmul.f32 %v302_v52, %v573_v36  ;;  %v309_v23 = vmul.f32 %v302_v52, %v580_v43 }
  0xf8   :  { %v321_v60 = vperm.slane %v300_v54, 0  ;;  %v310_v4 = vmul.f32 %v302_v52, %v589_v50  ;;  %v311_v28 = vmul.f32 %v302_v52, %v601_v58  ;;  %v312_v24 = vmul.f32 %v302_v52, %v607_v63 }
  0xf9   :  { %v313_v36 = vmul.f32 %v302_v52, %v615_v6  ;;  %v314_v10 = vmul.f32 %v302_v52, %v625_v14  ;;  %v315_v12 = vmul.f32 %v302_v52, %v633_v20  ;;  %v316_v58 = vmul.f32 %v302_v52, %v640_v30 }
  0xfa   :  { %v323_v0 = vadd.f32 %v321_v60, %v304_v55  ;;  %v324_v1 = vadd.f32 %v321_v60, %v305_v56  ;;  %v325_v2 = vadd.f32 %v321_v60, %v306_v57  ;;  %v326_v3 = vadd.f32 %v321_v60, %v307_v61 }
  0xfb   :  { %v327_v5 = vadd.f32 %v321_v60, %v308_v62  ;;  %v328_v29 = vadd.f32 %v321_v60, %v309_v23  ;;  %v338_v53 = vadd.f32 %v321_v60, %v319_v59  ;;  %v329_v7 = vadd.f32 %v321_v60, %v310_v4 }
  0xfc   :  { %v339_v8 = vmax.f32 %v323_v0, 0.0  ;;  %v340_v45 = vmax.f32 %v324_v1, 0.0  ;;  %v341_v9 = vmax.f32 %v325_v2, 0.0  ;;  %v330_v11 = vadd.f32 %v321_v60, %v311_v28 }
  0xfd   :  { %v342_v43 = vmax.f32 %v326_v3, 0.0  ;;  %v331_v50 = vadd.f32 %v321_v60, %v312_v24  ;;  %v343_v13 = vmax.f32 %v327_v5, 0.0  ;;  %v332_v63 = vadd.f32 %v321_v60, %v313_v36 }
  0xfe   :  { %v333_v15 = vadd.f32 %v321_v60, %v314_v10  ;;  %v344_v16 = vmax.f32 %v328_v29, 0.0  ;;  %v345_v17 = vmax.f32 %v329_v7, 0.0  ;;  %v355_v18 = vpack.c.bf16 %v339_v8, %v339_v8 }
  0xff   :  { %v356_v19 = vpack.c.bf16 %v340_v45, %v340_v45  ;;  %v357_v21 = vpack.c.bf16 %v341_v9, %v341_v9  ;;  %v317_v6 = vmul.f32 %v302_v52, %v648_v38  ;;  %v334_v25 = vadd.f32 %v321_v60, %v315_v12 }
 0x100   :  { %v346_v14 = vmax.f32 %v330_v11, 0.0  ;;  %v358_v26 = vpack.c.bf16 %v342_v43, %v342_v43  ;;  %v318_v27 = vmul.f32 %v302_v52, %v658_v47  ;;  %v335_v20 = vadd.f32 %v321_v60, %v316_v58  ;;  %372 = vst.msk [vmem:[%s767_s5] sm:$0xf] %vm371_vm6, %v355_v18 }
 0x101   :  { %v347_v31 = vmax.f32 %v331_v50, 0.0  ;;  %v359_v32 = vpack.c.bf16 %v343_v13, %v343_v13  ;;  %v336_v30 = vadd.f32 %v321_v60, %v317_v6  ;;  %v348_v33 = vmax.f32 %v332_v63, 0.0  ;;  %373 = vst.msk [vmem:[%s767_s5 + $0x4] sm:$0xf] %vm371_vm6, %v356_v19 }
 0x102   :  { %v360_v35 = vpack.c.bf16 %v344_v16, %v344_v16  ;;  %v337_v38 = vadd.f32 %v321_v60, %v318_v27  ;;  %v349_v37 = vmax.f32 %v333_v15, 0.0  ;;  %v361_v39 = vpack.c.bf16 %v345_v17, %v345_v17  ;;  %374 = vst.msk [vmem:[%s767_s5 + $0x8] sm:$0xf] %vm371_vm6, %v357_v21 }
 0x103   :  { %v350_v47 = vmax.f32 %v334_v25, 0.0  ;;  %v362_v40 = vpack.c.bf16 %v346_v14, %v346_v14  ;;  %375 = vst.msk [vmem:[%s767_s5 + $0xc] sm:$0xf] %vm371_vm6, %v358_v26  ;;  %v351_v41 = vmax.f32 %v335_v20, 0.0  ;;  %v363_v22 = vpack.c.bf16 %v347_v31, %v347_v31 }
 0x104   :  { %376 = vst.msk [vmem:[%s767_s5 + $0x10] sm:$0xf] %vm371_vm6, %v359_v32  ;;  %v352_v42 = vmax.f32 %v336_v30, 0.0  ;;  %v364_v44 = vpack.c.bf16 %v348_v33, %v348_v33  ;;  %v353_v46 = vmax.f32 %v337_v38, 0.0  ;;  %v365_v48 = vpack.c.bf16 %v349_v37, %v349_v37 }
 0x105   :  { %377 = vst.msk [vmem:[%s767_s5 + $0x14] sm:$0xf] %vm371_vm6, %v360_v35  ;;  %v354_v34 = vmax.f32 %v338_v53, 0.0  ;;  %v366_v49 = vpack.c.bf16 %v350_v47, %v350_v47  ;;  %v367_v51 = vpack.c.bf16 %v351_v41, %v351_v41 }
 0x106   :  { %378 = vst.msk [vmem:[%s767_s5 + $0x18] sm:$0xf] %vm371_vm6, %v361_v39  ;;  %v368_v52 = vpack.c.bf16 %v352_v42, %v352_v42  ;;  %v369_v54 = vpack.c.bf16 %v353_v46, %v353_v46 }
 0x107   :  { %379 = vst.msk [vmem:[%s767_s5 + $0x1c] sm:$0xf] %vm371_vm6, %v362_v40  ;;  %v370_v55 = vpack.c.bf16 %v354_v34, %v354_v34 }
 0x108   :  { %380 = vst.msk [vmem:[%s767_s5 + $0x20] sm:$0xf] %vm371_vm6, %v363_v22 }
 0x109   :  { %381 = vst.msk [vmem:[%s767_s5 + $0x24] sm:$0xf] %vm371_vm6, %v364_v44 }
 0x10a   :  { %382 = vst.msk [vmem:[%s767_s5 + $0x28] sm:$0xf] %vm371_vm6, %v365_v48 }
 0x10b   :  { %383 = vst.msk [vmem:[%s767_s5 + $0x2c] sm:$0xf] %vm371_vm6, %v366_v49 }
 0x10c   :  { %384 = vst.msk [vmem:[%s767_s5 + $0x30] sm:$0xf] %vm371_vm6, %v367_v51 }
 0x10d   :  { %385 = vst.msk [vmem:[%s767_s5 + $0x34] sm:$0xf] %vm371_vm6, %v368_v52 }
 0x10e   :  { %386 = vst.msk [vmem:[%s767_s5 + $0x38] sm:$0xf] %vm371_vm6, %v369_v54 }
 0x10f   :  { %387 = vst.msk [vmem:[%s767_s5 + $0x3c] sm:$0xf] %vm371_vm6, %v370_v55 }

// kernel: keypoint_forward.18
= control target key start
LH: loop header
LB: loop body
LE: loop exit
PB: predicated region body
PF: predicated region fallthrough
CT: control target
= control target key end

     0   :  { %vm80_vm0 = vcmask 523264   ;;  %vm153_vm1 = vcmask 519168   ;;  %s387_s0 = inlined_call_operand.vmem [shape: bf16[9,32,64], index: 0, kind: input, shape index: {}]   ;;  %s388_s1 = inlined_call_operand.vmem [shape: bf16[32,64], index: 1, kind: output, shape index: {}]  }
   0x1   :  { %v163_v0 = vld [vmem:[%s387_s0] sm:$0xff]   ;;  %v235_v1 = vld [vmem:[%s387_s0 + $0x10] sm:$0xff]   ;;  %v302_v33 = vld [vmem:[%s387_s0 + $0x8] sm:$0xff]  }
   0x2   :  { %v237_v2 = vld [vmem:[%s387_s0 + $0x20] sm:$0xff]   ;;  %v164_v3 = vunpack.c.l.bf16 %v163_v0  ;;  %v172_v4 = vunpack.c.l.bf16 %v235_v1  ;;  %v239_v6 = vld [vmem:[%s387_s0 + $0x30] sm:$0xff]   ;;  %v165_v17 = vunpack.c.h.bf16 %v163_v0  ;;  %v173_v18 = vunpack.c.h.bf16 %v235_v1  ;;  %v307_v34 = vld [vmem:[%s387_s0 + $0x18] sm:$0xff]  }
   0x3   :  { %v180_v5 = vunpack.c.l.bf16 %v237_v2  ;;  %v241_v7 = vld [vmem:[%s387_s0 + $0x40] sm:$0xff]   ;;  %v188_v8 = vunpack.c.l.bf16 %v239_v6  ;;  %v243_v9 = vld [vmem:[%s387_s0 + $0x50] sm:$0xff]   ;;  %v181_v24 = vunpack.c.h.bf16 %v237_v2  ;;  %v189_v25 = vunpack.c.h.bf16 %v239_v6  ;;  %v238_v39 = vld [vmem:[%s387_s0 + $0x28] sm:$0xff]  }
   0x4   :  { %v245_v10 = vld [vmem:[%s387_s0 + $0x60] sm:$0xff]   ;;  %v196_v11 = vunpack.c.l.bf16 %v241_v7  ;;  %v247_v12 = vld [vmem:[%s387_s0 + $0x70] sm:$0xff]   ;;  %v81_v13 = vsel %vm80_vm0, %v164_v3, -inf  ;;  %v82_v15 = vsel %vm80_vm0, %v172_v4, -inf  ;;  %v204_v19 = vunpack.c.l.bf16 %v243_v9  ;;  %v316_v40 = vld [vmem:[%s387_s0 + $0x38] sm:$0xff]  }
   0x5   :  { %v289_v14 = vld [vmem:[%s387_s0 + $0x80] sm:$0xff]   ;;  %v84_v16 = vsel %vm80_vm0, %v180_v5, -inf  ;;  %v212_v20 = vunpack.c.l.bf16 %v245_v10  ;;  %v83_v21 = vmax.f32 %v81_v13, %v82_v15  ;;  %v220_v22 = vunpack.c.l.bf16 %v247_v12  ;;  %v326_v49 = vld [vmem:[%s387_s0 + $0x48] sm:$0xff]   ;;  %v244_v58 = vld [vmem:[%s387_s0 + $0x58] sm:$0xff]  }
   0x6   :  { %v86_v23 = vsel %vm80_vm0, %v188_v8, -inf  ;;  %v228_v26 = vunpack.c.l.bf16 %v289_v14  ;;  %v88_v28 = vsel %vm80_vm0, %v196_v11, -inf  ;;  %v197_v29 = vunpack.c.h.bf16 %v241_v7  ;;  %v246_v60 = vld [vmem:[%s387_s0 + $0x68] sm:$0xff]   ;;  %v248_v11 = vld [vmem:[%s387_s0 + $0x78] sm:$0xff]  }
   0x7   :  { %v85_v27 = vmax.f32 %v83_v21, %v84_v16  ;;  %v98_v30 = vsel %vm80_vm0, %v165_v17, -inf  ;;  %v99_v31 = vsel %vm80_vm0, %v173_v18, -inf  ;;  %v101_v32 = vsel %vm80_vm0, %v181_v24, -inf }
   0x8   :  { %v90_v36 = vsel %vm80_vm0, %v204_v19, -inf  ;;  %v205_v37 = vunpack.c.h.bf16 %v243_v9  ;;  %v100_v38 = vmax.f32 %v98_v30, %v99_v31  ;;  %v92_v41 = vsel %vm80_vm0, %v212_v20, -inf }
   0x9   :  { %v87_v35 = vmax.f32 %v85_v27, %v86_v23  ;;  %v94_v42 = vsel %vm80_vm0, %v220_v22, -inf  ;;  %v213_v43 = vunpack.c.h.bf16 %v245_v10  ;;  %v103_v44 = vsel %vm80_vm0, %v189_v25, -inf }
   0xa   :  { %v102_v46 = vmax.f32 %v100_v38, %v101_v32  ;;  %v168_v47 = vunpack.c.l.bf16 %v302_v33  ;;  %v176_v48 = vunpack.c.l.bf16 %v307_v34  ;;  %v221_v50 = vunpack.c.h.bf16 %v247_v12  ;;  %v250_v12 = vld [vmem:[%s387_s0 + $0x88] sm:$0xff]  }
   0xb   :  { %v89_v45 = vmax.f32 %v87_v35, %v88_v28  ;;  %v105_v51 = vsel %vm80_vm0, %v197_v29, -inf  ;;  %v184_v52 = vunpack.c.l.bf16 %v238_v39  ;;  %v192_v53 = vunpack.c.l.bf16 %v316_v40 }
   0xc   :  { %v96_v55 = vsel %vm80_vm0, %v228_v26, -inf  ;;  %v104_v56 = vmax.f32 %v102_v46, %v103_v44  ;;  %v107_v57 = vsel %vm80_vm0, %v205_v37, -inf  ;;  %v200_v59 = vunpack.c.l.bf16 %v326_v49 }
   0xd   :  { %v91_v54 = vmax.f32 %v89_v45, %v90_v36  ;;  %v115_v61 = vsel %vm80_vm0, %v168_v47, -inf  ;;  %v116_v62 = vsel %vm80_vm0, %v176_v48, -inf  ;;  %v118_v63 = vsel %vm80_vm0, %v184_v52, -inf }
   0xe   :  { %v229_v1 = vunpack.c.h.bf16 %v289_v14  ;;  %v106_v2 = vmax.f32 %v104_v56, %v105_v51  ;;  %v117_v3 = vmax.f32 %v115_v61, %v116_v62  ;;  %v109_v4 = vsel %vm80_vm0, %v213_v43, -inf }
   0xf   :  { %v93_v0 = vmax.f32 %v91_v54, %v92_v41  ;;  %v111_v5 = vsel %vm80_vm0, %v221_v50, -inf  ;;  %v208_v6 = vunpack.c.l.bf16 %v244_v58  ;;  %v120_v7 = vsel %vm80_vm0, %v192_v53, -inf }
  0x10   :  { %v108_v9 = vmax.f32 %v106_v2, %v107_v57  ;;  %v216_v10 = vunpack.c.l.bf16 %v246_v60  ;;  %v119_v13 = vmax.f32 %v117_v3, %v118_v63  ;;  %v122_v14 = vsel %vm80_vm0, %v200_v59, -inf }
  0x11   :  { %v95_v8 = vmax.f32 %v93_v0, %v94_v42  ;;  %v169_v15 = vunpack.c.h.bf16 %v302_v33  ;;  %v177_v16 = vunpack.c.h.bf16 %v307_v34  ;;  %v185_v17 = vunpack.c.h.bf16 %v238_v39 }
  0x12   :  { %v110_v19 = vmax.f32 %v108_v9, %v109_v4  ;;  %v113_v20 = vsel %vm80_vm0, %v229_v1, -inf  ;;  %v121_v21 = vmax.f32 %v119_v13, %v120_v7  ;;  %v224_v22 = vunpack.c.l.bf16 %v248_v11 }
  0x13   :  { %v97_v18 = vmax.f32 %v95_v8, %v96_v55  ;;  %v232_v23 = vunpack.c.l.bf16 %v250_v12  ;;  %v124_v24 = vsel %vm80_vm0, %v208_v6, -inf  ;;  %v193_v25 = vunpack.c.h.bf16 %v316_v40 }
  0x14   :  { %v112_v27 = vmax.f32 %v110_v19, %v111_v5  ;;  %v123_v28 = vmax.f32 %v121_v21, %v122_v14  ;;  %v132_v29 = vsel %vm80_vm0, %v169_v15, -inf  ;;  %v126_v30 = vsel %vm80_vm0, %v216_v10, -inf }
  0x15   :  { %v149_v26 = vpack.c.bf16 %v97_v18, %v97_v18  ;;  %v201_v31 = vunpack.c.h.bf16 %v326_v49  ;;  %v133_v32 = vsel %vm80_vm0, %v177_v16, -inf  ;;  %v135_v33 = vsel %vm80_vm0, %v185_v17, -inf }
  0x16   :  { %v114_v34 = vmax.f32 %v112_v27, %v113_v20  ;;  %v125_v35 = vmax.f32 %v123_v28, %v124_v24  ;;  %v134_v36 = vmax.f32 %v132_v29, %v133_v32  ;;  %v128_v37 = vsel %vm80_vm0, %v224_v22, -inf }
  0x17   :  { %154 = vst.msk [vmem:[%s388_s1] sm:$0xf] %vm153_vm1, %v149_v26  ;;  %v209_v38 = vunpack.c.h.bf16 %v244_v58  ;;  %v137_v39 = vsel %vm80_vm0, %v193_v25, -inf  ;;  %v130_v43 = vsel %vm80_vm0, %v232_v23, -inf  ;;  %v217_v44 = vunpack.c.h.bf16 %v246_v60 }
  0x18   :  { %v150_v40 = vpack.c.bf16 %v114_v34, %v114_v34  ;;  %v127_v41 = vmax.f32 %v125_v35, %v126_v30  ;;  %v136_v42 = vmax.f32 %v134_v36, %v135_v33  ;;  %v139_v45 = vsel %vm80_vm0, %v201_v31, -inf }
  0x19   :  { %v225_v48 = vunpack.c.h.bf16 %v248_v11  ;;  %v141_v49 = vsel %vm80_vm0, %v209_v38, -inf  ;;  %v233_v52 = vunpack.c.h.bf16 %v250_v12  ;;  %v143_v53 = vsel %vm80_vm0, %v217_v44, -inf }
  0x1a   :  { %155 = vst.msk [vmem:[%s388_s1 + $0x4] sm:$0xf] %vm153_vm1, %v150_v40  ;;  %v129_v46 = vmax.f32 %v127_v41, %v128_v37  ;;  %v138_v47 = vmax.f32 %v136_v42, %v137_v39 }
  0x1b   :  { %v145_v56 = vsel %vm80_vm0, %v225_v48, -inf  ;;  %v147_v58 = vsel %vm80_vm0, %v233_v52, -inf }
  0x1c   :  { %v131_v50 = vmax.f32 %v129_v46, %v130_v43  ;;  %v140_v51 = vmax.f32 %v138_v47, %v139_v45 }
  0x1e   :  { %v151_v54 = vpack.c.bf16 %v131_v50, %v131_v50  ;;  %v142_v55 = vmax.f32 %v140_v51, %v141_v49 }
  0x20   :  { %156 = vst.msk [vmem:[%s388_s1 + $0x8] sm:$0xf] %vm153_vm1, %v151_v54  ;;  %v144_v57 = vmax.f32 %v142_v55, %v143_v53 }
  0x22   :  { %v146_v59 = vmax.f32 %v144_v57, %v145_v56 }
  0x24   :  { %v148_v60 = vmax.f32 %v146_v59, %v147_v58 }
  0x26   :  { %v152_v61 = vpack.c.bf16 %v148_v60, %v148_v60 }
  0x28   :  { %157 = vst.msk [vmem:[%s388_s1 + $0xc] sm:$0xf] %vm153_vm1, %v152_v61 }

// kernel: keypoint_forward.19
= control target key start
LH: loop header
LB: loop body
LE: loop exit
PB: predicated region body
PF: predicated region fallthrough
CT: control target
= control target key end

     0   :  { %vm375_vm0 = vcmask 523264   ;;  %vm550_vm4 = vcmask 519168   ;;  %s1033_s1 = inlined_call_operand.vmem [shape: bf16[576,64], index: 1, kind: input, shape index: {}]   ;;  %s1034_s2 = inlined_call_operand.vmem [shape: f32[1,64], index: 2, kind: input, shape index: {}]   ;;  %s1035_s0 = inlined_call_operand.vmem [shape: bf16[32,576], index: 0, kind: input, shape index: {}]   ;;  %s1036_s3 = inlined_call_operand.vmem [shape: f32[1,64], index: 3, kind: input, shape index: {}]   ;;  %s1037_s4 = inlined_call_operand.vmem [shape: f32[1,64], index: 4, kind: input, shape index: {}]   ;;  %s1038_s5 = inlined_call_operand.vmem [shape: bf16[32,64], index: 5, kind: output, shape index: {}]  }
   0x1   :  { %v762_v0 = vld [vmem:[%s1033_s1 + $0x38] sm:$0xff]  ;;  %v761_v4 = vld [vmem:[%s1033_s1 + $0x30] sm:$0xff]  ;;  %v760_v8 = vld [vmem:[%s1033_s1 + $0x28] sm:$0xff] }
   0x2   :  { %v770_v1 = vld [vmem:[%s1033_s1 + $0x78] sm:$0xff]  ;;  %382 = vmatpush.bf16.msra.mxu0 %v762_v0  ;;  %v769_v5 = vld [vmem:[%s1033_s1 + $0x70] sm:$0xff]  ;;  %v768_v9 = vld [vmem:[%s1033_s1 + $0x68] sm:$0xff] }
   0x3   :  { %v778_v2 = vld [vmem:[%s1033_s1 + $0xb8] sm:$0xff]  ;;  %401 = vmatpush.bf16.msra.mxu1 %v770_v1  ;;  %v777_v6 = vld [vmem:[%s1033_s1 + $0xb0] sm:$0xff]  ;;  %v776_v10 = vld [vmem:[%s1033_s1 + $0xa8] sm:$0xff] }
   0x4   :  { %v786_v3 = vld [vmem:[%s1033_s1 + $0xf8] sm:$0xff]  ;;  %420 = vmatpush.bf16.msra.mxu2 %v778_v2  ;;  %v785_v7 = vld [vmem:[%s1033_s1 + $0xf0] sm:$0xff]  ;;  %v784_v11 = vld [vmem:[%s1033_s1 + $0xe8] sm:$0xff] }
   0x5   :  { %439 = vmatpush.bf16.msra.mxu3 %v786_v3  ;;  %v759_v12 = vld [vmem:[%s1033_s1 + $0x20] sm:$0xff]  ;;  %v758_v16 = vld [vmem:[%s1033_s1 + $0x18] sm:$0xff]  ;;  %v757_v20 = vld [vmem:[%s1033_s1 + $0x10] sm:$0xff] }
   0x6   :  { %383 = vmatpush.bf16.msra.mxu0 %v761_v4  ;;  %v767_v13 = vld [vmem:[%s1033_s1 + $0x60] sm:$0xff]  ;;  %v766_v17 = vld [vmem:[%s1033_s1 + $0x58] sm:$0xff]  ;;  %v765_v21 = vld [vmem:[%s1033_s1 + $0x50] sm:$0xff] }
   0x7   :  { %402 = vmatpush.bf16.msra.mxu1 %v769_v5  ;;  %v775_v14 = vld [vmem:[%s1033_s1 + $0xa0] sm:$0xff]  ;;  %v774_v18 = vld [vmem:[%s1033_s1 + $0x98] sm:$0xff]  ;;  %v773_v22 = vld [vmem:[%s1033_s1 + $0x90] sm:$0xff] }
   0x8   :  { %421 = vmatpush.bf16.msra.mxu2 %v777_v6  ;;  %v783_v15 = vld [vmem:[%s1033_s1 + $0xe0] sm:$0xff]  ;;  %v782_v19 = vld [vmem:[%s1033_s1 + $0xd8] sm:$0xff]  ;;  %v781_v23 = vld [vmem:[%s1033_s1 + $0xd0] sm:$0xff] }
   0x9   :  { %440 = vmatpush.bf16.msra.mxu3 %v785_v7  ;;  %v756_v24 = vld [vmem:[%s1033_s1 + $0x8] sm:$0xff]  ;;  %v755_v28 = vld [vmem:[%s1033_s1] sm:$0xff]  ;;  %v747_v33 = vld [vmem:[%s1035_s0 + $0x10] sm:$0xf0] }
   0xa   :  { %384 = vmatpush.bf16.msra.mxu0 %v760_v8  ;;  %v764_v25 = vld [vmem:[%s1033_s1 + $0x48] sm:$0xff]  ;;  %v763_v29 = vld [vmem:[%s1033_s1 + $0x40] sm:$0xff]  ;;  %v563_v35 = vld [vmem:[%s1035_s0 + $0x14] sm:$0xf0] }
   0xb   :  { %403 = vmatpush.bf16.msra.mxu1 %v768_v9  ;;  %v772_v26 = vld [vmem:[%s1033_s1 + $0x88] sm:$0xff]  ;;  %v771_v30 = vld [vmem:[%s1033_s1 + $0x80] sm:$0xff]  ;;  %v748_v37 = vld [vmem:[%s1035_s0 + $0x18] sm:$0xf0] }
   0xc   :  { %422 = vmatpush.bf16.msra.mxu2 %v776_v10  ;;  %v780_v27 = vld [vmem:[%s1033_s1 + $0xc8] sm:$0xff]  ;;  %v779_v31 = vld [vmem:[%s1033_s1 + $0xc0] sm:$0xff]  ;;  %v790_v40 = vld [vmem:[%s1033_s1 + $0x118] sm:$0xff] }
   0xd   :  { %441 = vmatpush.bf16.msra.mxu3 %v784_v11  ;;  %v561_v32 = vld [vmem:[%s1035_s0] sm:$0xf]  ;;  %v745_v34 = vld [vmem:[%s1035_s0 + $0x4] sm:$0xf]  ;;  %v569_v36 = vld [vmem:[%s1035_s0 + $0x8] sm:$0xf] }
   0xe   :  { %385 = vmatpush.bf16.msra.mxu0 %v759_v12  ;;  %v746_v38 = vld [vmem:[%s1035_s0 + $0xc] sm:$0xf]  ;;  %v571_v39 = vld [vmem:[%s1035_s0 + $0x1c] sm:$0xf0]  ;;  %v562_v41 = vor.u32 %v747_v33, %v561_v32  ;;  %v566_v42 = vor.u32 %v745_v34, %v563_v35  ;;  %v570_v43 = vor.u32 %v748_v37, %v569_v36  ;;  %v789_v45 = vld [vmem:[%s1033_s1 + $0x110] sm:$0xff] }
   0xf   :  { %404 = vmatpush.bf16.msra.mxu1 %v767_v13  ;;  %v574_v44 = vor.u32 %v746_v38, %v571_v39  ;;  %v788_v46 = vld [vmem:[%s1033_s1 + $0x108] sm:$0xff]  ;;  %v787_v47 = vld [vmem:[%s1033_s1 + $0x100] sm:$0xff]  ;;  %v752_v49 = vld [vmem:[%s1035_s0 + $0x38] sm:$0xf0] }
  0x10   :  { %423 = vmatpush.bf16.msra.mxu2 %v775_v14  ;;  %v581_v48 = vld [vmem:[%s1035_s0 + $0x28] sm:$0xf]  ;;  %v750_v50 = vld [vmem:[%s1035_s0 + $0x2c] sm:$0xf]  ;;  %v583_v51 = vld [vmem:[%s1035_s0 + $0x3c] sm:$0xf0] }
  0x11   :  { %442 = vmatpush.bf16.msra.mxu3 %v783_v15  ;;  %v589_v52 = vld [vmem:[%s1035_s0 + $0x30] sm:$0xf]  ;;  %v753_v53 = vld [vmem:[%s1035_s0 + $0x40] sm:$0xf0]  ;;  %v751_v54 = vld [vmem:[%s1035_s0 + $0x34] sm:$0xf]  ;;  %v582_v56 = vor.u32 %v752_v49, %v581_v48  ;;  %v586_v57 = vor.u32 %v750_v50, %v583_v51 }
  0x12   :  { %386 = vmatpush.bf16.msra.mxu0 %v758_v16  ;;  %v591_v55 = vld [vmem:[%s1035_s0 + $0x44] sm:$0xf0]  ;;  %v590_v58 = vor.u32 %v753_v53, %v589_v52  ;;  %v577_v60 = vld [vmem:[%s1035_s0 + $0x10] sm:$0xf]  ;;  %v749_v61 = vld [vmem:[%s1035_s0 + $0x20] sm:$0xf0] }
  0x13   :  { %405 = vmatpush.bf16.msra.mxu1 %v766_v17  ;;  %v594_v59 = vor.u32 %v751_v54, %v591_v55  ;;  %v597_v62 = vld [vmem:[%s1035_s0 + $0x38] sm:$0xf]  ;;  %v754_v63 = vld [vmem:[%s1035_s0 + $0x48] sm:$0xf0]  ;;  %v578_v0 = vor.u32 %v749_v61, %v577_v60  ;;  %v795_v12 = vld [vmem:[%s1034_s2] ss:$0 sm:$0xff] }
  0x14   :  { %424 = vmatpush.bf16.msra.mxu2 %v774_v18  ;;  %v598_v1 = vor.u32 %v754_v63, %v597_v62 }
  0x15   :  { %443 = vmatpush.bf16.msra.mxu3 %v782_v19 }
  0x16   :  { %387 = vmatpush.bf16.msra.mxu0 %v757_v20 }
  0x17   :  { %406 = vmatpush.bf16.msra.mxu1 %v765_v21 }
  0x18   :  { %425 = vmatpush.bf16.msra.mxu2 %v773_v22 }
  0x19   :  { %444 = vmatpush.bf16.msra.mxu3 %v781_v23 }
  0x1a   :  { %388 = vmatpush.bf16.msra.mxu0 %v756_v24 }
  0x1b   :  { %407 = vmatpush.bf16.msra.mxu1 %v764_v25 }
  0x1c   :  { %426 = vmatpush.bf16.msra.mxu2 %v772_v26 }
  0x1d   :  { %445 = vmatpush.bf16.msra.mxu3 %v780_v27 }
  0x1e   :  { %389 = vmatpush.bf16.msra.mxu0 %v755_v28 }
  0x1f   :  { %408 = vmatpush.bf16.msra.mxu1 %v763_v29 }
  0x20   :  { %427 = vmatpush.bf16.msra.mxu2 %v771_v30 }
  0x21   :  { %446 = vmatpush.bf16.msra.mxu3 %v779_v31  ;;  %390 = vmatmul.bf16.vlgmr.msra.gmra.mxu0 %v562_v41 }
  0x22   :  { %462 = vmatpush.bf16.msrb.mxu0 %v790_v40  ;;  %409 = vmatmul.bf16.vlgmr.msra.gmra.mxu1 %v566_v42 }
  0x23   :  { %791 = vmatpush.bf16.msrb.mxu1 %v790_v40  ;;  %428 = vmatmul.bf16.vlgmr.msra.gmra.mxu2 %v570_v43 }
  0x24   :  { %447 = vmatmul.bf16.vlgmr.msra.gmra.mxu3 %v574_v44 }
  0x26   :  { %463 = vmatpush.bf16.msrb.mxu0 %v789_v45 }
  0x27   :  { %792 = vmatpush.bf16.msrb.mxu1 %v789_v45 }
  0x2a   :  { %464 = vmatpush.bf16.msrb.mxu0 %v788_v46 }
  0x2b   :  { %793 = vmatpush.bf16.msrb.mxu1 %v788_v46 }
  0x2e   :  { %465 = vmatpush.bf16.msrb.mxu0 %v787_v47 }
  0x2f   :  { %794 = vmatpush.bf16.msrb.mxu1 %v787_v47 }
  0x31   :  { %395 = vmatmul.bf16.gmra.mxu0 %v582_v56 }
  0x32   :  { %414 = vmatmul.bf16.gmra.mxu1 %v586_v57 }
  0x33   :  { %433 = vmatmul.bf16.gmra.mxu2 %v590_v58 }
  0x34   :  { %452 = vmatmul.bf16.gmra.mxu3 %v594_v59 }
  0x41   :  { %743 = vmatmul.msk.bf16.vlgmr.msrb.gmra.mxu0 %vm375_vm0, %v578_v0 }
  0x42   :  { %744 = vmatmul.msk.bf16.vlgmr.msrb.gmra.mxu1 %vm375_vm0, %v598_v1 }
  0x9e   :  { %v391_v2 = vpop.f32.mrf.mxu0 }
  0x9f   :  { %v410_v3 = vpop.f32.mrf.mxu1  ;;  %v392_v16 = vadd.f32 %v795_v12, %v391_v2 }
  0xa1   :  { %v411_v19 = vadd.f32 %v410_v3, %v392_v16 }
  0xa6   :  { %v429_v4 = vpop.f32.mrf.mxu2  ;;  %v393_v6 = vpop.f32.mrf.mxu0 }
  0xa7   :  { %v448_v5 = vpop.f32.mrf.mxu3  ;;  %v412_v7 = vpop.f32.mrf.mxu1  ;;  %v394_v20 = vadd.f32 %v795_v12, %v393_v6  ;;  %v430_v22 = vadd.f32 %v429_v4, %v411_v19 }
  0xa9   :  { %v413_v27 = vadd.f32 %v412_v7, %v394_v20  ;;  %v449_v30 = vadd.f32 %v448_v5, %v430_v22  ;;  %v512_v20 = vld [vmem:[%s1036_s3] sm:$0x1] }
  0xae   :  { %v431_v8 = vpop.f32.mrf.mxu2  ;;  %v396_v10 = vpop.f32.mrf.mxu0 }
  0xaf   :  { %v450_v9 = vpop.f32.mrf.mxu3  ;;  %v415_v11 = vpop.f32.mrf.mxu1  ;;  %v397_v18 = vadd.f32 %v795_v12, %v396_v10  ;;  %v432_v31 = vadd.f32 %v431_v8, %v413_v27 }
  0xb1   :  { %v416_v23 = vadd.f32 %v415_v11, %v397_v18  ;;  %v451_v36 = vadd.f32 %v450_v9, %v432_v31 }
  0xb6   :  { %v434_v13 = vpop.f32.mrf.mxu2  ;;  %v398_v14 = vpop.f32.mrf.mxu0 }
  0xb7   :  { %v417_v15 = vpop.f32.mrf.mxu1  ;;  %v453_v17 = vpop.f32.mrf.mxu3  ;;  %v399_v21 = vadd.f32 %v795_v12, %v398_v14  ;;  %v435_v28 = vadd.f32 %v434_v13, %v416_v23 }
  0xb9   :  { %v418_v29 = vadd.f32 %v417_v15, %v399_v21  ;;  %v454_v34 = vadd.f32 %v453_v17, %v435_v28 }
  0xbe   :  { %v436_v24 = vpop.f32.mrf.mxu2  ;;  %v467_v25 = vpop.f32.mrf.mxu0 }
  0xbf   :  { %v472_v26 = vpop.f32.mrf.mxu1  ;;  %v437_v32 = vadd.f32 %v436_v24, %v418_v29  ;;  %v455_v33 = vpop.f32.mrf.mxu3  ;;  %v1001_v35 = vadd.f32 %v467_v25, %v449_v30  ;;  %v525_v24 = vld [vmem:[%s1037_s4] sm:$0x1] }
  0xc0   :  { %v473_v38 = vadd.f32 %v472_v26, %v454_v34 }
  0xc1   :  { %v456_v37 = vadd.f32 %v455_v33, %v437_v32  ;;  %v490_v41 = vmul.f32 %v1001_v35, %v1001_v35  ;;  %v477_v44 = vsel %vm375_vm0, %v1001_v35, 0.0 }
  0xc2   :  { %v492_v45 = vmul.f32 %v473_v38, %v473_v38  ;;  %v480_v50 = vsel %vm375_vm0, %v473_v38, 0.0 }
  0xc3   :  { %v494_v49 = vsel %vm375_vm0, %v490_v41, 0.0 }
  0xc4   :  { %v497_v55 = vsel %vm375_vm0, %v492_v45, 0.0 }
  0xc6   :  { %v469_v39 = vpop.f32.mrf.mxu0 }
  0xc7   :  { %v474_v40 = vpop.f32.mrf.mxu1  ;;  %v470_v42 = vadd.f32 %v469_v39, %v451_v36 }
  0xc8   :  { %v475_v43 = vadd.f32 %v474_v40, %v456_v37 }
  0xc9   :  { %v478_v46 = vsel %vm375_vm0, %v470_v42, 0.0  ;;  %v491_v47 = vmul.f32 %v470_v42, %v470_v42 }
  0xca   :  { %v479_v48 = vadd.f32 %v478_v46, %v477_v44  ;;  %v493_v52 = vmul.f32 %v475_v43, %v475_v43  ;;  %v482_v56 = vsel %vm375_vm0, %v475_v43, 0.0 }
  0xcb   :  { %v495_v51 = vsel %vm375_vm0, %v491_v47, 0.0 }
  0xcc   :  { %v496_v53 = vadd.f32 %v495_v51, %v494_v49  ;;  %v481_v54 = vadd.f32 %v480_v50, %v479_v48  ;;  %v499_v59 = vsel %vm375_vm0, %v493_v52, 0.0 }
  0xce   :  { %v483_v57 = vadd.f32 %v482_v56, %v481_v54  ;;  %v498_v58 = vadd.f32 %v497_v55, %v496_v53 }
  0xd0   :  { %v484_v60 = vrot.slane %v483_v57, 4  ;;  %v500_v61 = vadd.f32 %v499_v59, %v498_v58 }
  0xd2   :  { %v485_v62 = vadd.f32 %v484_v60, %v483_v57  ;;  %v501_v63 = vrot.slane %v500_v61, 4 }
  0xd4   :  { %v486_v0 = vrot.slane %v485_v62, 2  ;;  %v502_v1 = vadd.f32 %v501_v63, %v500_v61 }
  0xd6   :  { %v487_v2 = vadd.f32 %v486_v0, %v485_v62  ;;  %v503_v3 = vrot.slane %v502_v1, 2 }
  0xd8   :  { %v488_v4 = vrot.slane %v487_v2, 1  ;;  %v504_v5 = vadd.f32 %v503_v3, %v502_v1 }
  0xda   :  { %v489_v6 = vadd.f32 %v488_v4, %v487_v2  ;;  %v505_v7 = vrot.slane %v504_v5, 1 }
  0xdc   :  { %v506_v8 = vadd.f32 %v505_v7, %v504_v5  ;;  %v507_v9 = vmul.f32 0.03125, %v489_v6 }
  0xde   :  { %v508_v10 = vmul.f32 0.03125, %v506_v8  ;;  %v509_v11 = vmul.f32 %v507_v9, %v507_v9 }
  0xe0   :  { %v510_v12 = vsub.f32 %v508_v10, %v509_v11 }
  0xe2   :  { %v511_v13 = vmax.f32 %v510_v12, 0.0 }
  0xe4   :  { %v513_v14 = vadd.f32 1e-05, %v511_v13 }
  0xe6   :  { %796 = vrsqrt.f32 %v513_v14  ;;  %vm520_vm2 = vweird.f32 %v513_v14 }
  0xec   :  { %v797_v15 = vpop.eup %796 }
  0xed   :  { %v515_v16 = vmul.f32 %v797_v15, %v513_v14  ;;  %vm521_vm1 = vweird.f32 %v797_v15 }
  0xee   :  { %vm522_vm3 = vmor %vm520_vm2, %vm521_vm1 }
  0xef   :  { %v516_v17 = vmul.f32 %v797_v15, %v515_v16 }
  0xf1   :  { %v517_v18 = vmul.f32 0.5, %v516_v17 }
  0xf3   :  { %v518_v19 = vsub.f32 1.5, %v517_v18 }
  0xf5   :  { %v519_v21 = vmul.f32 %v797_v15, %v518_v19 }
  0xf7   :  { %v523_v22 = vsel %vm522_vm3, %v797_v15, %v519_v21 }
  0xf8   :  { %v524_v23 = vmul.f32 %v523_v22, %v512_v20 }
  0xfa   :  { %v526_v25 = vmul.f32 %v524_v23, %v507_v9  ;;  %v529_v26 = vperm.slane %v524_v23, 0 }
  0xfc   :  { %v527_v27 = vsub.f32 %v525_v24, %v526_v25  ;;  %v531_v28 = vmul.f32 %v529_v26, %v1001_v35  ;;  %v532_v29 = vmul.f32 %v529_v26, %v470_v42  ;;  %v533_v30 = vmul.f32 %v529_v26, %v473_v38 }
  0xfd   :  { %v534_v31 = vmul.f32 %v529_v26, %v475_v43 }
  0xfe   :  { %v536_v32 = vperm.slane %v527_v27, 0 }
 0x100   :  { %v538_v33 = vadd.f32 %v536_v32, %v531_v28  ;;  %v539_v34 = vadd.f32 %v536_v32, %v532_v29  ;;  %v540_v36 = vadd.f32 %v536_v32, %v533_v30  ;;  %v541_v37 = vadd.f32 %v536_v32, %v534_v31 }
 0x102   :  { %v542_v39 = vmax.f32 %v538_v33, 0.0  ;;  %v543_v40 = vmax.f32 %v539_v34, 0.0  ;;  %v544_v41 = vmax.f32 %v540_v36, 0.0  ;;  %v545_v44 = vmax.f32 %v541_v37, 0.0 }
 0x104   :  { %v546_v45 = vpack.c.bf16 %v542_v39, %v542_v39  ;;  %v547_v46 = vpack.c.bf16 %v543_v40, %v543_v40  ;;  %v548_v47 = vpack.c.bf16 %v544_v41, %v544_v41  ;;  %v549_v48 = vpack.c.bf16 %v545_v44, %v545_v44 }
 0x106   :  { %551 = vst.msk [vmem:[%s1038_s5] sm:$0xf] %vm550_vm4, %v546_v45 }
 0x107   :  { %552 = vst.msk [vmem:[%s1038_s5 + $0x4] sm:$0xf] %vm550_vm4, %v547_v46 }
 0x108   :  { %553 = vst.msk [vmem:[%s1038_s5 + $0x8] sm:$0xf] %vm550_vm4, %v548_v47 }
 0x109   :  { %554 = vst.msk [vmem:[%s1038_s5 + $0xc] sm:$0xf] %vm550_vm4, %v549_v48 }

// kernel: keypoint_forward.20
= control target key start
LH: loop header
LB: loop body
LE: loop exit
PB: predicated region body
PF: predicated region fallthrough
CT: control target
= control target key end

     0   :  { %vm378_vm0 = vcmask 523264   ;;  %vm565_vm4 = vcmask 519168   ;;  %s1086_s1 = inlined_call_operand.vmem [shape: bf16[576,64], index: 1, kind: input, shape index: {}]   ;;  %s1087_s2 = inlined_call_operand.vmem [shape: f32[1,64], index: 2, kind: input, shape index: {}]   ;;  %s1088_s0 = inlined_call_operand.vmem [shape: bf16[32,576], index: 0, kind: input, shape index: {}]   ;;  %s1089_s3 = inlined_call_operand.vmem [shape: f32[1,64], index: 3, kind: input, shape index: {}]   ;;  %s1090_s4 = inlined_call_operand.vmem [shape: f32[1,64], index: 4, kind: input, shape index: {}]   ;;  %s1091_s5 = inlined_call_operand.vmem [shape: bf16[32,64], index: 5, kind: input, shape index: {}]   ;;  %s1092_s6 = inlined_call_operand.vmem [shape: bf16[32,64], index: 6, kind: output, shape index: {}]  }
   0x1   :  { %v777_v0 = vld [vmem:[%s1086_s1 + $0x38] sm:$0xff]  ;;  %v776_v4 = vld [vmem:[%s1086_s1 + $0x30] sm:$0xff]  ;;  %v775_v8 = vld [vmem:[%s1086_s1 + $0x28] sm:$0xff] }
   0x2   :  { %v785_v1 = vld [vmem:[%s1086_s1 + $0x78] sm:$0xff]  ;;  %385 = vmatpush.bf16.msra.mxu0 %v777_v0  ;;  %v784_v5 = vld [vmem:[%s1086_s1 + $0x70] sm:$0xff]  ;;  %v783_v9 = vld [vmem:[%s1086_s1 + $0x68] sm:$0xff] }
   0x3   :  { %v793_v2 = vld [vmem:[%s1086_s1 + $0xb8] sm:$0xff]  ;;  %404 = vmatpush.bf16.msra.mxu1 %v785_v1  ;;  %v792_v6 = vld [vmem:[%s1086_s1 + $0xb0] sm:$0xff]  ;;  %v791_v10 = vld [vmem:[%s1086_s1 + $0xa8] sm:$0xff] }
   0x4   :  { %v801_v3 = vld [vmem:[%s1086_s1 + $0xf8] sm:$0xff]  ;;  %423 = vmatpush.bf16.msra.mxu2 %v793_v2  ;;  %v800_v7 = vld [vmem:[%s1086_s1 + $0xf0] sm:$0xff]  ;;  %v799_v11 = vld [vmem:[%s1086_s1 + $0xe8] sm:$0xff] }
   0x5   :  { %442 = vmatpush.bf16.msra.mxu3 %v801_v3  ;;  %v774_v12 = vld [vmem:[%s1086_s1 + $0x20] sm:$0xff]  ;;  %v773_v16 = vld [vmem:[%s1086_s1 + $0x18] sm:$0xff]  ;;  %v772_v20 = vld [vmem:[%s1086_s1 + $0x10] sm:$0xff] }
   0x6   :  { %386 = vmatpush.bf16.msra.mxu0 %v776_v4  ;;  %v782_v13 = vld [vmem:[%s1086_s1 + $0x60] sm:$0xff]  ;;  %v781_v17 = vld [vmem:[%s1086_s1 + $0x58] sm:$0xff]  ;;  %v780_v21 = vld [vmem:[%s1086_s1 + $0x50] sm:$0xff] }
   0x7   :  { %405 = vmatpush.bf16.msra.mxu1 %v784_v5  ;;  %v790_v14 = vld [vmem:[%s1086_s1 + $0xa0] sm:$0xff]  ;;  %v789_v18 = vld [vmem:[%s1086_s1 + $0x98] sm:$0xff]  ;;  %v788_v22 = vld [vmem:[%s1086_s1 + $0x90] sm:$0xff] }
   0x8   :  { %424 = vmatpush.bf16.msra.mxu2 %v792_v6  ;;  %v798_v15 = vld [vmem:[%s1086_s1 + $0xe0] sm:$0xff]  ;;  %v797_v19 = vld [vmem:[%s1086_s1 + $0xd8] sm:$0xff]  ;;  %v796_v23 = vld [vmem:[%s1086_s1 + $0xd0] sm:$0xff] }
   0x9   :  { %443 = vmatpush.bf16.msra.mxu3 %v800_v7  ;;  %v771_v24 = vld [vmem:[%s1086_s1 + $0x8] sm:$0xff]  ;;  %v770_v28 = vld [vmem:[%s1086_s1] sm:$0xff]  ;;  %v762_v33 = vld [vmem:[%s1088_s0 + $0x10] sm:$0xf0] }
   0xa   :  { %387 = vmatpush.bf16.msra.mxu0 %v775_v8  ;;  %v779_v25 = vld [vmem:[%s1086_s1 + $0x48] sm:$0xff]  ;;  %v778_v29 = vld [vmem:[%s1086_s1 + $0x40] sm:$0xff]  ;;  %v578_v35 = vld [vmem:[%s1088_s0 + $0x14] sm:$0xf0] }
   0xb   :  { %406 = vmatpush.bf16.msra.mxu1 %v783_v9  ;;  %v787_v26 = vld [vmem:[%s1086_s1 + $0x88] sm:$0xff]  ;;  %v786_v30 = vld [vmem:[%s1086_s1 + $0x80] sm:$0xff]  ;;  %v763_v37 = vld [vmem:[%s1088_s0 + $0x18] sm:$0xf0] }
   0xc   :  { %425 = vmatpush.bf16.msra.mxu2 %v791_v10  ;;  %v795_v27 = vld [vmem:[%s1086_s1 + $0xc8] sm:$0xff]  ;;  %v794_v31 = vld [vmem:[%s1086_s1 + $0xc0] sm:$0xff]  ;;  %v805_v40 = vld [vmem:[%s1086_s1 + $0x118] sm:$0xff] }
   0xd   :  { %444 = vmatpush.bf16.msra.mxu3 %v799_v11  ;;  %v576_v32 = vld [vmem:[%s1088_s0] sm:$0xf]  ;;  %v760_v34 = vld [vmem:[%s1088_s0 + $0x4] sm:$0xf]  ;;  %v584_v36 = vld [vmem:[%s1088_s0 + $0x8] sm:$0xf] }
   0xe   :  { %388 = vmatpush.bf16.msra.mxu0 %v774_v12  ;;  %v761_v38 = vld [vmem:[%s1088_s0 + $0xc] sm:$0xf]  ;;  %v586_v39 = vld [vmem:[%s1088_s0 + $0x1c] sm:$0xf0]  ;;  %v577_v41 = vor.u32 %v762_v33, %v576_v32  ;;  %v581_v42 = vor.u32 %v760_v34, %v578_v35  ;;  %v585_v43 = vor.u32 %v763_v37, %v584_v36  ;;  %v804_v45 = vld [vmem:[%s1086_s1 + $0x110] sm:$0xff] }
   0xf   :  { %407 = vmatpush.bf16.msra.mxu1 %v782_v13  ;;  %v589_v44 = vor.u32 %v761_v38, %v586_v39  ;;  %v803_v46 = vld [vmem:[%s1086_s1 + $0x108] sm:$0xff]  ;;  %v802_v47 = vld [vmem:[%s1086_s1 + $0x100] sm:$0xff]  ;;  %v767_v49 = vld [vmem:[%s1088_s0 + $0x38] sm:$0xf0] }
  0x10   :  { %426 = vmatpush.bf16.msra.mxu2 %v790_v14  ;;  %v596_v48 = vld [vmem:[%s1088_s0 + $0x28] sm:$0xf]  ;;  %v765_v50 = vld [vmem:[%s1088_s0 + $0x2c] sm:$0xf]  ;;  %v598_v51 = vld [vmem:[%s1088_s0 + $0x3c] sm:$0xf0] }
  0x11   :  { %445 = vmatpush.bf16.msra.mxu3 %v798_v15  ;;  %v604_v52 = vld [vmem:[%s1088_s0 + $0x30] sm:$0xf]  ;;  %v768_v53 = vld [vmem:[%s1088_s0 + $0x40] sm:$0xf0]  ;;  %v766_v54 = vld [vmem:[%s1088_s0 + $0x34] sm:$0xf]  ;;  %v597_v56 = vor.u32 %v767_v49, %v596_v48  ;;  %v601_v57 = vor.u32 %v765_v50, %v598_v51 }
  0x12   :  { %389 = vmatpush.bf16.msra.mxu0 %v773_v16  ;;  %v606_v55 = vld [vmem:[%s1088_s0 + $0x44] sm:$0xf0]  ;;  %v605_v58 = vor.u32 %v768_v53, %v604_v52  ;;  %v592_v60 = vld [vmem:[%s1088_s0 + $0x10] sm:$0xf]  ;;  %v764_v61 = vld [vmem:[%s1088_s0 + $0x20] sm:$0xf0] }
  0x13   :  { %408 = vmatpush.bf16.msra.mxu1 %v781_v17  ;;  %v609_v59 = vor.u32 %v766_v54, %v606_v55  ;;  %v612_v62 = vld [vmem:[%s1088_s0 + $0x38] sm:$0xf]  ;;  %v769_v63 = vld [vmem:[%s1088_s0 + $0x48] sm:$0xf0]  ;;  %v593_v0 = vor.u32 %v764_v61, %v592_v60  ;;  %v819_v12 = vld [vmem:[%s1087_s2] ss:$0 sm:$0xff] }
  0x14   :  { %427 = vmatpush.bf16.msra.mxu2 %v789_v18  ;;  %v613_v1 = vor.u32 %v769_v63, %v612_v62 }
  0x15   :  { %446 = vmatpush.bf16.msra.mxu3 %v797_v19 }
  0x16   :  { %390 = vmatpush.bf16.msra.mxu0 %v772_v20 }
  0x17   :  { %409 = vmatpush.bf16.msra.mxu1 %v780_v21 }
  0x18   :  { %428 = vmatpush.bf16.msra.mxu2 %v788_v22 }
  0x19   :  { %447 = vmatpush.bf16.msra.mxu3 %v796_v23 }
  0x1a   :  { %391 = vmatpush.bf16.msra.mxu0 %v771_v24 }
  0x1b   :  { %410 = vmatpush.bf16.msra.mxu1 %v779_v25 }
  0x1c   :  { %429 = vmatpush.bf16.msra.mxu2 %v787_v26 }
  0x1d   :  { %448 = vmatpush.bf16.msra.mxu3 %v795_v27 }
  0x1e   :  { %392 = vmatpush.bf16.msra.mxu0 %v770_v28 }
  0x1f   :  { %411 = vmatpush.bf16.msra.mxu1 %v778_v29 }
  0x20   :  { %430 = vmatpush.bf16.msra.mxu2 %v786_v30 }
  0x21   :  { %449 = vmatpush.bf16.msra.mxu3 %v794_v31  ;;  %393 = vmatmul.bf16.vlgmr.msra.gmra.mxu0 %v577_v41 }
  0x22   :  { %465 = vmatpush.bf16.msrb.mxu0 %v805_v40  ;;  %412 = vmatmul.bf16.vlgmr.msra.gmra.mxu1 %v581_v42 }
  0x23   :  { %815 = vmatpush.bf16.msrb.mxu1 %v805_v40  ;;  %431 = vmatmul.bf16.vlgmr.msra.gmra.mxu2 %v585_v43 }
  0x24   :  { %450 = vmatmul.bf16.vlgmr.msra.gmra.mxu3 %v589_v44 }
  0x26   :  { %466 = vmatpush.bf16.msrb.mxu0 %v804_v45 }
  0x27   :  { %816 = vmatpush.bf16.msrb.mxu1 %v804_v45 }
  0x2a   :  { %467 = vmatpush.bf16.msrb.mxu0 %v803_v46 }
  0x2b   :  { %817 = vmatpush.bf16.msrb.mxu1 %v803_v46 }
  0x2e   :  { %468 = vmatpush.bf16.msrb.mxu0 %v802_v47 }
  0x2f   :  { %818 = vmatpush.bf16.msrb.mxu1 %v802_v47 }
  0x31   :  { %398 = vmatmul.bf16.gmra.mxu0 %v597_v56 }
  0x32   :  { %417 = vmatmul.bf16.gmra.mxu1 %v601_v57 }
  0x33   :  { %436 = vmatmul.bf16.gmra.mxu2 %v605_v58 }
  0x34   :  { %455 = vmatmul.bf16.gmra.mxu3 %v609_v59 }
  0x41   :  { %758 = vmatmul.msk.bf16.vlgmr.msrb.gmra.mxu0 %vm378_vm0, %v593_v0 }
  0x42   :  { %759 = vmatmul.msk.bf16.vlgmr.msrb.gmra.mxu1 %vm378_vm0, %v613_v1 }
  0x9e   :  { %v394_v2 = vpop.f32.mrf.mxu0 }
  0x9f   :  { %v413_v3 = vpop.f32.mrf.mxu1  ;;  %v395_v16 = vadd.f32 %v819_v12, %v394_v2 }
  0xa1   :  { %v414_v19 = vadd.f32 %v413_v3, %v395_v16 }
  0xa6   :  { %v432_v4 = vpop.f32.mrf.mxu2  ;;  %v396_v6 = vpop.f32.mrf.mxu0 }
  0xa7   :  { %v451_v5 = vpop.f32.mrf.mxu3  ;;  %v415_v7 = vpop.f32.mrf.mxu1  ;;  %v397_v20 = vadd.f32 %v819_v12, %v396_v6  ;;  %v433_v22 = vadd.f32 %v432_v4, %v414_v19 }
  0xa9   :  { %v416_v27 = vadd.f32 %v415_v7, %v397_v20  ;;  %v452_v30 = vadd.f32 %v451_v5, %v433_v22  ;;  %v515_v20 = vld [vmem:[%s1089_s3] sm:$0x1] }
  0xae   :  { %v434_v8 = vpop.f32.mrf.mxu2  ;;  %v399_v10 = vpop.f32.mrf.mxu0 }
  0xaf   :  { %v453_v9 = vpop.f32.mrf.mxu3  ;;  %v418_v11 = vpop.f32.mrf.mxu1  ;;  %v400_v18 = vadd.f32 %v819_v12, %v399_v10  ;;  %v435_v31 = vadd.f32 %v434_v8, %v416_v27 }
  0xb1   :  { %v419_v23 = vadd.f32 %v418_v11, %v400_v18  ;;  %v454_v36 = vadd.f32 %v453_v9, %v435_v31 }
  0xb6   :  { %v437_v13 = vpop.f32.mrf.mxu2  ;;  %v401_v14 = vpop.f32.mrf.mxu0 }
  0xb7   :  { %v420_v15 = vpop.f32.mrf.mxu1  ;;  %v456_v17 = vpop.f32.mrf.mxu3  ;;  %v402_v21 = vadd.f32 %v819_v12, %v401_v14  ;;  %v438_v28 = vadd.f32 %v437_v13, %v419_v23 }
  0xb9   :  { %v421_v29 = vadd.f32 %v420_v15, %v402_v21  ;;  %v457_v34 = vadd.f32 %v456_v17, %v438_v28  ;;  %v814_v28 = vld [vmem:[%s1091_s5 + $0x8] sm:$0xff]  }
  0xbe   :  { %v439_v24 = vpop.f32.mrf.mxu2  ;;  %v470_v25 = vpop.f32.mrf.mxu0 }
  0xbf   :  { %v475_v26 = vpop.f32.mrf.mxu1  ;;  %v440_v32 = vadd.f32 %v439_v24, %v421_v29  ;;  %v458_v33 = vpop.f32.mrf.mxu3  ;;  %v1030_v35 = vadd.f32 %v470_v25, %v452_v30  ;;  %v528_v24 = vld [vmem:[%s1090_s4] sm:$0x1] }
  0xc0   :  { %v1032_v38 = vadd.f32 %v475_v26, %v457_v34  ;;  %v807_v25 = vld [vmem:[%s1091_s5] sm:$0xff]   ;;  %v813_v34 = vunpack.c.h.bf16 %v814_v28 }
  0xc1   :  { %v459_v37 = vadd.f32 %v458_v33, %v440_v32  ;;  %v493_v41 = vmul.f32 %v1030_v35, %v1030_v35  ;;  %v480_v44 = vsel %vm378_vm0, %v1030_v35, 0.0  ;;  %v808_v30 = vunpack.c.l.bf16 %v807_v25 }
  0xc2   :  { %v495_v45 = vmul.f32 %v1032_v38, %v1032_v38  ;;  %v483_v50 = vsel %vm378_vm0, %v1032_v38, 0.0  ;;  %v809_v32 = vunpack.c.h.bf16 %v807_v25  ;;  %v812_v33 = vunpack.c.l.bf16 %v814_v28 }
  0xc3   :  { %v497_v49 = vsel %vm378_vm0, %v493_v41, 0.0 }
  0xc4   :  { %v500_v55 = vsel %vm378_vm0, %v495_v45, 0.0 }
  0xc6   :  { %v472_v39 = vpop.f32.mrf.mxu0 }
  0xc7   :  { %v477_v40 = vpop.f32.mrf.mxu1  ;;  %v1036_v42 = vadd.f32 %v472_v39, %v454_v36 }
  0xc8   :  { %v1038_v43 = vadd.f32 %v477_v40, %v459_v37 }
  0xc9   :  { %v481_v46 = vsel %vm378_vm0, %v1036_v42, 0.0  ;;  %v494_v47 = vmul.f32 %v1036_v42, %v1036_v42 }
  0xca   :  { %v482_v48 = vadd.f32 %v481_v46, %v480_v44  ;;  %v496_v52 = vmul.f32 %v1038_v43, %v1038_v43  ;;  %v485_v56 = vsel %vm378_vm0, %v1038_v43, 0.0 }
  0xcb   :  { %v498_v51 = vsel %vm378_vm0, %v494_v47, 0.0 }
  0xcc   :  { %v499_v53 = vadd.f32 %v498_v51, %v497_v49  ;;  %v484_v54 = vadd.f32 %v483_v50, %v482_v48  ;;  %v502_v59 = vsel %vm378_vm0, %v496_v52, 0.0 }
  0xce   :  { %v486_v57 = vadd.f32 %v485_v56, %v484_v54  ;;  %v501_v58 = vadd.f32 %v500_v55, %v499_v53 }
  0xd0   :  { %v487_v60 = vrot.slane %v486_v57, 4  ;;  %v503_v61 = vadd.f32 %v502_v59, %v501_v58 }
  0xd2   :  { %v488_v62 = vadd.f32 %v487_v60, %v486_v57  ;;  %v504_v63 = vrot.slane %v503_v61, 4 }
  0xd4   :  { %v489_v0 = vrot.slane %v488_v62, 2  ;;  %v505_v1 = vadd.f32 %v504_v63, %v503_v61 }
  0xd6   :  { %v490_v2 = vadd.f32 %v489_v0, %v488_v62  ;;  %v506_v3 = vrot.slane %v505_v1, 2 }
  0xd8   :  { %v491_v4 = vrot.slane %v490_v2, 1  ;;  %v507_v5 = vadd.f32 %v506_v3, %v505_v1 }
  0xda   :  { %v492_v6 = vadd.f32 %v491_v4, %v490_v2  ;;  %v508_v7 = vrot.slane %v507_v5, 1 }
  0xdc   :  { %v509_v8 = vadd.f32 %v508_v7, %v507_v5  ;;  %v510_v9 = vmul.f32 0.03125, %v492_v6 }
  0xde   :  { %v511_v10 = vmul.f32 0.03125, %v509_v8  ;;  %v512_v11 = vmul.f32 %v510_v9, %v510_v9 }
  0xe0   :  { %v513_v12 = vsub.f32 %v511_v10, %v512_v11 }
  0xe2   :  { %v514_v13 = vmax.f32 %v513_v12, 0.0 }
  0xe4   :  { %v516_v14 = vadd.f32 1e-05, %v514_v13 }
  0xe6   :  { %820 = vrsqrt.f32 %v516_v14  ;;  %vm523_vm2 = vweird.f32 %v516_v14 }
  0xec   :  { %v821_v15 = vpop.eup %820 }
  0xed   :  { %v518_v16 = vmul.f32 %v821_v15, %v516_v14  ;;  %vm524_vm1 = vweird.f32 %v821_v15 }
  0xee   :  { %vm525_vm3 = vmor %vm523_vm2, %vm524_vm1 }
  0xef   :  { %v519_v17 = vmul.f32 %v821_v15, %v518_v16 }
  0xf1   :  { %v520_v18 = vmul.f32 0.5, %v519_v17 }
  0xf3   :  { %v521_v19 = vsub.f32 1.5, %v520_v18 }
  0xf5   :  { %v522_v21 = vmul.f32 %v821_v15, %v521_v19 }
  0xf7   :  { %v526_v22 = vsel %vm525_vm3, %v821_v15, %v522_v21 }
  0xf8   :  { %v527_v23 = vmul.f32 %v526_v22, %v515_v20 }
  0xfa   :  { %v529_v26 = vmul.f32 %v527_v23, %v510_v9  ;;  %v532_v27 = vperm.slane %v527_v23, 0 }
  0xfc   :  { %v530_v29 = vsub.f32 %v528_v24, %v529_v26  ;;  %v534_v31 = vmul.f32 %v532_v27, %v1030_v35  ;;  %v535_v36 = vmul.f32 %v532_v27, %v1036_v42  ;;  %v536_v37 = vmul.f32 %v532_v27, %v1032_v38 }
  0xfd   :  { %v537_v39 = vmul.f32 %v532_v27, %v1038_v43 }
  0xfe   :  { %v539_v40 = vperm.slane %v530_v29, 0 }
 0x100   :  { %v541_v41 = vadd.f32 %v539_v40, %v534_v31  ;;  %v542_v44 = vadd.f32 %v539_v40, %v535_v36  ;;  %v543_v45 = vadd.f32 %v539_v40, %v536_v37  ;;  %v544_v46 = vadd.f32 %v539_v40, %v537_v39 }
 0x102   :  { %v553_v47 = vadd.f32 %v808_v30, %v541_v41  ;;  %v554_v48 = vadd.f32 %v809_v32, %v542_v44  ;;  %v555_v49 = vadd.f32 %v812_v33, %v543_v45  ;;  %v556_v50 = vadd.f32 %v813_v34, %v544_v46 }
 0x104   :  { %v557_v51 = vmax.f32 %v553_v47, 0.0  ;;  %v558_v35 = vmax.f32 %v554_v48, 0.0  ;;  %v559_v52 = vmax.f32 %v555_v49, 0.0  ;;  %v560_v53 = vmax.f32 %v556_v50, 0.0 }
 0x106   :  { %v561_v54 = vpack.c.bf16 %v557_v51, %v557_v51  ;;  %v562_v42 = vpack.c.bf16 %v558_v35, %v558_v35  ;;  %v563_v55 = vpack.c.bf16 %v559_v52, %v559_v52  ;;  %v564_v38 = vpack.c.bf16 %v560_v53, %v560_v53 }
 0x108   :  { %566 = vst.msk [vmem:[%s1092_s6] sm:$0xf] %vm565_vm4, %v561_v54 }
 0x109   :  { %567 = vst.msk [vmem:[%s1092_s6 + $0x4] sm:$0xf] %vm565_vm4, %v562_v42 }
 0x10a   :  { %568 = vst.msk [vmem:[%s1092_s6 + $0x8] sm:$0xf] %vm565_vm4, %v563_v55 }
 0x10b   :  { %569 = vst.msk [vmem:[%s1092_s6 + $0xc] sm:$0xf] %vm565_vm4, %v564_v38 }

// kernel: keypoint_forward.23
= control target key start
LH: loop header
LB: loop body
LE: loop exit
PB: predicated region body
PF: predicated region fallthrough
CT: control target
= control target key end

     0   :  { %vm333_vm0 = vcmask 523264   ;;  %s794_s1 = inlined_call_operand.vmem [shape: bf16[576,128], index: 1, kind: input, shape index: {}]   ;;  %s795_s2 = inlined_call_operand.vmem [shape: f32[1,128], index: 2, kind: input, shape index: {}]   ;;  %s796_s0 = inlined_call_operand.vmem [shape: bf16[8,576], index: 0, kind: input, shape index: {}]   ;;  %s797_s3 = inlined_call_operand.vmem [shape: f32[1,128], index: 3, kind: input, shape index: {}]   ;;  %s798_s4 = inlined_call_operand.vmem [shape: f32[1,128], index: 4, kind: input, shape index: {}]   ;;  %s799_s5 = inlined_call_operand.vmem [shape: bf16[8,128], index: 5, kind: output, shape index: {}]  }
   0x1   :  { %v603_v0 = vld [vmem:[%s794_s1 + $0x38] sm:$0xff]  ;;  %v602_v4 = vld [vmem:[%s794_s1 + $0x30] sm:$0xff]  ;;  %v601_v8 = vld [vmem:[%s794_s1 + $0x28] sm:$0xff] }
   0x2   :  { %v619_v1 = vld [vmem:[%s794_s1 + $0xb8] sm:$0xff]  ;;  %337 = vmatpush.bf16.msra.mxu0 %v603_v0  ;;  %v618_v5 = vld [vmem:[%s794_s1 + $0xb0] sm:$0xff]  ;;  %v617_v9 = vld [vmem:[%s794_s1 + $0xa8] sm:$0xff] }
   0x3   :  { %v627_v2 = vld [vmem:[%s794_s1 + $0xf8] sm:$0xff]  ;;  %363 = vmatpush.bf16.msra.mxu2 %v619_v1  ;;  %v626_v6 = vld [vmem:[%s794_s1 + $0xf0] sm:$0xff]  ;;  %v625_v10 = vld [vmem:[%s794_s1 + $0xe8] sm:$0xff] }
   0x4   :  { %v611_v3 = vld [vmem:[%s794_s1 + $0x78] sm:$0xff]  ;;  %376 = vmatpush.bf16.msra.mxu3 %v627_v2  ;;  %v610_v7 = vld [vmem:[%s794_s1 + $0x70] sm:$0xff]  ;;  %v609_v11 = vld [vmem:[%s794_s1 + $0x68] sm:$0xff] }
   0x5   :  { %350 = vmatpush.bf16.msra.mxu1 %v611_v3  ;;  %v600_v12 = vld [vmem:[%s794_s1 + $0x20] sm:$0xff]  ;;  %v599_v16 = vld [vmem:[%s794_s1 + $0x18] sm:$0xff]  ;;  %v598_v20 = vld [vmem:[%s794_s1 + $0x10] sm:$0xff] }
   0x6   :  { %338 = vmatpush.bf16.msra.mxu0 %v602_v4  ;;  %v616_v13 = vld [vmem:[%s794_s1 + $0xa0] sm:$0xff]  ;;  %v615_v17 = vld [vmem:[%s794_s1 + $0x98] sm:$0xff]  ;;  %v614_v21 = vld [vmem:[%s794_s1 + $0x90] sm:$0xff] }
   0x7   :  { %364 = vmatpush.bf16.msra.mxu2 %v618_v5  ;;  %v624_v14 = vld [vmem:[%s794_s1 + $0xe0] sm:$0xff]  ;;  %v623_v18 = vld [vmem:[%s794_s1 + $0xd8] sm:$0xff]  ;;  %v622_v22 = vld [vmem:[%s794_s1 + $0xd0] sm:$0xff] }
   0x8   :  { %377 = vmatpush.bf16.msra.mxu3 %v626_v6  ;;  %v608_v15 = vld [vmem:[%s794_s1 + $0x60] sm:$0xff]  ;;  %v607_v19 = vld [vmem:[%s794_s1 + $0x58] sm:$0xff]  ;;  %v606_v23 = vld [vmem:[%s794_s1 + $0x50] sm:$0xff] }
   0x9   :  { %351 = vmatpush.bf16.msra.mxu1 %v610_v7  ;;  %v597_v24 = vld [vmem:[%s794_s1 + $0x8] sm:$0xff]  ;;  %v21_v26 = vld [vmem:[%s796_s0] sm:$0xff]  ;;  %v631_v38 = vld [vmem:[%s794_s1 + $0x118] sm:$0xff] }
   0xa   :  { %339 = vmatpush.bf16.msra.mxu0 %v601_v8  ;;  %v613_v25 = vld [vmem:[%s794_s1 + $0x88] sm:$0xff]  ;;  %v103_v30 = vunpack.c.l.b16 %v21_v26  ;;  %v596_v32 = vld [vmem:[%s794_s1] sm:$0xff]  ;;  %v104_v35 = vunpack.c.h.b16 %v21_v26  ;;  %v630_v43 = vld [vmem:[%s794_s1 + $0x110] sm:$0xff] }
   0xb   :  { %365 = vmatpush.bf16.msra.mxu2 %v617_v9  ;;  %v22_v27 = vld [vmem:[%s796_s0 + $0x8] sm:$0xff]  ;;  %v612_v33 = vld [vmem:[%s794_s1 + $0x80] sm:$0xff]  ;;  %v23_v45 = vld [vmem:[%s796_s0 + $0x10] sm:$0xf] }
   0xc   :  { %378 = vmatpush.bf16.msra.mxu3 %v625_v10  ;;  %v621_v28 = vld [vmem:[%s794_s1 + $0xc8] sm:$0xff]  ;;  %v105_v31 = vunpack.c.l.b16 %v22_v27  ;;  %v106_v34 = vunpack.c.h.b16 %v22_v27  ;;  %v620_v36 = vld [vmem:[%s794_s1 + $0xc0] sm:$0xff]  ;;  %v108_v39 = vpack.c.b16 %v103_v30, %v103_v30  ;;  %v109_v42 = vpack.c.b16 %v104_v35, %v104_v35 }
   0xd   :  { %352 = vmatpush.bf16.msra.mxu1 %v609_v11  ;;  %v605_v29 = vld [vmem:[%s794_s1 + $0x48] sm:$0xff]  ;;  %v604_v37 = vld [vmem:[%s794_s1 + $0x40] sm:$0xff]  ;;  %v107_v47 = vunpack.c.l.b16 %v23_v45 }
   0xe   :  { %340 = vmatpush.bf16.msra.mxu0 %v600_v12  ;;  %v110_v40 = vpack.c.b16 %v105_v31, %v105_v31  ;;  %v111_v41 = vpack.c.b16 %v106_v34, %v106_v34  ;;  %v629_v44 = vld [vmem:[%s794_s1 + $0x108] sm:$0xff]  ;;  %v628_v46 = vld [vmem:[%s794_s1 + $0x100] sm:$0xff] }
   0xf   :  { %366 = vmatpush.bf16.msra.mxu2 %v616_v13  ;;  %v112_v48 = vpack.c.b16 %v107_v47, %v107_v47  ;;  %v632_v50 = vld [vmem:[%s795_s2] ss:$0 sm:$0xff] }
  0x10   :  { %379 = vmatpush.bf16.msra.mxu3 %v624_v14 }
  0x11   :  { %353 = vmatpush.bf16.msra.mxu1 %v608_v15 }
  0x12   :  { %341 = vmatpush.bf16.msra.mxu0 %v599_v16 }
  0x13   :  { %367 = vmatpush.bf16.msra.mxu2 %v615_v17 }
  0x14   :  { %380 = vmatpush.bf16.msra.mxu3 %v623_v18 }
  0x15   :  { %354 = vmatpush.bf16.msra.mxu1 %v607_v19 }
  0x16   :  { %342 = vmatpush.bf16.msra.mxu0 %v598_v20 }
  0x17   :  { %368 = vmatpush.bf16.msra.mxu2 %v614_v21 }
  0x18   :  { %381 = vmatpush.bf16.msra.mxu3 %v622_v22 }
  0x19   :  { %355 = vmatpush.bf16.msra.mxu1 %v606_v23 }
  0x1a   :  { %343 = vmatpush.bf16.msra.mxu0 %v597_v24 }
  0x1b   :  { %369 = vmatpush.bf16.msra.mxu2 %v613_v25  ;;  %v420_v25 = vld [vmem:[%s797_s3] sm:$0x1] }
  0x1c   :  { %382 = vmatpush.bf16.msra.mxu3 %v621_v28 }
  0x1d   :  { %356 = vmatpush.bf16.msra.mxu1 %v605_v29  ;;  %v433_v29 = vld [vmem:[%s798_s4] sm:$0x1] }
  0x1e   :  { %344 = vmatpush.bf16.msra.mxu0 %v596_v32 }
  0x1f   :  { %370 = vmatpush.bf16.msra.mxu2 %v612_v33 }
  0x20   :  { %383 = vmatpush.bf16.msra.mxu3 %v620_v36 }
  0x21   :  { %357 = vmatpush.bf16.msra.mxu1 %v604_v37  ;;  %345 = vmatmul.bf16.vlgmr.msra.gmra.mxu0 %v108_v39 }
  0x22   :  { %393 = vmatpush.bf16.msrb.mxu0 %v631_v38  ;;  %371 = vmatmul.bf16.vlgmr.msra.gmra.mxu2 %v110_v40 }
  0x23   :  { %384 = vmatmul.bf16.vlgmr.msra.gmra.mxu3 %v111_v41 }
  0x24   :  { %358 = vmatmul.bf16.vlgmr.msra.gmra.mxu1 %v109_v42 }
  0x26   :  { %394 = vmatpush.bf16.msrb.mxu0 %v630_v43 }
  0x2a   :  { %395 = vmatpush.bf16.msrb.mxu0 %v629_v44 }
  0x2e   :  { %396 = vmatpush.bf16.msrb.mxu0 %v628_v46 }
  0x31   :  { %595 = vmatmul.msk.bf16.vlgmr.msrb.gmra.mxu0 %vm333_vm0, %v112_v48 }
  0x9e   :  { %v346_v49 = vpop.f32.mrf.mxu0 }
  0x9f   :  { %v347_v52 = vadd.f32 %v632_v50, %v346_v49 }
  0xa1   :  { %v359_v51 = vpop.f32.mrf.mxu1 }
  0xa2   :  { %v360_v56 = vadd.f32 %v359_v51, %v347_v52 }
  0xa5   :  { %v372_v53 = vpop.f32.mrf.mxu2 }
  0xa6   :  { %v385_v54 = vpop.f32.mrf.mxu3  ;;  %v348_v55 = vpop.f32.mrf.mxu0  ;;  %v373_v58 = vadd.f32 %v372_v53, %v360_v56 }
  0xa8   :  { %v386_v60 = vadd.f32 %v385_v54, %v373_v58 }
  0xa9   :  { %v361_v57 = vpop.f32.mrf.mxu1 }
  0xad   :  { %v374_v59 = vpop.f32.mrf.mxu2 }
  0xae   :  { %v387_v61 = vpop.f32.mrf.mxu3  ;;  %v398_v62 = vpop.f32.mrf.mxu0 }
  0xaf   :  { %v399_v63 = vadd.f32 %v398_v62, %v386_v60 }
  0xb1   :  { %v402_v0 = vrot.slane %v399_v63, 4  ;;  %v408_v1 = vmul.f32 %v399_v63, %v399_v63 }
  0xb3   :  { %v403_v2 = vadd.f32 %v402_v0, %v399_v63  ;;  %v409_v3 = vrot.slane %v408_v1, 4 }
  0xb5   :  { %v404_v4 = vrot.slane %v403_v2, 2  ;;  %v410_v5 = vadd.f32 %v409_v3, %v408_v1 }
  0xb6   :  { %v400_v6 = vpop.f32.mrf.mxu0 }
  0xb7   :  { %v405_v7 = vadd.f32 %v404_v4, %v403_v2  ;;  %v411_v8 = vrot.slane %v410_v5, 2 }
  0xb9   :  { %v406_v9 = vrot.slane %v405_v7, 1  ;;  %v412_v10 = vadd.f32 %v411_v8, %v410_v5 }
  0xbb   :  { %v407_v11 = vadd.f32 %v406_v9, %v405_v7  ;;  %v413_v12 = vrot.slane %v412_v10, 1 }
  0xbd   :  { %v414_v13 = vadd.f32 %v413_v12, %v412_v10  ;;  %v415_v14 = vmul.f32 0.125, %v407_v11 }
  0xbf   :  { %v416_v15 = vmul.f32 0.125, %v414_v13  ;;  %v417_v16 = vmul.f32 %v415_v14, %v415_v14 }
  0xc1   :  { %v418_v17 = vsub.f32 %v416_v15, %v417_v16 }
  0xc3   :  { %v419_v18 = vmax.f32 %v418_v17, 0.0 }
  0xc5   :  { %v421_v19 = vadd.f32 1e-05, %v419_v18 }
  0xc7   :  { %633 = vrsqrt.f32 %v421_v19  ;;  %vm428_vm2 = vweird.f32 %v421_v19 }
  0xcd   :  { %v634_v20 = vpop.eup %633 }
  0xce   :  { %v423_v21 = vmul.f32 %v634_v20, %v421_v19  ;;  %vm429_vm1 = vweird.f32 %v634_v20 }
  0xcf   :  { %vm430_vm3 = vmor %vm428_vm2, %vm429_vm1 }
  0xd0   :  { %v424_v22 = vmul.f32 %v634_v20, %v423_v21 }
  0xd2   :  { %v425_v23 = vmul.f32 0.5, %v424_v22 }
  0xd4   :  { %v426_v24 = vsub.f32 1.5, %v425_v23 }
  0xd6   :  { %v427_v26 = vmul.f32 %v634_v20, %v426_v24 }
  0xd8   :  { %v431_v27 = vsel %vm430_vm3, %v634_v20, %v427_v26 }
  0xd9   :  { %v432_v28 = vmul.f32 %v431_v27, %v420_v25 }
  0xdb   :  { %v434_v30 = vmul.f32 %v432_v28, %v415_v14  ;;  %v437_v31 = vperm.slane %v432_v28, 0 }
  0xdd   :  { %v435_v32 = vsub.f32 %v433_v29, %v434_v30  ;;  %v439_v33 = vmul.f32 %v437_v31, %v399_v63 }
  0xdf   :  { %v441_v34 = vperm.slane %v435_v32, 0 }
  0xe1   :  { %v443_v35 = vadd.f32 %v441_v34, %v439_v33 }
  0xe3   :  { %v444_v36 = vmax.f32 %v443_v35, 0.0 }
  0xe5   :  { %v445_v37 = vpack.c.bf16 %v444_v36, %v444_v36 }
  0xe7   :  { %446 = vst [vmem:[%s799_s5] sm:$0xf] %v445_v37 }

// kernel: keypoint_forward.25
= control target key start
LH: loop header
LB: loop body
LE: loop exit
PB: predicated region body
PF: predicated region fallthrough
CT: control target
= control target key end

     0   :  { %s1439_s1 = inlined_call_operand.vmem [shape: bf16[1152,128], index: 1, kind: input, shape index: {}]   ;;  %s1440_s2 = inlined_call_operand.vmem [shape: f32[1,128], index: 2, kind: input, shape index: {}]   ;;  %s1441_s0 = inlined_call_operand.vmem [shape: bf16[8,1152], index: 0, kind: input, shape index: {}]   ;;  %s1442_s3 = inlined_call_operand.vmem [shape: f32[1,128], index: 3, kind: input, shape index: {}]   ;;  %s1443_s4 = inlined_call_operand.vmem [shape: f32[1,128], index: 4, kind: input, shape index: {}]   ;;  %s1444_s5 = inlined_call_operand.vmem [shape: bf16[8,128], index: 5, kind: output, shape index: {}]  }
   0x1   :  { %v1098_v0 = vld [vmem:[%s1439_s1 + $0x38] sm:$0xff]  ;;  %v1097_v4 = vld [vmem:[%s1439_s1 + $0x30] sm:$0xff]  ;;  %v1096_v8 = vld [vmem:[%s1439_s1 + $0x28] sm:$0xff] }
   0x2   :  { %v1114_v1 = vld [vmem:[%s1439_s1 + $0xb8] sm:$0xff]  ;;  %637 = vmatpush.bf16.msra.mxu0 %v1098_v0  ;;  %v1113_v5 = vld [vmem:[%s1439_s1 + $0xb0] sm:$0xff]  ;;  %v1112_v9 = vld [vmem:[%s1439_s1 + $0xa8] sm:$0xff] }
   0x3   :  { %v1122_v2 = vld [vmem:[%s1439_s1 + $0xf8] sm:$0xff]  ;;  %663 = vmatpush.bf16.msra.mxu2 %v1114_v1  ;;  %v1121_v6 = vld [vmem:[%s1439_s1 + $0xf0] sm:$0xff]  ;;  %v1120_v10 = vld [vmem:[%s1439_s1 + $0xe8] sm:$0xff] }
   0x4   :  { %v1106_v3 = vld [vmem:[%s1439_s1 + $0x78] sm:$0xff]  ;;  %676 = vmatpush.bf16.msra.mxu3 %v1122_v2  ;;  %v1105_v7 = vld [vmem:[%s1439_s1 + $0x70] sm:$0xff]  ;;  %v1104_v11 = vld [vmem:[%s1439_s1 + $0x68] sm:$0xff] }
   0x5   :  { %650 = vmatpush.bf16.msra.mxu1 %v1106_v3  ;;  %v1095_v12 = vld [vmem:[%s1439_s1 + $0x20] sm:$0xff]  ;;  %v1094_v16 = vld [vmem:[%s1439_s1 + $0x18] sm:$0xff]  ;;  %v1093_v20 = vld [vmem:[%s1439_s1 + $0x10] sm:$0xff] }
   0x6   :  { %638 = vmatpush.bf16.msra.mxu0 %v1097_v4  ;;  %v1111_v13 = vld [vmem:[%s1439_s1 + $0xa0] sm:$0xff]  ;;  %v1110_v17 = vld [vmem:[%s1439_s1 + $0x98] sm:$0xff]  ;;  %v1109_v21 = vld [vmem:[%s1439_s1 + $0x90] sm:$0xff] }
   0x7   :  { %664 = vmatpush.bf16.msra.mxu2 %v1113_v5  ;;  %v1119_v14 = vld [vmem:[%s1439_s1 + $0xe0] sm:$0xff]  ;;  %v1118_v18 = vld [vmem:[%s1439_s1 + $0xd8] sm:$0xff]  ;;  %v1117_v22 = vld [vmem:[%s1439_s1 + $0xd0] sm:$0xff] }
   0x8   :  { %677 = vmatpush.bf16.msra.mxu3 %v1121_v6  ;;  %v1103_v15 = vld [vmem:[%s1439_s1 + $0x60] sm:$0xff]  ;;  %v1102_v19 = vld [vmem:[%s1439_s1 + $0x58] sm:$0xff]  ;;  %v1101_v23 = vld [vmem:[%s1439_s1 + $0x50] sm:$0xff] }
   0x9   :  { %651 = vmatpush.bf16.msra.mxu1 %v1105_v7  ;;  %v1092_v24 = vld [vmem:[%s1439_s1 + $0x8] sm:$0xff]  ;;  %v20_v29 = vld [vmem:[%s1441_s0] sm:$0xff]  ;;  %v1130_v34 = vld [vmem:[%s1439_s1 + $0x138] sm:$0xff] }
   0xa   :  { %639 = vmatpush.bf16.msra.mxu0 %v1096_v8  ;;  %v1108_v25 = vld [vmem:[%s1439_s1 + $0x88] sm:$0xff]  ;;  %v1091_v30 = vld [vmem:[%s1439_s1] sm:$0xff]  ;;  %v178_v33 = vunpack.c.l.b16 %v20_v29  ;;  %v1146_v35 = vld [vmem:[%s1439_s1 + $0x1b8] sm:$0xff]  ;;  %v179_v39 = vunpack.c.h.b16 %v20_v29 }
   0xb   :  { %665 = vmatpush.bf16.msra.mxu2 %v1112_v9  ;;  %v1116_v26 = vld [vmem:[%s1439_s1 + $0xc8] sm:$0xff]  ;;  %v1107_v31 = vld [vmem:[%s1439_s1 + $0x80] sm:$0xff]  ;;  %v1154_v40 = vld [vmem:[%s1439_s1 + $0x1f8] sm:$0xff] }
   0xc   :  { %678 = vmatpush.bf16.msra.mxu3 %v1120_v10  ;;  %v1100_v27 = vld [vmem:[%s1439_s1 + $0x48] sm:$0xff]  ;;  %v1115_v36 = vld [vmem:[%s1439_s1 + $0xc0] sm:$0xff]  ;;  %v1138_v41 = vld [vmem:[%s1439_s1 + $0x178] sm:$0xff]  ;;  %v187_v43 = vpack.c.b16 %v178_v33, %v178_v33  ;;  %v188_v47 = vpack.c.b16 %v179_v39, %v179_v39 }
   0xd   :  { %652 = vmatpush.bf16.msra.mxu1 %v1104_v11  ;;  %v21_v28 = vld [vmem:[%s1441_s0 + $0x8] sm:$0xff]  ;;  %v1099_v37 = vld [vmem:[%s1439_s1 + $0x40] sm:$0xff]  ;;  %v1129_v44 = vld [vmem:[%s1439_s1 + $0x130] sm:$0xff] }
   0xe   :  { %640 = vmatpush.bf16.msra.mxu0 %v1095_v12  ;;  %v180_v32 = vunpack.c.l.b16 %v21_v28  ;;  %v181_v38 = vunpack.c.h.b16 %v21_v28  ;;  %v1145_v45 = vld [vmem:[%s1439_s1 + $0x1b0] sm:$0xff]  ;;  %v1128_v50 = vld [vmem:[%s1439_s1 + $0x128] sm:$0xff]  ;;  %v1127_v54 = vld [vmem:[%s1439_s1 + $0x120] sm:$0xff] }
   0xf   :  { %666 = vmatpush.bf16.msra.mxu2 %v1111_v13  ;;  %v1153_v48 = vld [vmem:[%s1439_s1 + $0x1f0] sm:$0xff]  ;;  %v1144_v51 = vld [vmem:[%s1439_s1 + $0x1a8] sm:$0xff]  ;;  %v1143_v55 = vld [vmem:[%s1439_s1 + $0x1a0] sm:$0xff] }
  0x10   :  { %679 = vmatpush.bf16.msra.mxu3 %v1119_v14  ;;  %v189_v42 = vpack.c.b16 %v180_v32, %v180_v32  ;;  %v190_v46 = vpack.c.b16 %v181_v38, %v181_v38  ;;  %v1137_v49 = vld [vmem:[%s1439_s1 + $0x170] sm:$0xff]  ;;  %v1152_v52 = vld [vmem:[%s1439_s1 + $0x1e8] sm:$0xff]  ;;  %v1151_v56 = vld [vmem:[%s1439_s1 + $0x1e0] sm:$0xff] }
  0x11   :  { %653 = vmatpush.bf16.msra.mxu1 %v1103_v15  ;;  %v1136_v53 = vld [vmem:[%s1439_s1 + $0x168] sm:$0xff]  ;;  %v1135_v57 = vld [vmem:[%s1439_s1 + $0x160] sm:$0xff]  ;;  %v1126_v58 = vld [vmem:[%s1439_s1 + $0x118] sm:$0xff] }
  0x12   :  { %641 = vmatpush.bf16.msra.mxu0 %v1094_v16  ;;  %v1142_v59 = vld [vmem:[%s1439_s1 + $0x198] sm:$0xff]  ;;  %v1125_v62 = vld [vmem:[%s1439_s1 + $0x110] sm:$0xff]  ;;  %v1124_v2 = vld [vmem:[%s1439_s1 + $0x108] sm:$0xff] }
  0x13   :  { %667 = vmatpush.bf16.msra.mxu2 %v1110_v17  ;;  %v1150_v60 = vld [vmem:[%s1439_s1 + $0x1d8] sm:$0xff]  ;;  %v1141_v63 = vld [vmem:[%s1439_s1 + $0x190] sm:$0xff]  ;;  %v1140_v3 = vld [vmem:[%s1439_s1 + $0x188] sm:$0xff] }
  0x14   :  { %680 = vmatpush.bf16.msra.mxu3 %v1118_v18  ;;  %v1134_v61 = vld [vmem:[%s1439_s1 + $0x158] sm:$0xff]  ;;  %v1149_v0 = vld [vmem:[%s1439_s1 + $0x1d0] sm:$0xff]  ;;  %v1148_v6 = vld [vmem:[%s1439_s1 + $0x1c8] sm:$0xff] }
  0x15   :  { %654 = vmatpush.bf16.msra.mxu1 %v1102_v19  ;;  %v1133_v1 = vld [vmem:[%s1439_s1 + $0x150] sm:$0xff]  ;;  %v23_v4 = vld [vmem:[%s1441_s0 + $0x18] sm:$0xff]  ;;  %v1132_v7 = vld [vmem:[%s1439_s1 + $0x148] sm:$0xff] }
  0x16   :  { %642 = vmatpush.bf16.msra.mxu0 %v1093_v20  ;;  %v22_v5 = vld [vmem:[%s1441_s0 + $0x10] sm:$0xff]  ;;  %v184_v8 = vunpack.c.l.b16 %v23_v4  ;;  %v1123_v10 = vld [vmem:[%s1439_s1 + $0x100] sm:$0xff]  ;;  %v1162_v12 = vld [vmem:[%s1439_s1 + $0x238] sm:$0xff]  ;;  %v185_v13 = vunpack.c.h.b16 %v23_v4 }
  0x17   :  { %668 = vmatpush.bf16.msra.mxu2 %v1109_v21  ;;  %v182_v9 = vunpack.c.l.b16 %v22_v5  ;;  %v1139_v11 = vld [vmem:[%s1439_s1 + $0x180] sm:$0xff]  ;;  %v183_v16 = vunpack.c.h.b16 %v22_v5  ;;  %v1161_v19 = vld [vmem:[%s1439_s1 + $0x230] sm:$0xff] }
  0x18   :  { %681 = vmatpush.bf16.msra.mxu3 %v1117_v22  ;;  %v1147_v14 = vld [vmem:[%s1439_s1 + $0x1c0] sm:$0xff]  ;;  %v193_v17 = vpack.c.b16 %v184_v8, %v184_v8  ;;  %v194_v20 = vpack.c.b16 %v185_v13, %v185_v13  ;;  %v1160_v22 = vld [vmem:[%s1439_s1 + $0x228] sm:$0xff] }
  0x19   :  { %655 = vmatpush.bf16.msra.mxu1 %v1101_v23  ;;  %v1131_v15 = vld [vmem:[%s1439_s1 + $0x140] sm:$0xff]  ;;  %v191_v18 = vpack.c.b16 %v182_v9, %v182_v9  ;;  %v192_v21 = vpack.c.b16 %v183_v16, %v183_v16 }
  0x1a   :  { %643 = vmatpush.bf16.msra.mxu0 %v1092_v24  ;;  %v1159_v23 = vld [vmem:[%s1439_s1 + $0x220] sm:$0xff]  ;;  %v1158_v24 = vld [vmem:[%s1439_s1 + $0x218] sm:$0xff] }
  0x1b   :  { %669 = vmatpush.bf16.msra.mxu2 %v1108_v25  ;;  %v1157_v25 = vld [vmem:[%s1439_s1 + $0x210] sm:$0xff]  ;;  %v1155_v29 = vld [vmem:[%s1439_s1 + $0x200] sm:$0xff] }
  0x1c   :  { %682 = vmatpush.bf16.msra.mxu3 %v1116_v26  ;;  %v1156_v26 = vld [vmem:[%s1439_s1 + $0x208] sm:$0xff]  ;;  %v1163_v39 = vld [vmem:[%s1440_s2] ss:$0 sm:$0xff] }
  0x1d   :  { %656 = vmatpush.bf16.msra.mxu1 %v1100_v27  ;;  %v24_v27 = vld [vmem:[%s1441_s0 + $0x20] sm:$0xf] }
  0x1e   :  { %644 = vmatpush.bf16.msra.mxu0 %v1091_v30  ;;  %v186_v28 = vunpack.c.l.b16 %v24_v27 }
  0x1f   :  { %670 = vmatpush.bf16.msra.mxu2 %v1107_v31 }
  0x20   :  { %683 = vmatpush.bf16.msra.mxu3 %v1115_v36  ;;  %v195_v30 = vpack.c.b16 %v186_v28, %v186_v28 }
  0x21   :  { %657 = vmatpush.bf16.msra.mxu1 %v1099_v37  ;;  %645 = vmatmul.bf16.vlgmr.msra.gmra.mxu0 %v187_v43 }
  0x22   :  { %689 = vmatpush.bf16.msrb.mxu0 %v1130_v34  ;;  %671 = vmatmul.bf16.vlgmr.msra.gmra.mxu2 %v189_v42 }
  0x23   :  { %715 = vmatpush.bf16.msrb.mxu2 %v1146_v35  ;;  %684 = vmatmul.bf16.vlgmr.msra.gmra.mxu3 %v190_v46 }
  0x24   :  { %728 = vmatpush.bf16.msrb.mxu3 %v1154_v40  ;;  %658 = vmatmul.bf16.vlgmr.msra.gmra.mxu1 %v188_v47 }
  0x25   :  { %702 = vmatpush.bf16.msrb.mxu1 %v1138_v41 }
  0x26   :  { %690 = vmatpush.bf16.msrb.mxu0 %v1129_v44 }
  0x27   :  { %716 = vmatpush.bf16.msrb.mxu2 %v1145_v45 }
  0x28   :  { %729 = vmatpush.bf16.msrb.mxu3 %v1153_v48 }
  0x29   :  { %703 = vmatpush.bf16.msrb.mxu1 %v1137_v49 }
  0x2a   :  { %691 = vmatpush.bf16.msrb.mxu0 %v1128_v50 }
  0x2b   :  { %717 = vmatpush.bf16.msrb.mxu2 %v1144_v51 }
  0x2c   :  { %730 = vmatpush.bf16.msrb.mxu3 %v1152_v52 }
  0x2d   :  { %704 = vmatpush.bf16.msrb.mxu1 %v1136_v53 }
  0x2e   :  { %692 = vmatpush.bf16.msrb.mxu0 %v1127_v54 }
  0x2f   :  { %718 = vmatpush.bf16.msrb.mxu2 %v1143_v55 }
  0x30   :  { %731 = vmatpush.bf16.msrb.mxu3 %v1151_v56 }
  0x31   :  { %705 = vmatpush.bf16.msrb.mxu1 %v1135_v57 }
  0x32   :  { %693 = vmatpush.bf16.msrb.mxu0 %v1126_v58 }
  0x33   :  { %719 = vmatpush.bf16.msrb.mxu2 %v1142_v59 }
  0x34   :  { %732 = vmatpush.bf16.msrb.mxu3 %v1150_v60 }
  0x35   :  { %706 = vmatpush.bf16.msrb.mxu1 %v1134_v61 }
  0x36   :  { %694 = vmatpush.bf16.msrb.mxu0 %v1125_v62 }
  0x37   :  { %720 = vmatpush.bf16.msrb.mxu2 %v1141_v63 }
  0x38   :  { %733 = vmatpush.bf16.msrb.mxu3 %v1149_v0 }
  0x39   :  { %707 = vmatpush.bf16.msrb.mxu1 %v1133_v1 }
  0x3a   :  { %695 = vmatpush.bf16.msrb.mxu0 %v1124_v2 }
  0x3b   :  { %721 = vmatpush.bf16.msrb.mxu2 %v1140_v3 }
  0x3c   :  { %734 = vmatpush.bf16.msrb.mxu3 %v1148_v6 }
  0x3d   :  { %708 = vmatpush.bf16.msrb.mxu1 %v1132_v7 }
  0x3e   :  { %696 = vmatpush.bf16.msrb.mxu0 %v1123_v10 }
  0x3f   :  { %722 = vmatpush.bf16.msrb.mxu2 %v1139_v11 }
  0x40   :  { %735 = vmatpush.bf16.msrb.mxu3 %v1147_v14 }
  0x41   :  { %709 = vmatpush.bf16.msrb.mxu1 %v1131_v15  ;;  %697 = vmatmul.bf16.vlgmr.msrb.gmra.mxu0 %v191_v18 }
  0x42   :  { %741 = vmatpush.bf16.msra.mxu0 %v1162_v12  ;;  %723 = vmatmul.bf16.vlgmr.msrb.gmra.mxu2 %v193_v17 }
  0x43   :  { %736 = vmatmul.bf16.vlgmr.msrb.gmra.mxu3 %v194_v20 }
  0x44   :  { %710 = vmatmul.bf16.vlgmr.msrb.gmra.mxu1 %v192_v21 }
  0x46   :  { %742 = vmatpush.bf16.msra.mxu0 %v1161_v19  ;;  %v772_v19 = vld [vmem:[%s1442_s3] sm:$0x1] }
  0x4a   :  { %743 = vmatpush.bf16.msra.mxu0 %v1160_v22 }
  0x4e   :  { %744 = vmatpush.bf16.msra.mxu0 %v1159_v23  ;;  %v785_v23 = vld [vmem:[%s1443_s4] sm:$0x1] }
  0x52   :  { %745 = vmatpush.bf16.msra.mxu0 %v1158_v24 }
  0x56   :  { %746 = vmatpush.bf16.msra.mxu0 %v1157_v25 }
  0x5a   :  { %747 = vmatpush.bf16.msra.mxu0 %v1156_v26 }
  0x5e   :  { %748 = vmatpush.bf16.msra.mxu0 %v1155_v29 }
  0x61   :  { %749 = vmatmul.bf16.vlgmr.msra.gmra.mxu0 %v195_v30 }
  0x9e   :  { %v646_v31 = vpop.f32.mrf.mxu0 }
  0x9f   :  { %v647_v40 = vadd.f32 %v1163_v39, %v646_v31 }
  0xa1   :  { %v659_v32 = vpop.f32.mrf.mxu1 }
  0xa2   :  { %v660_v43 = vadd.f32 %v659_v32, %v647_v40 }
  0xa5   :  { %v672_v33 = vpop.f32.mrf.mxu2 }
  0xa6   :  { %v685_v34 = vpop.f32.mrf.mxu3  ;;  %v648_v35 = vpop.f32.mrf.mxu0  ;;  %v673_v45 = vadd.f32 %v672_v33, %v660_v43 }
  0xa8   :  { %v686_v49 = vadd.f32 %v685_v34, %v673_v45 }
  0xa9   :  { %v661_v36 = vpop.f32.mrf.mxu1 }
  0xad   :  { %v674_v37 = vpop.f32.mrf.mxu2 }
  0xae   :  { %v687_v38 = vpop.f32.mrf.mxu3 }
  0xbe   :  { %v698_v41 = vpop.f32.mrf.mxu0 }
  0xbf   :  { %v699_v51 = vadd.f32 %v698_v41, %v686_v49 }
  0xc1   :  { %v711_v42 = vpop.f32.mrf.mxu1 }
  0xc2   :  { %v712_v53 = vadd.f32 %v711_v42, %v699_v51 }
  0xc5   :  { %v724_v44 = vpop.f32.mrf.mxu2 }
  0xc6   :  { %v737_v46 = vpop.f32.mrf.mxu3  ;;  %v700_v47 = vpop.f32.mrf.mxu0  ;;  %v725_v54 = vadd.f32 %v724_v44, %v712_v53 }
  0xc8   :  { %v738_v55 = vadd.f32 %v737_v46, %v725_v54 }
  0xc9   :  { %v713_v48 = vpop.f32.mrf.mxu1 }
  0xcd   :  { %v726_v50 = vpop.f32.mrf.mxu2 }
  0xce   :  { %v739_v52 = vpop.f32.mrf.mxu3 }
  0xde   :  { %v750_v56 = vpop.f32.mrf.mxu0 }
  0xdf   :  { %v751_v57 = vadd.f32 %v750_v56, %v738_v55 }
  0xe1   :  { %v754_v58 = vrot.slane %v751_v57, 4  ;;  %v760_v59 = vmul.f32 %v751_v57, %v751_v57 }
  0xe3   :  { %v755_v60 = vadd.f32 %v754_v58, %v751_v57  ;;  %v761_v61 = vrot.slane %v760_v59, 4 }
  0xe5   :  { %v756_v62 = vrot.slane %v755_v60, 2  ;;  %v762_v63 = vadd.f32 %v761_v61, %v760_v59 }
  0xe6   :  { %v752_v0 = vpop.f32.mrf.mxu0 }
  0xe7   :  { %v757_v1 = vadd.f32 %v756_v62, %v755_v60  ;;  %v763_v2 = vrot.slane %v762_v63, 2 }
  0xe9   :  { %v758_v3 = vrot.slane %v757_v1, 1  ;;  %v764_v4 = vadd.f32 %v763_v2, %v762_v63 }
  0xeb   :  { %v759_v5 = vadd.f32 %v758_v3, %v757_v1  ;;  %v765_v6 = vrot.slane %v764_v4, 1 }
  0xed   :  { %v766_v7 = vadd.f32 %v765_v6, %v764_v4  ;;  %v767_v8 = vmul.f32 0.125, %v759_v5 }
  0xef   :  { %v768_v9 = vmul.f32 0.125, %v766_v7  ;;  %v769_v10 = vmul.f32 %v767_v8, %v767_v8 }
  0xf1   :  { %v770_v11 = vsub.f32 %v768_v9, %v769_v10 }
  0xf3   :  { %v771_v12 = vmax.f32 %v770_v11, 0.0 }
  0xf5   :  { %v773_v13 = vadd.f32 1e-05, %v771_v12 }
  0xf7   :  { %1164 = vrsqrt.f32 %v773_v13  ;;  %vm780_vm1 = vweird.f32 %v773_v13 }
  0xfd   :  { %v1165_v14 = vpop.eup %1164 }
  0xfe   :  { %v775_v15 = vmul.f32 %v1165_v14, %v773_v13  ;;  %vm781_vm0 = vweird.f32 %v1165_v14 }
  0xff   :  { %vm782_vm2 = vmor %vm780_vm1, %vm781_vm0 }
 0x100   :  { %v776_v16 = vmul.f32 %v1165_v14, %v775_v15 }
 0x102   :  { %v777_v17 = vmul.f32 0.5, %v776_v16 }
 0x104   :  { %v778_v18 = vsub.f32 1.5, %v777_v17 }
 0x106   :  { %v779_v20 = vmul.f32 %v1165_v14, %v778_v18 }
 0x108   :  { %v783_v21 = vsel %vm782_vm2, %v1165_v14, %v779_v20 }
 0x109   :  { %v784_v22 = vmul.f32 %v783_v21, %v772_v19 }
 0x10b   :  { %v786_v24 = vmul.f32 %v784_v22, %v767_v8  ;;  %v789_v25 = vperm.slane %v784_v22, 0 }
 0x10d   :  { %v787_v26 = vsub.f32 %v785_v23, %v786_v24  ;;  %v791_v27 = vmul.f32 %v789_v25, %v751_v57 }
 0x10f   :  { %v793_v28 = vperm.slane %v787_v26, 0 }
 0x111   :  { %v795_v29 = vadd.f32 %v793_v28, %v791_v27 }
 0x113   :  { %v796_v30 = vmax.f32 %v795_v29, 0.0 }
 0x115   :  { %v797_v31 = vpack.c.bf16 %v796_v30, %v796_v30 }
 0x117   :  { %798 = vst [vmem:[%s1444_s5] sm:$0xf] %v797_v31 }

// kernel: keypoint_forward.24
= control target key start
LH: loop header
LB: loop body
LE: loop exit
PB: predicated region body
PF: predicated region fallthrough
CT: control target
= control target key end

     0   :  { %vm839_vm0 = vcmask 523264   ;;  %s1560_s1 = inlined_call_operand.vmem [shape: bf16[1152,128], index: 1, kind: input, shape index: {}]   ;;  %s1561_s2 = inlined_call_operand.vmem [shape: f32[1,128], index: 2, kind: input, shape index: {}]   ;;  %s1562_s0 = inlined_call_operand.vmem [shape: bf16[8,1152], index: 0, kind: input, shape index: {}]   ;;  %s1563_s6 = inlined_call_operand.vmem [shape: bf16[64,128], index: 6, kind: input, shape index: {}]   ;;  %s1564_s5 = inlined_call_operand.vmem [shape: bf16[8,64], index: 5, kind: input, shape index: {}]   ;;  %s1565_s7 = inlined_call_operand.vmem [shape: f32[1,128], index: 7, kind: input, shape index: {}]   ;;  %s1566_s3 = inlined_call_operand.vmem [shape: f32[1,128], index: 3, kind: input, shape index: {}]   ;;  %s1567_s4 = inlined_call_operand.vmem [shape: f32[1,128], index: 4, kind: input, shape index: {}]   ;;  %s1568_s8 = inlined_call_operand.vmem [shape: bf16[8,128], index: 8, kind: output, shape index: {}]  }
   0x1   :  { %v1181_v0 = vld [vmem:[%s1560_s1 + $0x38] sm:$0xff]  ;;  %v1180_v4 = vld [vmem:[%s1560_s1 + $0x30] sm:$0xff]  ;;  %v1179_v8 = vld [vmem:[%s1560_s1 + $0x28] sm:$0xff] }
   0x2   :  { %v1197_v1 = vld [vmem:[%s1560_s1 + $0xb8] sm:$0xff]  ;;  %647 = vmatpush.bf16.msra.mxu0 %v1181_v0  ;;  %v1196_v5 = vld [vmem:[%s1560_s1 + $0xb0] sm:$0xff]  ;;  %v1195_v9 = vld [vmem:[%s1560_s1 + $0xa8] sm:$0xff] }
   0x3   :  { %v1205_v2 = vld [vmem:[%s1560_s1 + $0xf8] sm:$0xff]  ;;  %673 = vmatpush.bf16.msra.mxu2 %v1197_v1  ;;  %v1204_v6 = vld [vmem:[%s1560_s1 + $0xf0] sm:$0xff]  ;;  %v1203_v10 = vld [vmem:[%s1560_s1 + $0xe8] sm:$0xff] }
   0x4   :  { %v1189_v3 = vld [vmem:[%s1560_s1 + $0x78] sm:$0xff]  ;;  %686 = vmatpush.bf16.msra.mxu3 %v1205_v2  ;;  %v1188_v7 = vld [vmem:[%s1560_s1 + $0x70] sm:$0xff]  ;;  %v1187_v11 = vld [vmem:[%s1560_s1 + $0x68] sm:$0xff] }
   0x5   :  { %660 = vmatpush.bf16.msra.mxu1 %v1189_v3  ;;  %v1178_v12 = vld [vmem:[%s1560_s1 + $0x20] sm:$0xff]  ;;  %v1177_v16 = vld [vmem:[%s1560_s1 + $0x18] sm:$0xff]  ;;  %v1176_v20 = vld [vmem:[%s1560_s1 + $0x10] sm:$0xff] }
   0x6   :  { %648 = vmatpush.bf16.msra.mxu0 %v1180_v4  ;;  %v1194_v13 = vld [vmem:[%s1560_s1 + $0xa0] sm:$0xff]  ;;  %v1193_v17 = vld [vmem:[%s1560_s1 + $0x98] sm:$0xff]  ;;  %v1192_v21 = vld [vmem:[%s1560_s1 + $0x90] sm:$0xff] }
   0x7   :  { %674 = vmatpush.bf16.msra.mxu2 %v1196_v5  ;;  %v1202_v14 = vld [vmem:[%s1560_s1 + $0xe0] sm:$0xff]  ;;  %v1201_v18 = vld [vmem:[%s1560_s1 + $0xd8] sm:$0xff]  ;;  %v1200_v22 = vld [vmem:[%s1560_s1 + $0xd0] sm:$0xff] }
   0x8   :  { %687 = vmatpush.bf16.msra.mxu3 %v1204_v6  ;;  %v1186_v15 = vld [vmem:[%s1560_s1 + $0x60] sm:$0xff]  ;;  %v1185_v19 = vld [vmem:[%s1560_s1 + $0x58] sm:$0xff]  ;;  %v1184_v23 = vld [vmem:[%s1560_s1 + $0x50] sm:$0xff] }
   0x9   :  { %661 = vmatpush.bf16.msra.mxu1 %v1188_v7  ;;  %v1175_v24 = vld [vmem:[%s1560_s1 + $0x8] sm:$0xff]  ;;  %v30_v29 = vld [vmem:[%s1562_s0] sm:$0xff]  ;;  %v1213_v34 = vld [vmem:[%s1560_s1 + $0x138] sm:$0xff] }
   0xa   :  { %649 = vmatpush.bf16.msra.mxu0 %v1179_v8  ;;  %v1191_v25 = vld [vmem:[%s1560_s1 + $0x88] sm:$0xff]  ;;  %v1174_v30 = vld [vmem:[%s1560_s1] sm:$0xff]  ;;  %v188_v33 = vunpack.c.l.b16 %v30_v29  ;;  %v1229_v35 = vld [vmem:[%s1560_s1 + $0x1b8] sm:$0xff]  ;;  %v189_v39 = vunpack.c.h.b16 %v30_v29 }
   0xb   :  { %675 = vmatpush.bf16.msra.mxu2 %v1195_v9  ;;  %v1199_v26 = vld [vmem:[%s1560_s1 + $0xc8] sm:$0xff]  ;;  %v1190_v31 = vld [vmem:[%s1560_s1 + $0x80] sm:$0xff]  ;;  %v1237_v40 = vld [vmem:[%s1560_s1 + $0x1f8] sm:$0xff] }
   0xc   :  { %688 = vmatpush.bf16.msra.mxu3 %v1203_v10  ;;  %v1183_v27 = vld [vmem:[%s1560_s1 + $0x48] sm:$0xff]  ;;  %v1198_v36 = vld [vmem:[%s1560_s1 + $0xc0] sm:$0xff]  ;;  %v1221_v41 = vld [vmem:[%s1560_s1 + $0x178] sm:$0xff]  ;;  %v197_v43 = vpack.c.b16 %v188_v33, %v188_v33  ;;  %v198_v47 = vpack.c.b16 %v189_v39, %v189_v39 }
   0xd   :  { %662 = vmatpush.bf16.msra.mxu1 %v1187_v11  ;;  %v31_v28 = vld [vmem:[%s1562_s0 + $0x8] sm:$0xff]  ;;  %v1182_v37 = vld [vmem:[%s1560_s1 + $0x40] sm:$0xff]  ;;  %v1212_v44 = vld [vmem:[%s1560_s1 + $0x130] sm:$0xff] }
   0xe   :  { %650 = vmatpush.bf16.msra.mxu0 %v1178_v12  ;;  %v190_v32 = vunpack.c.l.b16 %v31_v28  ;;  %v191_v38 = vunpack.c.h.b16 %v31_v28  ;;  %v1228_v45 = vld [vmem:[%s1560_s1 + $0x1b0] sm:$0xff]  ;;  %v1211_v50 = vld [vmem:[%s1560_s1 + $0x128] sm:$0xff]  ;;  %v1210_v54 = vld [vmem:[%s1560_s1 + $0x120] sm:$0xff] }
   0xf   :  { %676 = vmatpush.bf16.msra.mxu2 %v1194_v13  ;;  %v1236_v48 = vld [vmem:[%s1560_s1 + $0x1f0] sm:$0xff]  ;;  %v1227_v51 = vld [vmem:[%s1560_s1 + $0x1a8] sm:$0xff]  ;;  %v1226_v55 = vld [vmem:[%s1560_s1 + $0x1a0] sm:$0xff] }
  0x10   :  { %689 = vmatpush.bf16.msra.mxu3 %v1202_v14  ;;  %v199_v42 = vpack.c.b16 %v190_v32, %v190_v32  ;;  %v200_v46 = vpack.c.b16 %v191_v38, %v191_v38  ;;  %v1220_v49 = vld [vmem:[%s1560_s1 + $0x170] sm:$0xff]  ;;  %v1235_v52 = vld [vmem:[%s1560_s1 + $0x1e8] sm:$0xff]  ;;  %v1234_v56 = vld [vmem:[%s1560_s1 + $0x1e0] sm:$0xff] }
  0x11   :  { %663 = vmatpush.bf16.msra.mxu1 %v1186_v15  ;;  %v1219_v53 = vld [vmem:[%s1560_s1 + $0x168] sm:$0xff]  ;;  %v1218_v57 = vld [vmem:[%s1560_s1 + $0x160] sm:$0xff]  ;;  %v1209_v58 = vld [vmem:[%s1560_s1 + $0x118] sm:$0xff] }
  0x12   :  { %651 = vmatpush.bf16.msra.mxu0 %v1177_v16  ;;  %v1225_v59 = vld [vmem:[%s1560_s1 + $0x198] sm:$0xff]  ;;  %v1208_v62 = vld [vmem:[%s1560_s1 + $0x110] sm:$0xff]  ;;  %v1207_v2 = vld [vmem:[%s1560_s1 + $0x108] sm:$0xff] }
  0x13   :  { %677 = vmatpush.bf16.msra.mxu2 %v1193_v17  ;;  %v1233_v60 = vld [vmem:[%s1560_s1 + $0x1d8] sm:$0xff]  ;;  %v1224_v63 = vld [vmem:[%s1560_s1 + $0x190] sm:$0xff]  ;;  %v1223_v3 = vld [vmem:[%s1560_s1 + $0x188] sm:$0xff] }
  0x14   :  { %690 = vmatpush.bf16.msra.mxu3 %v1201_v18  ;;  %v1217_v61 = vld [vmem:[%s1560_s1 + $0x158] sm:$0xff]  ;;  %v1232_v0 = vld [vmem:[%s1560_s1 + $0x1d0] sm:$0xff]  ;;  %v1231_v6 = vld [vmem:[%s1560_s1 + $0x1c8] sm:$0xff] }
  0x15   :  { %664 = vmatpush.bf16.msra.mxu1 %v1185_v19  ;;  %v1216_v1 = vld [vmem:[%s1560_s1 + $0x150] sm:$0xff]  ;;  %v33_v4 = vld [vmem:[%s1562_s0 + $0x18] sm:$0xff]  ;;  %v1215_v7 = vld [vmem:[%s1560_s1 + $0x148] sm:$0xff] }
  0x16   :  { %652 = vmatpush.bf16.msra.mxu0 %v1176_v20  ;;  %v32_v5 = vld [vmem:[%s1562_s0 + $0x10] sm:$0xff]  ;;  %v194_v8 = vunpack.c.l.b16 %v33_v4  ;;  %v1206_v10 = vld [vmem:[%s1560_s1 + $0x100] sm:$0xff]  ;;  %v1245_v12 = vld [vmem:[%s1560_s1 + $0x238] sm:$0xff]  ;;  %v195_v13 = vunpack.c.h.b16 %v33_v4 }
  0x17   :  { %678 = vmatpush.bf16.msra.mxu2 %v1192_v21  ;;  %v192_v9 = vunpack.c.l.b16 %v32_v5  ;;  %v1222_v11 = vld [vmem:[%s1560_s1 + $0x180] sm:$0xff]  ;;  %v193_v16 = vunpack.c.h.b16 %v32_v5  ;;  %v1249_v19 = vld [vmem:[%s1563_s6 + $0x18] sm:$0xff]  ;;  %v1244_v20 = vld [vmem:[%s1560_s1 + $0x230] sm:$0xff] }
  0x18   :  { %691 = vmatpush.bf16.msra.mxu3 %v1200_v22  ;;  %v1230_v14 = vld [vmem:[%s1560_s1 + $0x1c0] sm:$0xff]  ;;  %v203_v17 = vpack.c.b16 %v194_v8, %v194_v8  ;;  %v204_v21 = vpack.c.b16 %v195_v13, %v195_v13  ;;  %v1241_v28 = vld [vmem:[%s1560_s1 + $0x218] sm:$0xff]  ;;  %v1240_v29 = vld [vmem:[%s1560_s1 + $0x210] sm:$0xff] }
  0x19   :  { %665 = vmatpush.bf16.msra.mxu1 %v1184_v23  ;;  %v1214_v15 = vld [vmem:[%s1560_s1 + $0x140] sm:$0xff]  ;;  %v201_v18 = vpack.c.b16 %v192_v9, %v192_v9  ;;  %v202_v22 = vpack.c.b16 %v193_v16, %v193_v16  ;;  %v1248_v23 = vld [vmem:[%s1563_s6 + $0x10] sm:$0xff] }
  0x1a   :  { %653 = vmatpush.bf16.msra.mxu0 %v1175_v24  ;;  %v1243_v24 = vld [vmem:[%s1560_s1 + $0x228] sm:$0xff]  ;;  %v34_v32 = vld [vmem:[%s1562_s0 + $0x20] sm:$0xf] }
  0x1b   :  { %679 = vmatpush.bf16.msra.mxu2 %v1191_v25  ;;  %v1247_v25 = vld [vmem:[%s1563_s6 + $0x8] sm:$0xff]  ;;  %v196_v33 = vunpack.c.l.b16 %v34_v32 }
  0x1c   :  { %692 = vmatpush.bf16.msra.mxu3 %v1199_v26  ;;  %v1242_v26 = vld [vmem:[%s1560_s1 + $0x220] sm:$0xff] }
  0x1d   :  { %666 = vmatpush.bf16.msra.mxu1 %v1183_v27  ;;  %v1246_v27 = vld [vmem:[%s1563_s6] sm:$0xff] }
  0x1e   :  { %654 = vmatpush.bf16.msra.mxu0 %v1174_v30  ;;  %v806_v30 = vld [vmem:[%s1564_s5] sm:$0xf] }
  0x1f   :  { %680 = vmatpush.bf16.msra.mxu2 %v1190_v31  ;;  %v1239_v31 = vld [vmem:[%s1560_s1 + $0x208] sm:$0xff] }
  0x20   :  { %693 = vmatpush.bf16.msra.mxu3 %v1198_v36 }
  0x21   :  { %667 = vmatpush.bf16.msra.mxu1 %v1182_v37  ;;  %655 = vmatmul.bf16.vlgmr.msra.gmra.mxu0 %v197_v43 }
  0x22   :  { %699 = vmatpush.bf16.msrb.mxu0 %v1213_v34  ;;  %681 = vmatmul.bf16.vlgmr.msra.gmra.mxu2 %v199_v42  ;;  %v1238_v34 = vld [vmem:[%s1560_s1 + $0x200] sm:$0xff] }
  0x23   :  { %725 = vmatpush.bf16.msrb.mxu2 %v1229_v35  ;;  %694 = vmatmul.bf16.vlgmr.msra.gmra.mxu3 %v200_v46  ;;  %v205_v35 = vpack.c.b16 %v196_v33, %v196_v33 }
  0x24   :  { %738 = vmatpush.bf16.msrb.mxu3 %v1237_v40  ;;  %668 = vmatmul.bf16.vlgmr.msra.gmra.mxu1 %v198_v47 }
  0x25   :  { %712 = vmatpush.bf16.msrb.mxu1 %v1221_v41 }
  0x26   :  { %700 = vmatpush.bf16.msrb.mxu0 %v1212_v44  ;;  %v1250_v44 = vld [vmem:[%s1561_s2] ss:$0 sm:$0xff] }
  0x27   :  { %726 = vmatpush.bf16.msrb.mxu2 %v1228_v45 }
  0x28   :  { %739 = vmatpush.bf16.msrb.mxu3 %v1236_v48 }
  0x29   :  { %713 = vmatpush.bf16.msrb.mxu1 %v1220_v49 }
  0x2a   :  { %701 = vmatpush.bf16.msrb.mxu0 %v1211_v50 }
  0x2b   :  { %727 = vmatpush.bf16.msrb.mxu2 %v1227_v51 }
  0x2c   :  { %740 = vmatpush.bf16.msrb.mxu3 %v1235_v52 }
  0x2d   :  { %714 = vmatpush.bf16.msrb.mxu1 %v1219_v53 }
  0x2e   :  { %702 = vmatpush.bf16.msrb.mxu0 %v1210_v54 }
  0x2f   :  { %728 = vmatpush.bf16.msrb.mxu2 %v1226_v55 }
  0x30   :  { %741 = vmatpush.bf16.msrb.mxu3 %v1234_v56 }
  0x31   :  { %715 = vmatpush.bf16.msrb.mxu1 %v1218_v57 }
  0x32   :  { %703 = vmatpush.bf16.msrb.mxu0 %v1209_v58 }
  0x33   :  { %729 = vmatpush.bf16.msrb.mxu2 %v1225_v59 }
  0x34   :  { %742 = vmatpush.bf16.msrb.mxu3 %v1233_v60 }
  0x35   :  { %716 = vmatpush.bf16.msrb.mxu1 %v1217_v61 }
  0x36   :  { %704 = vmatpush.bf16.msrb.mxu0 %v1208_v62 }
  0x37   :  { %730 = vmatpush.bf16.msrb.mxu2 %v1224_v63 }
  0x38   :  { %743 = vmatpush.bf16.msrb.mxu3 %v1232_v0 }
  0x39   :  { %717 = vmatpush.bf16.msrb.mxu1 %v1216_v1 }
  0x3a   :  { %705 = vmatpush.bf16.msrb.mxu0 %v1207_v2 }
  0x3b   :  { %731 = vmatpush.bf16.msrb.mxu2 %v1223_v3 }
  0x3c   :  { %744 = vmatpush.bf16.msrb.mxu3 %v1231_v6 }
  0x3d   :  { %718 = vmatpush.bf16.msrb.mxu1 %v1215_v7 }
  0x3e   :  { %706 = vmatpush.bf16.msrb.mxu0 %v1206_v10 }
  0x3f   :  { %732 = vmatpush.bf16.msrb.mxu2 %v1222_v11 }
  0x40   :  { %745 = vmatpush.bf16.msrb.mxu3 %v1230_v14 }
  0x41   :  { %719 = vmatpush.bf16.msrb.mxu1 %v1214_v15  ;;  %707 = vmatmul.bf16.vlgmr.msrb.gmra.mxu0 %v201_v18 }
  0x42   :  { %751 = vmatpush.bf16.msra.mxu0 %v1245_v12  ;;  %733 = vmatmul.bf16.vlgmr.msrb.gmra.mxu2 %v203_v17 }
  0x43   :  { %746 = vmatmul.bf16.vlgmr.msrb.gmra.mxu3 %v204_v21 }
  0x44   :  { %720 = vmatmul.bf16.vlgmr.msrb.gmra.mxu1 %v202_v22 }
  0x45   :  { %847 = vmatpush.bf16.msra.mxu1 %v1249_v19 }
  0x46   :  { %752 = vmatpush.bf16.msra.mxu0 %v1244_v20 }
  0x49   :  { %848 = vmatpush.bf16.msra.mxu1 %v1248_v23 }
  0x4a   :  { %753 = vmatpush.bf16.msra.mxu0 %v1243_v24 }
  0x4d   :  { %849 = vmatpush.bf16.msra.mxu1 %v1247_v25 }
  0x4e   :  { %754 = vmatpush.bf16.msra.mxu0 %v1242_v26  ;;  %v782_v26 = vld [vmem:[%s1566_s3] sm:$0x1] }
  0x51   :  { %850 = vmatpush.bf16.msra.mxu1 %v1246_v27 }
  0x52   :  { %755 = vmatpush.bf16.msra.mxu0 %v1241_v28 }
  0x54   :  { %1173 = vmatmul.msk.bf16.vlgmr.msra.gmra.mxu1 %vm839_vm0, %v806_v30  ;;  %v795_v30 = vld [vmem:[%s1567_s4] sm:$0x1] }
  0x56   :  { %756 = vmatpush.bf16.msra.mxu0 %v1240_v29 }
  0x5a   :  { %757 = vmatpush.bf16.msra.mxu0 %v1239_v31 }
  0x5e   :  { %758 = vmatpush.bf16.msra.mxu0 %v1238_v34 }
  0x61   :  { %759 = vmatmul.bf16.vlgmr.msra.gmra.mxu0 %v205_v35 }
  0x9e   :  { %v656_v36 = vpop.f32.mrf.mxu0 }
  0x9f   :  { %v657_v45 = vadd.f32 %v1250_v44, %v656_v36 }
  0xa1   :  { %v669_v37 = vpop.f32.mrf.mxu1 }
  0xa2   :  { %v670_v48 = vadd.f32 %v669_v37, %v657_v45  ;;  %v1251_v37 = vld [vmem:[%s1565_s7] ss:$0 sm:$0xff] }
  0xa5   :  { %v682_v38 = vpop.f32.mrf.mxu2 }
  0xa6   :  { %v695_v39 = vpop.f32.mrf.mxu3  ;;  %v658_v40 = vpop.f32.mrf.mxu0  ;;  %v683_v50 = vadd.f32 %v682_v38, %v670_v48 }
  0xa8   :  { %v696_v54 = vadd.f32 %v695_v39, %v683_v50 }
  0xa9   :  { %v671_v41 = vpop.f32.mrf.mxu1 }
  0xad   :  { %v684_v42 = vpop.f32.mrf.mxu2 }
  0xae   :  { %v697_v43 = vpop.f32.mrf.mxu3 }
  0xbe   :  { %v708_v46 = vpop.f32.mrf.mxu0 }
  0xbf   :  { %v709_v56 = vadd.f32 %v708_v46, %v696_v54 }
  0xc1   :  { %v721_v47 = vpop.f32.mrf.mxu1 }
  0xc2   :  { %v722_v58 = vadd.f32 %v721_v47, %v709_v56 }
  0xc5   :  { %v734_v49 = vpop.f32.mrf.mxu2 }
  0xc6   :  { %v747_v51 = vpop.f32.mrf.mxu3  ;;  %v710_v52 = vpop.f32.mrf.mxu0  ;;  %v735_v59 = vadd.f32 %v734_v49, %v722_v58 }
  0xc8   :  { %v748_v60 = vadd.f32 %v747_v51, %v735_v59 }
  0xc9   :  { %v723_v53 = vpop.f32.mrf.mxu1 }
  0xcd   :  { %v736_v55 = vpop.f32.mrf.mxu2 }
  0xce   :  { %v749_v57 = vpop.f32.mrf.mxu3 }
  0xd1   :  { %v852_v10 = vpop.f32.mrf.mxu1 }
  0xd9   :  { %v854_v18 = vpop.f32.mrf.mxu1 }
  0xde   :  { %v760_v61 = vpop.f32.mrf.mxu0 }
  0xdf   :  { %v761_v62 = vadd.f32 %v760_v61, %v748_v60 }
  0xe1   :  { %v764_v63 = vrot.slane %v761_v62, 4  ;;  %v770_v0 = vmul.f32 %v761_v62, %v761_v62 }
  0xe3   :  { %v765_v1 = vadd.f32 %v764_v63, %v761_v62  ;;  %v771_v2 = vrot.slane %v770_v0, 4 }
  0xe5   :  { %v766_v3 = vrot.slane %v765_v1, 2  ;;  %v772_v4 = vadd.f32 %v771_v2, %v770_v0 }
  0xe6   :  { %v762_v5 = vpop.f32.mrf.mxu0 }
  0xe7   :  { %v767_v6 = vadd.f32 %v766_v3, %v765_v1  ;;  %v773_v7 = vrot.slane %v772_v4, 2 }
  0xe9   :  { %v774_v8 = vadd.f32 %v773_v7, %v772_v4  ;;  %v768_v9 = vrot.slane %v767_v6, 1 }
  0xeb   :  { %v775_v11 = vrot.slane %v774_v8, 1  ;;  %v769_v12 = vadd.f32 %v768_v9, %v767_v6 }
  0xed   :  { %v776_v13 = vadd.f32 %v775_v11, %v774_v8  ;;  %v777_v14 = vmul.f32 0.125, %v769_v12 }
  0xef   :  { %v778_v15 = vmul.f32 0.125, %v776_v13  ;;  %v779_v16 = vmul.f32 %v777_v14, %v777_v14 }
  0xf1   :  { %v780_v17 = vsub.f32 %v778_v15, %v779_v16 }
  0xf3   :  { %v781_v19 = vmax.f32 %v780_v17, 0.0 }
  0xf5   :  { %v783_v20 = vadd.f32 1e-05, %v781_v19 }
  0xf7   :  { %1252 = vrsqrt.f32 %v783_v20  ;;  %vm790_vm2 = vweird.f32 %v783_v20 }
  0xfd   :  { %v1253_v21 = vpop.eup %1252 }
  0xfe   :  { %v785_v22 = vmul.f32 %v1253_v21, %v783_v20  ;;  %vm791_vm1 = vweird.f32 %v1253_v21 }
  0xff   :  { %vm792_vm3 = vmor %vm790_vm2, %vm791_vm1 }
 0x100   :  { %v786_v23 = vmul.f32 %v1253_v21, %v785_v22 }
 0x102   :  { %v787_v24 = vmul.f32 0.5, %v786_v23 }
 0x104   :  { %v788_v25 = vsub.f32 1.5, %v787_v24 }
 0x106   :  { %v789_v27 = vmul.f32 %v1253_v21, %v788_v25 }
 0x108   :  { %v793_v28 = vsel %vm792_vm3, %v1253_v21, %v789_v27 }
 0x109   :  { %v794_v29 = vmul.f32 %v793_v28, %v782_v26 }
 0x10b   :  { %v796_v31 = vmul.f32 %v794_v29, %v777_v14  ;;  %v799_v32 = vperm.slane %v794_v29, 0 }
 0x10d   :  { %v797_v33 = vsub.f32 %v795_v30, %v796_v31  ;;  %v801_v34 = vmul.f32 %v799_v32, %v761_v62 }
 0x10f   :  { %v803_v35 = vperm.slane %v797_v33, 0 }
 0x111   :  { %v805_v36 = vadd.f32 %v803_v35, %v801_v34 }
 0x113   :  { %v856_v38 = vadd.f32 %v852_v10, %v805_v36 }
 0x115   :  { %v861_v39 = vadd.f32 %v1251_v37, %v856_v38 }
 0x117   :  { %v862_v40 = vmax.f32 %v861_v39, 0.0 }
 0x119   :  { %v863_v41 = vpack.c.bf16 %v862_v40, %v862_v40 }
 0x11b   :  { %864 = vst [vmem:[%s1568_s8] sm:$0xf] %v863_v41 }

// kernel: keypoint_forward.26
= control target key start
LH: loop header
LB: loop body
LE: loop exit
PB: predicated region body
PF: predicated region fallthrough
CT: control target
= control target key end

     0   :  { %s1453_s1 = inlined_call_operand.vmem [shape: bf16[1152,128], index: 1, kind: input, shape index: {}]   ;;  %s1454_s2 = inlined_call_operand.vmem [shape: f32[1,128], index: 2, kind: input, shape index: {}]   ;;  %s1455_s0 = inlined_call_operand.vmem [shape: bf16[8,1152], index: 0, kind: input, shape index: {}]   ;;  %s1456_s3 = inlined_call_operand.vmem [shape: f32[1,128], index: 3, kind: input, shape index: {}]   ;;  %s1457_s4 = inlined_call_operand.vmem [shape: f32[1,128], index: 4, kind: input, shape index: {}]   ;;  %s1458_s5 = inlined_call_operand.vmem [shape: bf16[8,128], index: 5, kind: input, shape index: {}]   ;;  %s1459_s6 = inlined_call_operand.vmem [shape: bf16[8,128], index: 6, kind: output, shape index: {}]  }
   0x1   :  { %v1104_v0 = vld [vmem:[%s1453_s1 + $0x38] sm:$0xff]  ;;  %v1103_v4 = vld [vmem:[%s1453_s1 + $0x30] sm:$0xff]  ;;  %v1102_v8 = vld [vmem:[%s1453_s1 + $0x28] sm:$0xff] }
   0x2   :  { %v1120_v1 = vld [vmem:[%s1453_s1 + $0xb8] sm:$0xff]  ;;  %640 = vmatpush.bf16.msra.mxu0 %v1104_v0  ;;  %v1119_v5 = vld [vmem:[%s1453_s1 + $0xb0] sm:$0xff]  ;;  %v1118_v9 = vld [vmem:[%s1453_s1 + $0xa8] sm:$0xff] }
   0x3   :  { %v1128_v2 = vld [vmem:[%s1453_s1 + $0xf8] sm:$0xff]  ;;  %666 = vmatpush.bf16.msra.mxu2 %v1120_v1  ;;  %v1127_v6 = vld [vmem:[%s1453_s1 + $0xf0] sm:$0xff]  ;;  %v1126_v10 = vld [vmem:[%s1453_s1 + $0xe8] sm:$0xff] }
   0x4   :  { %v1112_v3 = vld [vmem:[%s1453_s1 + $0x78] sm:$0xff]  ;;  %679 = vmatpush.bf16.msra.mxu3 %v1128_v2  ;;  %v1111_v7 = vld [vmem:[%s1453_s1 + $0x70] sm:$0xff]  ;;  %v1110_v11 = vld [vmem:[%s1453_s1 + $0x68] sm:$0xff] }
   0x5   :  { %653 = vmatpush.bf16.msra.mxu1 %v1112_v3  ;;  %v1101_v12 = vld [vmem:[%s1453_s1 + $0x20] sm:$0xff]  ;;  %v1100_v16 = vld [vmem:[%s1453_s1 + $0x18] sm:$0xff]  ;;  %v1099_v20 = vld [vmem:[%s1453_s1 + $0x10] sm:$0xff] }
   0x6   :  { %641 = vmatpush.bf16.msra.mxu0 %v1103_v4  ;;  %v1117_v13 = vld [vmem:[%s1453_s1 + $0xa0] sm:$0xff]  ;;  %v1116_v17 = vld [vmem:[%s1453_s1 + $0x98] sm:$0xff]  ;;  %v1115_v21 = vld [vmem:[%s1453_s1 + $0x90] sm:$0xff] }
   0x7   :  { %667 = vmatpush.bf16.msra.mxu2 %v1119_v5  ;;  %v1125_v14 = vld [vmem:[%s1453_s1 + $0xe0] sm:$0xff]  ;;  %v1124_v18 = vld [vmem:[%s1453_s1 + $0xd8] sm:$0xff]  ;;  %v1123_v22 = vld [vmem:[%s1453_s1 + $0xd0] sm:$0xff] }
   0x8   :  { %680 = vmatpush.bf16.msra.mxu3 %v1127_v6  ;;  %v1109_v15 = vld [vmem:[%s1453_s1 + $0x60] sm:$0xff]  ;;  %v1108_v19 = vld [vmem:[%s1453_s1 + $0x58] sm:$0xff]  ;;  %v1107_v23 = vld [vmem:[%s1453_s1 + $0x50] sm:$0xff] }
   0x9   :  { %654 = vmatpush.bf16.msra.mxu1 %v1111_v7  ;;  %v1098_v24 = vld [vmem:[%s1453_s1 + $0x8] sm:$0xff]  ;;  %v23_v29 = vld [vmem:[%s1455_s0] sm:$0xff]  ;;  %v1136_v34 = vld [vmem:[%s1453_s1 + $0x138] sm:$0xff] }
   0xa   :  { %642 = vmatpush.bf16.msra.mxu0 %v1102_v8  ;;  %v1114_v25 = vld [vmem:[%s1453_s1 + $0x88] sm:$0xff]  ;;  %v1097_v30 = vld [vmem:[%s1453_s1] sm:$0xff]  ;;  %v181_v33 = vunpack.c.l.b16 %v23_v29  ;;  %v1152_v35 = vld [vmem:[%s1453_s1 + $0x1b8] sm:$0xff]  ;;  %v182_v39 = vunpack.c.h.b16 %v23_v29 }
   0xb   :  { %668 = vmatpush.bf16.msra.mxu2 %v1118_v9  ;;  %v1122_v26 = vld [vmem:[%s1453_s1 + $0xc8] sm:$0xff]  ;;  %v1113_v31 = vld [vmem:[%s1453_s1 + $0x80] sm:$0xff]  ;;  %v1160_v40 = vld [vmem:[%s1453_s1 + $0x1f8] sm:$0xff] }
   0xc   :  { %681 = vmatpush.bf16.msra.mxu3 %v1126_v10  ;;  %v1106_v27 = vld [vmem:[%s1453_s1 + $0x48] sm:$0xff]  ;;  %v1121_v36 = vld [vmem:[%s1453_s1 + $0xc0] sm:$0xff]  ;;  %v1144_v41 = vld [vmem:[%s1453_s1 + $0x178] sm:$0xff]  ;;  %v190_v43 = vpack.c.b16 %v181_v33, %v181_v33  ;;  %v191_v47 = vpack.c.b16 %v182_v39, %v182_v39 }
   0xd   :  { %655 = vmatpush.bf16.msra.mxu1 %v1110_v11  ;;  %v24_v28 = vld [vmem:[%s1455_s0 + $0x8] sm:$0xff]  ;;  %v1105_v37 = vld [vmem:[%s1453_s1 + $0x40] sm:$0xff]  ;;  %v1135_v44 = vld [vmem:[%s1453_s1 + $0x130] sm:$0xff] }
   0xe   :  { %643 = vmatpush.bf16.msra.mxu0 %v1101_v12  ;;  %v183_v32 = vunpack.c.l.b16 %v24_v28  ;;  %v184_v38 = vunpack.c.h.b16 %v24_v28  ;;  %v1151_v45 = vld [vmem:[%s1453_s1 + $0x1b0] sm:$0xff]  ;;  %v1134_v50 = vld [vmem:[%s1453_s1 + $0x128] sm:$0xff]  ;;  %v1133_v54 = vld [vmem:[%s1453_s1 + $0x120] sm:$0xff] }
   0xf   :  { %669 = vmatpush.bf16.msra.mxu2 %v1117_v13  ;;  %v1159_v48 = vld [vmem:[%s1453_s1 + $0x1f0] sm:$0xff]  ;;  %v1150_v51 = vld [vmem:[%s1453_s1 + $0x1a8] sm:$0xff]  ;;  %v1149_v55 = vld [vmem:[%s1453_s1 + $0x1a0] sm:$0xff] }
  0x10   :  { %682 = vmatpush.bf16.msra.mxu3 %v1125_v14  ;;  %v192_v42 = vpack.c.b16 %v183_v32, %v183_v32  ;;  %v193_v46 = vpack.c.b16 %v184_v38, %v184_v38  ;;  %v1143_v49 = vld [vmem:[%s1453_s1 + $0x170] sm:$0xff]  ;;  %v1158_v52 = vld [vmem:[%s1453_s1 + $0x1e8] sm:$0xff]  ;;  %v1157_v56 = vld [vmem:[%s1453_s1 + $0x1e0] sm:$0xff] }
  0x11   :  { %656 = vmatpush.bf16.msra.mxu1 %v1109_v15  ;;  %v1142_v53 = vld [vmem:[%s1453_s1 + $0x168] sm:$0xff]  ;;  %v1141_v57 = vld [vmem:[%s1453_s1 + $0x160] sm:$0xff]  ;;  %v1132_v58 = vld [vmem:[%s1453_s1 + $0x118] sm:$0xff] }
  0x12   :  { %644 = vmatpush.bf16.msra.mxu0 %v1100_v16  ;;  %v1148_v59 = vld [vmem:[%s1453_s1 + $0x198] sm:$0xff]  ;;  %v1131_v62 = vld [vmem:[%s1453_s1 + $0x110] sm:$0xff]  ;;  %v1130_v2 = vld [vmem:[%s1453_s1 + $0x108] sm:$0xff] }
  0x13   :  { %670 = vmatpush.bf16.msra.mxu2 %v1116_v17  ;;  %v1156_v60 = vld [vmem:[%s1453_s1 + $0x1d8] sm:$0xff]  ;;  %v1147_v63 = vld [vmem:[%s1453_s1 + $0x190] sm:$0xff]  ;;  %v1146_v3 = vld [vmem:[%s1453_s1 + $0x188] sm:$0xff] }
  0x14   :  { %683 = vmatpush.bf16.msra.mxu3 %v1124_v18  ;;  %v1140_v61 = vld [vmem:[%s1453_s1 + $0x158] sm:$0xff]  ;;  %v1155_v0 = vld [vmem:[%s1453_s1 + $0x1d0] sm:$0xff]  ;;  %v1154_v6 = vld [vmem:[%s1453_s1 + $0x1c8] sm:$0xff] }
  0x15   :  { %657 = vmatpush.bf16.msra.mxu1 %v1108_v19  ;;  %v1139_v1 = vld [vmem:[%s1453_s1 + $0x150] sm:$0xff]  ;;  %v26_v4 = vld [vmem:[%s1455_s0 + $0x18] sm:$0xff]  ;;  %v1138_v7 = vld [vmem:[%s1453_s1 + $0x148] sm:$0xff] }
  0x16   :  { %645 = vmatpush.bf16.msra.mxu0 %v1099_v20  ;;  %v25_v5 = vld [vmem:[%s1455_s0 + $0x10] sm:$0xff]  ;;  %v187_v8 = vunpack.c.l.b16 %v26_v4  ;;  %v1129_v10 = vld [vmem:[%s1453_s1 + $0x100] sm:$0xff]  ;;  %v1168_v12 = vld [vmem:[%s1453_s1 + $0x238] sm:$0xff]  ;;  %v188_v13 = vunpack.c.h.b16 %v26_v4 }
  0x17   :  { %671 = vmatpush.bf16.msra.mxu2 %v1115_v21  ;;  %v185_v9 = vunpack.c.l.b16 %v25_v5  ;;  %v1145_v11 = vld [vmem:[%s1453_s1 + $0x180] sm:$0xff]  ;;  %v186_v16 = vunpack.c.h.b16 %v25_v5  ;;  %v1167_v19 = vld [vmem:[%s1453_s1 + $0x230] sm:$0xff] }
  0x18   :  { %684 = vmatpush.bf16.msra.mxu3 %v1123_v22  ;;  %v1153_v14 = vld [vmem:[%s1453_s1 + $0x1c0] sm:$0xff]  ;;  %v196_v17 = vpack.c.b16 %v187_v8, %v187_v8  ;;  %v197_v20 = vpack.c.b16 %v188_v13, %v188_v13  ;;  %v1166_v22 = vld [vmem:[%s1453_s1 + $0x228] sm:$0xff] }
  0x19   :  { %658 = vmatpush.bf16.msra.mxu1 %v1107_v23  ;;  %v1137_v15 = vld [vmem:[%s1453_s1 + $0x140] sm:$0xff]  ;;  %v194_v18 = vpack.c.b16 %v185_v9, %v185_v9  ;;  %v195_v21 = vpack.c.b16 %v186_v16, %v186_v16 }
  0x1a   :  { %646 = vmatpush.bf16.msra.mxu0 %v1098_v24  ;;  %v1165_v23 = vld [vmem:[%s1453_s1 + $0x220] sm:$0xff]  ;;  %v1164_v24 = vld [vmem:[%s1453_s1 + $0x218] sm:$0xff] }
  0x1b   :  { %672 = vmatpush.bf16.msra.mxu2 %v1114_v25  ;;  %v1163_v25 = vld [vmem:[%s1453_s1 + $0x210] sm:$0xff]  ;;  %v1161_v29 = vld [vmem:[%s1453_s1 + $0x200] sm:$0xff] }
  0x1c   :  { %685 = vmatpush.bf16.msra.mxu3 %v1122_v26  ;;  %v1162_v26 = vld [vmem:[%s1453_s1 + $0x208] sm:$0xff]  ;;  %v1169_v39 = vld [vmem:[%s1454_s2] ss:$0 sm:$0xff] }
  0x1d   :  { %659 = vmatpush.bf16.msra.mxu1 %v1106_v27  ;;  %v27_v27 = vld [vmem:[%s1455_s0 + $0x20] sm:$0xf] }
  0x1e   :  { %647 = vmatpush.bf16.msra.mxu0 %v1097_v30  ;;  %v189_v28 = vunpack.c.l.b16 %v27_v27 }
  0x1f   :  { %673 = vmatpush.bf16.msra.mxu2 %v1113_v31 }
  0x20   :  { %686 = vmatpush.bf16.msra.mxu3 %v1121_v36  ;;  %v198_v30 = vpack.c.b16 %v189_v28, %v189_v28 }
  0x21   :  { %660 = vmatpush.bf16.msra.mxu1 %v1105_v37  ;;  %648 = vmatmul.bf16.vlgmr.msra.gmra.mxu0 %v190_v43 }
  0x22   :  { %692 = vmatpush.bf16.msrb.mxu0 %v1136_v34  ;;  %674 = vmatmul.bf16.vlgmr.msra.gmra.mxu2 %v192_v42 }
  0x23   :  { %718 = vmatpush.bf16.msrb.mxu2 %v1152_v35  ;;  %687 = vmatmul.bf16.vlgmr.msra.gmra.mxu3 %v193_v46 }
  0x24   :  { %731 = vmatpush.bf16.msrb.mxu3 %v1160_v40  ;;  %661 = vmatmul.bf16.vlgmr.msra.gmra.mxu1 %v191_v47 }
  0x25   :  { %705 = vmatpush.bf16.msrb.mxu1 %v1144_v41 }
  0x26   :  { %693 = vmatpush.bf16.msrb.mxu0 %v1135_v44 }
  0x27   :  { %719 = vmatpush.bf16.msrb.mxu2 %v1151_v45 }
  0x28   :  { %732 = vmatpush.bf16.msrb.mxu3 %v1159_v48 }
  0x29   :  { %706 = vmatpush.bf16.msrb.mxu1 %v1143_v49 }
  0x2a   :  { %694 = vmatpush.bf16.msrb.mxu0 %v1134_v50 }
  0x2b   :  { %720 = vmatpush.bf16.msrb.mxu2 %v1150_v51 }
  0x2c   :  { %733 = vmatpush.bf16.msrb.mxu3 %v1158_v52 }
  0x2d   :  { %707 = vmatpush.bf16.msrb.mxu1 %v1142_v53 }
  0x2e   :  { %695 = vmatpush.bf16.msrb.mxu0 %v1133_v54 }
  0x2f   :  { %721 = vmatpush.bf16.msrb.mxu2 %v1149_v55 }
  0x30   :  { %734 = vmatpush.bf16.msrb.mxu3 %v1157_v56 }
  0x31   :  { %708 = vmatpush.bf16.msrb.mxu1 %v1141_v57 }
  0x32   :  { %696 = vmatpush.bf16.msrb.mxu0 %v1132_v58 }
  0x33   :  { %722 = vmatpush.bf16.msrb.mxu2 %v1148_v59 }
  0x34   :  { %735 = vmatpush.bf16.msrb.mxu3 %v1156_v60 }
  0x35   :  { %709 = vmatpush.bf16.msrb.mxu1 %v1140_v61 }
  0x36   :  { %697 = vmatpush.bf16.msrb.mxu0 %v1131_v62 }
  0x37   :  { %723 = vmatpush.bf16.msrb.mxu2 %v1147_v63 }
  0x38   :  { %736 = vmatpush.bf16.msrb.mxu3 %v1155_v0 }
  0x39   :  { %710 = vmatpush.bf16.msrb.mxu1 %v1139_v1 }
  0x3a   :  { %698 = vmatpush.bf16.msrb.mxu0 %v1130_v2 }
  0x3b   :  { %724 = vmatpush.bf16.msrb.mxu2 %v1146_v3 }
  0x3c   :  { %737 = vmatpush.bf16.msrb.mxu3 %v1154_v6 }
  0x3d   :  { %711 = vmatpush.bf16.msrb.mxu1 %v1138_v7 }
  0x3e   :  { %699 = vmatpush.bf16.msrb.mxu0 %v1129_v10 }
  0x3f   :  { %725 = vmatpush.bf16.msrb.mxu2 %v1145_v11 }
  0x40   :  { %738 = vmatpush.bf16.msrb.mxu3 %v1153_v14 }
  0x41   :  { %712 = vmatpush.bf16.msrb.mxu1 %v1137_v15  ;;  %700 = vmatmul.bf16.vlgmr.msrb.gmra.mxu0 %v194_v18 }
  0x42   :  { %744 = vmatpush.bf16.msra.mxu0 %v1168_v12  ;;  %726 = vmatmul.bf16.vlgmr.msrb.gmra.mxu2 %v196_v17 }
  0x43   :  { %739 = vmatmul.bf16.vlgmr.msrb.gmra.mxu3 %v197_v20 }
  0x44   :  { %713 = vmatmul.bf16.vlgmr.msrb.gmra.mxu1 %v195_v21 }
  0x46   :  { %745 = vmatpush.bf16.msra.mxu0 %v1167_v19  ;;  %v775_v19 = vld [vmem:[%s1456_s3] sm:$0x1] }
  0x4a   :  { %746 = vmatpush.bf16.msra.mxu0 %v1166_v22 }
  0x4e   :  { %747 = vmatpush.bf16.msra.mxu0 %v1165_v23  ;;  %v788_v23 = vld [vmem:[%s1457_s4] sm:$0x1] }
  0x52   :  { %748 = vmatpush.bf16.msra.mxu0 %v1164_v24 }
  0x56   :  { %749 = vmatpush.bf16.msra.mxu0 %v1163_v25 }
  0x5a   :  { %750 = vmatpush.bf16.msra.mxu0 %v1162_v26  ;;  %v799_v26 = vld [vmem:[%s1458_s5] sm:$0xf] }
  0x5e   :  { %751 = vmatpush.bf16.msra.mxu0 %v1161_v29 }
  0x61   :  { %752 = vmatmul.bf16.vlgmr.msra.gmra.mxu0 %v198_v30  ;;  %v800_v30 = vunpack.c.l.bf16 %v799_v26 }
  0x9e   :  { %v649_v31 = vpop.f32.mrf.mxu0 }
  0x9f   :  { %v650_v40 = vadd.f32 %v1169_v39, %v649_v31 }
  0xa1   :  { %v662_v32 = vpop.f32.mrf.mxu1 }
  0xa2   :  { %v663_v43 = vadd.f32 %v662_v32, %v650_v40 }
  0xa5   :  { %v675_v33 = vpop.f32.mrf.mxu2 }
  0xa6   :  { %v688_v34 = vpop.f32.mrf.mxu3  ;;  %v651_v35 = vpop.f32.mrf.mxu0  ;;  %v676_v45 = vadd.f32 %v675_v33, %v663_v43 }
  0xa8   :  { %v689_v49 = vadd.f32 %v688_v34, %v676_v45 }
  0xa9   :  { %v664_v36 = vpop.f32.mrf.mxu1 }
  0xad   :  { %v677_v37 = vpop.f32.mrf.mxu2 }
  0xae   :  { %v690_v38 = vpop.f32.mrf.mxu3 }
  0xbe   :  { %v701_v41 = vpop.f32.mrf.mxu0 }
  0xbf   :  { %v702_v51 = vadd.f32 %v701_v41, %v689_v49 }
  0xc1   :  { %v714_v42 = vpop.f32.mrf.mxu1 }
  0xc2   :  { %v715_v53 = vadd.f32 %v714_v42, %v702_v51 }
  0xc5   :  { %v727_v44 = vpop.f32.mrf.mxu2 }
  0xc6   :  { %v740_v46 = vpop.f32.mrf.mxu3  ;;  %v703_v47 = vpop.f32.mrf.mxu0  ;;  %v728_v54 = vadd.f32 %v727_v44, %v715_v53 }
  0xc8   :  { %v741_v55 = vadd.f32 %v740_v46, %v728_v54 }
  0xc9   :  { %v716_v48 = vpop.f32.mrf.mxu1 }
  0xcd   :  { %v729_v50 = vpop.f32.mrf.mxu2 }
  0xce   :  { %v742_v52 = vpop.f32.mrf.mxu3 }
  0xde   :  { %v753_v56 = vpop.f32.mrf.mxu0 }
  0xdf   :  { %v754_v57 = vadd.f32 %v753_v56, %v741_v55 }
  0xe1   :  { %v757_v58 = vrot.slane %v754_v57, 4  ;;  %v763_v59 = vmul.f32 %v754_v57, %v754_v57 }
  0xe3   :  { %v758_v60 = vadd.f32 %v757_v58, %v754_v57  ;;  %v764_v61 = vrot.slane %v763_v59, 4 }
  0xe5   :  { %v759_v62 = vrot.slane %v758_v60, 2  ;;  %v765_v63 = vadd.f32 %v764_v61, %v763_v59 }
  0xe6   :  { %v755_v0 = vpop.f32.mrf.mxu0 }
  0xe7   :  { %v760_v1 = vadd.f32 %v759_v62, %v758_v60  ;;  %v766_v2 = vrot.slane %v765_v63, 2 }
  0xe9   :  { %v761_v3 = vrot.slane %v760_v1, 1  ;;  %v767_v4 = vadd.f32 %v766_v2, %v765_v63 }
  0xeb   :  { %v762_v5 = vadd.f32 %v761_v3, %v760_v1  ;;  %v768_v6 = vrot.slane %v767_v4, 1 }
  0xed   :  { %v769_v7 = vadd.f32 %v768_v6, %v767_v4  ;;  %v770_v8 = vmul.f32 0.125, %v762_v5 }
  0xef   :  { %v771_v9 = vmul.f32 0.125, %v769_v7  ;;  %v772_v10 = vmul.f32 %v770_v8, %v770_v8 }
  0xf1   :  { %v773_v11 = vsub.f32 %v771_v9, %v772_v10 }
  0xf3   :  { %v774_v12 = vmax.f32 %v773_v11, 0.0 }
  0xf5   :  { %v776_v13 = vadd.f32 1e-05, %v774_v12 }
  0xf7   :  { %1170 = vrsqrt.f32 %v776_v13  ;;  %vm783_vm1 = vweird.f32 %v776_v13 }
  0xfd   :  { %v1171_v14 = vpop.eup %1170 }
  0xfe   :  { %v778_v15 = vmul.f32 %v1171_v14, %v776_v13  ;;  %vm784_vm0 = vweird.f32 %v1171_v14 }
  0xff   :  { %vm785_vm2 = vmor %vm783_vm1, %vm784_vm0 }
 0x100   :  { %v779_v16 = vmul.f32 %v1171_v14, %v778_v15 }
 0x102   :  { %v780_v17 = vmul.f32 0.5, %v779_v16 }
 0x104   :  { %v781_v18 = vsub.f32 1.5, %v780_v17 }
 0x106   :  { %v782_v20 = vmul.f32 %v1171_v14, %v781_v18 }
 0x108   :  { %v786_v21 = vsel %vm785_vm2, %v1171_v14, %v782_v20 }
 0x109   :  { %v787_v22 = vmul.f32 %v786_v21, %v775_v19 }
 0x10b   :  { %v789_v24 = vmul.f32 %v787_v22, %v770_v8  ;;  %v792_v25 = vperm.slane %v787_v22, 0 }
 0x10d   :  { %v790_v27 = vsub.f32 %v788_v23, %v789_v24  ;;  %v794_v28 = vmul.f32 %v792_v25, %v754_v57 }
 0x10f   :  { %v796_v29 = vperm.slane %v790_v27, 0 }
 0x111   :  { %v798_v31 = vadd.f32 %v796_v29, %v794_v28 }
 0x113   :  { %v801_v32 = vadd.f32 %v800_v30, %v798_v31 }
 0x115   :  { %v802_v33 = vmax.f32 %v801_v32, 0.0 }
 0x117   :  { %v803_v34 = vpack.c.bf16 %v802_v33, %v802_v33 }
 0x119   :  { %804 = vst [vmem:[%s1459_s6] sm:$0xf] %v803_v34 }

// kernel: keypoint_forward.30
= control target key start
LH: loop header
LB: loop body
LE: loop exit
PB: predicated region body
PF: predicated region fallthrough
CT: control target
= control target key end

     0   :  { %vm1150_vm0 = vcmask 1041408   ;;  %vm1158_vm1 = vcmask 779264   ;;  %vm1218_vm7 = vcmask 1040384   ;;  %vm1254_vm9 = vcmask 779265   ;;  %s2997_s0 = inlined_call_operand.vmem [shape: bf16[2,1,1,9,224], index: 0, kind: input, shape index: {}, may-alias: {0,6}]   ;;  %s2998_s1 = inlined_call_operand.vmem [shape: bf16[2,1152], index: 1, kind: input, shape index: {}]   ;;  %s2999_s2 = inlined_call_operand.vmem [shape: bf16[1152,224], index: 2, kind: input, shape index: {}]   ;;  %s3000_s3 = inlined_call_operand.vmem [shape: f32[1,224], index: 3, kind: input, shape index: {}]   ;;  %s3001_s4 = inlined_call_operand.vmem [shape: f32[1,224], index: 4, kind: input, shape index: {}]   ;;  %s3002_s5 = inlined_call_operand.vmem [shape: f32[1,224], index: 5, kind: input, shape index: {}]   ;;  %s3003_s6 = inlined_call_operand.vmem [shape: bf16[2,1,1,9,224], index: 6, kind: output, shape index: {}, may-alias: {0,6}]  }
   0x1   :  { %v1356_v0 = vld [vmem:[%s2999_s2 + $0x70] sm:$0xf]  ;;  %v1890_v1 = vld [vmem:[%s2999_s2 + $0x74] sm:$0xf0]  ;;  %v1348_v9 = vld [vmem:[%s2999_s2 + $0x60] sm:$0xf] }
   0x2   :  { %v1420_v2 = vld [vmem:[%s2999_s2 + $0xf0] sm:$0xf]  ;;  %v1357_v3 = vor.u32 %v1890_v1, %v1356_v0  ;;  %v1906_v4 = vld [vmem:[%s2999_s2 + $0xf4] sm:$0xf0]  ;;  %v1888_v10 = vld [vmem:[%s2999_s2 + $0x64] sm:$0xf0] }
   0x3   :  { %v1484_v5 = vld [vmem:[%s2999_s2 + $0x170] sm:$0xf]  ;;  %v1922_v6 = vld [vmem:[%s2999_s2 + $0x174] sm:$0xf0]  ;;  %v1421_v7 = vor.u32 %v1906_v4, %v1420_v2  ;;  %v1412_v11 = vld [vmem:[%s2999_s2 + $0xe0] sm:$0xf]  ;;  %v1349_v12 = vor.u32 %v1888_v10, %v1348_v9 }
   0x4   :  { %v1485_v8 = vor.u32 %v1922_v6, %v1484_v5  ;;  %916 = vmatpush.bf16.msra.mxu0 %v1357_v3  ;;  %v1904_v13 = vld [vmem:[%s2999_s2 + $0xe4] sm:$0xf0]  ;;  %v1548_v14 = vld [vmem:[%s2999_s2 + $0x1f0] sm:$0xf]  ;;  %v1938_v15 = vld [vmem:[%s2999_s2 + $0x1f4] sm:$0xf0] }
   0x5   :  { %929 = vmatpush.bf16.msra.mxu1 %v1421_v7  ;;  %v1413_v16 = vor.u32 %v1904_v13, %v1412_v11  ;;  %v1549_v17 = vor.u32 %v1938_v15, %v1548_v14  ;;  %v1476_v18 = vld [vmem:[%s2999_s2 + $0x160] sm:$0xf]  ;;  %v1920_v19 = vld [vmem:[%s2999_s2 + $0x164] sm:$0xf0]  ;;  %v1340_v20 = vld [vmem:[%s2999_s2 + $0x50] sm:$0xf] }
   0x6   :  { %942 = vmatpush.bf16.msra.mxu2 %v1485_v8  ;;  %v1477_v21 = vor.u32 %v1920_v19, %v1476_v18  ;;  %v1886_v22 = vld [vmem:[%s2999_s2 + $0x54] sm:$0xf0]  ;;  %v1404_v23 = vld [vmem:[%s2999_s2 + $0xd0] sm:$0xf]  ;;  %v1540_v25 = vld [vmem:[%s2999_s2 + $0x1e0] sm:$0xf] }
   0x7   :  { %v1902_v24 = vld [vmem:[%s2999_s2 + $0xd4] sm:$0xf0]  ;;  %955 = vmatpush.bf16.msra.mxu3 %v1549_v17  ;;  %v1936_v26 = vld [vmem:[%s2999_s2 + $0x1e4] sm:$0xf0]  ;;  %v1468_v27 = vld [vmem:[%s2999_s2 + $0x150] sm:$0xf]  ;;  %v1341_v28 = vor.u32 %v1886_v22, %v1340_v20 }
   0x8   :  { %917 = vmatpush.bf16.msra.mxu0 %v1349_v12  ;;  %v1541_v29 = vor.u32 %v1936_v26, %v1540_v25  ;;  %v1918_v30 = vld [vmem:[%s2999_s2 + $0x154] sm:$0xf0]  ;;  %v1332_v31 = vld [vmem:[%s2999_s2 + $0x40] sm:$0xf]  ;;  %v1884_v32 = vld [vmem:[%s2999_s2 + $0x44] sm:$0xf0]  ;;  %v1405_v33 = vor.u32 %v1902_v24, %v1404_v23 }
   0x9   :  { %930 = vmatpush.bf16.msra.mxu1 %v1413_v16  ;;  %v1469_v34 = vor.u32 %v1918_v30, %v1468_v27  ;;  %v1396_v35 = vld [vmem:[%s2999_s2 + $0xc0] sm:$0xf]  ;;  %v1900_v36 = vld [vmem:[%s2999_s2 + $0xc4] sm:$0xf0]  ;;  %v1532_v37 = vld [vmem:[%s2999_s2 + $0x1d0] sm:$0xf]  ;;  %v1333_v42 = vor.u32 %v1884_v32, %v1332_v31 }
   0xa   :  { %943 = vmatpush.bf16.msra.mxu2 %v1477_v21  ;;  %v1934_v38 = vld [vmem:[%s2999_s2 + $0x1d4] sm:$0xf0]  ;;  %v1460_v39 = vld [vmem:[%s2999_s2 + $0x140] sm:$0xf]  ;;  %v1916_v40 = vld [vmem:[%s2999_s2 + $0x144] sm:$0xf0]  ;;  %v1397_v45 = vor.u32 %v1900_v36, %v1396_v35 }
   0xb   :  { %956 = vmatpush.bf16.msra.mxu3 %v1541_v29  ;;  %v1533_v41 = vor.u32 %v1934_v38, %v1532_v37  ;;  %v1524_v43 = vld [vmem:[%s2999_s2 + $0x1c0] sm:$0xf]  ;;  %v1932_v44 = vld [vmem:[%s2999_s2 + $0x1c4] sm:$0xf0]  ;;  %v1461_v46 = vor.u32 %v1916_v40, %v1460_v39  ;;  %v1324_v47 = vld [vmem:[%s2999_s2 + $0x30] sm:$0xf] }
   0xc   :  { %918 = vmatpush.bf16.msra.mxu0 %v1341_v28  ;;  %v1882_v48 = vld [vmem:[%s2999_s2 + $0x34] sm:$0xf0]  ;;  %v1388_v49 = vld [vmem:[%s2999_s2 + $0xb0] sm:$0xf]  ;;  %v1525_v53 = vor.u32 %v1932_v44, %v1524_v43  ;;  %v1316_v59 = vld [vmem:[%s2999_s2 + $0x20] sm:$0xf] }
   0xd   :  { %931 = vmatpush.bf16.msra.mxu1 %v1405_v33  ;;  %v1898_v50 = vld [vmem:[%s2999_s2 + $0xb4] sm:$0xf0]  ;;  %v1452_v51 = vld [vmem:[%s2999_s2 + $0x130] sm:$0xf]  ;;  %v1325_v54 = vor.u32 %v1882_v48, %v1324_v47  ;;  %v1880_v60 = vld [vmem:[%s2999_s2 + $0x24] sm:$0xf0] }
   0xe   :  { %944 = vmatpush.bf16.msra.mxu2 %v1469_v34  ;;  %v1914_v52 = vld [vmem:[%s2999_s2 + $0x134] sm:$0xf0]  ;;  %v1516_v55 = vld [vmem:[%s2999_s2 + $0x1b0] sm:$0xf]  ;;  %v1389_v57 = vor.u32 %v1898_v50, %v1388_v49  ;;  %v1380_v61 = vld [vmem:[%s2999_s2 + $0xa0] sm:$0xf]  ;;  %v1317_v2 = vor.u32 %v1880_v60, %v1316_v59 }
   0xf   :  { %957 = vmatpush.bf16.msra.mxu3 %v1533_v41  ;;  %v1930_v56 = vld [vmem:[%s2999_s2 + $0x1b4] sm:$0xf0]  ;;  %v1453_v58 = vor.u32 %v1914_v52, %v1452_v51  ;;  %v1896_v62 = vld [vmem:[%s2999_s2 + $0xa4] sm:$0xf0]  ;;  %v1444_v63 = vld [vmem:[%s2999_s2 + $0x120] sm:$0xf] }
  0x10   :  { %919 = vmatpush.bf16.msra.mxu0 %v1333_v42  ;;  %v1912_v0 = vld [vmem:[%s2999_s2 + $0x124] sm:$0xf0]  ;;  %v1517_v1 = vor.u32 %v1930_v56, %v1516_v55  ;;  %v1508_v3 = vld [vmem:[%s2999_s2 + $0x1a0] sm:$0xf]  ;;  %v1381_v5 = vor.u32 %v1896_v62, %v1380_v61  ;;  %v1308_v7 = vld [vmem:[%s2999_s2 + $0x10] sm:$0xf] }
  0x11   :  { %932 = vmatpush.bf16.msra.mxu1 %v1397_v45  ;;  %v1928_v4 = vld [vmem:[%s2999_s2 + $0x1a4] sm:$0xf0]  ;;  %v1445_v6 = vor.u32 %v1912_v0, %v1444_v63  ;;  %v1878_v8 = vld [vmem:[%s2999_s2 + $0x14] sm:$0xf0]  ;;  %v1372_v9 = vld [vmem:[%s2999_s2 + $0x90] sm:$0xf] }
  0x12   :  { %945 = vmatpush.bf16.msra.mxu2 %v1461_v46  ;;  %v1894_v10 = vld [vmem:[%s2999_s2 + $0x94] sm:$0xf0]  ;;  %v1436_v11 = vld [vmem:[%s2999_s2 + $0x110] sm:$0xf]  ;;  %v1509_v13 = vor.u32 %v1928_v4, %v1508_v3  ;;  %v1300_v14 = vld [vmem:[%s2999_s2] sm:$0xf]  ;;  %v1309_v15 = vor.u32 %v1878_v8, %v1308_v7 }
  0x13   :  { %958 = vmatpush.bf16.msra.mxu3 %v1525_v53  ;;  %v1910_v12 = vld [vmem:[%s2999_s2 + $0x114] sm:$0xf0]  ;;  %v1876_v16 = vld [vmem:[%s2999_s2 + $0x4] sm:$0xf0]  ;;  %v1500_v17 = vld [vmem:[%s2999_s2 + $0x190] sm:$0xf]  ;;  %v1373_v19 = vor.u32 %v1894_v10, %v1372_v9 }
  0x14   :  { %920 = vmatpush.bf16.msra.mxu0 %v1325_v54  ;;  %v1926_v18 = vld [vmem:[%s2999_s2 + $0x194] sm:$0xf0]  ;;  %v1437_v20 = vor.u32 %v1910_v12, %v1436_v11  ;;  %v1364_v21 = vld [vmem:[%s2999_s2 + $0x80] sm:$0xf]  ;;  %v1892_v22 = vld [vmem:[%s2999_s2 + $0x84] sm:$0xf0]  ;;  %v1301_v31 = vor.u32 %v1876_v16, %v1300_v14 }
  0x15   :  { %933 = vmatpush.bf16.msra.mxu1 %v1389_v57  ;;  %v1612_v23 = vld [vmem:[%s2999_s2 + $0x270] sm:$0xf]  ;;  %v1954_v24 = vld [vmem:[%s2999_s2 + $0x274] sm:$0xf0]  ;;  %v1501_v27 = vor.u32 %v1926_v18, %v1500_v17  ;;  %v1428_v28 = vld [vmem:[%s2999_s2 + $0x100] sm:$0xf]  ;;  %v1365_v35 = vor.u32 %v1892_v22, %v1364_v21 }
  0x16   :  { %946 = vmatpush.bf16.msra.mxu2 %v1453_v58  ;;  %v1676_v25 = vld [vmem:[%s2999_s2 + $0x2f0] sm:$0xf]  ;;  %v1970_v26 = vld [vmem:[%s2999_s2 + $0x2f4] sm:$0xf0]  ;;  %v1908_v29 = vld [vmem:[%s2999_s2 + $0x104] sm:$0xf0]  ;;  %v1613_v36 = vor.u32 %v1954_v24, %v1612_v23 }
  0x17   :  { %959 = vmatpush.bf16.msra.mxu3 %v1517_v1  ;;  %v1740_v30 = vld [vmem:[%s2999_s2 + $0x370] sm:$0xf]  ;;  %v1986_v32 = vld [vmem:[%s2999_s2 + $0x374] sm:$0xf0]  ;;  %v1492_v33 = vld [vmem:[%s2999_s2 + $0x180] sm:$0xf]  ;;  %v1677_v39 = vor.u32 %v1970_v26, %v1676_v25  ;;  %v1429_v40 = vor.u32 %v1908_v29, %v1428_v28 }
  0x18   :  { %921 = vmatpush.bf16.msra.mxu0 %v1317_v2  ;;  %v1924_v34 = vld [vmem:[%s2999_s2 + $0x184] sm:$0xf0]  ;;  %v1804_v37 = vld [vmem:[%s2999_s2 + $0x3f0] sm:$0xf]  ;;  %v2002_v38 = vld [vmem:[%s2999_s2 + $0x3f4] sm:$0xf0]  ;;  %v1741_v43 = vor.u32 %v1986_v32, %v1740_v30 }
  0x19   :  { %934 = vmatpush.bf16.msra.mxu1 %v1381_v5  ;;  %v1604_v41 = vld [vmem:[%s2999_s2 + $0x260] sm:$0xf]  ;;  %v1952_v42 = vld [vmem:[%s2999_s2 + $0x264] sm:$0xf0]  ;;  %v1493_v44 = vor.u32 %v1924_v34, %v1492_v33  ;;  %v1805_v47 = vor.u32 %v2002_v38, %v1804_v37  ;;  %v1596_v54 = vld [vmem:[%s2999_s2 + $0x250] sm:$0xf] }
  0x1a   :  { %947 = vmatpush.bf16.msra.mxu2 %v1445_v6  ;;  %v1668_v45 = vld [vmem:[%s2999_s2 + $0x2e0] sm:$0xf]  ;;  %v1968_v46 = vld [vmem:[%s2999_s2 + $0x2e4] sm:$0xf0]  ;;  %v1605_v50 = vor.u32 %v1952_v42, %v1604_v41  ;;  %v1950_v55 = vld [vmem:[%s2999_s2 + $0x254] sm:$0xf0] }
  0x1b   :  { %960 = vmatpush.bf16.msra.mxu3 %v1509_v13  ;;  %v1732_v48 = vld [vmem:[%s2999_s2 + $0x360] sm:$0xf]  ;;  %v1984_v49 = vld [vmem:[%s2999_s2 + $0x364] sm:$0xf0]  ;;  %v1669_v53 = vor.u32 %v1968_v46, %v1668_v45  ;;  %v1660_v58 = vld [vmem:[%s2999_s2 + $0x2d0] sm:$0xf]  ;;  %v1597_v63 = vor.u32 %v1950_v55, %v1596_v54 }
  0x1c   :  { %922 = vmatpush.bf16.msra.mxu0 %v1309_v15  ;;  %v1796_v51 = vld [vmem:[%s2999_s2 + $0x3e0] sm:$0xf]  ;;  %v2000_v52 = vld [vmem:[%s2999_s2 + $0x3e4] sm:$0xf0]  ;;  %v1733_v57 = vor.u32 %v1984_v49, %v1732_v48  ;;  %v1966_v59 = vld [vmem:[%s2999_s2 + $0x2d4] sm:$0xf0] }
  0x1d   :  { %935 = vmatpush.bf16.msra.mxu1 %v1373_v19  ;;  %v22_v56 = vld [vmem:[%s2998_s1] sm:$0xff]  ;;  %v1797_v60 = vor.u32 %v2000_v52, %v1796_v51  ;;  %v1724_v61 = vld [vmem:[%s2999_s2 + $0x350] sm:$0xf]  ;;  %v1982_v62 = vld [vmem:[%s2999_s2 + $0x354] sm:$0xf0]  ;;  %v1661_v2 = vor.u32 %v1966_v59, %v1660_v58 }
  0x1e   :  { %948 = vmatpush.bf16.msra.mxu2 %v1437_v20  ;;  %175 = vst [vmem:[#allocation1] ss:$9 sm:$0xff] %v22_v56  ;;  %v1788_v0 = vld [vmem:[%s2999_s2 + $0x3d0] sm:$0xf]  ;;  %v1998_v1 = vld [vmem:[%s2999_s2 + $0x3d4] sm:$0xf0]  ;;  %v1725_v5 = vor.u32 %v1982_v62, %v1724_v61  ;;  %vm1255_vm10 = vmor %vm1254_vm9, %vm1218_vm7 }
  0x1f   :  { %961 = vmatpush.bf16.msra.mxu3 %v1501_v27  ;;  %v1588_v3 = vld [vmem:[%s2999_s2 + $0x240] sm:$0xf]  ;;  %v1948_v4 = vld [vmem:[%s2999_s2 + $0x244] sm:$0xf0]  ;;  %v1789_v8 = vor.u32 %v1998_v1, %v1788_v0  ;;  %v1580_v11 = vld [vmem:[%s2999_s2 + $0x230] sm:$0xf] }
  0x20   :  { %923 = vmatpush.bf16.msra.mxu0 %v1301_v31  ;;  %v1652_v6 = vld [vmem:[%s2999_s2 + $0x2c0] sm:$0xf]  ;;  %v1964_v7 = vld [vmem:[%s2999_s2 + $0x2c4] sm:$0xf0]  ;;  %v1589_v12 = vor.u32 %v1948_v4, %v1588_v3  ;;  %v1946_v13 = vld [vmem:[%s2999_s2 + $0x234] sm:$0xf0] }
  0x21   :  { %936 = vmatpush.bf16.msra.mxu1 %v1365_v35  ;;  %v1716_v9 = vld [vmem:[%s2999_s2 + $0x340] sm:$0xf]  ;;  %v1980_v10 = vld [vmem:[%s2999_s2 + $0x344] sm:$0xf0]  ;;  %v1653_v16 = vor.u32 %v1964_v7, %v1652_v6  ;;  %v1644_v21 = vld [vmem:[%s2999_s2 + $0x2b0] sm:$0xf]  ;;  %v1581_v27 = vor.u32 %v1946_v13, %v1580_v11 }
  0x22   :  { %949 = vmatpush.bf16.msra.mxu2 %v1429_v40  ;;  %v1780_v14 = vld [vmem:[%s2999_s2 + $0x3c0] sm:$0xf]  ;;  %v1996_v15 = vld [vmem:[%s2999_s2 + $0x3c4] sm:$0xf0]  ;;  %v1717_v20 = vor.u32 %v1980_v10, %v1716_v9  ;;  %v1962_v22 = vld [vmem:[%s2999_s2 + $0x2b4] sm:$0xf0] }
  0x23   :  { %962 = vmatpush.bf16.msra.mxu3 %v1493_v44  ;;  %v1781_v23 = vor.u32 %v1996_v15, %v1780_v14  ;;  %v1708_v24 = vld [vmem:[%s2999_s2 + $0x330] sm:$0xf]  ;;  %v1978_v25 = vld [vmem:[%s2999_s2 + $0x334] sm:$0xf0]  ;;  %v1645_v30 = vor.u32 %v1962_v22, %v1644_v21  ;;  %v1572_v31 = vld [vmem:[%s2999_s2 + $0x220] sm:$0xf] }
  0x24   :  { %968 = vmatpush.bf16.msrb.mxu0 %v1613_v36  ;;  %v1772_v28 = vld [vmem:[%s2999_s2 + $0x3b0] sm:$0xf]  ;;  %v1994_v29 = vld [vmem:[%s2999_s2 + $0x3b4] sm:$0xf0]  ;;  %v1944_v32 = vld [vmem:[%s2999_s2 + $0x224] sm:$0xf0]  ;;  %v1709_v33 = vor.u32 %v1978_v25, %v1708_v24 }
  0x25   :  { %981 = vmatpush.bf16.msrb.mxu1 %v1677_v39  ;;  %v2355_v17 = vld [vmem:[#allocation1 + $0x12] sm:$0xff]  ;;  %v2357_v18 = vld [vmem:[#allocation1] sm:$0xff]  ;;  %v2375_v26 = vld [vmem:[#allocation1 + $0x9] sm:$0xff]  ;;  %v1773_v36 = vor.u32 %v1994_v29, %v1772_v28  ;;  %v1573_v39 = vor.u32 %v1944_v32, %v1572_v31 }
  0x26   :  { %994 = vmatpush.bf16.msrb.mxu2 %v1741_v43  ;;  %v2359_v19 = vld [vmem:[#allocation1 + $0x1b] sm:$0xff]  ;;  %924 = vmatmul.bf16.vlgmr.msra.gmra.mxu0 %v2357_v18  ;;  %v1960_v35 = vld [vmem:[%s2999_s2 + $0x2a4] sm:$0xf0]  ;;  %v1564_v40 = vld [vmem:[%s2999_s2 + $0x210] sm:$0xf] }
  0x27   :  { %1007 = vmatpush.bf16.msrb.mxu3 %v1805_v47  ;;  %950 = vmatmul.bf16.vlgmr.msra.gmra.mxu2 %v2355_v17  ;;  %v1636_v34 = vld [vmem:[%s2999_s2 + $0x2a0] sm:$0xf]  ;;  %v1976_v38 = vld [vmem:[%s2999_s2 + $0x324] sm:$0xf0]  ;;  %v1942_v44 = vld [vmem:[%s2999_s2 + $0x214] sm:$0xf0] }
  0x28   :  { %969 = vmatpush.bf16.msrb.mxu0 %v1605_v50  ;;  %963 = vmatmul.bf16.vlgmr.msra.gmra.mxu3 %v2359_v19  ;;  %v1700_v37 = vld [vmem:[%s2999_s2 + $0x320] sm:$0xf]  ;;  %v1992_v42 = vld [vmem:[%s2999_s2 + $0x3a4] sm:$0xf0]  ;;  %v1637_v43 = vor.u32 %v1960_v35, %v1636_v34  ;;  %v1628_v45 = vld [vmem:[%s2999_s2 + $0x290] sm:$0xf] }
  0x29   :  { %982 = vmatpush.bf16.msrb.mxu1 %v1669_v53  ;;  %v1764_v41 = vld [vmem:[%s2999_s2 + $0x3a0] sm:$0xf]  ;;  %v1958_v46 = vld [vmem:[%s2999_s2 + $0x294] sm:$0xf0]  ;;  %v1701_v47 = vor.u32 %v1976_v38, %v1700_v37  ;;  %v1692_v48 = vld [vmem:[%s2999_s2 + $0x310] sm:$0xf] }
  0x2a   :  { %995 = vmatpush.bf16.msrb.mxu2 %v1733_v57  ;;  %937 = vmatmul.bf16.vlgmr.msra.gmra.mxu1 %v2375_v26  ;;  %v1974_v49 = vld [vmem:[%s2999_s2 + $0x314] sm:$0xf0]  ;;  %v1756_v50 = vld [vmem:[%s2999_s2 + $0x390] sm:$0xf]  ;;  %v1765_v51 = vor.u32 %v1992_v42, %v1764_v41  ;;  %v1556_v52 = vld [vmem:[%s2999_s2 + $0x200] sm:$0xf]  ;;  %v1565_v57 = vor.u32 %v1942_v44, %v1564_v40  ;;  %v1629_v62 = vor.u32 %v1958_v46, %v1628_v45 }
  0x2b   :  { %1008 = vmatpush.bf16.msrb.mxu3 %v1797_v60  ;;  %v1940_v53 = vld [vmem:[%s2999_s2 + $0x204] sm:$0xf0]  ;;  %v1990_v54 = vld [vmem:[%s2999_s2 + $0x394] sm:$0xf0]  ;;  %v1620_v58 = vld [vmem:[%s2999_s2 + $0x280] sm:$0xf]  ;;  %v1693_v1 = vor.u32 %v1974_v49, %v1692_v48 }
  0x2c   :  { %970 = vmatpush.bf16.msrb.mxu0 %v1597_v63  ;;  %v2439_v55 = vld [vmem:[#allocation1 + $0x36] sm:$0xff]  ;;  %v2441_v56 = vld [vmem:[#allocation1 + $0x24] sm:$0xff]  ;;  %v2451_v61 = vld [vmem:[#allocation1 + $0x2d] sm:$0xff]  ;;  %v1557_v9 = vor.u32 %v1940_v53, %v1556_v52 }
  0x2d   :  { %983 = vmatpush.bf16.msrb.mxu1 %v1661_v2  ;;  %v2446_v59 = vld [vmem:[#allocation1 + $0x3f] sm:$0xff]  ;;  %v23_v60 = vld [vmem:[%s2998_s1 + $0x8] sm:$0x1]  ;;  %v1868_v0 = vld [vmem:[%s2999_s2 + $0x470] sm:$0xf] }
  0x2e   :  { %996 = vmatpush.bf16.msrb.mxu2 %v1725_v5  ;;  %v1956_v63 = vld [vmem:[%s2999_s2 + $0x284] sm:$0xf0]  ;;  %185 = vst [vmem:[#allocation1] ss:$9 sm:$0xff] %v23_v60  ;;  %v2018_v2 = vld [vmem:[%s2999_s2 + $0x474] sm:$0xf0]  ;;  %v1757_v5 = vor.u32 %v1990_v54, %v1756_v50 }
  0x2f   :  { %1009 = vmatpush.bf16.msrb.mxu3 %v1789_v8  ;;  %v1889_v3 = vld [vmem:[%s2999_s2 + $0x74] sm:$0xf]  ;;  %v1358_v4 = vld [vmem:[%s2999_s2 + $0x78] sm:$0xf0]  ;;  %v1684_v6 = vld [vmem:[%s2999_s2 + $0x300] sm:$0xf]  ;;  %v1621_v13 = vor.u32 %v1956_v63, %v1620_v58  ;;  %v1869_v14 = vor.u32 %v2018_v2, %v1868_v0 }
  0x30   :  { %971 = vmatpush.bf16.msrb.mxu0 %v1589_v12  ;;  %v1972_v7 = vld [vmem:[%s2999_s2 + $0x304] sm:$0xf0]  ;;  %v1905_v8 = vld [vmem:[%s2999_s2 + $0xf4] sm:$0xf]  ;;  %v1422_v10 = vld [vmem:[%s2999_s2 + $0xf8] sm:$0xf0] }
  0x31   :  { %984 = vmatpush.bf16.msrb.mxu1 %v1653_v16  ;;  %v1748_v11 = vld [vmem:[%s2999_s2 + $0x380] sm:$0xf]  ;;  %v1988_v12 = vld [vmem:[%s2999_s2 + $0x384] sm:$0xf0]  ;;  %v1921_v15 = vld [vmem:[%s2999_s2 + $0x174] sm:$0xf]  ;;  %v1685_v21 = vor.u32 %v1972_v7, %v1684_v6  ;;  %v1425_v24 = vor.u32 %v1905_v8, %v1422_v10 }
  0x32   :  { %997 = vmatpush.bf16.msrb.mxu2 %v1717_v20  ;;  %v1486_v16 = vld [vmem:[%s2999_s2 + $0x178] sm:$0xf0]  ;;  %v1361_v20 = vor.u32 %v1889_v3, %v1358_v4  ;;  %v1860_v22 = vld [vmem:[%s2999_s2 + $0x460] sm:$0xf]  ;;  %v1749_v25 = vor.u32 %v1988_v12, %v1748_v11  ;;  %v1350_v28 = vld [vmem:[%s2999_s2 + $0x68] sm:$0xf0] }
  0x33   :  { %1010 = vmatpush.bf16.msrb.mxu3 %v1781_v23  ;;  %v2016_v23 = vld [vmem:[%s2999_s2 + $0x464] sm:$0xf0]  ;;  %v1489_v29 = vor.u32 %v1921_v15, %v1486_v16  ;;  %v1414_v31 = vld [vmem:[%s2999_s2 + $0xe8] sm:$0xf0]  ;;  %v2014_v37 = vld [vmem:[%s2999_s2 + $0x454] sm:$0xf0] }
  0x34   :  { %972 = vmatpush.bf16.msrb.mxu0 %v1581_v27  ;;  %v1887_v27 = vld [vmem:[%s2999_s2 + $0x64] sm:$0xf]  ;;  %v1861_v32 = vor.u32 %v2016_v23, %v1860_v22  ;;  %v1478_v34 = vld [vmem:[%s2999_s2 + $0x168] sm:$0xf0]  ;;  %v1342_v40 = vld [vmem:[%s2999_s2 + $0x58] sm:$0xf0] }
  0x35   :  { %985 = vmatpush.bf16.msrb.mxu1 %v1645_v30  ;;  %v1903_v30 = vld [vmem:[%s2999_s2 + $0xe4] sm:$0xf]  ;;  %v1353_v35 = vor.u32 %v1887_v27, %v1350_v28  ;;  %v1901_v42 = vld [vmem:[%s2999_s2 + $0xd4] sm:$0xf]  ;;  %v1470_v46 = vld [vmem:[%s2999_s2 + $0x158] sm:$0xf0] }
  0x36   :  { %998 = vmatpush.bf16.msrb.mxu2 %v1709_v33  ;;  %v1919_v33 = vld [vmem:[%s2999_s2 + $0x164] sm:$0xf]  ;;  %v1417_v38 = vor.u32 %v1903_v30, %v1414_v31  ;;  %v1917_v45 = vld [vmem:[%s2999_s2 + $0x154] sm:$0xf]  ;;  %v1844_v48 = vld [vmem:[%s2999_s2 + $0x440] sm:$0xf] }
  0x37   :  { %1011 = vmatpush.bf16.msrb.mxu3 %v1773_v36  ;;  %v1852_v36 = vld [vmem:[%s2999_s2 + $0x450] sm:$0xf]  ;;  %v1481_v41 = vor.u32 %v1919_v33, %v1478_v34  ;;  %v2012_v49 = vld [vmem:[%s2999_s2 + $0x444] sm:$0xf0]  ;;  %v1334_v52 = vld [vmem:[%s2999_s2 + $0x48] sm:$0xf0]  ;;  %v1473_v53 = vor.u32 %v1917_v45, %v1470_v46 }
  0x38   :  { %973 = vmatpush.bf16.msrb.mxu0 %v1573_v39  ;;  %v1885_v39 = vld [vmem:[%s2999_s2 + $0x54] sm:$0xf]  ;;  %v1853_v44 = vor.u32 %v2014_v37, %v1852_v36  ;;  %v1899_v54 = vld [vmem:[%s2999_s2 + $0xc4] sm:$0xf]  ;;  %v1845_v58 = vor.u32 %v2012_v49, %v1844_v48  ;;  %v1836_v0 = vld [vmem:[%s2999_s2 + $0x430] sm:$0xf] }
  0x39   :  { %986 = vmatpush.bf16.msrb.mxu1 %v1637_v43  ;;  %v1406_v43 = vld [vmem:[%s2999_s2 + $0xd8] sm:$0xf0]  ;;  %v1915_v60 = vld [vmem:[%s2999_s2 + $0x144] sm:$0xf]  ;;  %v1881_v3 = vld [vmem:[%s2999_s2 + $0x34] sm:$0xf] }
  0x3a   :  { %999 = vmatpush.bf16.msrb.mxu2 %v1701_v47  ;;  %v1345_v47 = vor.u32 %v1885_v39, %v1342_v40  ;;  %v1409_v50 = vor.u32 %v1901_v42, %v1406_v43  ;;  %v1326_v4 = vld [vmem:[%s2999_s2 + $0x38] sm:$0xf0]  ;;  %v1897_v6 = vld [vmem:[%s2999_s2 + $0xb4] sm:$0xf]  ;;  %v1828_v12 = vld [vmem:[%s2999_s2 + $0x420] sm:$0xf] }
  0x3b   :  { %1012 = vmatpush.bf16.msrb.mxu3 %v1765_v51  ;;  %v1883_v51 = vld [vmem:[%s2999_s2 + $0x44] sm:$0xf]  ;;  %v1390_v7 = vld [vmem:[%s2999_s2 + $0xb8] sm:$0xf0]  ;;  %v1329_v11 = vor.u32 %v1881_v3, %v1326_v4  ;;  %v1318_v16 = vld [vmem:[%s2999_s2 + $0x28] sm:$0xf0] }
  0x3c   :  { %974 = vmatpush.bf16.msrb.mxu0 %v1565_v57  ;;  %v1398_v57 = vld [vmem:[%s2999_s2 + $0xc8] sm:$0xf0]  ;;  %v1337_v63 = vor.u32 %v1883_v51, %v1334_v52  ;;  %v1454_v10 = vld [vmem:[%s2999_s2 + $0x138] sm:$0xf0]  ;;  %v1879_v15 = vld [vmem:[%s2999_s2 + $0x24] sm:$0xf] }
  0x3d   :  { %987 = vmatpush.bf16.msrb.mxu1 %v1629_v62  ;;  %v1462_v62 = vld [vmem:[%s2999_s2 + $0x148] sm:$0xf0]  ;;  %v1401_v2 = vor.u32 %v1899_v54, %v1398_v57  ;;  %v1321_v27 = vor.u32 %v1879_v15, %v1318_v16  ;;  %v1820_v28 = vld [vmem:[%s2999_s2 + $0x410] sm:$0xf]  ;;  %v1877_v31 = vld [vmem:[%s2999_s2 + $0x14] sm:$0xf] }
  0x3e   :  { %1000 = vmatpush.bf16.msrb.mxu2 %v1693_v1  ;;  %v2010_v1 = vld [vmem:[%s2999_s2 + $0x434] sm:$0xf0]  ;;  %v1382_v22 = vld [vmem:[%s2999_s2 + $0xa8] sm:$0xf0]  ;;  %v1893_v34 = vld [vmem:[%s2999_s2 + $0x94] sm:$0xf] }
  0x3f   :  { %1013 = vmatpush.bf16.msrb.mxu3 %v1757_v5  ;;  %v1465_v5 = vor.u32 %v1915_v60, %v1462_v62  ;;  %v1837_v8 = vor.u32 %v2010_v1, %v1836_v0  ;;  %v1812_v37 = vld [vmem:[%s2999_s2 + $0x400] sm:$0xf]  ;;  %v1438_v39 = vld [vmem:[%s2999_s2 + $0x118] sm:$0xf0]  ;;  %v1875_v42 = vld [vmem:[%s2999_s2 + $0x4] sm:$0xf] }
  0x40   :  { %975 = vmatpush.bf16.msrb.mxu0 %v1557_v9  ;;  %v1913_v9 = vld [vmem:[%s2999_s2 + $0x134] sm:$0xf]  ;;  %v1302_v43 = vld [vmem:[%s2999_s2 + $0x8] sm:$0xf0]  ;;  %v1550_v46 = vld [vmem:[%s2999_s2 + $0x1f8] sm:$0xf0] }
  0x41   :  { %988 = vmatpush.bf16.msrb.mxu1 %v1621_v13  ;;  %v2008_v13 = vld [vmem:[%s2999_s2 + $0x424] sm:$0xf0]  ;;  %v1937_v45 = vld [vmem:[%s2999_s2 + $0x1f4] sm:$0xf]  ;;  %v1614_v49 = vld [vmem:[%s2999_s2 + $0x278] sm:$0xf0]  ;;  %v1305_v57 = vor.u32 %v1875_v42, %v1302_v43 }
  0x42   :  { %1001 = vmatpush.bf16.msrb.mxu2 %v1685_v21  ;;  %v1895_v21 = vld [vmem:[%s2999_s2 + $0xa4] sm:$0xf]  ;;  %v1829_v23 = vor.u32 %v2008_v13, %v1828_v12  ;;  %v1366_v51 = vld [vmem:[%s2999_s2 + $0x88] sm:$0xf0]  ;;  %v1678_v54 = vld [vmem:[%s2999_s2 + $0x2f8] sm:$0xf0] }
  0x43   :  { %1014 = vmatpush.bf16.msrb.mxu3 %v1749_v25  ;;  %976 = vmatmul.bf16.vlgmr.msrb.gmra.mxu0 %v2441_v56  ;;  %v1446_v25 = vld [vmem:[%s2999_s2 + $0x128] sm:$0xf0]  ;;  %v1385_v30 = vor.u32 %v1895_v21, %v1382_v22  ;;  %v1907_v60 = vld [vmem:[%s2999_s2 + $0x104] sm:$0xf]  ;;  %v1985_v3 = vld [vmem:[%s2999_s2 + $0x374] sm:$0xf] }
  0x44   :  { %1020 = vmatpush.bf16.msra.mxu0 %v1869_v14  ;;  %989 = vmatmul.bf16.vlgmr.msrb.gmra.mxu1 %v2451_v61  ;;  %v1393_v14 = vor.u32 %v1897_v6, %v1390_v7  ;;  %v1430_v62 = vld [vmem:[%s2999_s2 + $0x108] sm:$0xf0]  ;;  %v1742_v4 = vld [vmem:[%s2999_s2 + $0x378] sm:$0xf0]  ;;  %v1951_v6 = vld [vmem:[%s2999_s2 + $0x264] sm:$0xf] }
  0x45   :  { %1033 = vmatpush.bf16.msra.mxu1 %v1361_v20  ;;  %1002 = vmatmul.bf16.vlgmr.msrb.gmra.mxu2 %v2439_v55  ;;  %v1457_v20 = vor.u32 %v1913_v9, %v1454_v10  ;;  %v1606_v7 = vld [vmem:[%s2999_s2 + $0x268] sm:$0xf0]  ;;  %v1433_v9 = vor.u32 %v1907_v60, %v1430_v62  ;;  %v1967_v10 = vld [vmem:[%s2999_s2 + $0x2e4] sm:$0xf]  ;;  %v1745_v13 = vor.u32 %v1985_v3, %v1742_v4  ;;  %v1534_v16 = vld [vmem:[%s2999_s2 + $0x1d8] sm:$0xf0] }
  0x46   :  { %1046 = vmatpush.bf16.msra.mxu2 %v1425_v24  ;;  %1015 = vmatmul.bf16.vlgmr.msrb.gmra.mxu3 %v2446_v59  ;;  %v1911_v24 = vld [vmem:[%s2999_s2 + $0x124] sm:$0xf]  ;;  %v1609_v15 = vor.u32 %v1951_v6, %v1606_v7  ;;  %v1734_v21 = vld [vmem:[%s2999_s2 + $0x368] sm:$0xf0]  ;;  %v1925_v3 = vld [vmem:[%s2999_s2 + $0x194] sm:$0xf] }
  0x47   :  { %1059 = vmatpush.bf16.msra.mxu3 %v1489_v29  ;;  %v2006_v29 = vld [vmem:[%s2999_s2 + $0x414] sm:$0xf0]  ;;  %v1449_v33 = vor.u32 %v1911_v24, %v1446_v25  ;;  %v1598_v24 = vld [vmem:[%s2999_s2 + $0x258] sm:$0xf0]  ;;  %v1965_v25 = vld [vmem:[%s2999_s2 + $0x2d4] sm:$0xf] }
  0x48   :  { %1021 = vmatpush.bf16.msra.mxu0 %v1861_v32  ;;  %v1310_v32 = vld [vmem:[%s2999_s2 + $0x18] sm:$0xf0]  ;;  %v1821_v36 = vor.u32 %v2006_v29, %v1820_v28  ;;  %v1979_v42 = vld [vmem:[%s2999_s2 + $0x344] sm:$0xf]  ;;  %v1718_v43 = vld [vmem:[%s2999_s2 + $0x348] sm:$0xf0] }
  0x49   :  { %1034 = vmatpush.bf16.msra.mxu1 %v1353_v35  ;;  %v1374_v35 = vld [vmem:[%s2999_s2 + $0x98] sm:$0xf0]  ;;  %v1313_v40 = vor.u32 %v1877_v31, %v1310_v32  ;;  %v1526_v32 = vld [vmem:[%s2999_s2 + $0x1c8] sm:$0xf0]  ;;  %v1943_v60 = vld [vmem:[%s2999_s2 + $0x224] sm:$0xf] }
  0x4a   :  { %1047 = vmatpush.bf16.msra.mxu2 %v1417_v38  ;;  %v1909_v38 = vld [vmem:[%s2999_s2 + $0x114] sm:$0xf]  ;;  %v1574_v62 = vld [vmem:[%s2999_s2 + $0x228] sm:$0xf0]  ;;  %v1975_v6 = vld [vmem:[%s2999_s2 + $0x324] sm:$0xf] }
  0x4b   :  { %1060 = vmatpush.bf16.msra.mxu3 %v1481_v41  ;;  %v2004_v41 = vld [vmem:[%s2999_s2 + $0x404] sm:$0xf0]  ;;  %v1441_v48 = vor.u32 %v1909_v38, %v1438_v39  ;;  %v1577_v4 = vor.u32 %v1943_v60, %v1574_v62  ;;  %v1702_v7 = vld [vmem:[%s2999_s2 + $0x328] sm:$0xf0]  ;;  %v1838_v60 = vld [vmem:[%s2999_s2 + $0x438] sm:$0xf0] }
  0x4c   :  { %1022 = vmatpush.bf16.msra.mxu0 %v1853_v44  ;;  %v1377_v44 = vor.u32 %v1893_v34, %v1374_v35  ;;  %v1813_v52 = vor.u32 %v2004_v41, %v1812_v37  ;;  %v1947_v35 = vld [vmem:[%s2999_s2 + $0x244] sm:$0xf] }
  0x4d   :  { %1035 = vmatpush.bf16.msra.mxu1 %v1345_v47  ;;  %v1953_v47 = vld [vmem:[%s2999_s2 + $0x274] sm:$0xf]  ;;  %v1963_v37 = vld [vmem:[%s2999_s2 + $0x2c4] sm:$0xf] }
  0x4e   :  { %1048 = vmatpush.bf16.msra.mxu2 %v1409_v50  ;;  %v1891_v50 = vld [vmem:[%s2999_s2 + $0x84] sm:$0xf]  ;;  %v1617_v0 = vor.u32 %v1953_v47, %v1614_v49  ;;  %v1961_v47 = vld [vmem:[%s2999_s2 + $0x2b4] sm:$0xf] }
  0x4f   :  { %1061 = vmatpush.bf16.msra.mxu3 %v1473_v53  ;;  %v1969_v53 = vld [vmem:[%s2999_s2 + $0x2f4] sm:$0xf]  ;;  %v1369_v1 = vor.u32 %v1891_v50, %v1366_v51  ;;  %v1721_v50 = vor.u32 %v1979_v42, %v1718_v43  ;;  %v1927_v51 = vld [vmem:[%s2999_s2 + $0x1a4] sm:$0xf]  ;;  %v1862_v42 = vld [vmem:[%s2999_s2 + $0x468] sm:$0xf0] }
  0x50   :  { %1023 = vmatpush.bf16.msra.mxu0 %v1845_v58  ;;  %v1553_v58 = vor.u32 %v1937_v45, %v1550_v46  ;;  %v1945_v45 = vld [vmem:[%s2999_s2 + $0x234] sm:$0xf]  ;;  %v1582_v46 = vld [vmem:[%s2999_s2 + $0x238] sm:$0xf0] }
  0x51   :  { %1036 = vmatpush.bf16.msra.mxu1 %v1337_v63  ;;  %v1935_v63 = vld [vmem:[%s2999_s2 + $0x1e4] sm:$0xf] }
  0x52   :  { %1049 = vmatpush.bf16.msra.mxu2 %v1401_v2  ;;  %v1542_v2 = vld [vmem:[%s2999_s2 + $0x1e8] sm:$0xf0] }
  0x53   :  { %1062 = vmatpush.bf16.msra.mxu3 %v1465_v5  ;;  %v1681_v5 = vor.u32 %v1969_v53, %v1678_v54  ;;  %v1545_v12 = vor.u32 %v1935_v63, %v1542_v2  ;;  %v1510_v53 = vld [vmem:[%s2999_s2 + $0x1a8] sm:$0xf0]  ;;  %v1977_v54 = vld [vmem:[%s2999_s2 + $0x334] sm:$0xf]  ;;  %v1959_v63 = vld [vmem:[%s2999_s2 + $0x2a4] sm:$0xf] }
  0x54   :  { %1024 = vmatpush.bf16.msra.mxu0 %v1837_v8  ;;  %v2700_v8 = vld [vmem:[#allocation1] sm:$0xff] }
  0x55   :  { %1037 = vmatpush.bf16.msra.mxu1 %v1329_v11  ;;  %v1670_v11 = vld [vmem:[%s2999_s2 + $0x2e8] sm:$0xf0] }
  0x56   :  { %1050 = vmatpush.bf16.msra.mxu2 %v1393_v14  ;;  %v1933_v14 = vld [vmem:[%s2999_s2 + $0x1d4] sm:$0xf]  ;;  %v1673_v22 = vor.u32 %v1967_v10, %v1670_v11  ;;  %v1566_v11 = vld [vmem:[%s2999_s2 + $0x218] sm:$0xf0] }
  0x57   :  { %1063 = vmatpush.bf16.msra.mxu3 %v1457_v20  ;;  %v1983_v20 = vld [vmem:[%s2999_s2 + $0x364] sm:$0xf]  ;;  %v1537_v28 = vor.u32 %v1933_v14, %v1534_v16  ;;  %v1941_v10 = vld [vmem:[%s2999_s2 + $0x214] sm:$0xf] }
  0x58   :  { %1025 = vmatpush.bf16.msra.mxu0 %v1829_v23  ;;  %v1949_v23 = vld [vmem:[%s2999_s2 + $0x254] sm:$0xf]  ;;  %v1737_v29 = vor.u32 %v1983_v20, %v1734_v21  ;;  %v1923_v16 = vld [vmem:[%s2999_s2 + $0x184] sm:$0xf]  ;;  %v1494_v20 = vld [vmem:[%s2999_s2 + $0x188] sm:$0xf0] }
  0x59   :  { %1038 = vmatpush.bf16.msra.mxu1 %v1321_v27  ;;  %v1662_v27 = vld [vmem:[%s2999_s2 + $0x2d8] sm:$0xf0]  ;;  %v1601_v31 = vor.u32 %v1949_v23, %v1598_v24  ;;  %v1939_v21 = vld [vmem:[%s2999_s2 + $0x204] sm:$0xf]  ;;  %v1558_v23 = vld [vmem:[%s2999_s2 + $0x208] sm:$0xf0] }
  0x5a   :  { %1051 = vmatpush.bf16.msra.mxu2 %v1385_v30  ;;  %v1931_v30 = vld [vmem:[%s2999_s2 + $0x1c4] sm:$0xf]  ;;  %v1665_v34 = vor.u32 %v1965_v25, %v1662_v27  ;;  %v1973_v24 = vld [vmem:[%s2999_s2 + $0x314] sm:$0xf]  ;;  %v1694_v25 = vld [vmem:[%s2999_s2 + $0x318] sm:$0xf0] }
  0x5b   :  { %1064 = vmatpush.bf16.msra.mxu3 %v1449_v33  ;;  %v1981_v33 = vld [vmem:[%s2999_s2 + $0x354] sm:$0xf]  ;;  %v1529_v38 = vor.u32 %v1931_v30, %v1526_v32  ;;  %v1955_v32 = vld [vmem:[%s2999_s2 + $0x284] sm:$0xf] }
  0x5c   :  { %1026 = vmatpush.bf16.msra.mxu0 %v1821_v36  ;;  %v1590_v36 = vld [vmem:[%s2999_s2 + $0x248] sm:$0xf0]  ;;  %v2017_v30 = vld [vmem:[%s2999_s2 + $0x474] sm:$0xf] }
  0x5d   :  { %1039 = vmatpush.bf16.msra.mxu1 %v1313_v40  ;;  %v1929_v40 = vld [vmem:[%s2999_s2 + $0x1b4] sm:$0xf]  ;;  %v1593_v41 = vor.u32 %v1947_v35, %v1590_v36  ;;  %v1561_v35 = vor.u32 %v1939_v21, %v1558_v23 }
  0x5e   :  { %1052 = vmatpush.bf16.msra.mxu2 %v1377_v44 }
  0x5f   :  { %1065 = vmatpush.bf16.msra.mxu3 %v1441_v48  ;;  %v1646_v48 = vld [vmem:[%s2999_s2 + $0x2b8] sm:$0xf0] }
  0x60   :  { %1027 = vmatpush.bf16.msra.mxu0 %v1813_v52  ;;  %v1585_v52 = vor.u32 %v1945_v45, %v1582_v46  ;;  %v1997_v46 = vld [vmem:[%s2999_s2 + $0x3d4] sm:$0xf] }
  0x61   :  { %1040 = vmatpush.bf16.msra.mxu1 %v1305_v57  ;;  %v1710_v57 = vld [vmem:[%s2999_s2 + $0x338] sm:$0xf0] }
  0x62   :  { %1053 = vmatpush.bf16.msra.mxu2 %v1369_v1  ;;  %v1513_v1 = vor.u32 %v1927_v51, %v1510_v53  ;;  %v1713_v2 = vor.u32 %v1977_v54, %v1710_v57  ;;  %v1993_v57 = vld [vmem:[%s2999_s2 + $0x3b4] sm:$0xf] }
  0x63   :  { %1028 = vmatmul.bf16.vlgmr.msra.gmra.mxu0 %v2700_v8  ;;  %1066 = vmatpush.bf16.msra.mxu3 %v1433_v9 }
  0x64   :  { %1072 = vmatpush.bf16.msrb.mxu0 %v1553_v58  ;;  %1041 = vmatmul.bf16.vlgmr.msra.gmra.mxu1 %v2357_v18  ;;  %v1726_v18 = vld [vmem:[%s2999_s2 + $0x358] sm:$0xf0]  ;;  %v1649_v58 = vor.u32 %v1961_v47, %v1646_v48  ;;  %v2013_v48 = vld [vmem:[%s2999_s2 + $0x454] sm:$0xf] }
  0x65   :  { %1085 = vmatpush.bf16.msrb.mxu1 %v1617_v0  ;;  %1054 = vmatmul.bf16.vlgmr.msra.gmra.mxu2 %v2375_v26  ;;  %v1654_v26 = vld [vmem:[%s2999_s2 + $0x2c8] sm:$0xf0]  ;;  %v1729_v39 = vor.u32 %v1981_v33, %v1726_v18  ;;  %v1497_v18 = vor.u32 %v1923_v16, %v1494_v20  ;;  %v1790_v47 = vld [vmem:[%s2999_s2 + $0x3d8] sm:$0xf0] }
  0x66   :  { %1098 = vmatpush.bf16.msrb.mxu2 %v1681_v5  ;;  %1067 = vmatmul.bf16.vlgmr.msra.gmra.mxu3 %v2355_v17  ;;  %v1518_v17 = vld [vmem:[%s2999_s2 + $0x1b8] sm:$0xf0]  ;;  %v1657_v44 = vor.u32 %v1963_v37, %v1654_v26  ;;  %v1638_v0 = vld [vmem:[%s2999_s2 + $0x2a8] sm:$0xf0]  ;;  %v1971_v37 = vld [vmem:[%s2999_s2 + $0x304] sm:$0xf] }
  0x67   :  { %1111 = vmatpush.bf16.msrb.mxu3 %v1745_v13  ;;  %v1521_v49 = vor.u32 %v1929_v40, %v1518_v17  ;;  %v1502_v5 = vld [vmem:[%s2999_s2 + $0x198] sm:$0xf0]  ;;  %v1641_v9 = vor.u32 %v1959_v63, %v1638_v0  ;;  %v1622_v33 = vld [vmem:[%s2999_s2 + $0x288] sm:$0xf0]  ;;  %v1999_v40 = vld [vmem:[%s2999_s2 + $0x3e4] sm:$0xf] }
  0x68   :  { %1073 = vmatpush.bf16.msrb.mxu0 %v1545_v12  ;;  %v1957_v12 = vld [vmem:[%s2999_s2 + $0x294] sm:$0xf]  ;;  %v1630_v13 = vld [vmem:[%s2999_s2 + $0x298] sm:$0xf0]  ;;  %v1505_v14 = vor.u32 %v1925_v3, %v1502_v5  ;;  %v1686_v26 = vld [vmem:[%s2999_s2 + $0x308] sm:$0xf0] }
  0x69   :  { %1086 = vmatpush.bf16.msrb.mxu1 %v1609_v15  ;;  %v1705_v15 = vor.u32 %v1975_v6, %v1702_v7  ;;  %v1633_v27 = vor.u32 %v1957_v12, %v1630_v13  ;;  %v2015_v17 = vld [vmem:[%s2999_s2 + $0x464] sm:$0xf]  ;;  %v1689_v43 = vor.u32 %v1971_v37, %v1686_v26  ;;  %v1830_v3 = vld [vmem:[%s2999_s2 + $0x428] sm:$0xf0]  ;;  %v1989_v6 = vld [vmem:[%s2999_s2 + $0x394] sm:$0xf] }
  0x6a   :  { %1099 = vmatpush.bf16.msrb.mxu2 %v1673_v22  ;;  %v1569_v22 = vor.u32 %v1941_v10, %v1566_v11  ;;  %v1865_v45 = vor.u32 %v2015_v17, %v1862_v42  ;;  %v1991_v0 = vld [vmem:[%s2999_s2 + $0x3a4] sm:$0xf]  ;;  %v1758_v7 = vld [vmem:[%s2999_s2 + $0x398] sm:$0xf0]  ;;  %v1814_v16 = vld [vmem:[%s2999_s2 + $0x408] sm:$0xf0] }
  0x6b   :  { %1112 = vmatpush.bf16.msrb.mxu3 %v1737_v29  ;;  %v1806_v29 = vld [vmem:[%s2999_s2 + $0x3f8] sm:$0xf0]  ;;  %v1761_v11 = vor.u32 %v1989_v6, %v1758_v7  ;;  %v1987_v13 = vld [vmem:[%s2999_s2 + $0x384] sm:$0xf] }
  0x6c   :  { %1074 = vmatpush.bf16.msrb.mxu0 %v1537_v28  ;;  %v2001_v28 = vld [vmem:[%s2999_s2 + $0x3f4] sm:$0xf]  ;;  %v1822_v10 = vld [vmem:[%s2999_s2 + $0x418] sm:$0xf0] }
  0x6d   :  { %1087 = vmatpush.bf16.msrb.mxu1 %v1601_v31  ;;  %v1870_v31 = vld [vmem:[%s2999_s2 + $0x478] sm:$0xf0]  ;;  %v1809_v36 = vor.u32 %v2001_v28, %v1806_v29 }
  0x6e   :  { %1100 = vmatpush.bf16.msrb.mxu2 %v1665_v34  ;;  %v1697_v34 = vor.u32 %v1973_v24, %v1694_v25 }
  0x6f   :  { %1113 = vmatpush.bf16.msrb.mxu3 %v1729_v39  ;;  %v1625_v39 = vor.u32 %v1955_v32, %v1622_v33 }
  0x70   :  { %1075 = vmatpush.bf16.msrb.mxu0 %v1529_v38  ;;  %v1873_v38 = vor.u32 %v2017_v30, %v1870_v31 }
  0x71   :  { %1088 = vmatpush.bf16.msrb.mxu1 %v1593_v41  ;;  %v1798_v41 = vld [vmem:[%s2999_s2 + $0x3e8] sm:$0xf0] }
  0x72   :  { %1101 = vmatpush.bf16.msrb.mxu2 %v1657_v44  ;;  %v1801_v44 = vor.u32 %v1999_v40, %v1798_v41 }
  0x73   :  { %1114 = vmatpush.bf16.msrb.mxu3 %v1721_v50  ;;  %v1793_v50 = vor.u32 %v1997_v46, %v1790_v47 }
  0x74   :  { %1076 = vmatpush.bf16.msrb.mxu0 %v1521_v49  ;;  %v1854_v49 = vld [vmem:[%s2999_s2 + $0x458] sm:$0xf0] }
  0x75   :  { %1089 = vmatpush.bf16.msrb.mxu1 %v1585_v52  ;;  %v1857_v51 = vor.u32 %v2013_v48, %v1854_v49  ;;  %v1782_v52 = vld [vmem:[%s2999_s2 + $0x3c8] sm:$0xf0] }
  0x76   :  { %1102 = vmatpush.bf16.msrb.mxu2 %v1649_v58  ;;  %v2009_v58 = vld [vmem:[%s2999_s2 + $0x434] sm:$0xf] }
  0x77   :  { %1115 = vmatpush.bf16.msrb.mxu3 %v1713_v2  ;;  %v1841_v63 = vor.u32 %v2009_v58, %v1838_v60  ;;  %v2007_v2 = vld [vmem:[%s2999_s2 + $0x424] sm:$0xf] }
  0x78   :  { %1077 = vmatpush.bf16.msrb.mxu0 %v1513_v1  ;;  %v1766_v1 = vld [vmem:[%s2999_s2 + $0x3a8] sm:$0xf0]  ;;  %v1833_v5 = vor.u32 %v2007_v2, %v1830_v3 }
  0x79   :  { %1090 = vmatpush.bf16.msrb.mxu1 %v1577_v4  ;;  %v1769_v4 = vor.u32 %v1991_v0, %v1766_v1 }
  0x7a   :  { %1103 = vmatpush.bf16.msrb.mxu2 %v1641_v9  ;;  %v2005_v9 = vld [vmem:[%s2999_s2 + $0x414] sm:$0xf] }
  0x7b   :  { %1116 = vmatpush.bf16.msrb.mxu3 %v1705_v15  ;;  %v1825_v12 = vor.u32 %v2005_v9, %v1822_v10  ;;  %v2003_v15 = vld [vmem:[%s2999_s2 + $0x404] sm:$0xf] }
  0x7c   :  { %1078 = vmatpush.bf16.msrb.mxu0 %v1505_v14  ;;  %v1750_v14 = vld [vmem:[%s2999_s2 + $0x388] sm:$0xf0]  ;;  %v1817_v21 = vor.u32 %v2003_v15, %v1814_v16 }
  0x7d   :  { %1091 = vmatpush.bf16.msrb.mxu1 %v1569_v22  ;;  %v1753_v20 = vor.u32 %v1987_v13, %v1750_v14  ;;  %v168_v22 = vld [vmem:[%s3000_s3] sm:$0x3] }
  0x7e   :  { %1104 = vmatpush.bf16.msrb.mxu2 %v1633_v27  ;;  %v170_v23 = vperm.slane %v168_v22, 0 }
  0x7f   :  { %1117 = vmatpush.bf16.msrb.mxu3 %v1697_v34 }
  0x80   :  { %1079 = vmatpush.bf16.msrb.mxu0 %v1497_v18 }
  0x81   :  { %1092 = vmatpush.bf16.msrb.mxu1 %v1561_v35 }
  0x82   :  { %1105 = vmatpush.bf16.msrb.mxu2 %v1625_v39 }
  0x83   :  { %1080 = vmatmul.bf16.vlgmr.msrb.gmra.mxu0 %v2359_v19  ;;  %1118 = vmatpush.bf16.msrb.mxu3 %v1689_v43  ;;  %v1995_v19 = vld [vmem:[%s2999_s2 + $0x3c4] sm:$0xf] }
  0x84   :  { %1124 = vmatpush.bf16.msra.mxu0 %v1809_v36  ;;  %1093 = vmatmul.bf16.vlgmr.msrb.gmra.mxu1 %v2441_v56  ;;  %v2011_v56 = vld [vmem:[%s2999_s2 + $0x444] sm:$0xf]  ;;  %v1785_v53 = vor.u32 %v1995_v19, %v1782_v52 }
  0x85   :  { %1137 = vmatpush.bf16.msra.mxu1 %v1873_v38  ;;  %1106 = vmatmul.bf16.vlgmr.msrb.gmra.mxu2 %v2451_v61  ;;  %v1846_v61 = vld [vmem:[%s2999_s2 + $0x448] sm:$0xf0] }
  0x86   :  { %1119 = vmatmul.bf16.vlgmr.msrb.gmra.mxu3 %v2439_v55  ;;  %v1849_v54 = vor.u32 %v2011_v56, %v1846_v61  ;;  %v1774_v55 = vld [vmem:[%s2999_s2 + $0x3b8] sm:$0xf0]  ;;  %v171_v61 = vperm.slane %v168_v22, 1 }
  0x87   :  { %v1777_v62 = vor.u32 %v1993_v57, %v1774_v55 }
  0x88   :  { %1125 = vmatpush.bf16.msra.mxu0 %v1801_v44 }
  0x89   :  { %1138 = vmatpush.bf16.msra.mxu1 %v1865_v45 }
  0x8c   :  { %1126 = vmatpush.bf16.msra.mxu0 %v1793_v50 }
  0x8d   :  { %1139 = vmatpush.bf16.msra.mxu1 %v1857_v51 }
  0x90   :  { %1127 = vmatpush.bf16.msra.mxu0 %v1785_v53 }
  0x91   :  { %1140 = vmatpush.bf16.msra.mxu1 %v1849_v54 }
  0x94   :  { %1128 = vmatpush.bf16.msra.mxu0 %v1777_v62 }
  0x95   :  { %1141 = vmatpush.bf16.msra.mxu1 %v1841_v63 }
  0x98   :  { %1129 = vmatpush.bf16.msra.mxu0 %v1769_v4 }
  0x99   :  { %1142 = vmatpush.bf16.msra.mxu1 %v1833_v5 }
  0x9c   :  { %1130 = vmatpush.bf16.msra.mxu0 %v1761_v11 }
  0x9d   :  { %1143 = vmatpush.bf16.msra.mxu1 %v1825_v12 }
  0xa0   :  { %1131 = vmatpush.bf16.msra.mxu0 %v1753_v20 }
  0xa1   :  { %1144 = vmatpush.bf16.msra.mxu1 %v1817_v21 }
  0xa3   :  { %1132 = vmatmul.bf16.vlgmr.msra.gmra.mxu0 %v2446_v59  ;;  %v925_v24 = vpop.f32.mrf.mxu0 }
  0xa4   :  { %1145 = vmatmul.bf16.vlgmr.msra.gmra.mxu1 %v2700_v8  ;;  %v926_v25 = vadd.f32 %v925_v24, %v170_v23 }
  0xa7   :  { %v938_v27 = vpop.f32.mrf.mxu1 }
  0xa8   :  { %v939_v28 = vadd.f32 %v938_v27, %v926_v25 }
  0xaa   :  { %v951_v29 = vpop.f32.mrf.mxu2 }
  0xab   :  { %v952_v30 = vadd.f32 %v951_v29, %v939_v28  ;;  %v964_v31 = vpop.f32.mrf.mxu3  ;;  %v927_v32 = vpop.f32.mrf.mxu0 }
  0xad   :  { %v965_v33 = vadd.f32 %v964_v31, %v952_v30 }
  0xaf   :  { %v940_v18 = vpop.f32.mrf.mxu1 }
  0xb2   :  { %v953_v34 = vpop.f32.mrf.mxu2 }
  0xb3   :  { %v966_v35 = vpop.f32.mrf.mxu3 }
  0xc0   :  { %v977_v59 = vpop.f32.mrf.mxu0 }
  0xc1   :  { %v978_v36 = vadd.f32 %v977_v59, %v965_v33  ;;  %v990_v8 = vpop.f32.mrf.mxu1 }
  0xc3   :  { %v991_v37 = vadd.f32 %v990_v8, %v978_v36 }
  0xc8   :  { %v1003_v26 = vpop.f32.mrf.mxu2  ;;  %v979_v40 = vpop.f32.mrf.mxu0 }
  0xc9   :  { %v1004_v38 = vadd.f32 %v1003_v26, %v991_v37  ;;  %v1016_v39 = vpop.f32.mrf.mxu3  ;;  %v992_v17 = vpop.f32.mrf.mxu1 }
  0xcb   :  { %v1017_v41 = vadd.f32 %v1016_v39, %v1004_v38 }
  0xd0   :  { %v1005_v42 = vpop.f32.mrf.mxu2 }
  0xd1   :  { %v1018_v43 = vpop.f32.mrf.mxu3 }
  0xe0   :  { %v1029_v44 = vpop.f32.mrf.mxu0 }
  0xe1   :  { %v1042_v45 = vpop.f32.mrf.mxu1  ;;  %v2967_v19 = vadd.f32 %v1029_v44, %v1017_v41 }
  0xe2   :  { %v1043_v58 = vadd.f32 %v1042_v45, %v171_v61 }
  0xe3   :  { %v1151_v52 = vsel %vm1150_vm0, %v2967_v19, 0.0  ;;  %v1166_v56 = vmul.f32 %v2967_v19, %v2967_v19 }
  0xe4   :  { %v1152_v57 = vrot.slane %v1151_v52, 4 }
  0xe5   :  { %v1168_v55 = vsel %vm1150_vm0, %v1166_v56, 0.0 }
  0xe6   :  { %v1153_v60 = vadd.f32 %v1152_v57, %v1151_v52  ;;  %v1169_v62 = vrot.slane %v1168_v55, 4 }
  0xe8   :  { %v1031_v46 = vpop.f32.mrf.mxu0  ;;  %v1055_v47 = vpop.f32.mrf.mxu2  ;;  %v1154_v4 = vrot.slane %v1153_v60, 2  ;;  %v1170_v5 = vadd.f32 %v1169_v62, %v1168_v55 }
  0xe9   :  { %v1044_v48 = vpop.f32.mrf.mxu1  ;;  %v1068_v49 = vpop.f32.mrf.mxu3  ;;  %v1056_v63 = vadd.f32 %v1055_v47, %v1043_v58 }
  0xea   :  { %v1155_v7 = vadd.f32 %v1154_v4, %v1153_v60  ;;  %v1171_v9 = vrot.slane %v1170_v5, 2 }
  0xeb   :  { %v1069_v6 = vadd.f32 %v1068_v49, %v1056_v63 }
  0xec   :  { %v1156_v13 = vrot.slane %v1155_v7, 1  ;;  %v1172_v14 = vadd.f32 %v1171_v9, %v1170_v5 }
  0xee   :  { %v1157_v16 = vadd.f32 %v1156_v13, %v1155_v7  ;;  %v1173_v20 = vrot.slane %v1172_v14, 1 }
  0xf0   :  { %v1057_v50 = vpop.f32.mrf.mxu2  ;;  %v1174_v22 = vadd.f32 %v1173_v20, %v1172_v14  ;;  %v2972_v23 = vmul.f32 0.5, %v1157_v16 }
  0xf1   :  { %v1070_v51 = vpop.f32.mrf.mxu3 }
  0xf2   :  { %v1184_v29 = vmul.f32 0.5, %v1174_v22  ;;  %v1186_v30 = vmul.f32 %v2972_v23, %v2972_v23 }
  0xf4   :  { %v1188_v18 = vsub.f32 %v1184_v29, %v1186_v30 }
  0xf6   :  { %v1190_v26 = vmax.f32 %v1188_v18, 0.0 }
  0xf8   :  { %v1193_v17 = vadd.f32 1e-05, %v1190_v26 }
  0xfa   :  { %2019 = vrsqrt.f32 %v1193_v17  ;;  %vm1201_vm6 = vweird.f32 %v1193_v17 }
 0x100   :  { %v1081_v53 = vpop.f32.mrf.mxu0  ;;  %v2020_v51 = vpop.eup %2019 }
 0x101   :  { %v1094_v54 = vpop.f32.mrf.mxu1  ;;  %v1082_v10 = vadd.f32 %v1081_v53, %v1069_v6  ;;  %v1196_v61 = vmul.f32 %v2020_v51, %v1193_v17  ;;  %vm1202_vm3 = vweird.f32 %v2020_v51 }
 0x102   :  { %vm1203_vm8 = vmor %vm1201_vm6, %vm1202_vm3 }
 0x103   :  { %v1095_v15 = vadd.f32 %v1094_v54, %v1082_v10  ;;  %v1197_v53 = vmul.f32 %v2020_v51, %v1196_v61 }
 0x105   :  { %v1198_v57 = vmul.f32 0.5, %v1197_v53 }
 0x107   :  { %v1199_v60 = vsub.f32 1.5, %v1198_v57 }
 0x108   :  { %v1107_v0 = vpop.f32.mrf.mxu2  ;;  %v1083_v1 = vpop.f32.mrf.mxu0 }
 0x109   :  { %v1096_v2 = vpop.f32.mrf.mxu1  ;;  %v1120_v3 = vpop.f32.mrf.mxu3  ;;  %v1108_v21 = vadd.f32 %v1107_v0, %v1095_v15  ;;  %v1200_v0 = vmul.f32 %v2020_v51, %v1199_v60 }
 0x10b   :  { %v1121_v24 = vadd.f32 %v1120_v3, %v1108_v21  ;;  %v1192_v3 = vld [vmem:[%s3001_s4] sm:$0x3]  ;;  %v1204_v5 = vsel %vm1203_vm8, %v2020_v51, %v1200_v0 }
 0x110   :  { %v1109_v11 = vpop.f32.mrf.mxu2 }
 0x111   :  { %v1122_v12 = vpop.f32.mrf.mxu3 }
 0x112   :  { %v1222_v12 = vld [vmem:[%s3002_s5] sm:$0x3] }
 0x120   :  { %v1133_v25 = vpop.f32.mrf.mxu0 }
 0x121   :  { %v1134_v27 = vadd.f32 %v1133_v25, %v1121_v24  ;;  %v1146_v28 = vpop.f32.mrf.mxu1 }
 0x123   :  { %v2976_v31 = vadd.f32 %v1146_v28, %v1134_v27 }
 0x125   :  { %v1159_v32 = vsel %vm1158_vm1, %v2976_v31, 0.0  ;;  %v1167_v33 = vmul.f32 %v2976_v31, %v2976_v31 }
 0x126   :  { %v1160_v34 = vrot.slane %v1159_v32, 4 }
 0x127   :  { %v1175_v35 = vsel %vm1158_vm1, %v1167_v33, 0.0 }
 0x128   :  { %v1161_v59 = vadd.f32 %v1160_v34, %v1159_v32  ;;  %v1176_v36 = vrot.slane %v1175_v35, 4  ;;  %v1135_v8 = vpop.f32.mrf.mxu0 }
 0x129   :  { %v1148_v37 = vpop.f32.mrf.mxu1 }
 0x12a   :  { %v1162_v38 = vrot.slane %v1161_v59, 2  ;;  %v1177_v39 = vadd.f32 %v1176_v36, %v1175_v35 }
 0x12c   :  { %v1163_v40 = vadd.f32 %v1162_v38, %v1161_v59  ;;  %v1178_v41 = vrot.slane %v1177_v39, 2 }
 0x12e   :  { %v1164_v42 = vrot.slane %v1163_v40, 1  ;;  %v1179_v43 = vadd.f32 %v1178_v41, %v1177_v39 }
 0x130   :  { %v1165_v44 = vadd.f32 %v1164_v42, %v1163_v40  ;;  %v1180_v45 = vrot.slane %v1179_v43, 1 }
 0x132   :  { %v1181_v46 = vadd.f32 %v1180_v45, %v1179_v43  ;;  %v1183_v47 = vmul.f32 0.5, %v1165_v44 }
 0x134   :  { %v1185_v48 = vmul.f32 0.5, %v1181_v46  ;;  %v1187_v49 = vmul.f32 %v1183_v47, %v1183_v47 }
 0x136   :  { %v1189_v50 = vsub.f32 %v1185_v48, %v1187_v49 }
 0x138   :  { %v1191_v52 = vmax.f32 %v1189_v50, 0.0 }
 0x13a   :  { %v1194_v56 = vadd.f32 1e-05, %v1191_v52 }
 0x13c   :  { %2021 = vrsqrt.f32 %v1194_v56  ;;  %vm1211_vm4 = vweird.f32 %v1194_v56 }
 0x142   :  { %v2022_v54 = vpop.eup %2021 }
 0x143   :  { %v1206_v55 = vmul.f32 %v2022_v54, %v1194_v56  ;;  %vm1212_vm2 = vweird.f32 %v2022_v54 }
 0x144   :  { %vm1213_vm5 = vmor %vm1211_vm4, %vm1212_vm2 }
 0x145   :  { %v1207_v58 = vmul.f32 %v2022_v54, %v1206_v55 }
 0x147   :  { %v1208_v62 = vmul.f32 0.5, %v1207_v58 }
 0x149   :  { %v1209_v63 = vsub.f32 1.5, %v1208_v62 }
 0x14b   :  { %v1210_v1 = vmul.f32 %v2022_v54, %v1209_v63 }
 0x14d   :  { %v1214_v2 = vsel %vm1213_vm5, %v2022_v54, %v1210_v1 }
 0x14e   :  { %v1217_v4 = vrot.slane %v1214_v2, 7 }
 0x150   :  { %v1219_v6 = vsel %vm1218_vm7, %v1204_v5, %v1217_v4 }
 0x151   :  { %v1221_v7 = vmul.f32 %v1219_v6, %v1192_v3 }
 0x153   :  { %v1224_v9 = vperm.slane %v1221_v7, 0  ;;  %v1225_v10 = vperm.slane %v1221_v7, 1 }
 0x155   :  { %v1229_v11 = vmul.f32 %v1225_v10, %v1183_v47  ;;  %v1228_v13 = vmul.f32 %v1224_v9, %v2972_v23  ;;  %v1236_v20 = vmul.f32 %v1224_v9, %v2967_v19  ;;  %v1237_v21 = vmul.f32 %v1225_v10, %v2976_v31 }
 0x157   :  { %v1232_v14 = vrot.slane %v1229_v11, 7 }
 0x159   :  { %v1233_v15 = vsel %vm1218_vm7, %v1228_v13, %v1232_v14 }
 0x15a   :  { %v1235_v16 = vsub.f32 %v1222_v12, %v1233_v15 }
 0x15c   :  { %v1239_v22 = vperm.slane %v1235_v16, 0  ;;  %v1240_v24 = vperm.slane %v1235_v16, 1 }
 0x15e   :  { %v1243_v25 = vadd.f32 %v1239_v22, %v1236_v20  ;;  %v1244_v27 = vadd.f32 %v1240_v24, %v1237_v21 }
 0x160   :  { %v1245_v28 = vmax.f32 %v1243_v25, 0.0  ;;  %v1246_v29 = vmax.f32 %v1244_v27, 0.0 }
 0x162   :  { %v1247_v30 = vpack.c.bf16 %v1246_v29, %v1245_v28 }
 0x164   :  { %v1249_v32 = vrot.slane %v1247_v30, 3 }
 0x166   :  { %v1252_v23 = vsel %vm1218_vm7, %v1247_v30, %v1249_v32 }
 0x167   :  { %1256 = vst.msk [vmem:[#allocation2] sm:$0x3] %vm1255_vm10, %v1252_v23 }
 0x16e   :  { %v1275_v33 = vld [vmem:[#allocation2] sm:$0x3] }
 0x16f   :  { %1874 = vst [vmem:[%s3003_s6 + $0x8] sm:$0x3] %v1275_v33 }

// kernel: keypoint_forward.29
= control target key start
LH: loop header
LB: loop body
LE: loop exit
PB: predicated region body
PF: predicated region fallthrough
CT: control target
= control target key end

     0   :  { %s272_s0 = inlined_call_operand.vmem [shape: bf16[2,1,224], index: 0, kind: input, shape index: {}]   ;;  %s273_s1 = inlined_call_operand.vmem [shape: f32[224,30], index: 1, kind: input, shape index: {}]   ;;  %s274_s2 = inlined_call_operand.vmem [shape: f32[1,30], index: 2, kind: input, shape index: {}]   ;;  %s275_s3 = inlined_call_operand.hbm [shape: f32[2,30], index: 3, kind: output, shape index: {}]  }
   0x1   :  { %v36_v0 = vld [vmem:[%s273_s1 + $0x78] sm:$0xff]  ;;  %v35_v1 = vld [vmem:[%s273_s1 + $0x70] sm:$0xff]  ;;  %v34_v2 = vld [vmem:[%s273_s1 + $0x68] sm:$0xff] }
   0x2   :  { %66 = vmatpush.msra.mxu0 %v36_v0  ;;  %v48_v3 = vld [vmem:[%s273_s1 + $0xd8] sm:$0xff]  ;;  %v47_v4 = vld [vmem:[%s273_s1 + $0xd0] sm:$0xff]  ;;  %v33_v5 = vld [vmem:[%s273_s1 + $0x60] sm:$0xff] }
   0x3   :  { %90 = vmatpush.msra.mxu1 %v48_v3  ;;  %v46_v6 = vld [vmem:[%s273_s1 + $0xc8] sm:$0xff]  ;;  %v32_v7 = vld [vmem:[%s273_s1 + $0x58] sm:$0xff]  ;;  %v45_v8 = vld [vmem:[%s273_s1 + $0xc0] sm:$0xff] }
   0x4   :  { %67 = vmatpush.msra.mxu0 %v35_v1  ;;  %v31_v9 = vld [vmem:[%s273_s1 + $0x50] sm:$0xff]  ;;  %v44_v10 = vld [vmem:[%s273_s1 + $0xb8] sm:$0xff]  ;;  %v30_v11 = vld [vmem:[%s273_s1 + $0x48] sm:$0xff] }
   0x5   :  { %91 = vmatpush.msra.mxu1 %v47_v4  ;;  %v43_v12 = vld [vmem:[%s273_s1 + $0xb0] sm:$0xff] }
   0x6   :  { %68 = vmatpush.msra.mxu0 %v34_v2 }
   0x7   :  { %92 = vmatpush.msra.mxu1 %v46_v6 }
   0x8   :  { %69 = vmatpush.msra.mxu0 %v33_v5 }
   0x9   :  { %93 = vmatpush.msra.mxu1 %v45_v8 }
   0xa   :  { %70 = vmatpush.msra.mxu0 %v32_v7 }
   0xb   :  { %8 = vsyncpa [#allocation3], 0  ;;  %94 = vmatpush.msra.mxu1 %v44_v10  ;;  %v29_v13 = vld [vmem:[%s273_s1 + $0x40] sm:$0xff]  ;;  %v42_v14 = vld [vmem:[%s273_s1 + $0xa8] sm:$0xff]  ;;  %vm59_vm0 = vcmask 1041409   ;;  %vm63_vm1 = vcmask 785408  }
   0xc   :  { %71 = vmatpush.msra.mxu0 %v31_v9  ;;  %v28_v15 = vld [vmem:[%s273_s1 + $0x38] sm:$0xff]  ;;  %v41_v16 = vld [vmem:[%s273_s1 + $0xa0] sm:$0xff]  ;;  %v27_v19 = vld [vmem:[%s273_s1 + $0x30] sm:$0xff]  ;;  %s153_s19 = smov [#allocation2]   ;;  %s115_s23 = sshll.u32 %s275_s3, 4  ;;  %vm106_vm2 = vcmask 238592   ;;  %s116_s23 = int_to_ptr.hbm [resolvable:$true] %s115_s23 }
   0xd   :  { %95 = vmatpush.msra.mxu1 %v43_v12  ;;  %v15_v17 = vld [vmem:[%s272_s0] sm:$0x3]  ;;  %v16_v18 = vld [vmem:[%s272_s0 + $0x2] sm:$0x3]  ;;  %v40_v20 = vld [vmem:[%s273_s1 + $0x98] sm:$0xff]  ;;  %s113_s20 = sshll.u32 %s153_s19, 4  ;;  %s114_s20 = int_to_ptr.vmem [resolvable:$true] %s113_s20 }
   0xe   :  { %72 = vmatpush.msra.mxu0 %v30_v11  ;;  %v17_v21 = vunpack.c.l.bf16 %v15_v17  ;;  %v18_v22 = vunpack.c.l.bf16 %v16_v18  ;;  %v26_v23 = vld [vmem:[%s273_s1 + $0x28] sm:$0xff]  ;;  %v39_v24 = vld [vmem:[%s273_s1 + $0x90] sm:$0xff]  ;;  %v25_v27 = vld [vmem:[%s273_s1 + $0x20] sm:$0xff] }
   0xf   :  { %96 = vmatpush.msra.mxu1 %v42_v14  ;;  %v38_v28 = vld [vmem:[%s273_s1 + $0x88] sm:$0xff]  ;;  %v24_v29 = vld [vmem:[%s273_s1 + $0x18] sm:$0xff]  ;;  %v37_v30 = vld [vmem:[%s273_s1 + $0x80] sm:$0xff] }
  0x10   :  { %73 = vmatpush.msra.mxu0 %v29_v13  ;;  %v56_v25 = vperm.slane %v17_v21, 2  ;;  %v58_v26 = vperm.slane %v18_v22, 2  ;;  %v23_v32 = vld [vmem:[%s273_s1 + $0x10] sm:$0xff]  ;;  %v55_v33 = vperm.slane %v17_v21, 0  ;;  %v57_v34 = vperm.slane %v18_v22, 0  ;;  %v22_v35 = vld [vmem:[%s273_s1 + $0x8] sm:$0xff] }
  0x11   :  { %97 = vmatpush.msra.mxu1 %v41_v16  ;;  %v21_v36 = vld [vmem:[%s273_s1] sm:$0xff] }
  0x12   :  { %74 = vmatpush.msra.mxu0 %v28_v15  ;;  %v61_v31 = vsel %vm59_vm0, %v58_v26, %v56_v25  ;;  %v60_v37 = vsel %vm59_vm0, %v57_v34, %v55_v33  ;;  %v126_v38 = vld [vmem:[%s274_s2] ss:$0 sm:$0xff] }
  0x13   :  { %98 = vmatpush.msra.mxu1 %v40_v20 }
  0x14   :  { %75 = vmatpush.msra.mxu0 %v27_v19 }
  0x15   :  { %99 = vmatpush.msra.mxu1 %v39_v24 }
  0x16   :  { %76 = vmatpush.msra.mxu0 %v26_v23 }
  0x17   :  { %100 = vmatpush.msra.mxu1 %v38_v28 }
  0x18   :  { %77 = vmatpush.msra.mxu0 %v25_v27 }
  0x19   :  { %101 = vmatpush.msra.mxu1 %v37_v30 }
  0x1a   :  { %78 = vmatpush.msra.mxu0 %v24_v29  ;;  %124 = vmatmul.msk.f32.vlgmr.msra.gmra.mxu1 %vm63_vm1, %v61_v31 }
  0x1c   :  { %79 = vmatpush.msra.mxu0 %v23_v32 }
  0x1e   :  { %80 = vmatpush.msra.mxu0 %v22_v35 }
  0x20   :  { %81 = vmatpush.msra.mxu0 %v21_v36 }
  0x21   :  { %82 = vmatmul.f32.vlgmr.msra.gmra.mxu0 %v60_v37 }
  0x97   :  { %v103_v40 = vpop.f32.mrf.mxu1 }
  0x9e   :  { %v83_v39 = vpop.f32.mrf.mxu0 }
  0x9f   :  { %v84_v41 = vadd.f32 %v126_v38, %v83_v39 }
  0xa1   :  { %v104_v42 = vadd.f32 %v103_v40, %v84_v41 }
  0xa3   :  { %107 = vst.msk [vmem:[#allocation2] sm:$0x3] %vm106_vm2, %v104_v42 }
  0xa4   :  { %118 = dma.vmem_to_hbm [thread:$0]  %s114_s20, 32, %s116_s23, [#allocation3]  }
  0xa5   :  { %151 = dma.done.wait [#allocation3], 32  }
  0xa6   :  { %152 = vsyncadd [#allocation3], 4294967264 }
  0xa7   :  { %123 = vsyncpa [#allocation3], 1 }

// kernel: keypoint_forward.27
= control target key start
LH: loop header
LB: loop body
LE: loop exit
PB: predicated region body
PF: predicated region fallthrough
CT: control target
= control target key end

     0   :  { %vm1585_vm0 = vcmask 785408   ;;  %vm2004_vm1 = vcmask 1041408   ;;  %vm2012_vm2 = vcmask 779264   ;;  %vm2072_vm8 = vcmask 1040384   ;;  %s5347_s1 = inlined_call_operand.vmem [shape: bf16[2016,224], index: 1, kind: input, shape index: {}]   ;;  %s5348_s0 = inlined_call_operand.vmem [shape: bf16[2,2016], index: 0, kind: input, shape index: {}]   ;;  %s5349_s2 = inlined_call_operand.vmem [shape: f32[1,224], index: 2, kind: input, shape index: {}]   ;;  %s5350_s6 = inlined_call_operand.vmem [shape: bf16[128,224], index: 6, kind: input, shape index: {}]   ;;  %s5351_s5 = inlined_call_operand.vmem [shape: bf16[2,128], index: 5, kind: input, shape index: {}]   ;;  %s5352_s3 = inlined_call_operand.vmem [shape: f32[1,224], index: 3, kind: input, shape index: {}]   ;;  %s5353_s4 = inlined_call_operand.vmem [shape: f32[1,224], index: 4, kind: input, shape index: {}]   ;;  %s5354_s7 = inlined_call_operand.vmem [shape: f32[1,224], index: 7, kind: input, shape index: {}]   ;;  %s5355_s8 = inlined_call_operand.vmem [shape: bf16[2,224], index: 8, kind: output, shape index: {}]  }
   0x1   :  { %v2306_v0 = vld [vmem:[%s5347_s1 + $0x70] sm:$0xf]  ;;  %v3337_v1 = vld [vmem:[%s5347_s1 + $0x74] sm:$0xf0]  ;;  %v2298_v11 = vld [vmem:[%s5347_s1 + $0x60] sm:$0xf] }
   0x2   :  { %v2370_v2 = vld [vmem:[%s5347_s1 + $0xf0] sm:$0xf]  ;;  %v2307_v3 = vor.u32 %v3337_v1, %v2306_v0  ;;  %v3353_v4 = vld [vmem:[%s5347_s1 + $0xf4] sm:$0xf0]  ;;  %v3335_v13 = vld [vmem:[%s5347_s1 + $0x64] sm:$0xf0] }
   0x3   :  { %v2434_v5 = vld [vmem:[%s5347_s1 + $0x170] sm:$0xf]  ;;  %v3369_v6 = vld [vmem:[%s5347_s1 + $0x174] sm:$0xf0]  ;;  %v2371_v7 = vor.u32 %v3353_v4, %v2370_v2  ;;  %v2362_v14 = vld [vmem:[%s5347_s1 + $0xe0] sm:$0xf]  ;;  %v2299_v16 = vor.u32 %v3335_v13, %v2298_v11 }
   0x4   :  { %v2435_v8 = vor.u32 %v3369_v6, %v2434_v5  ;;  %v2498_v9 = vld [vmem:[%s5347_s1 + $0x1f0] sm:$0xf]  ;;  %v3385_v10 = vld [vmem:[%s5347_s1 + $0x1f4] sm:$0xf0]  ;;  %1588 = vmatpush.bf16.msra.mxu0 %v2307_v3  ;;  %v3351_v15 = vld [vmem:[%s5347_s1 + $0xe4] sm:$0xf0] }
   0x5   :  { %v2499_v12 = vor.u32 %v3385_v10, %v2498_v9  ;;  %1601 = vmatpush.bf16.msra.mxu1 %v2371_v7  ;;  %v2363_v17 = vor.u32 %v3351_v15, %v2362_v14  ;;  %v2426_v18 = vld [vmem:[%s5347_s1 + $0x160] sm:$0xf]  ;;  %v3367_v19 = vld [vmem:[%s5347_s1 + $0x164] sm:$0xf0]  ;;  %v2290_v23 = vld [vmem:[%s5347_s1 + $0x50] sm:$0xf] }
   0x6   :  { %1614 = vmatpush.bf16.msra.mxu2 %v2435_v8  ;;  %v2490_v20 = vld [vmem:[%s5347_s1 + $0x1e0] sm:$0xf]  ;;  %v2427_v21 = vor.u32 %v3367_v19, %v2426_v18  ;;  %v3383_v22 = vld [vmem:[%s5347_s1 + $0x1e4] sm:$0xf0]  ;;  %v3333_v24 = vld [vmem:[%s5347_s1 + $0x54] sm:$0xf0] }
   0x7   :  { %1627 = vmatpush.bf16.msra.mxu3 %v2499_v12  ;;  %v2491_v25 = vor.u32 %v3383_v22, %v2490_v20  ;;  %v2354_v26 = vld [vmem:[%s5347_s1 + $0xd0] sm:$0xf]  ;;  %v3349_v27 = vld [vmem:[%s5347_s1 + $0xd4] sm:$0xf0]  ;;  %v2291_v29 = vor.u32 %v3333_v24, %v2290_v23  ;;  %v2282_v35 = vld [vmem:[%s5347_s1 + $0x40] sm:$0xf] }
   0x8   :  { %v2418_v28 = vld [vmem:[%s5347_s1 + $0x150] sm:$0xf]  ;;  %1589 = vmatpush.bf16.msra.mxu0 %v2299_v16  ;;  %v3365_v30 = vld [vmem:[%s5347_s1 + $0x154] sm:$0xf0]  ;;  %v2355_v33 = vor.u32 %v3349_v27, %v2354_v26  ;;  %v3331_v36 = vld [vmem:[%s5347_s1 + $0x44] sm:$0xf0] }
   0x9   :  { %v2482_v31 = vld [vmem:[%s5347_s1 + $0x1d0] sm:$0xf]  ;;  %v3381_v32 = vld [vmem:[%s5347_s1 + $0x1d4] sm:$0xf0]  ;;  %1602 = vmatpush.bf16.msra.mxu1 %v2363_v17  ;;  %v2419_v34 = vor.u32 %v3365_v30, %v2418_v28  ;;  %v2346_v37 = vld [vmem:[%s5347_s1 + $0xc0] sm:$0xf]  ;;  %v2283_v44 = vor.u32 %v3331_v36, %v2282_v35 }
   0xa   :  { %1615 = vmatpush.bf16.msra.mxu2 %v2427_v21  ;;  %v2483_v38 = vor.u32 %v3381_v32, %v2482_v31  ;;  %v3347_v39 = vld [vmem:[%s5347_s1 + $0xc4] sm:$0xf0]  ;;  %v2410_v40 = vld [vmem:[%s5347_s1 + $0x140] sm:$0xf]  ;;  %v2274_v47 = vld [vmem:[%s5347_s1 + $0x30] sm:$0xf] }
   0xb   :  { %1628 = vmatpush.bf16.msra.mxu3 %v2491_v25  ;;  %v3363_v41 = vld [vmem:[%s5347_s1 + $0x144] sm:$0xf0]  ;;  %v2474_v42 = vld [vmem:[%s5347_s1 + $0x1c0] sm:$0xf]  ;;  %v2347_v45 = vor.u32 %v3347_v39, %v2346_v37  ;;  %v3329_v48 = vld [vmem:[%s5347_s1 + $0x34] sm:$0xf0] }
   0xc   :  { %v3379_v43 = vld [vmem:[%s5347_s1 + $0x1c4] sm:$0xf0]  ;;  %1590 = vmatpush.bf16.msra.mxu0 %v2291_v29  ;;  %v2411_v46 = vor.u32 %v3363_v41, %v2410_v40  ;;  %v2338_v49 = vld [vmem:[%s5347_s1 + $0xb0] sm:$0xf]  ;;  %v3345_v51 = vld [vmem:[%s5347_s1 + $0xb4] sm:$0xf0]  ;;  %v2275_v56 = vor.u32 %v3329_v48, %v2274_v47 }
   0xd   :  { %1603 = vmatpush.bf16.msra.mxu1 %v2355_v33  ;;  %v2475_v50 = vor.u32 %v3379_v43, %v2474_v42  ;;  %v2402_v52 = vld [vmem:[%s5347_s1 + $0x130] sm:$0xf]  ;;  %v3361_v53 = vld [vmem:[%s5347_s1 + $0x134] sm:$0xf0]  ;;  %v2339_v57 = vor.u32 %v3345_v51, %v2338_v49  ;;  %v2266_v59 = vld [vmem:[%s5347_s1 + $0x20] sm:$0xf] }
   0xe   :  { %1616 = vmatpush.bf16.msra.mxu2 %v2419_v34  ;;  %v2466_v54 = vld [vmem:[%s5347_s1 + $0x1b0] sm:$0xf]  ;;  %v3377_v55 = vld [vmem:[%s5347_s1 + $0x1b4] sm:$0xf0]  ;;  %v2403_v58 = vor.u32 %v3361_v53, %v2402_v52  ;;  %v3327_v60 = vld [vmem:[%s5347_s1 + $0x24] sm:$0xf0] }
   0xf   :  { %1629 = vmatpush.bf16.msra.mxu3 %v2483_v38  ;;  %v2330_v61 = vld [vmem:[%s5347_s1 + $0xa0] sm:$0xf]  ;;  %v2467_v62 = vor.u32 %v3377_v55, %v2466_v54  ;;  %v3343_v63 = vld [vmem:[%s5347_s1 + $0xa4] sm:$0xf0]  ;;  %v2267_v4 = vor.u32 %v3327_v60, %v2266_v59  ;;  %v2258_v7 = vld [vmem:[%s5347_s1 + $0x10] sm:$0xf] }
  0x10   :  { %1591 = vmatpush.bf16.msra.mxu0 %v2283_v44  ;;  %v2394_v0 = vld [vmem:[%s5347_s1 + $0x120] sm:$0xf]  ;;  %v3359_v1 = vld [vmem:[%s5347_s1 + $0x124] sm:$0xf0]  ;;  %v2331_v5 = vor.u32 %v3343_v63, %v2330_v61  ;;  %v3325_v8 = vld [vmem:[%s5347_s1 + $0x14] sm:$0xf0] }
  0x11   :  { %1604 = vmatpush.bf16.msra.mxu1 %v2347_v45  ;;  %v2458_v2 = vld [vmem:[%s5347_s1 + $0x1a0] sm:$0xf]  ;;  %v3375_v3 = vld [vmem:[%s5347_s1 + $0x1a4] sm:$0xf0]  ;;  %v2395_v6 = vor.u32 %v3359_v1, %v2394_v0  ;;  %v2322_v9 = vld [vmem:[%s5347_s1 + $0x90] sm:$0xf]  ;;  %v2259_v16 = vor.u32 %v3325_v8, %v2258_v7 }
  0x12   :  { %1617 = vmatpush.bf16.msra.mxu2 %v2411_v46  ;;  %v2459_v10 = vor.u32 %v3375_v3, %v2458_v2  ;;  %v3341_v11 = vld [vmem:[%s5347_s1 + $0x94] sm:$0xf0]  ;;  %v2386_v12 = vld [vmem:[%s5347_s1 + $0x110] sm:$0xf]  ;;  %v2250_v17 = vld [vmem:[%s5347_s1] sm:$0xf] }
  0x13   :  { %1630 = vmatpush.bf16.msra.mxu3 %v2475_v50  ;;  %v3357_v13 = vld [vmem:[%s5347_s1 + $0x114] sm:$0xf0]  ;;  %v2450_v14 = vld [vmem:[%s5347_s1 + $0x190] sm:$0xf]  ;;  %v3323_v18 = vld [vmem:[%s5347_s1 + $0x4] sm:$0xf0]  ;;  %v2323_v19 = vor.u32 %v3341_v11, %v2322_v9 }
  0x14   :  { %1592 = vmatpush.bf16.msra.mxu0 %v2275_v56  ;;  %v3373_v15 = vld [vmem:[%s5347_s1 + $0x194] sm:$0xf0]  ;;  %v2387_v20 = vor.u32 %v3357_v13, %v2386_v12  ;;  %v2314_v21 = vld [vmem:[%s5347_s1 + $0x80] sm:$0xf]  ;;  %v3339_v22 = vld [vmem:[%s5347_s1 + $0x84] sm:$0xf0]  ;;  %v2251_v31 = vor.u32 %v3323_v18, %v2250_v17 }
  0x15   :  { %1605 = vmatpush.bf16.msra.mxu1 %v2339_v57  ;;  %v2378_v23 = vld [vmem:[%s5347_s1 + $0x100] sm:$0xf]  ;;  %v2451_v24 = vor.u32 %v3373_v15, %v2450_v14  ;;  %v3355_v25 = vld [vmem:[%s5347_s1 + $0x104] sm:$0xf0]  ;;  %v2562_v28 = vld [vmem:[%s5347_s1 + $0x270] sm:$0xf]  ;;  %v2315_v35 = vor.u32 %v3339_v22, %v2314_v21 }
  0x16   :  { %1618 = vmatpush.bf16.msra.mxu2 %v2403_v58  ;;  %v2442_v26 = vld [vmem:[%s5347_s1 + $0x180] sm:$0xf]  ;;  %v3371_v27 = vld [vmem:[%s5347_s1 + $0x184] sm:$0xf0]  ;;  %v3401_v29 = vld [vmem:[%s5347_s1 + $0x274] sm:$0xf0]  ;;  %v2379_v36 = vor.u32 %v3355_v25, %v2378_v23 }
  0x17   :  { %1631 = vmatpush.bf16.msra.mxu3 %v2467_v62  ;;  %v2626_v30 = vld [vmem:[%s5347_s1 + $0x2f0] sm:$0xf]  ;;  %v3417_v32 = vld [vmem:[%s5347_s1 + $0x2f4] sm:$0xf0]  ;;  %v2443_v39 = vor.u32 %v3371_v27, %v2442_v26  ;;  %v2563_v40 = vor.u32 %v3401_v29, %v2562_v28  ;;  %v2554_v43 = vld [vmem:[%s5347_s1 + $0x260] sm:$0xf] }
  0x18   :  { %1593 = vmatpush.bf16.msra.mxu0 %v2267_v4  ;;  %v2690_v33 = vld [vmem:[%s5347_s1 + $0x370] sm:$0xf]  ;;  %v3433_v34 = vld [vmem:[%s5347_s1 + $0x374] sm:$0xf0]  ;;  %v2627_v41 = vor.u32 %v3417_v32, %v2626_v30  ;;  %v3399_v44 = vld [vmem:[%s5347_s1 + $0x264] sm:$0xf0] }
  0x19   :  { %1606 = vmatpush.bf16.msra.mxu1 %v2331_v5  ;;  %v2754_v37 = vld [vmem:[%s5347_s1 + $0x3f0] sm:$0xf]  ;;  %v3449_v38 = vld [vmem:[%s5347_s1 + $0x3f4] sm:$0xf0]  ;;  %v2691_v42 = vor.u32 %v3433_v34, %v2690_v33  ;;  %v2618_v45 = vld [vmem:[%s5347_s1 + $0x2e0] sm:$0xf]  ;;  %v2555_v52 = vor.u32 %v3399_v44, %v2554_v43 }
  0x1a   :  { %1619 = vmatpush.bf16.msra.mxu2 %v2395_v6  ;;  %v2755_v46 = vor.u32 %v3449_v38, %v2754_v37  ;;  %v3415_v47 = vld [vmem:[%s5347_s1 + $0x2e4] sm:$0xf0]  ;;  %v2682_v48 = vld [vmem:[%s5347_s1 + $0x360] sm:$0xf]  ;;  %v2546_v53 = vld [vmem:[%s5347_s1 + $0x250] sm:$0xf] }
  0x1b   :  { %1632 = vmatpush.bf16.msra.mxu3 %v2459_v10  ;;  %v3431_v49 = vld [vmem:[%s5347_s1 + $0x364] sm:$0xf0]  ;;  %v2746_v50 = vld [vmem:[%s5347_s1 + $0x3e0] sm:$0xf]  ;;  %v3397_v54 = vld [vmem:[%s5347_s1 + $0x254] sm:$0xf0]  ;;  %v2619_v55 = vor.u32 %v3415_v47, %v2618_v45 }
  0x1c   :  { %1594 = vmatpush.bf16.msra.mxu0 %v2259_v16  ;;  %v3447_v51 = vld [vmem:[%s5347_s1 + $0x3e4] sm:$0xf0]  ;;  %v2683_v56 = vor.u32 %v3431_v49, %v2682_v48  ;;  %v2610_v57 = vld [vmem:[%s5347_s1 + $0x2d0] sm:$0xf]  ;;  %v3413_v58 = vld [vmem:[%s5347_s1 + $0x2d4] sm:$0xf0]  ;;  %v2547_v1 = vor.u32 %v3397_v54, %v2546_v53 }
  0x1d   :  { %1607 = vmatpush.bf16.msra.mxu1 %v2323_v19  ;;  %v30_v59 = vld [vmem:[%s5348_s0] sm:$0xff]  ;;  %v2747_v60 = vor.u32 %v3447_v51, %v2746_v50  ;;  %v2674_v61 = vld [vmem:[%s5347_s1 + $0x350] sm:$0xf]  ;;  %v3429_v62 = vld [vmem:[%s5347_s1 + $0x354] sm:$0xf0]  ;;  %v2611_v2 = vor.u32 %v3413_v58, %v2610_v57  ;;  %vm2241_vm10 = vcmask 779265  }
  0x1e   :  { %1620 = vmatpush.bf16.msra.mxu2 %v2387_v20  ;;  %291 = vst [vmem:[#allocation1] ss:$9 sm:$0xff] %v30_v59  ;;  %v2738_v63 = vld [vmem:[%s5347_s1 + $0x3d0] sm:$0xf]  ;;  %v3445_v0 = vld [vmem:[%s5347_s1 + $0x3d4] sm:$0xf0]  ;;  %v2675_v3 = vor.u32 %v3429_v62, %v2674_v61  ;;  %vm2242_vm11 = vmor %vm2241_vm10, %vm2072_vm8 }
  0x1f   :  { %1633 = vmatpush.bf16.msra.mxu3 %v2451_v24  ;;  %v2538_v4 = vld [vmem:[%s5347_s1 + $0x240] sm:$0xf]  ;;  %v3395_v5 = vld [vmem:[%s5347_s1 + $0x244] sm:$0xf0]  ;;  %v2739_v7 = vor.u32 %v3445_v0, %v2738_v63  ;;  %v2530_v13 = vld [vmem:[%s5347_s1 + $0x230] sm:$0xf] }
  0x20   :  { %1595 = vmatpush.bf16.msra.mxu0 %v2251_v31  ;;  %v2602_v6 = vld [vmem:[%s5347_s1 + $0x2c0] sm:$0xf]  ;;  %v3411_v8 = vld [vmem:[%s5347_s1 + $0x2c4] sm:$0xf0]  ;;  %v2539_v14 = vor.u32 %v3395_v5, %v2538_v4  ;;  %v3393_v15 = vld [vmem:[%s5347_s1 + $0x234] sm:$0xf0] }
  0x21   :  { %1608 = vmatpush.bf16.msra.mxu1 %v2315_v35  ;;  %v2666_v9 = vld [vmem:[%s5347_s1 + $0x340] sm:$0xf]  ;;  %v3427_v10 = vld [vmem:[%s5347_s1 + $0x344] sm:$0xf0]  ;;  %v2594_v16 = vld [vmem:[%s5347_s1 + $0x2b0] sm:$0xf]  ;;  %v2603_v18 = vor.u32 %v3411_v8, %v2602_v6  ;;  %v2531_v29 = vor.u32 %v3393_v15, %v2530_v13 }
  0x22   :  { %1621 = vmatpush.bf16.msra.mxu2 %v2379_v36  ;;  %v2730_v11 = vld [vmem:[%s5347_s1 + $0x3c0] sm:$0xf]  ;;  %v3443_v12 = vld [vmem:[%s5347_s1 + $0x3c4] sm:$0xf0]  ;;  %v3409_v17 = vld [vmem:[%s5347_s1 + $0x2b4] sm:$0xf0]  ;;  %v2667_v19 = vor.u32 %v3427_v10, %v2666_v9 }
  0x23   :  { %1634 = vmatpush.bf16.msra.mxu3 %v2443_v39  ;;  %v2731_v23 = vor.u32 %v3443_v12, %v2730_v11  ;;  %v2658_v24 = vld [vmem:[%s5347_s1 + $0x330] sm:$0xf]  ;;  %v3425_v25 = vld [vmem:[%s5347_s1 + $0x334] sm:$0xf0]  ;;  %v2595_v30 = vor.u32 %v3409_v17, %v2594_v16  ;;  %v2522_v32 = vld [vmem:[%s5347_s1 + $0x220] sm:$0xf] }
  0x24   :  { %1640 = vmatpush.bf16.msrb.mxu0 %v2563_v40  ;;  %v2722_v27 = vld [vmem:[%s5347_s1 + $0x3b0] sm:$0xf]  ;;  %v3441_v28 = vld [vmem:[%s5347_s1 + $0x3b4] sm:$0xf0]  ;;  %v2659_v31 = vor.u32 %v3425_v25, %v2658_v24  ;;  %v3391_v33 = vld [vmem:[%s5347_s1 + $0x224] sm:$0xf0] }
  0x25   :  { %1653 = vmatpush.bf16.msrb.mxu1 %v2627_v41  ;;  %v3950_v20 = vld [vmem:[#allocation1 + $0x12] sm:$0xff]  ;;  %v3952_v21 = vld [vmem:[#allocation1] sm:$0xff]  ;;  %v3963_v26 = vld [vmem:[#allocation1 + $0x9] sm:$0xff]  ;;  %v2723_v35 = vor.u32 %v3441_v28, %v2722_v27  ;;  %v2523_v41 = vor.u32 %v3391_v33, %v2522_v32 }
  0x26   :  { %1666 = vmatpush.bf16.msrb.mxu2 %v2691_v42  ;;  %v3954_v22 = vld [vmem:[#allocation1 + $0x1b] sm:$0xff]  ;;  %1596 = vmatmul.bf16.vlgmr.msra.gmra.mxu0 %v3952_v21  ;;  %v3407_v36 = vld [vmem:[%s5347_s1 + $0x2a4] sm:$0xf0]  ;;  %v2514_v42 = vld [vmem:[%s5347_s1 + $0x210] sm:$0xf] }
  0x27   :  { %1679 = vmatpush.bf16.msrb.mxu3 %v2755_v46  ;;  %1622 = vmatmul.bf16.vlgmr.msra.gmra.mxu2 %v3950_v20  ;;  %v2586_v34 = vld [vmem:[%s5347_s1 + $0x2a0] sm:$0xf]  ;;  %v3423_v38 = vld [vmem:[%s5347_s1 + $0x324] sm:$0xf0]  ;;  %v3389_v46 = vld [vmem:[%s5347_s1 + $0x214] sm:$0xf0] }
  0x28   :  { %1641 = vmatpush.bf16.msrb.mxu0 %v2555_v52  ;;  %1635 = vmatmul.bf16.vlgmr.msra.gmra.mxu3 %v3954_v22  ;;  %v2650_v37 = vld [vmem:[%s5347_s1 + $0x320] sm:$0xf]  ;;  %v3439_v40 = vld [vmem:[%s5347_s1 + $0x3a4] sm:$0xf0]  ;;  %v2587_v44 = vor.u32 %v3407_v36, %v2586_v34  ;;  %v2578_v47 = vld [vmem:[%s5347_s1 + $0x290] sm:$0xf] }
  0x29   :  { %1654 = vmatpush.bf16.msrb.mxu1 %v2619_v55  ;;  %v2714_v39 = vld [vmem:[%s5347_s1 + $0x3a0] sm:$0xf]  ;;  %v31_v43 = vld [vmem:[%s5348_s0 + $0x8] sm:$0xff]  ;;  %v2651_v45 = vor.u32 %v3423_v38, %v2650_v37  ;;  %v3405_v48 = vld [vmem:[%s5347_s1 + $0x294] sm:$0xf0] }
  0x2a   :  { %1667 = vmatpush.bf16.msrb.mxu2 %v2683_v56  ;;  %1609 = vmatmul.bf16.vlgmr.msra.gmra.mxu1 %v3963_v26  ;;  %v2715_v49 = vor.u32 %v3439_v40, %v2714_v39  ;;  %v2642_v50 = vld [vmem:[%s5347_s1 + $0x310] sm:$0xf]  ;;  %v3421_v51 = vld [vmem:[%s5347_s1 + $0x314] sm:$0xf0]  ;;  %v2506_v54 = vld [vmem:[%s5347_s1 + $0x200] sm:$0xf]  ;;  %v2515_v56 = vor.u32 %v3389_v46, %v2514_v42  ;;  %v2579_v62 = vor.u32 %v3405_v48, %v2578_v47 }
  0x2b   :  { %1680 = vmatpush.bf16.msrb.mxu3 %v2747_v60  ;;  %v2706_v52 = vld [vmem:[%s5347_s1 + $0x390] sm:$0xf]  ;;  %v3437_v53 = vld [vmem:[%s5347_s1 + $0x394] sm:$0xf0]  ;;  %v3387_v55 = vld [vmem:[%s5347_s1 + $0x204] sm:$0xf0]  ;;  %v2643_v63 = vor.u32 %v3421_v51, %v2642_v50 }
  0x2c   :  { %1642 = vmatpush.bf16.msrb.mxu0 %v2547_v1  ;;  %v2570_v57 = vld [vmem:[%s5347_s1 + $0x280] sm:$0xf]  ;;  %v3403_v58 = vld [vmem:[%s5347_s1 + $0x284] sm:$0xf0]  ;;  %v4043_v61 = vld [vmem:[#allocation1 + $0x36] sm:$0xff]  ;;  %v2507_v9 = vor.u32 %v3387_v55, %v2506_v54 }
  0x2d   :  { %1655 = vmatpush.bf16.msrb.mxu1 %v2611_v2  ;;  %v2634_v59 = vld [vmem:[%s5347_s1 + $0x300] sm:$0xf]  ;;  %v3419_v60 = vld [vmem:[%s5347_s1 + $0x304] sm:$0xf0]  ;;  %v4049_v2 = vld [vmem:[#allocation1 + $0x2d] sm:$0xff]  ;;  %v2571_v13 = vor.u32 %v3403_v58, %v2570_v57 }
  0x2e   :  { %1668 = vmatpush.bf16.msrb.mxu2 %v2675_v3  ;;  %v4045_v0 = vld [vmem:[#allocation1 + $0x24] sm:$0xff]  ;;  %v2707_v3 = vor.u32 %v3437_v53, %v2706_v52  ;;  %v2698_v4 = vld [vmem:[%s5347_s1 + $0x380] sm:$0xf]  ;;  %v2818_v6 = vld [vmem:[%s5347_s1 + $0x470] sm:$0xf] }
  0x2f   :  { %1681 = vmatpush.bf16.msrb.mxu3 %v2739_v7  ;;  %v4047_v1 = vld [vmem:[#allocation1 + $0x3f] sm:$0xff]  ;;  %v3435_v5 = vld [vmem:[%s5347_s1 + $0x384] sm:$0xf0]  ;;  %v3465_v7 = vld [vmem:[%s5347_s1 + $0x474] sm:$0xf0] }
  0x30   :  { %1643 = vmatpush.bf16.msrb.mxu0 %v2539_v14  ;;  %301 = vst [vmem:[#allocation1] ss:$9 sm:$0xff] %v31_v43  ;;  %v2882_v8 = vld [vmem:[%s5347_s1 + $0x4f0] sm:$0xf]  ;;  %v3481_v10 = vld [vmem:[%s5347_s1 + $0x4f4] sm:$0xf0]  ;;  %v2635_v14 = vor.u32 %v3419_v60, %v2634_v59  ;;  %v2699_v17 = vor.u32 %v3435_v5, %v2698_v4 }
  0x31   :  { %1656 = vmatpush.bf16.msrb.mxu1 %v2603_v18  ;;  %v2946_v11 = vld [vmem:[%s5347_s1 + $0x570] sm:$0xf]  ;;  %v3497_v12 = vld [vmem:[%s5347_s1 + $0x574] sm:$0xf0]  ;;  %v2819_v18 = vor.u32 %v3465_v7, %v2818_v6  ;;  %v2810_v24 = vld [vmem:[%s5347_s1 + $0x460] sm:$0xf] }
  0x32   :  { %1669 = vmatpush.bf16.msrb.mxu2 %v2667_v19  ;;  %v3010_v15 = vld [vmem:[%s5347_s1 + $0x5f0] sm:$0xf]  ;;  %v3513_v16 = vld [vmem:[%s5347_s1 + $0x5f4] sm:$0xf0]  ;;  %v2883_v19 = vor.u32 %v3481_v10, %v2882_v8  ;;  %v3463_v25 = vld [vmem:[%s5347_s1 + $0x464] sm:$0xf0] }
  0x33   :  { %1682 = vmatpush.bf16.msrb.mxu3 %v2731_v23  ;;  %v2947_v23 = vor.u32 %v3497_v12, %v2946_v11  ;;  %v2874_v27 = vld [vmem:[%s5347_s1 + $0x4e0] sm:$0xf]  ;;  %v3011_v28 = vor.u32 %v3513_v16, %v3010_v15  ;;  %v3511_v33 = vld [vmem:[%s5347_s1 + $0x5e4] sm:$0xf0]  ;;  %v2811_v34 = vor.u32 %v3463_v25, %v2810_v24  ;;  %v2802_v37 = vld [vmem:[%s5347_s1 + $0x450] sm:$0xf] }
  0x34   :  { %1644 = vmatpush.bf16.msrb.mxu0 %v2531_v29  ;;  %v3479_v29 = vld [vmem:[%s5347_s1 + $0x4e4] sm:$0xf0]  ;;  %v3002_v32 = vld [vmem:[%s5347_s1 + $0x5e0] sm:$0xf]  ;;  %v3461_v38 = vld [vmem:[%s5347_s1 + $0x454] sm:$0xf0] }
  0x35   :  { %1657 = vmatpush.bf16.msrb.mxu1 %v2595_v30  ;;  %v2938_v30 = vld [vmem:[%s5347_s1 + $0x560] sm:$0xf]  ;;  %v2866_v39 = vld [vmem:[%s5347_s1 + $0x4d0] sm:$0xf]  ;;  %v3003_v40 = vor.u32 %v3511_v33, %v3002_v32  ;;  %v3493_v43 = vld [vmem:[%s5347_s1 + $0x554] sm:$0xf0]  ;;  %v2803_v46 = vor.u32 %v3461_v38, %v2802_v37 }
  0x36   :  { %1670 = vmatpush.bf16.msrb.mxu2 %v2659_v31  ;;  %v3495_v31 = vld [vmem:[%s5347_s1 + $0x564] sm:$0xf0]  ;;  %v2930_v42 = vld [vmem:[%s5347_s1 + $0x550] sm:$0xf]  ;;  %v2858_v51 = vld [vmem:[%s5347_s1 + $0x4c0] sm:$0xf] }
  0x37   :  { %1683 = vmatpush.bf16.msrb.mxu3 %v2723_v35  ;;  %v2875_v35 = vor.u32 %v3479_v29, %v2874_v27  ;;  %v2939_v36 = vor.u32 %v3495_v31, %v2938_v30  ;;  %v2931_v48 = vor.u32 %v3493_v43, %v2930_v42  ;;  %v3459_v50 = vld [vmem:[%s5347_s1 + $0x444] sm:$0xf0]  ;;  %v2922_v54 = vld [vmem:[%s5347_s1 + $0x540] sm:$0xf]  ;;  %v3473_v5 = vld [vmem:[%s5347_s1 + $0x4b4] sm:$0xf0] }
  0x38   :  { %1645 = vmatpush.bf16.msrb.mxu0 %v2523_v41  ;;  %v3477_v41 = vld [vmem:[%s5347_s1 + $0x4d4] sm:$0xf0]  ;;  %v3475_v53 = vld [vmem:[%s5347_s1 + $0x4c4] sm:$0xf0]  ;;  %v2914_v6 = vld [vmem:[%s5347_s1 + $0x530] sm:$0xf] }
  0x39   :  { %1658 = vmatpush.bf16.msrb.mxu1 %v2587_v44  ;;  %v2994_v44 = vld [vmem:[%s5347_s1 + $0x5d0] sm:$0xf]  ;;  %v2867_v47 = vor.u32 %v3477_v41, %v2866_v39  ;;  %v3491_v55 = vld [vmem:[%s5347_s1 + $0x544] sm:$0xf0]  ;;  %v2859_v59 = vor.u32 %v3475_v53, %v2858_v51  ;;  %v3489_v7 = vld [vmem:[%s5347_s1 + $0x534] sm:$0xf0] }
  0x3a   :  { %1671 = vmatpush.bf16.msrb.mxu2 %v2651_v45  ;;  %v3509_v45 = vld [vmem:[%s5347_s1 + $0x5d4] sm:$0xf0]  ;;  %v3507_v57 = vld [vmem:[%s5347_s1 + $0x5c4] sm:$0xf0]  ;;  %v2923_v60 = vor.u32 %v3491_v55, %v2922_v54  ;;  %v2978_v8 = vld [vmem:[%s5347_s1 + $0x5b0] sm:$0xf]  ;;  %v2915_v12 = vor.u32 %v3489_v7, %v2914_v6 }
  0x3b   :  { %1684 = vmatpush.bf16.msrb.mxu3 %v2715_v49  ;;  %v2794_v49 = vld [vmem:[%s5347_s1 + $0x440] sm:$0xf]  ;;  %v2995_v52 = vor.u32 %v3509_v45, %v2994_v44  ;;  %v3503_v24 = vld [vmem:[%s5347_s1 + $0x5a4] sm:$0xf0]  ;;  %v2770_v29 = vld [vmem:[%s5347_s1 + $0x410] sm:$0xf] }
  0x3c   :  { %1646 = vmatpush.bf16.msrb.mxu0 %v2515_v56  ;;  %v2986_v56 = vld [vmem:[%s5347_s1 + $0x5c0] sm:$0xf]  ;;  %v2795_v58 = vor.u32 %v3459_v50, %v2794_v49  ;;  %v3453_v30 = vld [vmem:[%s5347_s1 + $0x414] sm:$0xf0]  ;;  %v2834_v31 = vld [vmem:[%s5347_s1 + $0x490] sm:$0xf] }
  0x3d   :  { %1659 = vmatpush.bf16.msrb.mxu1 %v2579_v62  ;;  %v2786_v62 = vld [vmem:[%s5347_s1 + $0x430] sm:$0xf]  ;;  %v2987_v4 = vor.u32 %v3507_v57, %v2986_v56  ;;  %v2842_v15 = vld [vmem:[%s5347_s1 + $0x4a0] sm:$0xf]  ;;  %v3469_v33 = vld [vmem:[%s5347_s1 + $0x494] sm:$0xf0]  ;;  %v2771_v38 = vor.u32 %v3453_v30, %v2770_v29 }
  0x3e   :  { %1672 = vmatpush.bf16.msrb.mxu2 %v2643_v63  ;;  %v3457_v63 = vld [vmem:[%s5347_s1 + $0x434] sm:$0xf0]  ;;  %v2762_v39 = vld [vmem:[%s5347_s1 + $0x400] sm:$0xf]  ;;  %v2835_v41 = vor.u32 %v3469_v33, %v2834_v31  ;;  %v3467_v44 = vld [vmem:[%s5347_s1 + $0x484] sm:$0xf0] }
  0x3f   :  { %1685 = vmatpush.bf16.msrb.mxu3 %v2707_v3  ;;  %v2850_v3 = vld [vmem:[%s5347_s1 + $0x4b0] sm:$0xf]  ;;  %v2787_v10 = vor.u32 %v3457_v63, %v2786_v62  ;;  %v3501_v37 = vld [vmem:[%s5347_s1 + $0x594] sm:$0xf0]  ;;  %v2826_v43 = vld [vmem:[%s5347_s1 + $0x480] sm:$0xf] }
  0x40   :  { %1647 = vmatpush.bf16.msrb.mxu0 %v2507_v9  ;;  %v3505_v9 = vld [vmem:[%s5347_s1 + $0x5b4] sm:$0xf0]  ;;  %v2851_v11 = vor.u32 %v3473_v5, %v2850_v3  ;;  %v2890_v45 = vld [vmem:[%s5347_s1 + $0x500] sm:$0xf]  ;;  %v3499_v49 = vld [vmem:[%s5347_s1 + $0x584] sm:$0xf0]  ;;  %v2827_v57 = vor.u32 %v3467_v44, %v2826_v43 }
  0x41   :  { %1660 = vmatpush.bf16.msrb.mxu1 %v2571_v13  ;;  %v2778_v13 = vld [vmem:[%s5347_s1 + $0x420] sm:$0xf]  ;;  %v2979_v16 = vor.u32 %v3505_v9, %v2978_v8  ;;  %v3074_v50 = vld [vmem:[%s5347_s1 + $0x670] sm:$0xf]  ;;  %v3529_v51 = vld [vmem:[%s5347_s1 + $0x674] sm:$0xf0] }
  0x42   :  { %1673 = vmatpush.bf16.msrb.mxu2 %v2635_v14  ;;  %v3455_v14 = vld [vmem:[%s5347_s1 + $0x424] sm:$0xf0]  ;;  %v3545_v54 = vld [vmem:[%s5347_s1 + $0x6f4] sm:$0xf0]  ;;  %v3202_v55 = vld [vmem:[%s5347_s1 + $0x770] sm:$0xf]  ;;  %v3075_v63 = vor.u32 %v3529_v51, %v3074_v50 }
  0x43   :  { %1686 = vmatpush.bf16.msrb.mxu3 %v2699_v17  ;;  %1648 = vmatmul.bf16.vlgmr.msrb.gmra.mxu0 %v4045_v0  ;;  %v3471_v17 = vld [vmem:[%s5347_s1 + $0x4a4] sm:$0xf0]  ;;  %v2779_v25 = vor.u32 %v3455_v14, %v2778_v13  ;;  %v3561_v56 = vld [vmem:[%s5347_s1 + $0x774] sm:$0xf0]  ;;  %v3066_v5 = vld [vmem:[%s5347_s1 + $0x660] sm:$0xf] }
  0x44   :  { %1692 = vmatpush.bf16.msra.mxu0 %v2819_v18  ;;  %1661 = vmatmul.bf16.vlgmr.msrb.gmra.mxu1 %v4049_v2  ;;  %v2906_v18 = vld [vmem:[%s5347_s1 + $0x520] sm:$0xf]  ;;  %v2843_v27 = vor.u32 %v3471_v17, %v2842_v15  ;;  %v3527_v6 = vld [vmem:[%s5347_s1 + $0x664] sm:$0xf0]  ;;  %v304_v15 = vld [vmem:[#allocation1 + $0x12] sm:$0xff] }
  0x45   :  { %1705 = vmatpush.bf16.msra.mxu1 %v2883_v19  ;;  %1674 = vmatmul.bf16.vlgmr.msrb.gmra.mxu2 %v4043_v61  ;;  %v3487_v19 = vld [vmem:[%s5347_s1 + $0x524] sm:$0xf0]  ;;  %v3130_v7 = vld [vmem:[%s5347_s1 + $0x6e0] sm:$0xf]  ;;  %v3541_v29 = vld [vmem:[%s5347_s1 + $0x6d4] sm:$0xf0] }
  0x46   :  { %1718 = vmatpush.bf16.msra.mxu2 %v2947_v23  ;;  %1687 = vmatmul.bf16.vlgmr.msrb.gmra.mxu3 %v4047_v1  ;;  %v2970_v23 = vld [vmem:[%s5347_s1 + $0x5a0] sm:$0xf]  ;;  %v3543_v9 = vld [vmem:[%s5347_s1 + $0x6e4] sm:$0xf0]  ;;  %v3186_v30 = vld [vmem:[%s5347_s1 + $0x750] sm:$0xf] }
  0x47   :  { %1731 = vmatpush.bf16.msra.mxu3 %v3011_v28  ;;  %v2907_v28 = vor.u32 %v3487_v19, %v2906_v18  ;;  %v2971_v32 = vor.u32 %v3503_v24, %v2970_v23  ;;  %v3242_v13 = vld [vmem:[%s5347_s1 + $0x7c0] sm:$0xf]  ;;  %v3571_v14 = vld [vmem:[%s5347_s1 + $0x7c4] sm:$0xf0]  ;;  %v3067_v18 = vor.u32 %v3527_v6, %v3066_v5  ;;  %v3131_v19 = vor.u32 %v3543_v9, %v3130_v7  ;;  %v3058_v24 = vld [vmem:[%s5347_s1 + $0x650] sm:$0xf] }
  0x48   :  { %1693 = vmatpush.bf16.msra.mxu0 %v2811_v34  ;;  %v2898_v34 = vld [vmem:[%s5347_s1 + $0x510] sm:$0xf]  ;;  %v305_v17 = vld [vmem:[#allocation1 + $0x1b] sm:$0xff]  ;;  %v3555_v43 = vld [vmem:[%s5347_s1 + $0x744] sm:$0xf0] }
  0x49   :  { %1706 = vmatpush.bf16.msra.mxu1 %v2875_v35  ;;  %v3485_v35 = vld [vmem:[%s5347_s1 + $0x514] sm:$0xf0]  ;;  %v3226_v44 = vld [vmem:[%s5347_s1 + $0x7a0] sm:$0xf]  ;;  %v3106_v51 = vld [vmem:[%s5347_s1 + $0x6b0] sm:$0xf] }
  0x4a   :  { %1719 = vmatpush.bf16.msra.mxu2 %v2939_v36  ;;  %v2962_v36 = vld [vmem:[%s5347_s1 + $0x590] sm:$0xf]  ;;  %v2899_v42 = vor.u32 %v3485_v35, %v2898_v34  ;;  %v3557_v31 = vld [vmem:[%s5347_s1 + $0x754] sm:$0xf0]  ;;  %v3535_v5 = vld [vmem:[%s5347_s1 + $0x6a4] sm:$0xf0] }
  0x4b   :  { %1732 = vmatpush.bf16.msra.mxu3 %v3003_v40  ;;  %v3451_v40 = vld [vmem:[%s5347_s1 + $0x404] sm:$0xf0]  ;;  %v3569_v33 = vld [vmem:[%s5347_s1 + $0x7b4] sm:$0xf0]  ;;  %v3162_v6 = vld [vmem:[%s5347_s1 + $0x720] sm:$0xf] }
  0x4c   :  { %1694 = vmatpush.bf16.msra.mxu0 %v2803_v46  ;;  %v2963_v46 = vor.u32 %v3501_v37, %v2962_v36  ;;  %v2763_v53 = vor.u32 %v3451_v40, %v2762_v39  ;;  %v3187_v36 = vor.u32 %v3557_v31, %v3186_v30  ;;  %v3050_v37 = vld [vmem:[%s5347_s1 + $0x640] sm:$0xf]  ;;  %v3521_v50 = vld [vmem:[%s5347_s1 + $0x634] sm:$0xf0]  ;;  %v3551_v7 = vld [vmem:[%s5347_s1 + $0x724] sm:$0xf0] }
  0x4d   :  { %1707 = vmatpush.bf16.msra.mxu1 %v2867_v47  ;;  %v3483_v47 = vld [vmem:[%s5347_s1 + $0x504] sm:$0xf0]  ;;  %v3114_v39 = vld [vmem:[%s5347_s1 + $0x6c0] sm:$0xf] }
  0x4e   :  { %1720 = vmatpush.bf16.msra.mxu2 %v2931_v48  ;;  %v2954_v48 = vld [vmem:[%s5347_s1 + $0x580] sm:$0xf]  ;;  %v3563_v9 = vld [vmem:[%s5347_s1 + $0x784] sm:$0xf0] }
  0x4f   :  { %1733 = vmatpush.bf16.msra.mxu3 %v2995_v52  ;;  %v3138_v52 = vld [vmem:[%s5347_s1 + $0x6f0] sm:$0xf]  ;;  %v2955_v62 = vor.u32 %v3499_v49, %v2954_v48  ;;  %v3018_v30 = vld [vmem:[%s5347_s1 + $0x600] sm:$0xf]  ;;  %v3515_v31 = vld [vmem:[%s5347_s1 + $0x604] sm:$0xf0] }
  0x50   :  { %1695 = vmatpush.bf16.msra.mxu0 %v2795_v58  ;;  %v2891_v58 = vor.u32 %v3483_v47, %v2890_v45  ;;  %v3139_v3 = vor.u32 %v3545_v54, %v3138_v52  ;;  %v3567_v45 = vld [vmem:[%s5347_s1 + $0x7a4] sm:$0xf0]  ;;  %v3042_v49 = vld [vmem:[%s5347_s1 + $0x630] sm:$0xf] }
  0x51   :  { %1708 = vmatpush.bf16.msra.mxu1 %v2859_v59  ;;  %v3250_v59 = vld [vmem:[%s5347_s1 + $0x7d0] sm:$0xf]  ;;  %v3227_v52 = vor.u32 %v3567_v45, %v3226_v44  ;;  %v309_v44 = vld [vmem:[#allocation1 + $0x3f] sm:$0xff]  ;;  %v3019_v45 = vor.u32 %v3515_v31, %v3018_v30  ;;  %v2412_v30 = vld [vmem:[%s5347_s1 + $0x148] sm:$0xf0] }
  0x52   :  { %1721 = vmatpush.bf16.msra.mxu2 %v2923_v60  ;;  %v3573_v60 = vld [vmem:[%s5347_s1 + $0x7d4] sm:$0xf0]  ;;  %v3170_v54 = vld [vmem:[%s5347_s1 + $0x730] sm:$0xf]  ;;  %v2268_v31 = vld [vmem:[%s5347_s1 + $0x28] sm:$0xf0] }
  0x53   :  { %1734 = vmatpush.bf16.msra.mxu3 %v2987_v4  ;;  %v3203_v4 = vor.u32 %v3561_v56, %v3202_v55  ;;  %v3251_v8 = vor.u32 %v3573_v60, %v3250_v59  ;;  %v3553_v55 = vld [vmem:[%s5347_s1 + $0x734] sm:$0xf0]  ;;  %v3218_v56 = vld [vmem:[%s5347_s1 + $0x790] sm:$0xf] }
  0x54   :  { %1696 = vmatpush.bf16.msra.mxu0 %v2787_v10  ;;  %v3194_v10 = vld [vmem:[%s5347_s1 + $0x760] sm:$0xf]  ;;  %v3171_v60 = vor.u32 %v3553_v55, %v3170_v54  ;;  %v3350_v54 = vld [vmem:[%s5347_s1 + $0xe4] sm:$0xf] }
  0x55   :  { %1709 = vmatpush.bf16.msra.mxu1 %v2851_v11  ;;  %v3559_v11 = vld [vmem:[%s5347_s1 + $0x764] sm:$0xf0] }
  0x56   :  { %1722 = vmatpush.bf16.msra.mxu2 %v2915_v12  ;;  %v302_v12 = vld [vmem:[#allocation1] sm:$0xff]  ;;  %v3195_v23 = vor.u32 %v3559_v11, %v3194_v10  ;;  %v3336_v11 = vld [vmem:[%s5347_s1 + $0x74] sm:$0xf] }
  0x57   :  { %1735 = vmatpush.bf16.msra.mxu3 %v2979_v16  ;;  %v303_v16 = vld [vmem:[#allocation1 + $0x9] sm:$0xff] }
  0x58   :  { %1697 = vmatpush.bf16.msra.mxu0 %v2779_v25  ;;  %v3525_v25 = vld [vmem:[%s5347_s1 + $0x654] sm:$0xf0] }
  0x59   :  { %1710 = vmatpush.bf16.msra.mxu1 %v2843_v27  ;;  %v3122_v27 = vld [vmem:[%s5347_s1 + $0x6d0] sm:$0xf]  ;;  %v3059_v34 = vor.u32 %v3525_v25, %v3058_v24  ;;  %v3549_v24 = vld [vmem:[%s5347_s1 + $0x714] sm:$0xf0] }
  0x5a   :  { %1723 = vmatpush.bf16.msra.mxu2 %v2907_v28  ;;  %v3243_v28 = vor.u32 %v3571_v14, %v3242_v13  ;;  %v3123_v35 = vor.u32 %v3541_v29, %v3122_v27  ;;  %v3163_v14 = vor.u32 %v3551_v7, %v3162_v6  ;;  %v3334_v27 = vld [vmem:[%s5347_s1 + $0x64] sm:$0xf] }
  0x5b   :  { %1736 = vmatpush.bf16.msra.mxu3 %v2971_v32  ;;  %v3234_v32 = vld [vmem:[%s5347_s1 + $0x7b0] sm:$0xf] }
  0x5c   :  { %1698 = vmatpush.bf16.msra.mxu0 %v2771_v38  ;;  %v3523_v38 = vld [vmem:[%s5347_s1 + $0x644] sm:$0xf0]  ;;  %v3235_v40 = vor.u32 %v3569_v33, %v3234_v32  ;;  %v3082_v32 = vld [vmem:[%s5347_s1 + $0x680] sm:$0xf] }
  0x5d   :  { %1711 = vmatpush.bf16.msra.mxu1 %v2835_v41  ;;  %v3539_v41 = vld [vmem:[%s5347_s1 + $0x6c4] sm:$0xf0] }
  0x5e   :  { %1724 = vmatpush.bf16.msra.mxu2 %v2899_v42  ;;  %v3178_v42 = vld [vmem:[%s5347_s1 + $0x740] sm:$0xf]  ;;  %v3115_v47 = vor.u32 %v3539_v41, %v3114_v39  ;;  %v3352_v39 = vld [vmem:[%s5347_s1 + $0xf4] sm:$0xf] }
  0x5f   :  { %1737 = vmatpush.bf16.msra.mxu3 %v2963_v46  ;;  %v3051_v46 = vor.u32 %v3523_v38, %v3050_v37  ;;  %v3179_v48 = vor.u32 %v3555_v43, %v3178_v42  ;;  %v3547_v37 = vld [vmem:[%s5347_s1 + $0x704] sm:$0xf0]  ;;  %v3332_v38 = vld [vmem:[%s5347_s1 + $0x54] sm:$0xf]  ;;  %v2436_v43 = vld [vmem:[%s5347_s1 + $0x178] sm:$0xf0] }
  0x60   :  { %1699 = vmatpush.bf16.msra.mxu0 %v2763_v53  ;;  %v3537_v53 = vld [vmem:[%s5347_s1 + $0x6b4] sm:$0xf0]  ;;  %v3368_v42 = vld [vmem:[%s5347_s1 + $0x174] sm:$0xf] }
  0x61   :  { %1712 = vmatpush.bf16.msra.mxu1 %v2827_v57  ;;  %v3565_v57 = vld [vmem:[%s5347_s1 + $0x794] sm:$0xf0]  ;;  %v3107_v59 = vor.u32 %v3537_v53, %v3106_v51  ;;  %v3330_v53 = vld [vmem:[%s5347_s1 + $0x44] sm:$0xf] }
  0x62   :  { %1725 = vmatpush.bf16.msra.mxu2 %v2891_v58  ;;  %v3043_v58 = vor.u32 %v3521_v50, %v3042_v49 }
  0x63   :  { %1738 = vmatpush.bf16.msra.mxu3 %v2955_v62  ;;  %1700 = vmatmul.bf16.vlgmr.msra.gmra.mxu0 %v302_v12  ;;  %v3034_v62 = vld [vmem:[%s5347_s1 + $0x620] sm:$0xf]  ;;  %v2308_v12 = vld [vmem:[%s5347_s1 + $0x78] sm:$0xf0] }
  0x64   :  { %1744 = vmatpush.bf16.msrb.mxu0 %v3075_v63  ;;  %1713 = vmatmul.bf16.vlgmr.msra.gmra.mxu1 %v303_v16  ;;  %v3519_v63 = vld [vmem:[%s5347_s1 + $0x624] sm:$0xf0]  ;;  %v3517_v16 = vld [vmem:[%s5347_s1 + $0x614] sm:$0xf0]  ;;  %v2311_v25 = vor.u32 %v3336_v11, %v2308_v12  ;;  %v2356_v12 = vld [vmem:[%s5347_s1 + $0xd8] sm:$0xf0] }
  0x65   :  { %1757 = vmatpush.bf16.msrb.mxu1 %v3139_v3  ;;  %1726 = vmatmul.bf16.vlgmr.msra.gmra.mxu2 %v304_v15  ;;  %v3098_v3 = vld [vmem:[%s5347_s1 + $0x6a0] sm:$0xf]  ;;  %v3035_v10 = vor.u32 %v3519_v63, %v3034_v62  ;;  %v3026_v15 = vld [vmem:[%s5347_s1 + $0x610] sm:$0xf]  ;;  %v3382_v62 = vld [vmem:[%s5347_s1 + $0x1e4] sm:$0xf] }
  0x66   :  { %1770 = vmatpush.bf16.msrb.mxu2 %v3203_v4  ;;  %1739 = vmatmul.bf16.vlgmr.msra.gmra.mxu3 %v305_v17  ;;  %v3219_v4 = vor.u32 %v3565_v57, %v3218_v56  ;;  %v3099_v13 = vor.u32 %v3535_v5, %v3098_v3  ;;  %v3090_v17 = vld [vmem:[%s5347_s1 + $0x690] sm:$0xf]  ;;  %v3027_v29 = vor.u32 %v3517_v16, %v3026_v15  ;;  %v2364_v57 = vld [vmem:[%s5347_s1 + $0xe8] sm:$0xf0]  ;;  %v306_v3 = vld [vmem:[#allocation1 + $0x24] sm:$0xff] }
  0x67   :  { %1785 = vmatpush.bf16.msrb.mxu3 %v3251_v8  ;;  %v3210_v8 = vld [vmem:[%s5347_s1 + $0x780] sm:$0xf]  ;;  %v2492_v63 = vld [vmem:[%s5347_s1 + $0x1e8] sm:$0xf0]  ;;  %v2367_v6 = vor.u32 %v3350_v54, %v2364_v57  ;;  %v2276_v15 = vld [vmem:[%s5347_s1 + $0x38] sm:$0xf0] }
  0x68   :  { %1745 = vmatpush.bf16.msrb.mxu0 %v3067_v18  ;;  %v3211_v18 = vor.u32 %v3563_v9, %v3210_v8  ;;  %v307_v5 = vld [vmem:[#allocation1 + $0x2d] sm:$0xff]  ;;  %v2495_v11 = vor.u32 %v3382_v62, %v2492_v63 }
  0x69   :  { %1758 = vmatpush.bf16.msrb.mxu1 %v3131_v19  ;;  %v3533_v19 = vld [vmem:[%s5347_s1 + $0x694] sm:$0xf0]  ;;  %v3328_v8 = vld [vmem:[%s5347_s1 + $0x34] sm:$0xf]  ;;  %v2396_v54 = vld [vmem:[%s5347_s1 + $0x128] sm:$0xf0] }
  0x6a   :  { %1771 = vmatpush.bf16.msrb.mxu2 %v3195_v23  ;;  %v3154_v23 = vld [vmem:[%s5347_s1 + $0x710] sm:$0xf]  ;;  %v3091_v33 = vor.u32 %v3533_v19, %v3090_v17  ;;  %v3348_v9 = vld [vmem:[%s5347_s1 + $0xd4] sm:$0xf]  ;;  %v2484_v17 = vld [vmem:[%s5347_s1 + $0x1d8] sm:$0xf0] }
  0x6b   :  { %1786 = vmatpush.bf16.msrb.mxu3 %v3243_v28  ;;  %v2300_v28 = vld [vmem:[%s5347_s1 + $0x68] sm:$0xf0]  ;;  %v3380_v16 = vld [vmem:[%s5347_s1 + $0x1d4] sm:$0xf] }
  0x6c   :  { %1746 = vmatpush.bf16.msrb.mxu0 %v3059_v34  ;;  %v3155_v34 = vor.u32 %v3549_v24, %v3154_v23  ;;  %v2303_v41 = vor.u32 %v3334_v27, %v2300_v28  ;;  %v3326_v23 = vld [vmem:[%s5347_s1 + $0x24] sm:$0xf]  ;;  %v2487_v27 = vor.u32 %v3380_v16, %v2484_v17  ;;  %v2348_v28 = vld [vmem:[%s5347_s1 + $0xc8] sm:$0xf0]  ;;  %v3340_v63 = vld [vmem:[%s5347_s1 + $0x94] sm:$0xf] }
  0x6d   :  { %1759 = vmatpush.bf16.msrb.mxu1 %v3123_v35  ;;  %v3531_v35 = vld [vmem:[%s5347_s1 + $0x684] sm:$0xf0]  ;;  %v3346_v24 = vld [vmem:[%s5347_s1 + $0xc4] sm:$0xf]  ;;  %v2460_v57 = vld [vmem:[%s5347_s1 + $0x1a8] sm:$0xf0] }
  0x6e   :  { %1772 = vmatpush.bf16.msrb.mxu2 %v3187_v36  ;;  %v3146_v36 = vld [vmem:[%s5347_s1 + $0x700] sm:$0xf]  ;;  %v3083_v49 = vor.u32 %v3531_v35, %v3082_v32  ;;  %v3378_v32 = vld [vmem:[%s5347_s1 + $0x1c4] sm:$0xf]  ;;  %v2316_v16 = vld [vmem:[%s5347_s1 + $0x88] sm:$0xf0] }
  0x6f   :  { %1787 = vmatpush.bf16.msrb.mxu3 %v3235_v40  ;;  %v2372_v40 = vld [vmem:[%s5347_s1 + $0xf8] sm:$0xf0]  ;;  %v3147_v50 = vor.u32 %v3547_v37, %v3146_v36  ;;  %v3324_v36 = vld [vmem:[%s5347_s1 + $0x14] sm:$0xf]  ;;  %v3354_v17 = vld [vmem:[%s5347_s1 + $0x104] sm:$0xf] }
  0x70   :  { %1747 = vmatpush.bf16.msrb.mxu0 %v3051_v46  ;;  %v2292_v46 = vld [vmem:[%s5347_s1 + $0x58] sm:$0xf0]  ;;  %v2375_v51 = vor.u32 %v3352_v39, %v2372_v40  ;;  %v3344_v37 = vld [vmem:[%s5347_s1 + $0xb4] sm:$0xf] }
  0x71   :  { %1760 = vmatpush.bf16.msrb.mxu1 %v3115_v47  ;;  %v3384_v47 = vld [vmem:[%s5347_s1 + $0x1f4] sm:$0xf]  ;;  %v2295_v55 = vor.u32 %v3332_v38, %v2292_v46  ;;  %v2271_v38 = vor.u32 %v3326_v23, %v2268_v31  ;;  %v2340_v40 = vld [vmem:[%s5347_s1 + $0xb8] sm:$0xf0]  ;;  %v3370_v23 = vld [vmem:[%s5347_s1 + $0x184] sm:$0xf] }
  0x72   :  { %1773 = vmatpush.bf16.msrb.mxu2 %v3179_v48  ;;  %v2500_v48 = vld [vmem:[%s5347_s1 + $0x1f8] sm:$0xf0]  ;;  %v2343_v46 = vor.u32 %v3344_v37, %v2340_v40  ;;  %v3432_v31 = vld [vmem:[%s5347_s1 + $0x374] sm:$0xf] }
  0x73   :  { %1788 = vmatpush.bf16.msrb.mxu3 %v3227_v52  ;;  %v2439_v52 = vor.u32 %v3368_v42, %v2436_v43  ;;  %v2503_v56 = vor.u32 %v3384_v47, %v2500_v48  ;;  %v2404_v42 = vld [vmem:[%s5347_s1 + $0x138] sm:$0xf0]  ;;  %v3322_v48 = vld [vmem:[%s5347_s1 + $0x4] sm:$0xf] }
  0x74   :  { %1748 = vmatpush.bf16.msrb.mxu0 %v3043_v58  ;;  %v3366_v58 = vld [vmem:[%s5347_s1 + $0x164] sm:$0xf]  ;;  %v2260_v43 = vld [vmem:[%s5347_s1 + $0x18] sm:$0xf0] }
  0x75   :  { %1761 = vmatpush.bf16.msrb.mxu1 %v3107_v59  ;;  %v2428_v59 = vld [vmem:[%s5347_s1 + $0x168] sm:$0xf0] }
  0x76   :  { %1774 = vmatpush.bf16.msrb.mxu2 %v3171_v60  ;;  %v2284_v60 = vld [vmem:[%s5347_s1 + $0x48] sm:$0xf0]  ;;  %v2431_v7 = vor.u32 %v3366_v58, %v2428_v59  ;;  %v3400_v58 = vld [vmem:[%s5347_s1 + $0x274] sm:$0xf]  ;;  %v2564_v59 = vld [vmem:[%s5347_s1 + $0x278] sm:$0xf0] }
  0x77   :  { %1789 = vmatpush.bf16.msrb.mxu3 %v3219_v4  ;;  %v308_v4 = vld [vmem:[#allocation1 + $0x36] sm:$0xff] }
  0x78   :  { %1749 = vmatpush.bf16.msrb.mxu0 %v3035_v10  ;;  %v2287_v10 = vor.u32 %v3330_v53, %v2284_v60  ;;  %v3358_v53 = vld [vmem:[%s5347_s1 + $0x124] sm:$0xf] }
  0x79   :  { %1762 = vmatpush.bf16.msrb.mxu1 %v3099_v13  ;;  %v3364_v13 = vld [vmem:[%s5347_s1 + $0x154] sm:$0xf]  ;;  %v2399_v62 = vor.u32 %v3358_v53, %v2396_v54  ;;  %v2612_v54 = vld [vmem:[%s5347_s1 + $0x2d8] sm:$0xf0] }
  0x7a   :  { %1775 = vmatpush.bf16.msrb.mxu2 %v3163_v14  ;;  %v2420_v14 = vld [vmem:[%s5347_s1 + $0x158] sm:$0xf0]  ;;  %v3412_v53 = vld [vmem:[%s5347_s1 + $0x2d4] sm:$0xf] }
  0x7b   :  { %1790 = vmatpush.bf16.msrb.mxu3 %v3211_v18  ;;  %v2359_v18 = vor.u32 %v3348_v9, %v2356_v12  ;;  %v2423_v19 = vor.u32 %v3364_v13, %v2420_v14  ;;  %v3372_v9 = vld [vmem:[%s5347_s1 + $0x194] sm:$0xf]  ;;  %v2556_v12 = vld [vmem:[%s5347_s1 + $0x268] sm:$0xf0] }
  0x7c   :  { %1750 = vmatpush.bf16.msrb.mxu0 %v3027_v29  ;;  %v3362_v29 = vld [vmem:[%s5347_s1 + $0x144] sm:$0xf] }
  0x7d   :  { %1763 = vmatpush.bf16.msrb.mxu1 %v3091_v33  ;;  %v2476_v33 = vld [vmem:[%s5347_s1 + $0x1c8] sm:$0xf0]  ;;  %v2415_v35 = vor.u32 %v3362_v29, %v2412_v30  ;;  %v2628_v29 = vld [vmem:[%s5347_s1 + $0x2f8] sm:$0xf0] }
  0x7e   :  { %1776 = vmatpush.bf16.msrb.mxu2 %v3155_v34  ;;  %3256 = vmatmul.msk.bf16.vlgmr.msrb.gmra.mxu3 %vm1585_vm0, %v309_v44  ;;  %v2351_v34 = vor.u32 %v3346_v24, %v2348_v28  ;;  %v2479_v39 = vor.u32 %v3378_v32, %v2476_v33  ;;  %v3376_v44 = vld [vmem:[%s5347_s1 + $0x1b4] sm:$0xf]  ;;  %v2444_v24 = vld [vmem:[%s5347_s1 + $0x188] sm:$0xf0]  ;;  %v2548_v30 = vld [vmem:[%s5347_s1 + $0x258] sm:$0xf0] }
  0x7f   :  { %1796 = vmatpush.bf16.msra.mxu3 %v2311_v25  ;;  %v2279_v25 = vor.u32 %v3328_v8, %v2276_v15  ;;  %v2567_v8 = vor.u32 %v3400_v58, %v2564_v59  ;;  %v3338_v15 = vld [vmem:[%s5347_s1 + $0x84] sm:$0xf]  ;;  %v3416_v28 = vld [vmem:[%s5347_s1 + $0x2f4] sm:$0xf]  ;;  %v2692_v32 = vld [vmem:[%s5347_s1 + $0x378] sm:$0xf0]  ;;  %v2447_v37 = vor.u32 %v3370_v23, %v2444_v24 }
  0x80   :  { %1751 = vmatpush.bf16.msrb.mxu0 %v3019_v45  ;;  %v2468_v45 = vld [vmem:[%s5347_s1 + $0x1b8] sm:$0xf0]  ;;  %v2319_v33 = vor.u32 %v3338_v15, %v2316_v16  ;;  %v2695_v40 = vor.u32 %v3432_v31, %v2692_v32  ;;  %v3444_v59 = vld [vmem:[%s5347_s1 + $0x3d4] sm:$0xf]  ;;  %v3406_v32 = vld [vmem:[%s5347_s1 + $0x2a4] sm:$0xf] }
  0x81   :  { %1764 = vmatpush.bf16.msrb.mxu1 %v3083_v49  ;;  %v3342_v49 = vld [vmem:[%s5347_s1 + $0xa4] sm:$0xf]  ;;  %v2676_v58 = vld [vmem:[%s5347_s1 + $0x358] sm:$0xf0]  ;;  %v3440_v23 = vld [vmem:[%s5347_s1 + $0x3b4] sm:$0xf] }
  0x82   :  { %1777 = vmatpush.bf16.msrb.mxu2 %v3147_v50  ;;  %v2263_v50 = vor.u32 %v3324_v36, %v2260_v43  ;;  %v2756_v36 = vld [vmem:[%s5347_s1 + $0x3f8] sm:$0xf0]  ;;  %v2620_v43 = vld [vmem:[%s5347_s1 + $0x2e8] sm:$0xf0] }
  0x83   :  { %1797 = vmatpush.bf16.msra.mxu3 %v2303_v41  ;;  %1752 = vmatmul.bf16.vlgmr.msrb.gmra.mxu0 %v306_v3  ;;  %v3360_v41 = vld [vmem:[%s5347_s1 + $0x134] sm:$0xf]  ;;  %v2596_v15 = vld [vmem:[%s5347_s1 + $0x2b8] sm:$0xf0] }
  0x84   :  { %1809 = vmatpush.bf16.msra.mxu0 %v2375_v51  ;;  %1765 = vmatmul.bf16.vlgmr.msrb.gmra.mxu1 %v307_v5  ;;  %v2407_v47 = vor.u32 %v3360_v41, %v2404_v42  ;;  %v2471_v51 = vor.u32 %v3376_v44, %v2468_v45  ;;  %v2324_v5 = vld [vmem:[%s5347_s1 + $0x98] sm:$0xf0]  ;;  %v3394_v41 = vld [vmem:[%s5347_s1 + $0x244] sm:$0xf] }
  0x85   :  { %1822 = vmatpush.bf16.msra.mxu1 %v2439_v52  ;;  %1778 = vmatmul.bf16.vlgmr.msrb.gmra.mxu2 %v308_v4  ;;  %v2332_v52 = vld [vmem:[%s5347_s1 + $0xa8] sm:$0xf0]  ;;  %v2327_v13 = vor.u32 %v3340_v63, %v2324_v5  ;;  %v3414_v42 = vld [vmem:[%s5347_s1 + $0x2e4] sm:$0xf]  ;;  %v2724_v24 = vld [vmem:[%s5347_s1 + $0x3b8] sm:$0xf0] }
  0x86   :  { %1835 = vmatpush.bf16.msra.mxu2 %v2503_v56  ;;  %v3374_v56 = vld [vmem:[%s5347_s1 + $0x1a4] sm:$0xf]  ;;  %v2335_v60 = vor.u32 %v3342_v49, %v2332_v52  ;;  %v2623_v49 = vor.u32 %v3414_v42, %v2620_v43  ;;  %v3392_v52 = vld [vmem:[%s5347_s1 + $0x234] sm:$0xf]  ;;  %v2524_v5 = vld [vmem:[%s5347_s1 + $0x228] sm:$0xf0] }
  0x87   :  { %1798 = vmatpush.bf16.msra.mxu3 %v2295_v55  ;;  %v2252_v55 = vld [vmem:[%s5347_s1 + $0x8] sm:$0xf0]  ;;  %v2463_v4 = vor.u32 %v3374_v56, %v2460_v57  ;;  %v3430_v45 = vld [vmem:[%s5347_s1 + $0x364] sm:$0xf]  ;;  %v2532_v56 = vld [vmem:[%s5347_s1 + $0x238] sm:$0xf0] }
  0x88   :  { %1810 = vmatpush.bf16.msra.mxu0 %v2367_v6  ;;  %v2255_v3 = vor.u32 %v3322_v48, %v2252_v55  ;;  %v3356_v6 = vld [vmem:[%s5347_s1 + $0x114] sm:$0xf]  ;;  %v2748_v48 = vld [vmem:[%s5347_s1 + $0x3e8] sm:$0xf0]  ;;  %v2535_v63 = vor.u32 %v3392_v52, %v2532_v56 }
  0x89   :  { %1823 = vmatpush.bf16.msra.mxu1 %v2431_v7  ;;  %v2388_v7 = vld [vmem:[%s5347_s1 + $0x118] sm:$0xf0]  ;;  %v3428_v57 = vld [vmem:[%s5347_s1 + $0x354] sm:$0xf]  ;;  %v2812_v56 = vld [vmem:[%s5347_s1 + $0x468] sm:$0xf0] }
  0x8a   :  { %1836 = vmatpush.bf16.msra.mxu2 %v2495_v11  ;;  %v3398_v11 = vld [vmem:[%s5347_s1 + $0x264] sm:$0xf]  ;;  %v2391_v14 = vor.u32 %v3356_v6, %v2388_v7  ;;  %v2668_v7 = vld [vmem:[%s5347_s1 + $0x348] sm:$0xf0] }
  0x8b   :  { %1799 = vmatpush.bf16.msra.mxu3 %v2287_v10  ;;  %v2452_v10 = vld [vmem:[%s5347_s1 + $0x198] sm:$0xf0]  ;;  %v3426_v6 = vld [vmem:[%s5347_s1 + $0x344] sm:$0xf] }
  0x8c   :  { %1811 = vmatpush.bf16.msra.mxu0 %v2359_v18  ;;  %v2455_v18 = vor.u32 %v3372_v9, %v2452_v10  ;;  %v2732_v9 = vld [vmem:[%s5347_s1 + $0x3c8] sm:$0xf0] }
  0x8d   :  { %1824 = vmatpush.bf16.msra.mxu1 %v2423_v19  ;;  %v2380_v19 = vld [vmem:[%s5347_s1 + $0x108] sm:$0xf0] }
  0x8e   :  { %1837 = vmatpush.bf16.msra.mxu2 %v2487_v27  ;;  %v3396_v27 = vld [vmem:[%s5347_s1 + $0x254] sm:$0xf] }
  0x8f   :  { %1800 = vmatpush.bf16.msra.mxu3 %v2279_v25  ;;  %v2559_v25 = vor.u32 %v3398_v11, %v2556_v12  ;;  %v2671_v12 = vor.u32 %v3426_v6, %v2668_v7  ;;  %v2884_v6 = vld [vmem:[%s5347_s1 + $0x4f8] sm:$0xf0] }
  0x90   :  { %1812 = vmatpush.bf16.msra.mxu0 %v2351_v34  ;;  %v2383_v34 = vor.u32 %v3354_v17, %v2380_v19  ;;  %v2516_v17 = vld [vmem:[%s5347_s1 + $0x218] sm:$0xf0] }
  0x91   :  { %1825 = vmatpush.bf16.msra.mxu1 %v2415_v35  ;;  %v3448_v35 = vld [vmem:[%s5347_s1 + $0x3f4] sm:$0xf]  ;;  %v2660_v19 = vld [vmem:[%s5347_s1 + $0x338] sm:$0xf0] }
  0x92   :  { %1838 = vmatpush.bf16.msra.mxu2 %v2479_v39  ;;  %v2551_v39 = vor.u32 %v3396_v27, %v2548_v30  ;;  %v2759_v44 = vor.u32 %v3448_v35, %v2756_v36  ;;  %v2727_v35 = vor.u32 %v3440_v23, %v2724_v24  ;;  %v2652_v36 = vld [vmem:[%s5347_s1 + $0x328] sm:$0xf0] }
  0x93   :  { %1801 = vmatpush.bf16.msra.mxu3 %v2271_v38  ;;  %v2631_v38 = vor.u32 %v3416_v28, %v2628_v29  ;;  %v3386_v28 = vld [vmem:[%s5347_s1 + $0x204] sm:$0xf]  ;;  %v2508_v29 = vld [vmem:[%s5347_s1 + $0x208] sm:$0xf0] }
  0x94   :  { %1813 = vmatpush.bf16.msra.mxu0 %v2343_v46  ;;  %v2684_v46 = vld [vmem:[%s5347_s1 + $0x368] sm:$0xf0]  ;;  %v2511_v43 = vor.u32 %v3386_v28, %v2508_v29 }
  0x95   :  { %1826 = vmatpush.bf16.msra.mxu1 %v2407_v47  ;;  %v3446_v47 = vld [vmem:[%s5347_s1 + $0x3e4] sm:$0xf]  ;;  %v2876_v28 = vld [vmem:[%s5347_s1 + $0x4e8] sm:$0xf0] }
  0x96   :  { %1839 = vmatpush.bf16.msra.mxu2 %v2471_v51  ;;  %v2687_v51 = vor.u32 %v3430_v45, %v2684_v46  ;;  %v2751_v55 = vor.u32 %v3446_v47, %v2748_v48  ;;  %v2580_v45 = vld [vmem:[%s5347_s1 + $0x298] sm:$0xf0] }
  0x97   :  { %1802 = vmatpush.bf16.msra.mxu3 %v2263_v50 }
  0x98   :  { %1814 = vmatpush.bf16.msra.mxu0 %v2335_v60  ;;  %v2740_v60 = vld [vmem:[%s5347_s1 + $0x3d8] sm:$0xf0] }
  0x99   :  { %1827 = vmatpush.bf16.msra.mxu1 %v2399_v62  ;;  %v2615_v62 = vor.u32 %v3412_v53, %v2612_v54  ;;  %v2708_v54 = vld [vmem:[%s5347_s1 + $0x398] sm:$0xf0] }
  0x9a   :  { %1840 = vmatpush.bf16.msra.mxu2 %v2463_v4  ;;  %v3410_v4 = vld [vmem:[%s5347_s1 + $0x2c4] sm:$0xf] }
  0x9b   :  { %1803 = vmatpush.bf16.msra.mxu3 %v2255_v3  ;;  %v2679_v3 = vor.u32 %v3428_v57, %v2676_v58  ;;  %v3402_v58 = vld [vmem:[%s5347_s1 + $0x284] sm:$0xf] }
  0x9c   :  { %1815 = vmatpush.bf16.msra.mxu0 %v2327_v13  ;;  %v3388_v13 = vld [vmem:[%s5347_s1 + $0x214] sm:$0xf] }
  0x9d   :  { %1828 = vmatpush.bf16.msra.mxu1 %v2391_v14  ;;  %v3408_v14 = vld [vmem:[%s5347_s1 + $0x2b4] sm:$0xf]  ;;  %v2519_v30 = vor.u32 %v3388_v13, %v2516_v17 }
  0x9e   :  { %1841 = vmatpush.bf16.msra.mxu2 %v2455_v18  ;;  %1804 = vmatmul.bf16.vlgmr.msra.gmra.mxu3 %v3952_v21  ;;  %v2540_v21 = vld [vmem:[%s5347_s1 + $0x248] sm:$0xf0]  ;;  %v3424_v18 = vld [vmem:[%s5347_s1 + $0x334] sm:$0xf]  ;;  %v2599_v27 = vor.u32 %v3408_v14, %v2596_v15  ;;  %v2948_v14 = vld [vmem:[%s5347_s1 + $0x578] sm:$0xf0] }
  0x9f   :  { %1848 = vmatpush.bf16.msrb.mxu3 %v2567_v8  ;;  %v2543_v50 = vor.u32 %v3394_v41, %v2540_v21  ;;  %v3442_v8 = vld [vmem:[%s5347_s1 + $0x3c4] sm:$0xf]  ;;  %v2663_v31 = vor.u32 %v3424_v18, %v2660_v19  ;;  %v2820_v41 = vld [vmem:[%s5347_s1 + $0x478] sm:$0xf0]  ;;  %v3404_v21 = vld [vmem:[%s5347_s1 + $0x294] sm:$0xf] }
  0xa0   :  { %1816 = vmatpush.bf16.msra.mxu0 %v2319_v33  ;;  %v2735_v16 = vor.u32 %v3442_v8, %v2732_v9  ;;  %v2588_v33 = vld [vmem:[%s5347_s1 + $0x2a8] sm:$0xf0]  ;;  %v2583_v57 = vor.u32 %v3404_v21, %v2580_v45  ;;  %v3460_v8 = vld [vmem:[%s5347_s1 + $0x454] sm:$0xf]  ;;  %v2804_v9 = vld [vmem:[%s5347_s1 + $0x458] sm:$0xf0] }
  0xa1   :  { %1829 = vmatpush.bf16.msra.mxu1 %v2383_v34  ;;  %v3422_v34 = vld [vmem:[%s5347_s1 + $0x324] sm:$0xf]  ;;  %v2591_v42 = vor.u32 %v3406_v32, %v2588_v33  ;;  %v3512_v15 = vld [vmem:[%s5347_s1 + $0x5f4] sm:$0xf]  ;;  %v2807_v24 = vor.u32 %v3460_v8, %v2804_v9  ;;  %v2796_v33 = vld [vmem:[%s5347_s1 + $0x448] sm:$0xf0] }
  0xa2   :  { %1842 = vmatpush.bf16.msra.mxu2 %v2447_v37  ;;  %v3438_v37 = vld [vmem:[%s5347_s1 + $0x3a4] sm:$0xf]  ;;  %v3456_v21 = vld [vmem:[%s5347_s1 + $0x434] sm:$0xf]  ;;  %v2788_v45 = vld [vmem:[%s5347_s1 + $0x438] sm:$0xf0] }
  0xa3   :  { %1849 = vmatpush.bf16.msrb.mxu3 %v2559_v25  ;;  %1817 = vmatmul.bf16.vlgmr.msra.gmra.mxu0 %v3963_v26  ;;  %v3390_v26 = vld [vmem:[%s5347_s1 + $0x224] sm:$0xf]  ;;  %v4765_v25 = vld [vmem:[%s5349_s2] sm:$0x3]  ;;  %v1597_v46 = vpop.f32.mrf.mxu0  ;;  %v3504_v8 = vld [vmem:[%s5347_s1 + $0x5b4] sm:$0xf] }
  0xa4   :  { %1861 = vmatpush.bf16.msrb.mxu0 %v2631_v38  ;;  %1830 = vmatmul.bf16.vlgmr.msra.gmra.mxu1 %v3950_v20  ;;  %v2743_v20 = vor.u32 %v3444_v59, %v2740_v60  ;;  %v2527_v11 = vor.u32 %v3390_v26, %v2524_v5  ;;  %v286_v38 = vperm.slane %v4765_v25, 0  ;;  %v2572_v59 = vld [vmem:[%s5347_s1 + $0x288] sm:$0xf0]  ;;  %v3434_v26 = vld [vmem:[%s5347_s1 + $0x384] sm:$0xf] }
  0xa5   :  { %1874 = vmatpush.bf16.msrb.mxu1 %v2695_v40  ;;  %1843 = vmatmul.bf16.vlgmr.msra.gmra.mxu2 %v3954_v22  ;;  %v2604_v22 = vld [vmem:[%s5347_s1 + $0x2c8] sm:$0xf0]  ;;  %v3464_v40 = vld [vmem:[%s5347_s1 + $0x474] sm:$0xf]  ;;  %v2575_v13 = vor.u32 %v3402_v58, %v2572_v59  ;;  %v3458_v32 = vld [vmem:[%s5347_s1 + $0x444] sm:$0xf] }
  0xa6   :  { %1887 = vmatpush.bf16.msrb.mxu2 %v2759_v44  ;;  %v2607_v10 = vor.u32 %v3410_v4, %v2604_v22  ;;  %v2655_v44 = vor.u32 %v3422_v34, %v2652_v36  ;;  %v2823_v48 = vor.u32 %v3464_v40, %v2820_v41  ;;  %v1598_v52 = vadd.f32 %v1597_v46, %v286_v38  ;;  %v3480_v5 = vld [vmem:[%s5347_s1 + $0x4f4] sm:$0xf]  ;;  %v3494_v34 = vld [vmem:[%s5347_s1 + $0x564] sm:$0xf]  ;;  %v2868_v41 = vld [vmem:[%s5347_s1 + $0x4d8] sm:$0xf0] }
  0xa7   :  { %1850 = vmatpush.bf16.msrb.mxu3 %v2551_v39  ;;  %v2716_v39 = vld [vmem:[%s5347_s1 + $0x3a8] sm:$0xf0]  ;;  %v1610_v53 = vpop.f32.mrf.mxu1  ;;  %v2887_v18 = vor.u32 %v3480_v5, %v2884_v6  ;;  %v3510_v36 = vld [vmem:[%s5347_s1 + $0x5e4] sm:$0xf]  ;;  %v3476_v40 = vld [vmem:[%s5347_s1 + $0x4d4] sm:$0xf] }
  0xa8   :  { %1862 = vmatpush.bf16.msrb.mxu0 %v2623_v49  ;;  %v2719_v47 = vor.u32 %v3438_v37, %v2716_v39  ;;  %v3420_v49 = vld [vmem:[%s5347_s1 + $0x314] sm:$0xf]  ;;  %v1611_v60 = vadd.f32 %v1610_v53, %v1598_v52  ;;  %v3004_v37 = vld [vmem:[%s5347_s1 + $0x5e8] sm:$0xf0]  ;;  %v2799_v39 = vor.u32 %v3458_v32, %v2796_v33  ;;  %v3474_v52 = vld [vmem:[%s5347_s1 + $0x4c4] sm:$0xf] }
  0xa9   :  { %1875 = vmatpush.bf16.msrb.mxu1 %v2687_v51  ;;  %v3436_v51 = vld [vmem:[%s5347_s1 + $0x394] sm:$0xf]  ;;  %v2860_v53 = vld [vmem:[%s5347_s1 + $0x4c8] sm:$0xf0]  ;;  %v3506_v58 = vld [vmem:[%s5347_s1 + $0x5c4] sm:$0xf] }
  0xaa   :  { %1888 = vmatpush.bf16.msrb.mxu2 %v2751_v55  ;;  %v3462_v55 = vld [vmem:[%s5347_s1 + $0x464] sm:$0xf]  ;;  %v2711_v4 = vor.u32 %v3436_v51, %v2708_v54  ;;  %v1623_v7 = vpop.f32.mrf.mxu2  ;;  %v3492_v46 = vld [vmem:[%s5347_s1 + $0x554] sm:$0xf]  ;;  %v2871_v51 = vor.u32 %v3476_v40, %v2868_v41  ;;  %v2988_v59 = vld [vmem:[%s5347_s1 + $0x5c8] sm:$0xf0] }
  0xab   :  { %1851 = vmatpush.bf16.msrb.mxu3 %v2543_v50  ;;  %v2644_v50 = vld [vmem:[%s5347_s1 + $0x318] sm:$0xf0]  ;;  %v2815_v22 = vor.u32 %v3462_v55, %v2812_v56  ;;  %v1599_v23 = vpop.f32.mrf.mxu0  ;;  %v3490_v56 = vld [vmem:[%s5347_s1 + $0x544] sm:$0xf]  ;;  %v3488_v5 = vld [vmem:[%s5347_s1 + $0x534] sm:$0xf] }
  0xac   :  { %1863 = vmatpush.bf16.msrb.mxu0 %v2615_v62  ;;  %v2647_v62 = vor.u32 %v3420_v49, %v2644_v50  ;;  %v3508_v49 = vld [vmem:[%s5347_s1 + $0x5d4] sm:$0xf]  ;;  %v2996_v50 = vld [vmem:[%s5347_s1 + $0x5d8] sm:$0xf0]  ;;  %v2764_v23 = vld [vmem:[%s5347_s1 + $0x408] sm:$0xf0] }
  0xad   :  { %1876 = vmatpush.bf16.msrb.mxu1 %v2679_v3  ;;  %v2636_v3 = vld [vmem:[%s5347_s1 + $0x308] sm:$0xf0]  ;;  %v2999_v55 = vor.u32 %v3508_v49, %v2996_v50  ;;  %v2980_v9 = vld [vmem:[%s5347_s1 + $0x5b8] sm:$0xf0]  ;;  %v3528_v32 = vld [vmem:[%s5347_s1 + $0x674] sm:$0xf] }
  0xae   :  { %1889 = vmatpush.bf16.msrb.mxu2 %v2743_v20  ;;  %v2700_v20 = vld [vmem:[%s5347_s1 + $0x388] sm:$0xf0]  ;;  %v3076_v33 = vld [vmem:[%s5347_s1 + $0x678] sm:$0xf0]  ;;  %v3484_v41 = vld [vmem:[%s5347_s1 + $0x514] sm:$0xf] }
  0xaf   :  { %1852 = vmatpush.bf16.msrb.mxu3 %v2535_v63  ;;  %v3418_v63 = vld [vmem:[%s5347_s1 + $0x304] sm:$0xf]  ;;  %v1612_v29 = vpop.f32.mrf.mxu1  ;;  %v3068_v49 = vld [vmem:[%s5347_s1 + $0x668] sm:$0xf0] }
  0xb0   :  { %1864 = vmatpush.bf16.msrb.mxu0 %v2607_v10  ;;  %v3496_v10 = vld [vmem:[%s5347_s1 + $0x574] sm:$0xf]  ;;  %v2639_v17 = vor.u32 %v3418_v63, %v2636_v3  ;;  %v2852_v3 = vld [vmem:[%s5347_s1 + $0x4b8] sm:$0xf0]  ;;  %v3466_v50 = vld [vmem:[%s5347_s1 + $0x484] sm:$0xf] }
  0xb1   :  { %1877 = vmatpush.bf16.msrb.mxu1 %v2671_v12  ;;  %v1636_v12 = vpop.f32.mrf.mxu3  ;;  %v3472_v63 = vld [vmem:[%s5347_s1 + $0x4b4] sm:$0xf] }
  0xb2   :  { %1890 = vmatpush.bf16.msrb.mxu2 %v2735_v16  ;;  %v3012_v16 = vld [vmem:[%s5347_s1 + $0x5f8] sm:$0xf0] }
  0xb3   :  { %1853 = vmatpush.bf16.msrb.mxu3 %v2527_v11  ;;  %v1624_v11 = vadd.f32 %v1623_v7, %v1611_v60  ;;  %v2863_v60 = vor.u32 %v3474_v52, %v2860_v53  ;;  %v2916_v7 = vld [vmem:[%s5347_s1 + $0x538] sm:$0xf0] }
  0xb4   :  { %1865 = vmatpush.bf16.msrb.mxu0 %v2599_v27  ;;  %v3478_v27 = vld [vmem:[%s5347_s1 + $0x4e4] sm:$0xf] }
  0xb5   :  { %1878 = vmatpush.bf16.msrb.mxu1 %v2663_v31  ;;  %v4865_v19 = vadd.f32 %v1636_v12, %v1624_v11  ;;  %v3015_v31 = vor.u32 %v3512_v15, %v3012_v16  ;;  %v2879_v38 = vor.u32 %v3478_v27, %v2876_v28  ;;  %v2855_v12 = vor.u32 %v3472_v63, %v2852_v3  ;;  %v3470_v15 = vld [vmem:[%s5347_s1 + $0x4a4] sm:$0xf]  ;;  %v2844_v16 = vld [vmem:[%s5347_s1 + $0x4a8] sm:$0xf0]  ;;  %v3060_v63 = vld [vmem:[%s5347_s1 + $0x658] sm:$0xf0] }
  0xb6   :  { %1891 = vmatpush.bf16.msrb.mxu2 %v2727_v35  ;;  %v2940_v35 = vld [vmem:[%s5347_s1 + $0x568] sm:$0xf0]  ;;  %v3502_v27 = vld [vmem:[%s5347_s1 + $0x5a4] sm:$0xf]  ;;  %v3560_v3 = vld [vmem:[%s5347_s1 + $0x774] sm:$0xf] }
  0xb7   :  { %1854 = vmatpush.bf16.msrb.mxu3 %v2519_v30  ;;  %v2951_v30 = vor.u32 %v3496_v10, %v2948_v14  ;;  %v2972_v28 = vld [vmem:[%s5347_s1 + $0x5a8] sm:$0xf0] }
  0xb8   :  { %1866 = vmatpush.bf16.msrb.mxu0 %v2591_v42  ;;  %v1625_v42 = vpop.f32.mrf.mxu2 }
  0xb9   :  { %1879 = vmatpush.bf16.msrb.mxu1 %v2655_v44  ;;  %v3007_v44 = vor.u32 %v3510_v36, %v3004_v37  ;;  %v3468_v36 = vld [vmem:[%s5347_s1 + $0x494] sm:$0xf]  ;;  %v2836_v37 = vld [vmem:[%s5347_s1 + $0x498] sm:$0xf0] }
  0xba   :  { %1892 = vmatpush.bf16.msrb.mxu2 %v2719_v47  ;;  %v1638_v47 = vpop.f32.mrf.mxu3 }
  0xbb   :  { %1855 = vmatpush.bf16.msrb.mxu3 %v2511_v43  ;;  %v2943_v43 = vor.u32 %v3494_v34, %v2940_v35  ;;  %v2839_v47 = vor.u32 %v3468_v36, %v2836_v37  ;;  %v3568_v36 = vld [vmem:[%s5347_s1 + $0x7b4] sm:$0xf]  ;;  %v3236_v37 = vld [vmem:[%s5347_s1 + $0x7b8] sm:$0xf0] }
  0xbc   :  { %1867 = vmatpush.bf16.msrb.mxu0 %v2583_v57  ;;  %v2924_v57 = vld [vmem:[%s5347_s1 + $0x548] sm:$0xf0] }
  0xbd   :  { %1880 = vmatpush.bf16.msrb.mxu1 %v2647_v62 }
  0xbe   :  { %1856 = vmatmul.bf16.vlgmr.msrb.gmra.mxu3 %v4045_v0  ;;  %1893 = vmatpush.bf16.msrb.mxu2 %v2711_v4  ;;  %v2703_v0 = vor.u32 %v3434_v26, %v2700_v20  ;;  %v2927_v26 = vor.u32 %v3490_v56, %v2924_v57  ;;  %v2991_v4 = vor.u32 %v3506_v58, %v2988_v59  ;;  %v2772_v20 = vld [vmem:[%s5347_s1 + $0x418] sm:$0xf0]  ;;  %v3498_v56 = vld [vmem:[%s5347_s1 + $0x584] sm:$0xf]  ;;  %v2956_v57 = vld [vmem:[%s5347_s1 + $0x588] sm:$0xf0] }
  0xbf   :  { %1900 = vmatpush.bf16.msra.mxu3 %v2823_v48  ;;  %v2932_v48 = vld [vmem:[%s5347_s1 + $0x558] sm:$0xf0]  ;;  %v3524_v58 = vld [vmem:[%s5347_s1 + $0x654] sm:$0xf] }
  0xc0   :  { %1868 = vmatpush.bf16.msrb.mxu0 %v2575_v13  ;;  %v2935_v54 = vor.u32 %v3492_v46, %v2932_v48  ;;  %v1649_v6 = vpop.f32.mrf.mxu0  ;;  %v3526_v48 = vld [vmem:[%s5347_s1 + $0x664] sm:$0xf] }
  0xc1   :  { %1881 = vmatpush.bf16.msrb.mxu1 %v2639_v17  ;;  %v1650_v10 = vadd.f32 %v1649_v6, %v4865_v19  ;;  %v1662_v11 = vpop.f32.mrf.mxu1  ;;  %v2919_v17 = vor.u32 %v3488_v5, %v2916_v7  ;;  %v3450_v19 = vld [vmem:[%s5347_s1 + $0x404] sm:$0xf]  ;;  %v3252_v5 = vld [vmem:[%s5347_s1 + $0x7d8] sm:$0xf0]  ;;  %v2959_v7 = vor.u32 %v3498_v56, %v2956_v57 }
  0xc2   :  { %1894 = vmatpush.bf16.msrb.mxu2 %v2703_v0  ;;  %v3486_v0 = vld [vmem:[%s5347_s1 + $0x524] sm:$0xf]  ;;  %v2767_v35 = vor.u32 %v3450_v19, %v2764_v23  ;;  %v3028_v57 = vld [vmem:[%s5347_s1 + $0x618] sm:$0xf0] }
  0xc3   :  { %1901 = vmatpush.bf16.msra.mxu3 %v2815_v22  ;;  %1869 = vmatmul.bf16.vlgmr.msrb.gmra.mxu0 %v4049_v2  ;;  %v2791_v2 = vor.u32 %v3456_v21, %v2788_v45  ;;  %v3452_v22 = vld [vmem:[%s5347_s1 + $0x414] sm:$0xf]  ;;  %v1663_v14 = vadd.f32 %v1662_v11, %v1650_v10  ;;  %v2964_v45 = vld [vmem:[%s5347_s1 + $0x598] sm:$0xf0]  ;;  %v3522_v10 = vld [vmem:[%s5347_s1 + $0x644] sm:$0xf] }
  0xc4   :  { %1913 = vmatpush.bf16.msra.mxu0 %v2887_v18  ;;  %1882 = vmatmul.bf16.vlgmr.msrb.gmra.mxu1 %v4043_v61  ;;  %v3454_v61 = vld [vmem:[%s5347_s1 + $0x424] sm:$0xf]  ;;  %v2775_v13 = vor.u32 %v3452_v22, %v2772_v20  ;;  %v2983_v18 = vor.u32 %v3504_v8, %v2980_v9  ;;  %v3500_v21 = vld [vmem:[%s5347_s1 + $0x594] sm:$0xf]  ;;  %v3063_v8 = vor.u32 %v3524_v58, %v3060_v63 }
  0xc5   :  { %1926 = vmatpush.bf16.msra.mxu1 %v2951_v30  ;;  %1895 = vmatmul.bf16.vlgmr.msrb.gmra.mxu2 %v4047_v1  ;;  %v2780_v1 = vld [vmem:[%s5347_s1 + $0x428] sm:$0xf0]  ;;  %v2847_v30 = vor.u32 %v3470_v15, %v2844_v16  ;;  %v2967_v53 = vor.u32 %v3500_v21, %v2964_v45  ;;  %v3572_v20 = vld [vmem:[%s5347_s1 + $0x7d4] sm:$0xf]  ;;  %v3542_v11 = vld [vmem:[%s5347_s1 + $0x6e4] sm:$0xf]  ;;  %v3239_v21 = vor.u32 %v3568_v36, %v3236_v37 }
  0xc6   :  { %1939 = vmatpush.bf16.msra.mxu2 %v3015_v31  ;;  %v2783_v62 = vor.u32 %v3454_v61, %v2780_v1  ;;  %v3140_v61 = vld [vmem:[%s5347_s1 + $0x6f8] sm:$0xf0]  ;;  %v3071_v1 = vor.u32 %v3526_v48, %v3068_v49  ;;  %v3558_v15 = vld [vmem:[%s5347_s1 + $0x764] sm:$0xf]  ;;  %v3196_v16 = vld [vmem:[%s5347_s1 + $0x768] sm:$0xf0] }
  0xc7   :  { %1902 = vmatpush.bf16.msra.mxu3 %v2807_v24  ;;  %v2908_v24 = vld [vmem:[%s5347_s1 + $0x528] sm:$0xf0]  ;;  %v3566_v48 = vld [vmem:[%s5347_s1 + $0x7a4] sm:$0xf]  ;;  %v3552_v58 = vld [vmem:[%s5347_s1 + $0x734] sm:$0xf] }
  0xc8   :  { %1914 = vmatpush.bf16.msra.mxu0 %v2879_v38  ;;  %v1675_v29 = vpop.f32.mrf.mxu2  ;;  %v2911_v38 = vor.u32 %v3486_v0, %v2908_v24  ;;  %v1651_v42 = vpop.f32.mrf.mxu0  ;;  %v3199_v0 = vor.u32 %v3558_v15, %v3196_v16  ;;  %v3520_v24 = vld [vmem:[%s5347_s1 + $0x634] sm:$0xf]  ;;  %v3036_v45 = vld [vmem:[%s5347_s1 + $0x628] sm:$0xf0] }
  0xc9   :  { %1927 = vmatpush.bf16.msra.mxu1 %v2943_v43  ;;  %v1676_v31 = vadd.f32 %v1675_v29, %v1663_v14  ;;  %v1688_v34 = vpop.f32.mrf.mxu3  ;;  %v3079_v43 = vor.u32 %v3528_v32, %v3076_v33  ;;  %v1664_v46 = vpop.f32.mrf.mxu1  ;;  %v3052_v14 = vld [vmem:[%s5347_s1 + $0x648] sm:$0xf0]  ;;  %v3556_v32 = vld [vmem:[%s5347_s1 + $0x754] sm:$0xf]  ;;  %v3188_v33 = vld [vmem:[%s5347_s1 + $0x758] sm:$0xf0] }
  0xca   :  { %1940 = vmatpush.bf16.msra.mxu2 %v3007_v44  ;;  %v2900_v44 = vld [vmem:[%s5347_s1 + $0x518] sm:$0xf0]  ;;  %v3055_v23 = vor.u32 %v3522_v10, %v3052_v14  ;;  %v3595_v29 = vld [vmem:[#allocation1 + $0x9] sm:$0xff]  ;;  %v3518_v42 = vld [vmem:[%s5347_s1 + $0x624] sm:$0xf] }
  0xcb   :  { %1903 = vmatpush.bf16.msra.mxu3 %v2799_v39  ;;  %v2975_v39 = vor.u32 %v3502_v27, %v2972_v28  ;;  %v5003_v40 = vadd.f32 %v1688_v34, %v1676_v31  ;;  %v2903_v52 = vor.u32 %v3484_v41, %v2900_v44  ;;  %v3540_v27 = vld [vmem:[%s5347_s1 + $0x6d4] sm:$0xf]  ;;  %v3124_v28 = vld [vmem:[%s5347_s1 + $0x6d8] sm:$0xf0]  ;;  %v3191_v41 = vor.u32 %v3556_v32, %v3188_v33  ;;  %v3116_v44 = vld [vmem:[%s5347_s1 + $0x6c8] sm:$0xf0] }
  0xcc   :  { %1915 = vmatpush.bf16.msra.mxu0 %v2871_v51  ;;  %v2828_v51 = vld [vmem:[%s5347_s1 + $0x488] sm:$0xf0]  ;;  %v3044_v31 = vld [vmem:[%s5347_s1 + $0x638] sm:$0xf0]  ;;  %v3554_v46 = vld [vmem:[%s5347_s1 + $0x744] sm:$0xf] }
  0xcd   :  { %1928 = vmatpush.bf16.msra.mxu1 %v2935_v54  ;;  %v2892_v54 = vld [vmem:[%s5347_s1 + $0x508] sm:$0xf0]  ;;  %v3596_v34 = vld [vmem:[#allocation1 + $0x1b] sm:$0xff] }
  0xce   :  { %1941 = vmatpush.bf16.msra.mxu2 %v2999_v55  ;;  %v3544_v55 = vld [vmem:[%s5347_s1 + $0x6f4] sm:$0xf]  ;;  %v3228_v49 = vld [vmem:[%s5347_s1 + $0x7a8] sm:$0xf0]  ;;  %v3318_v33 = vld [vmem:[%s5350_s6 + $0x78] sm:$0xf0] }
  0xcf   :  { %1904 = vmatpush.bf16.msra.mxu3 %v2791_v2  ;;  %v3482_v2 = vld [vmem:[%s5347_s1 + $0x504] sm:$0xf]  ;;  %v3143_v22 = vor.u32 %v3544_v55, %v3140_v61  ;;  %v3108_v55 = vld [vmem:[%s5347_s1 + $0x6b8] sm:$0xf0]  ;;  %v3212_v10 = vld [vmem:[%s5347_s1 + $0x788] sm:$0xf0] }
  0xd0   :  { %1916 = vmatpush.bf16.msra.mxu0 %v2863_v60  ;;  %v1677_v59 = vpop.f32.mrf.mxu2  ;;  %v3594_v60 = vld [vmem:[#allocation1] sm:$0xff]  ;;  %v2895_v6 = vor.u32 %v3482_v2, %v2892_v54  ;;  %v3039_v2 = vor.u32 %v3518_v42, %v3036_v45  ;;  %v3536_v54 = vld [vmem:[%s5347_s1 + $0x6b4] sm:$0xf]  ;;  %v3310_v45 = vld [vmem:[%s5350_s6 + $0x68] sm:$0xf0] }
  0xd1   :  { %1929 = vmatpush.bf16.msra.mxu1 %v2927_v26  ;;  %v3204_v26 = vld [vmem:[%s5347_s1 + $0x778] sm:$0xf0]  ;;  %v3111_v63 = vor.u32 %v3536_v54, %v3108_v55  ;;  %v3308_v42 = vld [vmem:[%s5350_s6 + $0x60] sm:$0xf]  ;;  %v3584_v54 = vld [vmem:[%s5350_s6 + $0x54] sm:$0xf] }
  0xd2   :  { %1942 = vmatpush.bf16.msra.mxu2 %v2991_v4  ;;  %v1690_v4 = vpop.f32.mrf.mxu3  ;;  %v3207_v9 = vor.u32 %v3560_v3, %v3204_v26  ;;  %v3172_v59 = vld [vmem:[%s5347_s1 + $0x738] sm:$0xf0] }
  0xd3   :  { %1905 = vmatpush.bf16.msra.mxu3 %v2783_v62  ;;  %v2831_v62 = vor.u32 %v3466_v50, %v2828_v51  ;;  %v3175_v26 = vor.u32 %v3552_v58, %v3172_v59  ;;  %v3514_v4 = vld [vmem:[%s5347_s1 + $0x604] sm:$0xf]  ;;  %v3600_v59 = vld [vmem:[#allocation1 + $0x2d] sm:$0xff] }
  0xd4   :  { %1917 = vmatpush.bf16.msra.mxu0 %v2855_v12  ;;  %v3132_v12 = vld [vmem:[%s5347_s1 + $0x6e8] sm:$0xf0]  ;;  %v3582_v58 = vld [vmem:[%s5350_s6 + $0x44] sm:$0xf] }
  0xd5   :  { %1930 = vmatpush.bf16.msra.mxu1 %v2919_v17  ;;  %v3570_v17 = vld [vmem:[%s5347_s1 + $0x7c4] sm:$0xf]  ;;  %v3135_v19 = vor.u32 %v3542_v11, %v3132_v12 }
  0xd6   :  { %1943 = vmatpush.bf16.msra.mxu2 %v2983_v18  ;;  %v3244_v18 = vld [vmem:[%s5347_s1 + $0x7c8] sm:$0xf0] }
  0xd7   :  { %1906 = vmatpush.bf16.msra.mxu3 %v2775_v13  ;;  %v3255_v13 = vor.u32 %v3572_v20, %v3252_v5  ;;  %v3100_v20 = vld [vmem:[%s5347_s1 + $0x6a8] sm:$0xf0] }
  0xd8   :  { %1918 = vmatpush.bf16.msra.mxu0 %v2847_v30  ;;  %v3247_v30 = vor.u32 %v3570_v17, %v3244_v18  ;;  %v3092_v18 = vld [vmem:[%s5347_s1 + $0x698] sm:$0xf0] }
  0xd9   :  { %1931 = vmatpush.bf16.msra.mxu1 %v2911_v38  ;;  %v3127_v38 = vor.u32 %v3540_v27, %v3124_v28  ;;  %v3316_v28 = vld [vmem:[%s5350_s6 + $0x70] sm:$0xf] }
  0xda   :  { %1944 = vmatpush.bf16.msra.mxu2 %v2975_v39  ;;  %v3047_v39 = vor.u32 %v3520_v24, %v3044_v31 }
  0xdb   :  { %1907 = vmatpush.bf16.msra.mxu3 %v2767_v35  ;;  %v3597_v35 = vld [vmem:[#allocation1 + $0x12] sm:$0xff] }
  0xdc   :  { %1919 = vmatpush.bf16.msra.mxu0 %v2839_v47  ;;  %v3180_v47 = vld [vmem:[%s5347_s1 + $0x748] sm:$0xf0] }
  0xdd   :  { %1932 = vmatpush.bf16.msra.mxu1 %v2903_v52  ;;  %v3183_v52 = vor.u32 %v3554_v46, %v3180_v47  ;;  %v3598_v46 = vld [vmem:[#allocation1 + $0x24] sm:$0xff] }
  0xde   :  { %1908 = vmatmul.bf16.vlgmr.msra.gmra.mxu3 %v3594_v60  ;;  %1945 = vmatpush.bf16.msra.mxu2 %v2967_v53  ;;  %v3516_v53 = vld [vmem:[%s5347_s1 + $0x614] sm:$0xf] }
  0xdf   :  { %1952 = vmatpush.bf16.msrb.mxu3 %v3079_v43  ;;  %v3538_v43 = vld [vmem:[%s5347_s1 + $0x6c4] sm:$0xf]  ;;  %v3564_v60 = vld [vmem:[%s5347_s1 + $0x794] sm:$0xf]  ;;  %v3031_v3 = vor.u32 %v3516_v53, %v3028_v57  ;;  %v3585_v53 = vld [vmem:[%s5350_s6 + $0x54] sm:$0xf0] }
  0xe0   :  { %1920 = vmatpush.bf16.msra.mxu0 %v2831_v62  ;;  %v3119_v50 = vor.u32 %v3538_v43, %v3116_v44  ;;  %v1701_v51 = vpop.f32.mrf.mxu0  ;;  %v3587_v43 = vld [vmem:[%s5350_s6 + $0x64] sm:$0xf0]  ;;  %v3586_v44 = vld [vmem:[%s5350_s6 + $0x64] sm:$0xf] }
  0xe1   :  { %1933 = vmatpush.bf16.msra.mxu1 %v2895_v6  ;;  %v1702_v61 = vadd.f32 %v1701_v51, %v5003_v40  ;;  %v1714_v56 = vpop.f32.mrf.mxu1  ;;  %v3220_v40 = vld [vmem:[%s5347_s1 + $0x798] sm:$0xf0]  ;;  %v3020_v6 = vld [vmem:[%s5347_s1 + $0x608] sm:$0xf0]  ;;  %v3583_v57 = vld [vmem:[%s5350_s6 + $0x44] sm:$0xf0] }
  0xe2   :  { %1946 = vmatpush.bf16.msra.mxu2 %v2959_v7  ;;  %v3223_v5 = vor.u32 %v3564_v60, %v3220_v40  ;;  %v3550_v7 = vld [vmem:[%s5347_s1 + $0x724] sm:$0xf]  ;;  %v3023_v16 = vor.u32 %v3514_v4, %v3020_v6  ;;  %v3294_v40 = vld [vmem:[%s5350_s6 + $0x48] sm:$0xf0]  ;;  %v3580_v4 = vld [vmem:[%s5350_s6 + $0x34] sm:$0xf] }
  0xe3   :  { %1953 = vmatpush.bf16.msrb.mxu3 %v3071_v1  ;;  %1921 = vmatmul.bf16.vlgmr.msra.gmra.mxu0 %v3595_v29  ;;  %v3231_v1 = vor.u32 %v3566_v48, %v3228_v49  ;;  %v1715_v62 = vadd.f32 %v1714_v56, %v1702_v61  ;;  %v3589_v29 = vld [vmem:[%s5350_s6 + $0x74] sm:$0xf0]  ;;  %v3313_v49 = vor.u32 %v3586_v44, %v3310_v45  ;;  %v3302_v61 = vld [vmem:[%s5350_s6 + $0x58] sm:$0xf0]  ;;  %v3292_v56 = vld [vmem:[%s5350_s6 + $0x40] sm:$0xf] }
  0xe4   :  { %1965 = vmatpush.bf16.msrb.mxu0 %v3143_v22  ;;  %1934 = vmatmul.bf16.vlgmr.msra.gmra.mxu1 %v3597_v35  ;;  %v3534_v22 = vld [vmem:[%s5347_s1 + $0x6a4] sm:$0xf]  ;;  %v3317_v32 = vor.u32 %v3589_v29, %v3316_v28  ;;  %v3293_v60 = vor.u32 %v3583_v57, %v3292_v56  ;;  %v3262_v28 = vld [vmem:[%s5350_s6 + $0x8] sm:$0xf0]  ;;  %v3260_v29 = vld [vmem:[%s5350_s6] sm:$0xf] }
  0xe5   :  { %1978 = vmatpush.bf16.msrb.mxu1 %v3207_v9  ;;  %1947 = vmatmul.bf16.vlgmr.msra.gmra.mxu2 %v3596_v34  ;;  %v3562_v9 = vld [vmem:[%s5347_s1 + $0x784] sm:$0xf]  ;;  %v3103_v12 = vor.u32 %v3534_v22, %v3100_v20  ;;  %v3286_v22 = vld [vmem:[%s5350_s6 + $0x38] sm:$0xf0] }
  0xe6   :  { %1993 = vmatpush.bf16.msrb.mxu2 %v3255_v13  ;;  %v3532_v13 = vld [vmem:[%s5347_s1 + $0x694] sm:$0xf]  ;;  %v3215_v24 = vor.u32 %v3562_v9, %v3212_v10  ;;  %v3530_v35 = vld [vmem:[%s5347_s1 + $0x684] sm:$0xf]  ;;  %v3579_v9 = vld [vmem:[%s5350_s6 + $0x24] sm:$0xf0] }
  0xe7   :  { %1954 = vmatpush.bf16.msrb.mxu3 %v3063_v8  ;;  %v3164_v8 = vld [vmem:[%s5347_s1 + $0x728] sm:$0xf0]  ;;  %v3095_v34 = vor.u32 %v3532_v13, %v3092_v18  ;;  %v3578_v6 = vld [vmem:[%s5350_s6 + $0x24] sm:$0xf]  ;;  %v3268_v18 = vld [vmem:[%s5350_s6 + $0x10] sm:$0xf] }
  0xe8   :  { %1966 = vmatpush.bf16.msrb.mxu0 %v3135_v19  ;;  %v1727_v11 = vpop.f32.mrf.mxu2  ;;  %v3167_v17 = vor.u32 %v3550_v7, %v3164_v8  ;;  %v3548_v19 = vld [vmem:[%s5347_s1 + $0x714] sm:$0xf]  ;;  %v3278_v7 = vld [vmem:[%s5350_s6 + $0x28] sm:$0xf0]  ;;  %v3276_v8 = vld [vmem:[%s5350_s6 + $0x20] sm:$0xf] }
  0xe9   :  { %1979 = vmatpush.bf16.msrb.mxu1 %v3199_v0  ;;  %v1728_v14 = vadd.f32 %v1727_v11, %v1715_v62  ;;  %v1740_v15 = vpop.f32.mrf.mxu3  ;;  %v1703_v0 = vpop.f32.mrf.mxu0  ;;  %v3601_v62 = vld [vmem:[#allocation1 + $0x36] sm:$0xff]  ;;  %v3281_v10 = vor.u32 %v3578_v6, %v3278_v7  ;;  %v3277_v13 = vor.u32 %v3579_v9, %v3276_v8 }
  0xea   :  { %1994 = vmatpush.bf16.msrb.mxu2 %v3247_v30  ;;  %v1716_v27 = vpop.f32.mrf.mxu1  ;;  %v3588_v30 = vld [vmem:[%s5350_s6 + $0x74] sm:$0xf] }
  0xeb   :  { %1955 = vmatpush.bf16.msrb.mxu3 %v3055_v23  ;;  %v3156_v23 = vld [vmem:[%s5347_s1 + $0x718] sm:$0xf0]  ;;  %v5207_v31 = vadd.f32 %v1740_v15, %v1728_v14  ;;  %v3321_v36 = vor.u32 %v3588_v30, %v3318_v33  ;;  %v3576_v14 = vld [vmem:[%s5350_s6 + $0x14] sm:$0xf]  ;;  %v3574_v27 = vld [vmem:[%s5350_s6 + $0x4] sm:$0xf] }
  0xec   :  { %1967 = vmatpush.bf16.msrb.mxu0 %v3127_v38  ;;  %v3159_v37 = vor.u32 %v3548_v19, %v3156_v23  ;;  %v3084_v38 = vld [vmem:[%s5347_s1 + $0x688] sm:$0xf0]  ;;  %v3270_v15 = vld [vmem:[%s5350_s6 + $0x18] sm:$0xf0]  ;;  %v3577_v19 = vld [vmem:[%s5350_s6 + $0x14] sm:$0xf0]  ;;  %v3265_v33 = vor.u32 %v3574_v27, %v3262_v28 }
  0xed   :  { %1980 = vmatpush.bf16.msrb.mxu1 %v3191_v41  ;;  %v3148_v41 = vld [vmem:[%s5347_s1 + $0x708] sm:$0xf0]  ;;  %v3087_v47 = vor.u32 %v3530_v35, %v3084_v38  ;;  %v3273_v0 = vor.u32 %v3576_v14, %v3270_v15  ;;  %v3575_v30 = vld [vmem:[%s5350_s6 + $0x4] sm:$0xf0] }
  0xee   :  { %1995 = vmatpush.bf16.msrb.mxu2 %v3239_v21  ;;  %v3309_v21 = vor.u32 %v3587_v43, %v3308_v42  ;;  %v287_v42 = vperm.slane %v4765_v25, 1 }
  0xef   :  { %1956 = vmatpush.bf16.msrb.mxu3 %v3047_v39  ;;  %v3546_v39 = vld [vmem:[%s5347_s1 + $0x704] sm:$0xf] }
  0xf0   :  { %1968 = vmatpush.bf16.msrb.mxu0 %v3119_v50  ;;  %v1729_v48 = vpop.f32.mrf.mxu2  ;;  %v3599_v50 = vld [vmem:[#allocation1 + $0x3f] sm:$0xff]  ;;  %v3151_v51 = vor.u32 %v3546_v39, %v3148_v41 }
  0xf1   :  { %1981 = vmatpush.bf16.msrb.mxu1 %v3183_v52  ;;  %v3300_v52 = vld [vmem:[%s5350_s6 + $0x50] sm:$0xf]  ;;  %v2099_v39 = vld [vmem:[%s5351_s5] sm:$0x1] }
  0xf2   :  { %1996 = vmatpush.bf16.msrb.mxu2 %v3231_v1  ;;  %v3301_v55 = vor.u32 %v3585_v53, %v3300_v52  ;;  %v3305_v1 = vor.u32 %v3584_v54, %v3302_v61 }
  0xf3   :  { %1957 = vmatpush.bf16.msrb.mxu3 %v3039_v2  ;;  %v1742_v2 = vpop.f32.mrf.mxu3 }
  0xf4   :  { %1969 = vmatpush.bf16.msrb.mxu0 %v3111_v63  ;;  %v3297_v63 = vor.u32 %v3582_v58, %v3294_v40 }
  0xf5   :  { %1982 = vmatpush.bf16.msrb.mxu1 %v3175_v26  ;;  %v3581_v26 = vld [vmem:[%s5350_s6 + $0x34] sm:$0xf0] }
  0xf6   :  { %1997 = vmatpush.bf16.msrb.mxu2 %v3223_v5  ;;  %v3289_v5 = vor.u32 %v3580_v4, %v3286_v22 }
  0xf7   :  { %1958 = vmatpush.bf16.msrb.mxu3 %v3031_v3  ;;  %v3284_v3 = vld [vmem:[%s5350_s6 + $0x30] sm:$0xf] }
  0xf8   :  { %1970 = vmatpush.bf16.msrb.mxu0 %v3103_v12  ;;  %v3285_v20 = vor.u32 %v3581_v26, %v3284_v3 }
  0xf9   :  { %1983 = vmatpush.bf16.msrb.mxu1 %v3167_v17 }
  0xfa   :  { %1998 = vmatpush.bf16.msrb.mxu2 %v3215_v24  ;;  %v3269_v24 = vor.u32 %v3577_v19, %v3268_v18 }
  0xfb   :  { %1959 = vmatpush.bf16.msrb.mxu3 %v3023_v16 }
  0xfc   :  { %1971 = vmatpush.bf16.msrb.mxu0 %v3095_v34 }
  0xfd   :  { %3257 = vmatmul.msk.bf16.vlgmr.msrb.gmra.mxu2 %vm1585_vm0, %v3599_v50  ;;  %1984 = vmatpush.bf16.msrb.mxu1 %v3159_v37 }
  0xfe   :  { %2196 = vmatpush.bf16.msra.mxu2 %v3317_v32  ;;  %1960 = vmatmul.bf16.vlgmr.msrb.gmra.mxu3 %v3598_v46 }
  0xff   :  { %2209 = vmatpush.bf16.msra.mxu3 %v3321_v36  ;;  %v3261_v36 = vor.u32 %v3575_v30, %v3260_v29 }
 0x100   :  { %1972 = vmatpush.bf16.msrb.mxu0 %v3087_v47  ;;  %v1753_v11 = vpop.f32.mrf.mxu0 }
 0x101   :  { %1985 = vmatpush.bf16.msrb.mxu1 %v3151_v51  ;;  %v1792_v12 = vpop.f32.mrf.mxu3  ;;  %v1754_v16 = vadd.f32 %v1753_v11, %v5207_v31  ;;  %v1766_v17 = vpop.f32.mrf.mxu1 }
 0x102   :  { %2197 = vmatpush.bf16.msra.mxu2 %v3309_v21 }
 0x103   :  { %2210 = vmatpush.bf16.msra.mxu3 %v3313_v49  ;;  %1973 = vmatmul.bf16.vlgmr.msrb.gmra.mxu0 %v3600_v59  ;;  %v1767_v23 = vadd.f32 %v1766_v17, %v1754_v16 }
 0x104   :  { %1986 = vmatmul.bf16.vlgmr.msrb.gmra.mxu1 %v3601_v62 }
 0x106   :  { %2198 = vmatpush.bf16.msra.mxu2 %v3301_v55 }
 0x107   :  { %2211 = vmatpush.bf16.msra.mxu3 %v3305_v1 }
 0x108   :  { %v1779_v31 = vpop.f32.mrf.mxu2  ;;  %v1755_v35 = vpop.f32.mrf.mxu0 }
 0x109   :  { %v1780_v32 = vadd.f32 %v1779_v31, %v1767_v23  ;;  %v1794_v34 = vpop.f32.mrf.mxu3  ;;  %v1768_v38 = vpop.f32.mrf.mxu1 }
 0x10a   :  { %2199 = vmatpush.bf16.msra.mxu2 %v3293_v60 }
 0x10b   :  { %2212 = vmatpush.bf16.msra.mxu3 %v3297_v63  ;;  %v5310_v37 = vadd.f32 %v1792_v12, %v1780_v32 }
 0x10d   :  { %v2005_v40 = vsel %vm2004_vm1, %v5310_v37, 0.0  ;;  %v2020_v62 = vmul.f32 %v5310_v37, %v5310_v37 }
 0x10e   :  { %2200 = vmatpush.bf16.msra.mxu2 %v3285_v20  ;;  %v2006_v3 = vrot.slane %v2005_v40, 4 }
 0x10f   :  { %2213 = vmatpush.bf16.msra.mxu3 %v3289_v5  ;;  %v2022_v4 = vsel %vm2004_vm1, %v2020_v62, 0.0 }
 0x110   :  { %v1781_v41 = vpop.f32.mrf.mxu2  ;;  %v2007_v7 = vadd.f32 %v2006_v3, %v2005_v40  ;;  %v2023_v8 = vrot.slane %v2022_v4, 4 }
 0x112   :  { %2201 = vmatpush.bf16.msra.mxu2 %v3277_v13  ;;  %v2024_v11 = vadd.f32 %v2023_v8, %v2022_v4 }
 0x113   :  { %2214 = vmatpush.bf16.msra.mxu3 %v3281_v10  ;;  %v2008_v10 = vrot.slane %v2007_v7, 2 }
 0x114   :  { %v2025_v16 = vrot.slane %v2024_v11, 2 }
 0x115   :  { %v2009_v15 = vadd.f32 %v2008_v10, %v2007_v7 }
 0x116   :  { %2202 = vmatpush.bf16.msra.mxu2 %v3269_v24  ;;  %v2026_v19 = vadd.f32 %v2025_v16, %v2024_v11 }
 0x117   :  { %2215 = vmatpush.bf16.msra.mxu3 %v3273_v0  ;;  %v2010_v18 = vrot.slane %v2009_v15, 1 }
 0x118   :  { %v2027_v24 = vrot.slane %v2026_v19, 1 }
 0x119   :  { %v2011_v0 = vadd.f32 %v2010_v18, %v2009_v15  ;;  %v2046_v18 = vld [vmem:[%s5352_s3] sm:$0x3] }
 0x11a   :  { %2203 = vmatpush.bf16.msra.mxu2 %v3261_v36  ;;  %v2028_v32 = vadd.f32 %v2027_v24, %v2026_v19 }
 0x11b   :  { %2216 = vmatpush.bf16.msra.mxu3 %v3265_v33  ;;  %v5319_v34 = vmul.f32 0.5, %v2011_v0 }
 0x11c   :  { %v2038_v38 = vmul.f32 0.5, %v2028_v32 }
 0x11d   :  { %2204 = vmatmul.bf16.vlgmr.msra.gmra.mxu2 %v2099_v39 }
 0x11e   :  { %2217 = vmatmul.bf16.vlgmr.msra.gmra.mxu3 %v2099_v39  ;;  %v2040_v39 = vmul.f32 %v5319_v34, %v5319_v34 }
 0x120   :  { %v1818_v44 = vpop.f32.mrf.mxu0 }
 0x121   :  { %v1805_v43 = vpop.f32.mrf.mxu3  ;;  %v1831_v45 = vpop.f32.mrf.mxu1 }
 0x122   :  { %v1806_v21 = vadd.f32 %v1805_v43, %v287_v42 }
 0x124   :  { %v1819_v46 = vadd.f32 %v1818_v44, %v1806_v21 }
 0x126   :  { %v1832_v47 = vadd.f32 %v1831_v45, %v1819_v46 }
 0x128   :  { %v1844_v48 = vpop.f32.mrf.mxu2  ;;  %v1820_v50 = vpop.f32.mrf.mxu0 }
 0x129   :  { %v1807_v49 = vpop.f32.mrf.mxu3  ;;  %v1833_v51 = vpop.f32.mrf.mxu1  ;;  %v1845_v58 = vadd.f32 %v1844_v48, %v1832_v47  ;;  %v2042_v48 = vsub.f32 %v2038_v38, %v2040_v39  ;;  %v2224_v39 = vld [vmem:[%s5354_s7] sm:$0x3] }
 0x130   :  { %v1846_v2 = vpop.f32.mrf.mxu2 }
 0x140   :  { %v1870_v53 = vpop.f32.mrf.mxu0 }
 0x141   :  { %v1857_v52 = vpop.f32.mrf.mxu3  ;;  %v1883_v54 = vpop.f32.mrf.mxu1 }
 0x142   :  { %v1858_v63 = vadd.f32 %v1857_v52, %v1845_v58 }
 0x144   :  { %v1871_v22 = vadd.f32 %v1870_v53, %v1858_v63  ;;  %v2044_v53 = vmax.f32 %v2042_v48, 0.0 }
 0x146   :  { %v1884_v9 = vadd.f32 %v1883_v54, %v1871_v22 }
 0x148   :  { %v1896_v61 = vpop.f32.mrf.mxu2  ;;  %v1872_v1 = vpop.f32.mrf.mxu0 }
 0x149   :  { %v1859_v55 = vpop.f32.mrf.mxu3  ;;  %v1885_v56 = vpop.f32.mrf.mxu1  ;;  %v1897_v12 = vadd.f32 %v1896_v61, %v1884_v9 }
 0x14a   :  { %v2047_v56 = vadd.f32 1e-05, %v2044_v53 }
 0x14c   :  { %3590 = vrsqrt.f32 %v2047_v56  ;;  %vm2055_vm7 = vweird.f32 %v2047_v56 }
 0x150   :  { %v1898_v57 = vpop.f32.mrf.mxu2 }
 0x152   :  { %v3591_v63 = vpop.eup %3590 }
 0x153   :  { %vm2056_vm4 = vweird.f32 %v3591_v63 }
 0x154   :  { %vm2057_vm9 = vmor %vm2055_vm7, %vm2056_vm4 }
 0x160   :  { %v1922_v59 = vpop.f32.mrf.mxu0 }
 0x161   :  { %v1909_v25 = vpop.f32.mrf.mxu3  ;;  %v1935_v60 = vpop.f32.mrf.mxu1 }
 0x162   :  { %v1910_v14 = vadd.f32 %v1909_v25, %v1897_v12 }
 0x164   :  { %v1923_v17 = vadd.f32 %v1922_v59, %v1910_v14 }
 0x166   :  { %v1936_v23 = vadd.f32 %v1935_v60, %v1923_v17 }
 0x168   :  { %v1948_v20 = vpop.f32.mrf.mxu2  ;;  %v1924_v5 = vpop.f32.mrf.mxu0 }
 0x169   :  { %v1911_v26 = vpop.f32.mrf.mxu3  ;;  %v1937_v6 = vpop.f32.mrf.mxu1  ;;  %v1949_v27 = vadd.f32 %v1948_v20, %v1936_v23  ;;  %v2050_v20 = vmul.f32 %v3591_v63, %v2047_v56 }
 0x16b   :  { %v2051_v5 = vmul.f32 %v3591_v63, %v2050_v20 }
 0x16d   :  { %v2052_v10 = vmul.f32 0.5, %v2051_v5 }
 0x16f   :  { %v2053_v12 = vsub.f32 1.5, %v2052_v10 }
 0x170   :  { %v1950_v13 = vpop.f32.mrf.mxu2 }
 0x171   :  { %v2054_v15 = vmul.f32 %v3591_v63, %v2053_v12 }
 0x173   :  { %v2058_v23 = vsel %vm2057_vm9, %v3591_v63, %v2054_v15 }
 0x180   :  { %v2000_v30 = vpop.f32.mrf.mxu2  ;;  %v1974_v31 = vpop.f32.mrf.mxu0 }
 0x181   :  { %v1961_v28 = vpop.f32.mrf.mxu3  ;;  %v1987_v33 = vpop.f32.mrf.mxu1 }
 0x182   :  { %v1962_v29 = vadd.f32 %v1961_v28, %v1949_v27 }
 0x184   :  { %v1975_v35 = vadd.f32 %v1974_v31, %v1962_v29 }
 0x186   :  { %v1988_v36 = vadd.f32 %v1987_v33, %v1975_v35  ;;  %v2076_v33 = vld [vmem:[%s5353_s4] sm:$0x3] }
 0x188   :  { %v5323_v41 = vadd.f32 %v2000_v30, %v1988_v36  ;;  %v2002_v21 = vpop.f32.mrf.mxu2  ;;  %v1976_v45 = vpop.f32.mrf.mxu0 }
 0x189   :  { %v1963_v42 = vpop.f32.mrf.mxu3  ;;  %v1989_v47 = vpop.f32.mrf.mxu1 }
 0x18a   :  { %v2013_v43 = vsel %vm2012_vm2, %v5323_v41, 0.0  ;;  %v2021_v44 = vmul.f32 %v5323_v41, %v5323_v41 }
 0x18b   :  { %v2014_v46 = vrot.slane %v2013_v43, 4 }
 0x18c   :  { %v2029_v49 = vsel %vm2012_vm2, %v2021_v44, 0.0  ;;  %v2226_v44 = vperm.slane %v2224_v39, 0 }
 0x18d   :  { %v2015_v50 = vadd.f32 %v2014_v46, %v2013_v43  ;;  %v2030_v51 = vrot.slane %v2029_v49, 4 }
 0x18f   :  { %v2016_v2 = vrot.slane %v2015_v50, 2  ;;  %v2031_v52 = vadd.f32 %v2030_v51, %v2029_v49 }
 0x191   :  { %v2017_v54 = vadd.f32 %v2016_v2, %v2015_v50  ;;  %v2032_v55 = vrot.slane %v2031_v52, 2 }
 0x193   :  { %v2018_v61 = vrot.slane %v2017_v54, 1  ;;  %v2033_v1 = vadd.f32 %v2032_v55, %v2031_v52 }
 0x195   :  { %v2019_v57 = vadd.f32 %v2018_v61, %v2017_v54  ;;  %v2034_v25 = vrot.slane %v2033_v1, 1 }
 0x197   :  { %v2035_v58 = vadd.f32 %v2034_v25, %v2033_v1  ;;  %v2037_v59 = vmul.f32 0.5, %v2019_v57 }
 0x199   :  { %v2039_v60 = vmul.f32 0.5, %v2035_v58  ;;  %v2041_v40 = vmul.f32 %v2037_v59, %v2037_v59 }
 0x19b   :  { %v2043_v62 = vsub.f32 %v2039_v60, %v2041_v40 }
 0x19d   :  { %v2045_v3 = vmax.f32 %v2043_v62, 0.0 }
 0x19f   :  { %v2048_v4 = vadd.f32 1e-05, %v2045_v3 }
 0x1a0   :  { %v2205_v22 = vpop.f32.mrf.mxu2 }
 0x1a1   :  { %v2218_v26 = vpop.f32.mrf.mxu3  ;;  %3592 = vrsqrt.f32 %v2048_v4  ;;  %vm2065_vm5 = vweird.f32 %v2048_v4 }
 0x1a7   :  { %v3593_v7 = vpop.eup %3592 }
 0x1a8   :  { %v2207_v8 = vpop.f32.mrf.mxu2  ;;  %v2060_v9 = vmul.f32 %v3593_v7, %v2048_v4  ;;  %vm2066_vm3 = vweird.f32 %v3593_v7 }
 0x1a9   :  { %v2220_v6 = vpop.f32.mrf.mxu3  ;;  %vm2067_vm6 = vmor %vm2065_vm5, %vm2066_vm3 }
 0x1aa   :  { %v2061_v11 = vmul.f32 %v3593_v7, %v2060_v9 }
 0x1ac   :  { %v2062_v13 = vmul.f32 0.5, %v2061_v11 }
 0x1ae   :  { %v2063_v14 = vsub.f32 1.5, %v2062_v13 }
 0x1b0   :  { %v2064_v16 = vmul.f32 %v3593_v7, %v2063_v14 }
 0x1b2   :  { %v2068_v17 = vsel %vm2067_vm6, %v3593_v7, %v2064_v16 }
 0x1b3   :  { %v2071_v19 = vrot.slane %v2068_v17, 7 }
 0x1b5   :  { %v2073_v0 = vsel %vm2072_vm8, %v2058_v23, %v2071_v19 }
 0x1b6   :  { %v2075_v24 = vmul.f32 %v2073_v0, %v2046_v18 }
 0x1b8   :  { %v2078_v27 = vperm.slane %v2075_v24, 0  ;;  %v2079_v28 = vperm.slane %v2075_v24, 1 }
 0x1ba   :  { %v2082_v29 = vmul.f32 %v2078_v27, %v5319_v34  ;;  %v2083_v30 = vmul.f32 %v2079_v28, %v2037_v59  ;;  %v2090_v31 = vmul.f32 %v2078_v27, %v5310_v37  ;;  %v2091_v32 = vmul.f32 %v2079_v28, %v5323_v41 }
 0x1bb   :  { %v2227_v37 = vperm.slane %v2224_v39, 1 }
 0x1bc   :  { %v2086_v35 = vrot.slane %v2083_v30, 7 }
 0x1be   :  { %v2087_v36 = vsel %vm2072_vm8, %v2082_v29, %v2086_v35 }
 0x1bf   :  { %v2089_v38 = vsub.f32 %v2076_v33, %v2087_v36 }
 0x1c1   :  { %v2093_v42 = vperm.slane %v2089_v38, 0  ;;  %v2094_v43 = vperm.slane %v2089_v38, 1 }
 0x1c3   :  { %v2097_v34 = vadd.f32 %v2093_v42, %v2090_v31  ;;  %v2098_v21 = vadd.f32 %v2094_v43, %v2091_v32 }
 0x1c5   :  { %v2222_v45 = vadd.f32 %v2205_v22, %v2097_v34  ;;  %v2223_v41 = vadd.f32 %v2218_v26, %v2098_v21 }
 0x1c7   :  { %v2230_v46 = vadd.f32 %v2226_v44, %v2222_v45  ;;  %v2231_v47 = vadd.f32 %v2227_v37, %v2223_v41 }
 0x1c9   :  { %v2232_v48 = vmax.f32 %v2230_v46, 0.0  ;;  %v2233_v49 = vmax.f32 %v2231_v47, 0.0 }
 0x1cb   :  { %v2234_v50 = vpack.c.bf16 %v2233_v49, %v2232_v48 }
 0x1cd   :  { %v2236_v51 = vrot.slane %v2234_v50, 3 }
 0x1cf   :  { %v2239_v2 = vsel %vm2072_vm8, %v2234_v50, %v2236_v51 }
 0x1d0   :  { %2243 = vst.msk [vmem:[%s5355_s8] sm:$0x3] %vm2242_vm11, %v2239_v2 }

// kernel: keypoint_forward.31
= control target key start
LH: loop header
LB: loop body
LE: loop exit
PB: predicated region body
PF: predicated region fallthrough
CT: control target
= control target key end

     0   :  { %vm1578_vm0 = vcmask 785408   ;;  %vm1997_vm1 = vcmask 1041408   ;;  %vm2005_vm2 = vcmask 779264   ;;  %vm2065_vm8 = vcmask 1040384   ;;  %s5044_s0 = inlined_call_operand.vmem [shape: bf16[2,1,1,9,224], index: 0, kind: input, shape index: {}, may-alias: {0,6}]   ;;  %s5045_s1 = inlined_call_operand.vmem [shape: bf16[2,2016], index: 1, kind: input, shape index: {}]   ;;  %s5046_s2 = inlined_call_operand.vmem [shape: bf16[2016,224], index: 2, kind: input, shape index: {}]   ;;  %s5047_s3 = inlined_call_operand.vmem [shape: f32[1,224], index: 3, kind: input, shape index: {}]   ;;  %s5048_s4 = inlined_call_operand.vmem [shape: f32[1,224], index: 4, kind: input, shape index: {}]   ;;  %s5049_s5 = inlined_call_operand.vmem [shape: f32[1,224], index: 5, kind: input, shape index: {}]   ;;  %s5050_s6 = inlined_call_operand.vmem [shape: bf16[2,1,1,9,224], index: 6, kind: output, shape index: {}, may-alias: {0,6}]  }
   0x1   :  { %v2203_v0 = vld [vmem:[%s5046_s2 + $0x70] sm:$0xf]  ;;  %v3171_v1 = vld [vmem:[%s5046_s2 + $0x74] sm:$0xf0]  ;;  %v2195_v11 = vld [vmem:[%s5046_s2 + $0x60] sm:$0xf] }
   0x2   :  { %v2267_v2 = vld [vmem:[%s5046_s2 + $0xf0] sm:$0xf]  ;;  %v2204_v3 = vor.u32 %v3171_v1, %v2203_v0  ;;  %v3187_v4 = vld [vmem:[%s5046_s2 + $0xf4] sm:$0xf0]  ;;  %v3169_v13 = vld [vmem:[%s5046_s2 + $0x64] sm:$0xf0] }
   0x3   :  { %v2331_v5 = vld [vmem:[%s5046_s2 + $0x170] sm:$0xf]  ;;  %v3203_v6 = vld [vmem:[%s5046_s2 + $0x174] sm:$0xf0]  ;;  %v2268_v7 = vor.u32 %v3187_v4, %v2267_v2  ;;  %v2259_v14 = vld [vmem:[%s5046_s2 + $0xe0] sm:$0xf]  ;;  %v2196_v16 = vor.u32 %v3169_v13, %v2195_v11 }
   0x4   :  { %v2332_v8 = vor.u32 %v3203_v6, %v2331_v5  ;;  %v2395_v9 = vld [vmem:[%s5046_s2 + $0x1f0] sm:$0xf]  ;;  %v3219_v10 = vld [vmem:[%s5046_s2 + $0x1f4] sm:$0xf0]  ;;  %1581 = vmatpush.bf16.msra.mxu0 %v2204_v3  ;;  %v3185_v15 = vld [vmem:[%s5046_s2 + $0xe4] sm:$0xf0] }
   0x5   :  { %v2396_v12 = vor.u32 %v3219_v10, %v2395_v9  ;;  %1594 = vmatpush.bf16.msra.mxu1 %v2268_v7  ;;  %v2260_v17 = vor.u32 %v3185_v15, %v2259_v14  ;;  %v2323_v18 = vld [vmem:[%s5046_s2 + $0x160] sm:$0xf]  ;;  %v3201_v19 = vld [vmem:[%s5046_s2 + $0x164] sm:$0xf0]  ;;  %v2187_v23 = vld [vmem:[%s5046_s2 + $0x50] sm:$0xf] }
   0x6   :  { %1607 = vmatpush.bf16.msra.mxu2 %v2332_v8  ;;  %v2387_v20 = vld [vmem:[%s5046_s2 + $0x1e0] sm:$0xf]  ;;  %v2324_v21 = vor.u32 %v3201_v19, %v2323_v18  ;;  %v3217_v22 = vld [vmem:[%s5046_s2 + $0x1e4] sm:$0xf0]  ;;  %v3167_v24 = vld [vmem:[%s5046_s2 + $0x54] sm:$0xf0] }
   0x7   :  { %1620 = vmatpush.bf16.msra.mxu3 %v2396_v12  ;;  %v2388_v25 = vor.u32 %v3217_v22, %v2387_v20  ;;  %v2251_v26 = vld [vmem:[%s5046_s2 + $0xd0] sm:$0xf]  ;;  %v3183_v27 = vld [vmem:[%s5046_s2 + $0xd4] sm:$0xf0]  ;;  %v2188_v29 = vor.u32 %v3167_v24, %v2187_v23  ;;  %v2179_v35 = vld [vmem:[%s5046_s2 + $0x40] sm:$0xf] }
   0x8   :  { %v2315_v28 = vld [vmem:[%s5046_s2 + $0x150] sm:$0xf]  ;;  %1582 = vmatpush.bf16.msra.mxu0 %v2196_v16  ;;  %v3199_v30 = vld [vmem:[%s5046_s2 + $0x154] sm:$0xf0]  ;;  %v2252_v33 = vor.u32 %v3183_v27, %v2251_v26  ;;  %v3165_v36 = vld [vmem:[%s5046_s2 + $0x44] sm:$0xf0] }
   0x9   :  { %v2379_v31 = vld [vmem:[%s5046_s2 + $0x1d0] sm:$0xf]  ;;  %v3215_v32 = vld [vmem:[%s5046_s2 + $0x1d4] sm:$0xf0]  ;;  %1595 = vmatpush.bf16.msra.mxu1 %v2260_v17  ;;  %v2316_v34 = vor.u32 %v3199_v30, %v2315_v28  ;;  %v2243_v37 = vld [vmem:[%s5046_s2 + $0xc0] sm:$0xf]  ;;  %v2180_v44 = vor.u32 %v3165_v36, %v2179_v35 }
   0xa   :  { %1608 = vmatpush.bf16.msra.mxu2 %v2324_v21  ;;  %v2380_v38 = vor.u32 %v3215_v32, %v2379_v31  ;;  %v3181_v39 = vld [vmem:[%s5046_s2 + $0xc4] sm:$0xf0]  ;;  %v2307_v40 = vld [vmem:[%s5046_s2 + $0x140] sm:$0xf]  ;;  %v2171_v47 = vld [vmem:[%s5046_s2 + $0x30] sm:$0xf] }
   0xb   :  { %1621 = vmatpush.bf16.msra.mxu3 %v2388_v25  ;;  %v3197_v41 = vld [vmem:[%s5046_s2 + $0x144] sm:$0xf0]  ;;  %v2371_v42 = vld [vmem:[%s5046_s2 + $0x1c0] sm:$0xf]  ;;  %v2244_v45 = vor.u32 %v3181_v39, %v2243_v37  ;;  %v3163_v48 = vld [vmem:[%s5046_s2 + $0x34] sm:$0xf0] }
   0xc   :  { %v3213_v43 = vld [vmem:[%s5046_s2 + $0x1c4] sm:$0xf0]  ;;  %1583 = vmatpush.bf16.msra.mxu0 %v2188_v29  ;;  %v2308_v46 = vor.u32 %v3197_v41, %v2307_v40  ;;  %v2235_v49 = vld [vmem:[%s5046_s2 + $0xb0] sm:$0xf]  ;;  %v3179_v51 = vld [vmem:[%s5046_s2 + $0xb4] sm:$0xf0]  ;;  %v2172_v56 = vor.u32 %v3163_v48, %v2171_v47 }
   0xd   :  { %1596 = vmatpush.bf16.msra.mxu1 %v2252_v33  ;;  %v2372_v50 = vor.u32 %v3213_v43, %v2371_v42  ;;  %v2299_v52 = vld [vmem:[%s5046_s2 + $0x130] sm:$0xf]  ;;  %v3195_v53 = vld [vmem:[%s5046_s2 + $0x134] sm:$0xf0]  ;;  %v2236_v57 = vor.u32 %v3179_v51, %v2235_v49  ;;  %v2163_v59 = vld [vmem:[%s5046_s2 + $0x20] sm:$0xf] }
   0xe   :  { %1609 = vmatpush.bf16.msra.mxu2 %v2316_v34  ;;  %v2363_v54 = vld [vmem:[%s5046_s2 + $0x1b0] sm:$0xf]  ;;  %v3211_v55 = vld [vmem:[%s5046_s2 + $0x1b4] sm:$0xf0]  ;;  %v2300_v58 = vor.u32 %v3195_v53, %v2299_v52  ;;  %v3161_v60 = vld [vmem:[%s5046_s2 + $0x24] sm:$0xf0] }
   0xf   :  { %1622 = vmatpush.bf16.msra.mxu3 %v2380_v38  ;;  %v2227_v61 = vld [vmem:[%s5046_s2 + $0xa0] sm:$0xf]  ;;  %v2364_v62 = vor.u32 %v3211_v55, %v2363_v54  ;;  %v3177_v63 = vld [vmem:[%s5046_s2 + $0xa4] sm:$0xf0]  ;;  %v2164_v4 = vor.u32 %v3161_v60, %v2163_v59  ;;  %v2155_v7 = vld [vmem:[%s5046_s2 + $0x10] sm:$0xf] }
  0x10   :  { %1584 = vmatpush.bf16.msra.mxu0 %v2180_v44  ;;  %v2291_v0 = vld [vmem:[%s5046_s2 + $0x120] sm:$0xf]  ;;  %v3193_v1 = vld [vmem:[%s5046_s2 + $0x124] sm:$0xf0]  ;;  %v2228_v5 = vor.u32 %v3177_v63, %v2227_v61  ;;  %v3159_v8 = vld [vmem:[%s5046_s2 + $0x14] sm:$0xf0] }
  0x11   :  { %1597 = vmatpush.bf16.msra.mxu1 %v2244_v45  ;;  %v2355_v2 = vld [vmem:[%s5046_s2 + $0x1a0] sm:$0xf]  ;;  %v3209_v3 = vld [vmem:[%s5046_s2 + $0x1a4] sm:$0xf0]  ;;  %v2292_v6 = vor.u32 %v3193_v1, %v2291_v0  ;;  %v2219_v9 = vld [vmem:[%s5046_s2 + $0x90] sm:$0xf]  ;;  %v2156_v16 = vor.u32 %v3159_v8, %v2155_v7 }
  0x12   :  { %1610 = vmatpush.bf16.msra.mxu2 %v2308_v46  ;;  %v2356_v10 = vor.u32 %v3209_v3, %v2355_v2  ;;  %v3175_v11 = vld [vmem:[%s5046_s2 + $0x94] sm:$0xf0]  ;;  %v2283_v12 = vld [vmem:[%s5046_s2 + $0x110] sm:$0xf]  ;;  %v2147_v17 = vld [vmem:[%s5046_s2] sm:$0xf] }
  0x13   :  { %1623 = vmatpush.bf16.msra.mxu3 %v2372_v50  ;;  %v3191_v13 = vld [vmem:[%s5046_s2 + $0x114] sm:$0xf0]  ;;  %v2347_v14 = vld [vmem:[%s5046_s2 + $0x190] sm:$0xf]  ;;  %v3157_v18 = vld [vmem:[%s5046_s2 + $0x4] sm:$0xf0]  ;;  %v2220_v19 = vor.u32 %v3175_v11, %v2219_v9 }
  0x14   :  { %1585 = vmatpush.bf16.msra.mxu0 %v2172_v56  ;;  %v3207_v15 = vld [vmem:[%s5046_s2 + $0x194] sm:$0xf0]  ;;  %v2284_v20 = vor.u32 %v3191_v13, %v2283_v12  ;;  %v2211_v21 = vld [vmem:[%s5046_s2 + $0x80] sm:$0xf]  ;;  %v3173_v22 = vld [vmem:[%s5046_s2 + $0x84] sm:$0xf0]  ;;  %v2148_v31 = vor.u32 %v3157_v18, %v2147_v17 }
  0x15   :  { %1598 = vmatpush.bf16.msra.mxu1 %v2236_v57  ;;  %v2275_v23 = vld [vmem:[%s5046_s2 + $0x100] sm:$0xf]  ;;  %v2348_v24 = vor.u32 %v3207_v15, %v2347_v14  ;;  %v3189_v25 = vld [vmem:[%s5046_s2 + $0x104] sm:$0xf0]  ;;  %v2459_v28 = vld [vmem:[%s5046_s2 + $0x270] sm:$0xf]  ;;  %v2212_v35 = vor.u32 %v3173_v22, %v2211_v21 }
  0x16   :  { %1611 = vmatpush.bf16.msra.mxu2 %v2300_v58  ;;  %v2339_v26 = vld [vmem:[%s5046_s2 + $0x180] sm:$0xf]  ;;  %v3205_v27 = vld [vmem:[%s5046_s2 + $0x184] sm:$0xf0]  ;;  %v3235_v29 = vld [vmem:[%s5046_s2 + $0x274] sm:$0xf0]  ;;  %v2276_v36 = vor.u32 %v3189_v25, %v2275_v23 }
  0x17   :  { %1624 = vmatpush.bf16.msra.mxu3 %v2364_v62  ;;  %v2523_v30 = vld [vmem:[%s5046_s2 + $0x2f0] sm:$0xf]  ;;  %v3251_v32 = vld [vmem:[%s5046_s2 + $0x2f4] sm:$0xf0]  ;;  %v2340_v39 = vor.u32 %v3205_v27, %v2339_v26  ;;  %v2460_v40 = vor.u32 %v3235_v29, %v2459_v28  ;;  %v2451_v43 = vld [vmem:[%s5046_s2 + $0x260] sm:$0xf] }
  0x18   :  { %1586 = vmatpush.bf16.msra.mxu0 %v2164_v4  ;;  %v2587_v33 = vld [vmem:[%s5046_s2 + $0x370] sm:$0xf]  ;;  %v3267_v34 = vld [vmem:[%s5046_s2 + $0x374] sm:$0xf0]  ;;  %v2524_v41 = vor.u32 %v3251_v32, %v2523_v30  ;;  %v3233_v44 = vld [vmem:[%s5046_s2 + $0x264] sm:$0xf0] }
  0x19   :  { %1599 = vmatpush.bf16.msra.mxu1 %v2228_v5  ;;  %v2651_v37 = vld [vmem:[%s5046_s2 + $0x3f0] sm:$0xf]  ;;  %v3283_v38 = vld [vmem:[%s5046_s2 + $0x3f4] sm:$0xf0]  ;;  %v2588_v42 = vor.u32 %v3267_v34, %v2587_v33  ;;  %v2515_v45 = vld [vmem:[%s5046_s2 + $0x2e0] sm:$0xf]  ;;  %v2452_v52 = vor.u32 %v3233_v44, %v2451_v43 }
  0x1a   :  { %1612 = vmatpush.bf16.msra.mxu2 %v2292_v6  ;;  %v2652_v46 = vor.u32 %v3283_v38, %v2651_v37  ;;  %v3249_v47 = vld [vmem:[%s5046_s2 + $0x2e4] sm:$0xf0]  ;;  %v2579_v48 = vld [vmem:[%s5046_s2 + $0x360] sm:$0xf]  ;;  %v2443_v53 = vld [vmem:[%s5046_s2 + $0x250] sm:$0xf] }
  0x1b   :  { %1625 = vmatpush.bf16.msra.mxu3 %v2356_v10  ;;  %v3265_v49 = vld [vmem:[%s5046_s2 + $0x364] sm:$0xf0]  ;;  %v2643_v50 = vld [vmem:[%s5046_s2 + $0x3e0] sm:$0xf]  ;;  %v3231_v54 = vld [vmem:[%s5046_s2 + $0x254] sm:$0xf0]  ;;  %v2516_v55 = vor.u32 %v3249_v47, %v2515_v45 }
  0x1c   :  { %1587 = vmatpush.bf16.msra.mxu0 %v2156_v16  ;;  %v3281_v51 = vld [vmem:[%s5046_s2 + $0x3e4] sm:$0xf0]  ;;  %v2580_v56 = vor.u32 %v3265_v49, %v2579_v48  ;;  %v2507_v57 = vld [vmem:[%s5046_s2 + $0x2d0] sm:$0xf]  ;;  %v3247_v58 = vld [vmem:[%s5046_s2 + $0x2d4] sm:$0xf0]  ;;  %v2444_v1 = vor.u32 %v3231_v54, %v2443_v53 }
  0x1d   :  { %1600 = vmatpush.bf16.msra.mxu1 %v2220_v19  ;;  %v23_v59 = vld [vmem:[%s5045_s1] sm:$0xff]  ;;  %v2644_v60 = vor.u32 %v3281_v51, %v2643_v50  ;;  %v2571_v61 = vld [vmem:[%s5046_s2 + $0x350] sm:$0xf]  ;;  %v3263_v62 = vld [vmem:[%s5046_s2 + $0x354] sm:$0xf0]  ;;  %v2508_v2 = vor.u32 %v3247_v58, %v2507_v57  ;;  %vm2101_vm10 = vcmask 779265  }
  0x1e   :  { %1613 = vmatpush.bf16.msra.mxu2 %v2284_v20  ;;  %284 = vst [vmem:[#allocation1] ss:$9 sm:$0xff] %v23_v59  ;;  %v2635_v63 = vld [vmem:[%s5046_s2 + $0x3d0] sm:$0xf]  ;;  %v3279_v0 = vld [vmem:[%s5046_s2 + $0x3d4] sm:$0xf0]  ;;  %v2572_v3 = vor.u32 %v3263_v62, %v2571_v61  ;;  %vm2102_vm11 = vmor %vm2101_vm10, %vm2065_vm8 }
  0x1f   :  { %1626 = vmatpush.bf16.msra.mxu3 %v2348_v24  ;;  %v2435_v4 = vld [vmem:[%s5046_s2 + $0x240] sm:$0xf]  ;;  %v3229_v5 = vld [vmem:[%s5046_s2 + $0x244] sm:$0xf0]  ;;  %v2636_v7 = vor.u32 %v3279_v0, %v2635_v63  ;;  %v2427_v13 = vld [vmem:[%s5046_s2 + $0x230] sm:$0xf] }
  0x20   :  { %1588 = vmatpush.bf16.msra.mxu0 %v2148_v31  ;;  %v2499_v6 = vld [vmem:[%s5046_s2 + $0x2c0] sm:$0xf]  ;;  %v3245_v8 = vld [vmem:[%s5046_s2 + $0x2c4] sm:$0xf0]  ;;  %v2436_v14 = vor.u32 %v3229_v5, %v2435_v4  ;;  %v3227_v15 = vld [vmem:[%s5046_s2 + $0x234] sm:$0xf0] }
  0x21   :  { %1601 = vmatpush.bf16.msra.mxu1 %v2212_v35  ;;  %v2563_v9 = vld [vmem:[%s5046_s2 + $0x340] sm:$0xf]  ;;  %v3261_v10 = vld [vmem:[%s5046_s2 + $0x344] sm:$0xf0]  ;;  %v2491_v16 = vld [vmem:[%s5046_s2 + $0x2b0] sm:$0xf]  ;;  %v2500_v18 = vor.u32 %v3245_v8, %v2499_v6  ;;  %v2428_v29 = vor.u32 %v3227_v15, %v2427_v13 }
  0x22   :  { %1614 = vmatpush.bf16.msra.mxu2 %v2276_v36  ;;  %v2627_v11 = vld [vmem:[%s5046_s2 + $0x3c0] sm:$0xf]  ;;  %v3277_v12 = vld [vmem:[%s5046_s2 + $0x3c4] sm:$0xf0]  ;;  %v3243_v17 = vld [vmem:[%s5046_s2 + $0x2b4] sm:$0xf0]  ;;  %v2564_v19 = vor.u32 %v3261_v10, %v2563_v9 }
  0x23   :  { %1627 = vmatpush.bf16.msra.mxu3 %v2340_v39  ;;  %v2628_v23 = vor.u32 %v3277_v12, %v2627_v11  ;;  %v2555_v24 = vld [vmem:[%s5046_s2 + $0x330] sm:$0xf]  ;;  %v3259_v25 = vld [vmem:[%s5046_s2 + $0x334] sm:$0xf0]  ;;  %v2492_v30 = vor.u32 %v3243_v17, %v2491_v16  ;;  %v2419_v32 = vld [vmem:[%s5046_s2 + $0x220] sm:$0xf] }
  0x24   :  { %1633 = vmatpush.bf16.msrb.mxu0 %v2460_v40  ;;  %v2619_v27 = vld [vmem:[%s5046_s2 + $0x3b0] sm:$0xf]  ;;  %v3275_v28 = vld [vmem:[%s5046_s2 + $0x3b4] sm:$0xf0]  ;;  %v2556_v31 = vor.u32 %v3259_v25, %v2555_v24  ;;  %v3225_v33 = vld [vmem:[%s5046_s2 + $0x224] sm:$0xf0] }
  0x25   :  { %1646 = vmatpush.bf16.msrb.mxu1 %v2524_v41  ;;  %v3758_v20 = vld [vmem:[#allocation1 + $0x12] sm:$0xff]  ;;  %v3760_v21 = vld [vmem:[#allocation1] sm:$0xff]  ;;  %v3771_v26 = vld [vmem:[#allocation1 + $0x9] sm:$0xff]  ;;  %v2620_v35 = vor.u32 %v3275_v28, %v2619_v27  ;;  %v2420_v41 = vor.u32 %v3225_v33, %v2419_v32 }
  0x26   :  { %1659 = vmatpush.bf16.msrb.mxu2 %v2588_v42  ;;  %v3762_v22 = vld [vmem:[#allocation1 + $0x1b] sm:$0xff]  ;;  %1589 = vmatmul.bf16.vlgmr.msra.gmra.mxu0 %v3760_v21  ;;  %v3241_v36 = vld [vmem:[%s5046_s2 + $0x2a4] sm:$0xf0]  ;;  %v2411_v42 = vld [vmem:[%s5046_s2 + $0x210] sm:$0xf] }
  0x27   :  { %1672 = vmatpush.bf16.msrb.mxu3 %v2652_v46  ;;  %1615 = vmatmul.bf16.vlgmr.msra.gmra.mxu2 %v3758_v20  ;;  %v2483_v34 = vld [vmem:[%s5046_s2 + $0x2a0] sm:$0xf]  ;;  %v3257_v38 = vld [vmem:[%s5046_s2 + $0x324] sm:$0xf0]  ;;  %v3223_v45 = vld [vmem:[%s5046_s2 + $0x214] sm:$0xf0] }
  0x28   :  { %1634 = vmatpush.bf16.msrb.mxu0 %v2452_v52  ;;  %1628 = vmatmul.bf16.vlgmr.msra.gmra.mxu3 %v3762_v22  ;;  %v2547_v37 = vld [vmem:[%s5046_s2 + $0x320] sm:$0xf]  ;;  %v3273_v40 = vld [vmem:[%s5046_s2 + $0x3a4] sm:$0xf0]  ;;  %v2484_v43 = vor.u32 %v3241_v36, %v2483_v34  ;;  %v2475_v46 = vld [vmem:[%s5046_s2 + $0x290] sm:$0xf] }
  0x29   :  { %1647 = vmatpush.bf16.msrb.mxu1 %v2516_v55  ;;  %v2611_v39 = vld [vmem:[%s5046_s2 + $0x3a0] sm:$0xf]  ;;  %v2548_v44 = vor.u32 %v3257_v38, %v2547_v37  ;;  %v3239_v47 = vld [vmem:[%s5046_s2 + $0x294] sm:$0xf0]  ;;  %v2539_v49 = vld [vmem:[%s5046_s2 + $0x310] sm:$0xf]  ;;  %v2412_v55 = vor.u32 %v3223_v45, %v2411_v42 }
  0x2a   :  { %1660 = vmatpush.bf16.msrb.mxu2 %v2580_v56  ;;  %1602 = vmatmul.bf16.vlgmr.msra.gmra.mxu1 %v3771_v26  ;;  %v2612_v48 = vor.u32 %v3273_v40, %v2611_v39  ;;  %v3255_v50 = vld [vmem:[%s5046_s2 + $0x314] sm:$0xf0]  ;;  %v2603_v51 = vld [vmem:[%s5046_s2 + $0x390] sm:$0xf]  ;;  %v2403_v53 = vld [vmem:[%s5046_s2 + $0x200] sm:$0xf]  ;;  %v2476_v62 = vor.u32 %v3239_v47, %v2475_v46 }
  0x2b   :  { %1673 = vmatpush.bf16.msrb.mxu3 %v2644_v60  ;;  %v3271_v52 = vld [vmem:[%s5046_s2 + $0x394] sm:$0xf0]  ;;  %v3221_v54 = vld [vmem:[%s5046_s2 + $0x204] sm:$0xf0]  ;;  %v2467_v56 = vld [vmem:[%s5046_s2 + $0x280] sm:$0xf]  ;;  %v2540_v63 = vor.u32 %v3255_v50, %v2539_v49 }
  0x2c   :  { %1635 = vmatpush.bf16.msrb.mxu0 %v2444_v1  ;;  %v3237_v57 = vld [vmem:[%s5046_s2 + $0x284] sm:$0xf0]  ;;  %v2531_v58 = vld [vmem:[%s5046_s2 + $0x300] sm:$0xf]  ;;  %v3848_v60 = vld [vmem:[#allocation1 + $0x36] sm:$0xff]  ;;  %v2404_v9 = vor.u32 %v3221_v54, %v2403_v53 }
  0x2d   :  { %1648 = vmatpush.bf16.msrb.mxu1 %v2508_v2  ;;  %v3253_v59 = vld [vmem:[%s5046_s2 + $0x304] sm:$0xf0]  ;;  %v3855_v1 = vld [vmem:[#allocation1 + $0x3f] sm:$0xff]  ;;  %v3857_v2 = vld [vmem:[#allocation1 + $0x2d] sm:$0xff]  ;;  %v2468_v13 = vor.u32 %v3237_v57, %v2467_v56 }
  0x2e   :  { %1661 = vmatpush.bf16.msrb.mxu2 %v2572_v3  ;;  %v24_v61 = vld [vmem:[%s5045_s1 + $0x8] sm:$0xff]  ;;  %v2604_v3 = vor.u32 %v3271_v52, %v2603_v51  ;;  %v2595_v4 = vld [vmem:[%s5046_s2 + $0x380] sm:$0xf]  ;;  %v2715_v6 = vld [vmem:[%s5046_s2 + $0x470] sm:$0xf] }
  0x2f   :  { %1674 = vmatpush.bf16.msrb.mxu3 %v2636_v7  ;;  %v3853_v0 = vld [vmem:[#allocation1 + $0x24] sm:$0xff]  ;;  %v3299_v7 = vld [vmem:[%s5046_s2 + $0x474] sm:$0xf0]  ;;  %v2779_v8 = vld [vmem:[%s5046_s2 + $0x4f0] sm:$0xf] }
  0x30   :  { %1636 = vmatpush.bf16.msrb.mxu0 %v2436_v14  ;;  %v3269_v5 = vld [vmem:[%s5046_s2 + $0x384] sm:$0xf0]  ;;  %294 = vst [vmem:[#allocation1] ss:$9 sm:$0xff] %v24_v61  ;;  %v3315_v10 = vld [vmem:[%s5046_s2 + $0x4f4] sm:$0xf0]  ;;  %v2532_v14 = vor.u32 %v3253_v59, %v2531_v58 }
  0x31   :  { %1649 = vmatpush.bf16.msrb.mxu1 %v2500_v18  ;;  %v2843_v11 = vld [vmem:[%s5046_s2 + $0x570] sm:$0xf]  ;;  %v3331_v12 = vld [vmem:[%s5046_s2 + $0x574] sm:$0xf0]  ;;  %v2596_v17 = vor.u32 %v3269_v5, %v2595_v4  ;;  %v2716_v18 = vor.u32 %v3299_v7, %v2715_v6  ;;  %v2707_v24 = vld [vmem:[%s5046_s2 + $0x460] sm:$0xf] }
  0x32   :  { %1662 = vmatpush.bf16.msrb.mxu2 %v2564_v19  ;;  %v2907_v15 = vld [vmem:[%s5046_s2 + $0x5f0] sm:$0xf]  ;;  %v3347_v16 = vld [vmem:[%s5046_s2 + $0x5f4] sm:$0xf0]  ;;  %v2780_v19 = vor.u32 %v3315_v10, %v2779_v8  ;;  %v3297_v25 = vld [vmem:[%s5046_s2 + $0x464] sm:$0xf0] }
  0x33   :  { %1675 = vmatpush.bf16.msrb.mxu3 %v2628_v23  ;;  %v2844_v23 = vor.u32 %v3331_v12, %v2843_v11  ;;  %v2771_v27 = vld [vmem:[%s5046_s2 + $0x4e0] sm:$0xf]  ;;  %v2908_v28 = vor.u32 %v3347_v16, %v2907_v15  ;;  %v3345_v33 = vld [vmem:[%s5046_s2 + $0x5e4] sm:$0xf0]  ;;  %v2708_v34 = vor.u32 %v3297_v25, %v2707_v24  ;;  %v2699_v37 = vld [vmem:[%s5046_s2 + $0x450] sm:$0xf] }
  0x34   :  { %1637 = vmatpush.bf16.msrb.mxu0 %v2428_v29  ;;  %v3313_v29 = vld [vmem:[%s5046_s2 + $0x4e4] sm:$0xf0]  ;;  %v2899_v32 = vld [vmem:[%s5046_s2 + $0x5e0] sm:$0xf]  ;;  %v3295_v38 = vld [vmem:[%s5046_s2 + $0x454] sm:$0xf0] }
  0x35   :  { %1650 = vmatpush.bf16.msrb.mxu1 %v2492_v30  ;;  %v2835_v30 = vld [vmem:[%s5046_s2 + $0x560] sm:$0xf]  ;;  %v2763_v39 = vld [vmem:[%s5046_s2 + $0x4d0] sm:$0xf]  ;;  %v2900_v40 = vor.u32 %v3345_v33, %v2899_v32  ;;  %v3343_v45 = vld [vmem:[%s5046_s2 + $0x5d4] sm:$0xf0]  ;;  %v2700_v46 = vor.u32 %v3295_v38, %v2699_v37 }
  0x36   :  { %1663 = vmatpush.bf16.msrb.mxu2 %v2556_v31  ;;  %v3329_v31 = vld [vmem:[%s5046_s2 + $0x564] sm:$0xf0]  ;;  %v2827_v42 = vld [vmem:[%s5046_s2 + $0x550] sm:$0xf]  ;;  %v2691_v49 = vld [vmem:[%s5046_s2 + $0x440] sm:$0xf] }
  0x37   :  { %1676 = vmatpush.bf16.msrb.mxu3 %v2620_v35  ;;  %v2772_v35 = vor.u32 %v3313_v29, %v2771_v27  ;;  %v2836_v36 = vor.u32 %v3329_v31, %v2835_v30  ;;  %v3293_v50 = vld [vmem:[%s5046_s2 + $0x444] sm:$0xf0]  ;;  %v2755_v51 = vld [vmem:[%s5046_s2 + $0x4c0] sm:$0xf]  ;;  %v3307_v5 = vld [vmem:[%s5046_s2 + $0x4b4] sm:$0xf0] }
  0x38   :  { %1638 = vmatpush.bf16.msrb.mxu0 %v2420_v41  ;;  %v3311_v41 = vld [vmem:[%s5046_s2 + $0x4d4] sm:$0xf0]  ;;  %v3309_v53 = vld [vmem:[%s5046_s2 + $0x4c4] sm:$0xf0]  ;;  %v2819_v54 = vld [vmem:[%s5046_s2 + $0x540] sm:$0xf]  ;;  %v2692_v58 = vor.u32 %v3293_v50, %v2691_v49 }
  0x39   :  { %1651 = vmatpush.bf16.msrb.mxu1 %v2484_v43  ;;  %v3327_v43 = vld [vmem:[%s5046_s2 + $0x554] sm:$0xf0]  ;;  %v2764_v47 = vor.u32 %v3311_v41, %v2763_v39  ;;  %v2883_v56 = vld [vmem:[%s5046_s2 + $0x5c0] sm:$0xf]  ;;  %v3341_v57 = vld [vmem:[%s5046_s2 + $0x5c4] sm:$0xf0]  ;;  %v2756_v59 = vor.u32 %v3309_v53, %v2755_v51 }
  0x3a   :  { %1664 = vmatpush.bf16.msrb.mxu2 %v2548_v44  ;;  %v2891_v44 = vld [vmem:[%s5046_s2 + $0x5d0] sm:$0xf]  ;;  %v2884_v4 = vor.u32 %v3341_v57, %v2883_v56  ;;  %v3323_v7 = vld [vmem:[%s5046_s2 + $0x534] sm:$0xf0]  ;;  %v2739_v15 = vld [vmem:[%s5046_s2 + $0x4a0] sm:$0xf] }
  0x3b   :  { %1677 = vmatpush.bf16.msrb.mxu3 %v2612_v48  ;;  %v2828_v48 = vor.u32 %v3327_v43, %v2827_v42  ;;  %v2892_v52 = vor.u32 %v3343_v45, %v2891_v44  ;;  %v2811_v6 = vld [vmem:[%s5046_s2 + $0x530] sm:$0xf]  ;;  %v3337_v24 = vld [vmem:[%s5046_s2 + $0x5a4] sm:$0xf0]  ;;  %v3287_v30 = vld [vmem:[%s5046_s2 + $0x414] sm:$0xf0] }
  0x3c   :  { %1639 = vmatpush.bf16.msrb.mxu0 %v2412_v55  ;;  %v3325_v55 = vld [vmem:[%s5046_s2 + $0x544] sm:$0xf0]  ;;  %v2875_v8 = vld [vmem:[%s5046_s2 + $0x5b0] sm:$0xf]  ;;  %v2812_v12 = vor.u32 %v3323_v7, %v2811_v6  ;;  %v3303_v33 = vld [vmem:[%s5046_s2 + $0x494] sm:$0xf0] }
  0x3d   :  { %1652 = vmatpush.bf16.msrb.mxu1 %v2476_v62  ;;  %v2820_v61 = vor.u32 %v3325_v55, %v2819_v54  ;;  %v2683_v62 = vld [vmem:[%s5046_s2 + $0x430] sm:$0xf]  ;;  %v3335_v37 = vld [vmem:[%s5046_s2 + $0x594] sm:$0xf0]  ;;  %v2659_v39 = vld [vmem:[%s5046_s2 + $0x400] sm:$0xf] }
  0x3e   :  { %1665 = vmatpush.bf16.msrb.mxu2 %v2540_v63  ;;  %v3291_v63 = vld [vmem:[%s5046_s2 + $0x434] sm:$0xf0]  ;;  %v2667_v29 = vld [vmem:[%s5046_s2 + $0x410] sm:$0xf]  ;;  %v2723_v43 = vld [vmem:[%s5046_s2 + $0x480] sm:$0xf] }
  0x3f   :  { %1678 = vmatpush.bf16.msrb.mxu3 %v2604_v3  ;;  %v2747_v3 = vld [vmem:[%s5046_s2 + $0x4b0] sm:$0xf]  ;;  %v2684_v10 = vor.u32 %v3291_v63, %v2683_v62  ;;  %v2668_v38 = vor.u32 %v3287_v30, %v2667_v29  ;;  %v3301_v44 = vld [vmem:[%s5046_s2 + $0x484] sm:$0xf0]  ;;  %v2787_v45 = vld [vmem:[%s5046_s2 + $0x500] sm:$0xf] }
  0x40   :  { %1640 = vmatpush.bf16.msrb.mxu0 %v2404_v9  ;;  %v3339_v9 = vld [vmem:[%s5046_s2 + $0x5b4] sm:$0xf0]  ;;  %v2748_v11 = vor.u32 %v3307_v5, %v2747_v3  ;;  %v2731_v31 = vld [vmem:[%s5046_s2 + $0x490] sm:$0xf]  ;;  %v3333_v49 = vld [vmem:[%s5046_s2 + $0x584] sm:$0xf0]  ;;  %v2724_v57 = vor.u32 %v3301_v44, %v2723_v43 }
  0x41   :  { %1653 = vmatpush.bf16.msrb.mxu1 %v2468_v13  ;;  %v2675_v13 = vld [vmem:[%s5046_s2 + $0x420] sm:$0xf]  ;;  %v2876_v16 = vor.u32 %v3339_v9, %v2875_v8  ;;  %v2732_v41 = vor.u32 %v3303_v33, %v2731_v31  ;;  %v2971_v50 = vld [vmem:[%s5046_s2 + $0x670] sm:$0xf]  ;;  %v3363_v51 = vld [vmem:[%s5046_s2 + $0x674] sm:$0xf0] }
  0x42   :  { %1666 = vmatpush.bf16.msrb.mxu2 %v2532_v14  ;;  %v3289_v14 = vld [vmem:[%s5046_s2 + $0x424] sm:$0xf0]  ;;  %v3379_v54 = vld [vmem:[%s5046_s2 + $0x6f4] sm:$0xf0]  ;;  %v3099_v55 = vld [vmem:[%s5046_s2 + $0x770] sm:$0xf]  ;;  %v2972_v63 = vor.u32 %v3363_v51, %v2971_v50 }
  0x43   :  { %1679 = vmatpush.bf16.msrb.mxu3 %v2596_v17  ;;  %1641 = vmatmul.bf16.vlgmr.msrb.gmra.mxu0 %v3853_v0  ;;  %v3305_v17 = vld [vmem:[%s5046_s2 + $0x4a4] sm:$0xf0]  ;;  %v2676_v25 = vor.u32 %v3289_v14, %v2675_v13  ;;  %v3395_v56 = vld [vmem:[%s5046_s2 + $0x774] sm:$0xf0]  ;;  %v2963_v5 = vld [vmem:[%s5046_s2 + $0x660] sm:$0xf] }
  0x44   :  { %1685 = vmatpush.bf16.msra.mxu0 %v2716_v18  ;;  %1654 = vmatmul.bf16.vlgmr.msrb.gmra.mxu1 %v3857_v2  ;;  %v2803_v18 = vld [vmem:[%s5046_s2 + $0x520] sm:$0xf]  ;;  %v2740_v27 = vor.u32 %v3305_v17, %v2739_v15  ;;  %v3361_v6 = vld [vmem:[%s5046_s2 + $0x664] sm:$0xf0]  ;;  %v297_v15 = vld [vmem:[#allocation1 + $0x12] sm:$0xff] }
  0x45   :  { %1698 = vmatpush.bf16.msra.mxu1 %v2780_v19  ;;  %1667 = vmatmul.bf16.vlgmr.msrb.gmra.mxu2 %v3848_v60  ;;  %v3321_v19 = vld [vmem:[%s5046_s2 + $0x524] sm:$0xf0]  ;;  %v3027_v7 = vld [vmem:[%s5046_s2 + $0x6e0] sm:$0xf]  ;;  %v3375_v29 = vld [vmem:[%s5046_s2 + $0x6d4] sm:$0xf0] }
  0x46   :  { %1711 = vmatpush.bf16.msra.mxu2 %v2844_v23  ;;  %1680 = vmatmul.bf16.vlgmr.msrb.gmra.mxu3 %v3855_v1  ;;  %v2867_v23 = vld [vmem:[%s5046_s2 + $0x5a0] sm:$0xf]  ;;  %v3377_v9 = vld [vmem:[%s5046_s2 + $0x6e4] sm:$0xf0]  ;;  %v3083_v30 = vld [vmem:[%s5046_s2 + $0x750] sm:$0xf] }
  0x47   :  { %1724 = vmatpush.bf16.msra.mxu3 %v2908_v28  ;;  %v2804_v28 = vor.u32 %v3321_v19, %v2803_v18  ;;  %v2868_v32 = vor.u32 %v3337_v24, %v2867_v23  ;;  %v3139_v13 = vld [vmem:[%s5046_s2 + $0x7c0] sm:$0xf]  ;;  %v3405_v14 = vld [vmem:[%s5046_s2 + $0x7c4] sm:$0xf0]  ;;  %v2964_v18 = vor.u32 %v3361_v6, %v2963_v5  ;;  %v3028_v19 = vor.u32 %v3377_v9, %v3027_v7  ;;  %v2955_v24 = vld [vmem:[%s5046_s2 + $0x650] sm:$0xf] }
  0x48   :  { %1686 = vmatpush.bf16.msra.mxu0 %v2708_v34  ;;  %v2795_v34 = vld [vmem:[%s5046_s2 + $0x510] sm:$0xf]  ;;  %v298_v17 = vld [vmem:[#allocation1 + $0x1b] sm:$0xff]  ;;  %v3389_v43 = vld [vmem:[%s5046_s2 + $0x744] sm:$0xf0] }
  0x49   :  { %1699 = vmatpush.bf16.msra.mxu1 %v2772_v35  ;;  %v3319_v35 = vld [vmem:[%s5046_s2 + $0x514] sm:$0xf0]  ;;  %v3123_v44 = vld [vmem:[%s5046_s2 + $0x7a0] sm:$0xf]  ;;  %v3003_v51 = vld [vmem:[%s5046_s2 + $0x6b0] sm:$0xf] }
  0x4a   :  { %1712 = vmatpush.bf16.msra.mxu2 %v2836_v36  ;;  %v2859_v36 = vld [vmem:[%s5046_s2 + $0x590] sm:$0xf]  ;;  %v2796_v42 = vor.u32 %v3319_v35, %v2795_v34  ;;  %v3391_v31 = vld [vmem:[%s5046_s2 + $0x754] sm:$0xf0]  ;;  %v3369_v5 = vld [vmem:[%s5046_s2 + $0x6a4] sm:$0xf0] }
  0x4b   :  { %1725 = vmatpush.bf16.msra.mxu3 %v2900_v40  ;;  %v3285_v40 = vld [vmem:[%s5046_s2 + $0x404] sm:$0xf0]  ;;  %v3403_v33 = vld [vmem:[%s5046_s2 + $0x7b4] sm:$0xf0]  ;;  %v3059_v6 = vld [vmem:[%s5046_s2 + $0x720] sm:$0xf] }
  0x4c   :  { %1687 = vmatpush.bf16.msra.mxu0 %v2700_v46  ;;  %v2860_v46 = vor.u32 %v3335_v37, %v2859_v36  ;;  %v2660_v53 = vor.u32 %v3285_v40, %v2659_v39  ;;  %v3084_v36 = vor.u32 %v3391_v31, %v3083_v30  ;;  %v2947_v37 = vld [vmem:[%s5046_s2 + $0x640] sm:$0xf]  ;;  %v3355_v50 = vld [vmem:[%s5046_s2 + $0x634] sm:$0xf0]  ;;  %v3385_v7 = vld [vmem:[%s5046_s2 + $0x724] sm:$0xf0] }
  0x4d   :  { %1700 = vmatpush.bf16.msra.mxu1 %v2764_v47  ;;  %v3317_v47 = vld [vmem:[%s5046_s2 + $0x504] sm:$0xf0]  ;;  %v3011_v39 = vld [vmem:[%s5046_s2 + $0x6c0] sm:$0xf] }
  0x4e   :  { %1713 = vmatpush.bf16.msra.mxu2 %v2828_v48  ;;  %v2851_v48 = vld [vmem:[%s5046_s2 + $0x580] sm:$0xf]  ;;  %v3397_v9 = vld [vmem:[%s5046_s2 + $0x784] sm:$0xf0] }
  0x4f   :  { %1726 = vmatpush.bf16.msra.mxu3 %v2892_v52  ;;  %v3035_v52 = vld [vmem:[%s5046_s2 + $0x6f0] sm:$0xf]  ;;  %v2852_v62 = vor.u32 %v3333_v49, %v2851_v48  ;;  %v2915_v30 = vld [vmem:[%s5046_s2 + $0x600] sm:$0xf]  ;;  %v3349_v31 = vld [vmem:[%s5046_s2 + $0x604] sm:$0xf0] }
  0x50   :  { %1688 = vmatpush.bf16.msra.mxu0 %v2692_v58  ;;  %v2788_v58 = vor.u32 %v3317_v47, %v2787_v45  ;;  %v3036_v3 = vor.u32 %v3379_v54, %v3035_v52  ;;  %v3401_v45 = vld [vmem:[%s5046_s2 + $0x7a4] sm:$0xf0]  ;;  %v2939_v49 = vld [vmem:[%s5046_s2 + $0x630] sm:$0xf] }
  0x51   :  { %1701 = vmatpush.bf16.msra.mxu1 %v2756_v59  ;;  %v3147_v59 = vld [vmem:[%s5046_s2 + $0x7d0] sm:$0xf]  ;;  %v3124_v52 = vor.u32 %v3401_v45, %v3123_v44  ;;  %v302_v44 = vld [vmem:[#allocation1 + $0x3f] sm:$0xff]  ;;  %v2916_v45 = vor.u32 %v3349_v31, %v2915_v30  ;;  %v2309_v30 = vld [vmem:[%s5046_s2 + $0x148] sm:$0xf0] }
  0x52   :  { %1714 = vmatpush.bf16.msra.mxu2 %v2820_v61  ;;  %v3407_v61 = vld [vmem:[%s5046_s2 + $0x7d4] sm:$0xf0]  ;;  %v3067_v54 = vld [vmem:[%s5046_s2 + $0x730] sm:$0xf]  ;;  %v2165_v31 = vld [vmem:[%s5046_s2 + $0x28] sm:$0xf0] }
  0x53   :  { %1727 = vmatpush.bf16.msra.mxu3 %v2884_v4  ;;  %v3100_v4 = vor.u32 %v3395_v56, %v3099_v55  ;;  %v3148_v8 = vor.u32 %v3407_v61, %v3147_v59  ;;  %v3387_v55 = vld [vmem:[%s5046_s2 + $0x734] sm:$0xf0]  ;;  %v3115_v56 = vld [vmem:[%s5046_s2 + $0x790] sm:$0xf] }
  0x54   :  { %1689 = vmatpush.bf16.msra.mxu0 %v2684_v10  ;;  %v3091_v10 = vld [vmem:[%s5046_s2 + $0x760] sm:$0xf]  ;;  %v3068_v61 = vor.u32 %v3387_v55, %v3067_v54  ;;  %v3184_v54 = vld [vmem:[%s5046_s2 + $0xe4] sm:$0xf] }
  0x55   :  { %1702 = vmatpush.bf16.msra.mxu1 %v2748_v11  ;;  %v3393_v11 = vld [vmem:[%s5046_s2 + $0x764] sm:$0xf0] }
  0x56   :  { %1715 = vmatpush.bf16.msra.mxu2 %v2812_v12  ;;  %v295_v12 = vld [vmem:[#allocation1] sm:$0xff]  ;;  %v3092_v23 = vor.u32 %v3393_v11, %v3091_v10  ;;  %v3170_v11 = vld [vmem:[%s5046_s2 + $0x74] sm:$0xf] }
  0x57   :  { %1728 = vmatpush.bf16.msra.mxu3 %v2876_v16  ;;  %v296_v16 = vld [vmem:[#allocation1 + $0x9] sm:$0xff] }
  0x58   :  { %1690 = vmatpush.bf16.msra.mxu0 %v2676_v25  ;;  %v3359_v25 = vld [vmem:[%s5046_s2 + $0x654] sm:$0xf0] }
  0x59   :  { %1703 = vmatpush.bf16.msra.mxu1 %v2740_v27  ;;  %v3019_v27 = vld [vmem:[%s5046_s2 + $0x6d0] sm:$0xf]  ;;  %v2956_v34 = vor.u32 %v3359_v25, %v2955_v24  ;;  %v3383_v24 = vld [vmem:[%s5046_s2 + $0x714] sm:$0xf0] }
  0x5a   :  { %1716 = vmatpush.bf16.msra.mxu2 %v2804_v28  ;;  %v3140_v28 = vor.u32 %v3405_v14, %v3139_v13  ;;  %v3020_v35 = vor.u32 %v3375_v29, %v3019_v27  ;;  %v3060_v14 = vor.u32 %v3385_v7, %v3059_v6  ;;  %v3168_v27 = vld [vmem:[%s5046_s2 + $0x64] sm:$0xf] }
  0x5b   :  { %1729 = vmatpush.bf16.msra.mxu3 %v2868_v32  ;;  %v3131_v32 = vld [vmem:[%s5046_s2 + $0x7b0] sm:$0xf] }
  0x5c   :  { %1691 = vmatpush.bf16.msra.mxu0 %v2668_v38  ;;  %v3357_v38 = vld [vmem:[%s5046_s2 + $0x644] sm:$0xf0]  ;;  %v3132_v40 = vor.u32 %v3403_v33, %v3131_v32  ;;  %v2979_v32 = vld [vmem:[%s5046_s2 + $0x680] sm:$0xf] }
  0x5d   :  { %1704 = vmatpush.bf16.msra.mxu1 %v2732_v41  ;;  %v3373_v41 = vld [vmem:[%s5046_s2 + $0x6c4] sm:$0xf0] }
  0x5e   :  { %1717 = vmatpush.bf16.msra.mxu2 %v2796_v42  ;;  %v3075_v42 = vld [vmem:[%s5046_s2 + $0x740] sm:$0xf]  ;;  %v3012_v47 = vor.u32 %v3373_v41, %v3011_v39  ;;  %v3186_v39 = vld [vmem:[%s5046_s2 + $0xf4] sm:$0xf] }
  0x5f   :  { %1730 = vmatpush.bf16.msra.mxu3 %v2860_v46  ;;  %v2948_v46 = vor.u32 %v3357_v38, %v2947_v37  ;;  %v3076_v48 = vor.u32 %v3389_v43, %v3075_v42  ;;  %v3381_v37 = vld [vmem:[%s5046_s2 + $0x704] sm:$0xf0]  ;;  %v3166_v38 = vld [vmem:[%s5046_s2 + $0x54] sm:$0xf]  ;;  %v2333_v43 = vld [vmem:[%s5046_s2 + $0x178] sm:$0xf0] }
  0x60   :  { %1692 = vmatpush.bf16.msra.mxu0 %v2660_v53  ;;  %v3371_v53 = vld [vmem:[%s5046_s2 + $0x6b4] sm:$0xf0]  ;;  %v3202_v42 = vld [vmem:[%s5046_s2 + $0x174] sm:$0xf] }
  0x61   :  { %1705 = vmatpush.bf16.msra.mxu1 %v2724_v57  ;;  %v3399_v57 = vld [vmem:[%s5046_s2 + $0x794] sm:$0xf0]  ;;  %v3004_v59 = vor.u32 %v3371_v53, %v3003_v51  ;;  %v3164_v53 = vld [vmem:[%s5046_s2 + $0x44] sm:$0xf] }
  0x62   :  { %1718 = vmatpush.bf16.msra.mxu2 %v2788_v58  ;;  %v2940_v58 = vor.u32 %v3355_v50, %v2939_v49 }
  0x63   :  { %1731 = vmatpush.bf16.msra.mxu3 %v2852_v62  ;;  %1693 = vmatmul.bf16.vlgmr.msra.gmra.mxu0 %v295_v12  ;;  %v2931_v62 = vld [vmem:[%s5046_s2 + $0x620] sm:$0xf]  ;;  %v2205_v12 = vld [vmem:[%s5046_s2 + $0x78] sm:$0xf0] }
  0x64   :  { %1737 = vmatpush.bf16.msrb.mxu0 %v2972_v63  ;;  %1706 = vmatmul.bf16.vlgmr.msra.gmra.mxu1 %v296_v16  ;;  %v3353_v63 = vld [vmem:[%s5046_s2 + $0x624] sm:$0xf0]  ;;  %v3351_v16 = vld [vmem:[%s5046_s2 + $0x614] sm:$0xf0]  ;;  %v2208_v25 = vor.u32 %v3170_v11, %v2205_v12  ;;  %v2253_v12 = vld [vmem:[%s5046_s2 + $0xd8] sm:$0xf0] }
  0x65   :  { %1750 = vmatpush.bf16.msrb.mxu1 %v3036_v3  ;;  %1719 = vmatmul.bf16.vlgmr.msra.gmra.mxu2 %v297_v15  ;;  %v2995_v3 = vld [vmem:[%s5046_s2 + $0x6a0] sm:$0xf]  ;;  %v2932_v10 = vor.u32 %v3353_v63, %v2931_v62  ;;  %v2923_v15 = vld [vmem:[%s5046_s2 + $0x610] sm:$0xf]  ;;  %v3216_v62 = vld [vmem:[%s5046_s2 + $0x1e4] sm:$0xf] }
  0x66   :  { %1763 = vmatpush.bf16.msrb.mxu2 %v3100_v4  ;;  %1732 = vmatmul.bf16.vlgmr.msra.gmra.mxu3 %v298_v17  ;;  %v3116_v4 = vor.u32 %v3399_v57, %v3115_v56  ;;  %v2996_v13 = vor.u32 %v3369_v5, %v2995_v3  ;;  %v2987_v17 = vld [vmem:[%s5046_s2 + $0x690] sm:$0xf]  ;;  %v2924_v29 = vor.u32 %v3351_v16, %v2923_v15  ;;  %v2261_v57 = vld [vmem:[%s5046_s2 + $0xe8] sm:$0xf0]  ;;  %v299_v3 = vld [vmem:[#allocation1 + $0x24] sm:$0xff] }
  0x67   :  { %1778 = vmatpush.bf16.msrb.mxu3 %v3148_v8  ;;  %v3107_v8 = vld [vmem:[%s5046_s2 + $0x780] sm:$0xf]  ;;  %v2389_v63 = vld [vmem:[%s5046_s2 + $0x1e8] sm:$0xf0]  ;;  %v2264_v6 = vor.u32 %v3184_v54, %v2261_v57  ;;  %v2173_v15 = vld [vmem:[%s5046_s2 + $0x38] sm:$0xf0] }
  0x68   :  { %1738 = vmatpush.bf16.msrb.mxu0 %v2964_v18  ;;  %v3108_v18 = vor.u32 %v3397_v9, %v3107_v8  ;;  %v300_v5 = vld [vmem:[#allocation1 + $0x2d] sm:$0xff]  ;;  %v2392_v11 = vor.u32 %v3216_v62, %v2389_v63 }
  0x69   :  { %1751 = vmatpush.bf16.msrb.mxu1 %v3028_v19  ;;  %v3367_v19 = vld [vmem:[%s5046_s2 + $0x694] sm:$0xf0]  ;;  %v3162_v8 = vld [vmem:[%s5046_s2 + $0x34] sm:$0xf]  ;;  %v2293_v54 = vld [vmem:[%s5046_s2 + $0x128] sm:$0xf0] }
  0x6a   :  { %1764 = vmatpush.bf16.msrb.mxu2 %v3092_v23  ;;  %v3051_v23 = vld [vmem:[%s5046_s2 + $0x710] sm:$0xf]  ;;  %v2988_v33 = vor.u32 %v3367_v19, %v2987_v17  ;;  %v3182_v9 = vld [vmem:[%s5046_s2 + $0xd4] sm:$0xf]  ;;  %v2381_v17 = vld [vmem:[%s5046_s2 + $0x1d8] sm:$0xf0] }
  0x6b   :  { %1779 = vmatpush.bf16.msrb.mxu3 %v3140_v28  ;;  %v2197_v28 = vld [vmem:[%s5046_s2 + $0x68] sm:$0xf0]  ;;  %v3214_v16 = vld [vmem:[%s5046_s2 + $0x1d4] sm:$0xf] }
  0x6c   :  { %1739 = vmatpush.bf16.msrb.mxu0 %v2956_v34  ;;  %v3052_v34 = vor.u32 %v3383_v24, %v3051_v23  ;;  %v2200_v41 = vor.u32 %v3168_v27, %v2197_v28  ;;  %v3160_v23 = vld [vmem:[%s5046_s2 + $0x24] sm:$0xf]  ;;  %v2384_v27 = vor.u32 %v3214_v16, %v2381_v17  ;;  %v2245_v28 = vld [vmem:[%s5046_s2 + $0xc8] sm:$0xf0]  ;;  %v3174_v63 = vld [vmem:[%s5046_s2 + $0x94] sm:$0xf] }
  0x6d   :  { %1752 = vmatpush.bf16.msrb.mxu1 %v3020_v35  ;;  %v3365_v35 = vld [vmem:[%s5046_s2 + $0x684] sm:$0xf0]  ;;  %v3180_v24 = vld [vmem:[%s5046_s2 + $0xc4] sm:$0xf]  ;;  %v2357_v57 = vld [vmem:[%s5046_s2 + $0x1a8] sm:$0xf0] }
  0x6e   :  { %1765 = vmatpush.bf16.msrb.mxu2 %v3084_v36  ;;  %v3043_v36 = vld [vmem:[%s5046_s2 + $0x700] sm:$0xf]  ;;  %v2980_v49 = vor.u32 %v3365_v35, %v2979_v32  ;;  %v3212_v32 = vld [vmem:[%s5046_s2 + $0x1c4] sm:$0xf]  ;;  %v2213_v16 = vld [vmem:[%s5046_s2 + $0x88] sm:$0xf0] }
  0x6f   :  { %1780 = vmatpush.bf16.msrb.mxu3 %v3132_v40  ;;  %v2269_v40 = vld [vmem:[%s5046_s2 + $0xf8] sm:$0xf0]  ;;  %v3044_v50 = vor.u32 %v3381_v37, %v3043_v36  ;;  %v3158_v36 = vld [vmem:[%s5046_s2 + $0x14] sm:$0xf]  ;;  %v3188_v17 = vld [vmem:[%s5046_s2 + $0x104] sm:$0xf] }
  0x70   :  { %1740 = vmatpush.bf16.msrb.mxu0 %v2948_v46  ;;  %v2189_v46 = vld [vmem:[%s5046_s2 + $0x58] sm:$0xf0]  ;;  %v2272_v51 = vor.u32 %v3186_v39, %v2269_v40  ;;  %v3178_v37 = vld [vmem:[%s5046_s2 + $0xb4] sm:$0xf] }
  0x71   :  { %1753 = vmatpush.bf16.msrb.mxu1 %v3012_v47  ;;  %v3218_v47 = vld [vmem:[%s5046_s2 + $0x1f4] sm:$0xf]  ;;  %v2192_v55 = vor.u32 %v3166_v38, %v2189_v46  ;;  %v2168_v38 = vor.u32 %v3160_v23, %v2165_v31  ;;  %v2237_v40 = vld [vmem:[%s5046_s2 + $0xb8] sm:$0xf0]  ;;  %v3204_v23 = vld [vmem:[%s5046_s2 + $0x184] sm:$0xf] }
  0x72   :  { %1766 = vmatpush.bf16.msrb.mxu2 %v3076_v48  ;;  %v2397_v48 = vld [vmem:[%s5046_s2 + $0x1f8] sm:$0xf0]  ;;  %v2240_v46 = vor.u32 %v3178_v37, %v2237_v40  ;;  %v3266_v31 = vld [vmem:[%s5046_s2 + $0x374] sm:$0xf] }
  0x73   :  { %1781 = vmatpush.bf16.msrb.mxu3 %v3124_v52  ;;  %v2336_v52 = vor.u32 %v3202_v42, %v2333_v43  ;;  %v2400_v56 = vor.u32 %v3218_v47, %v2397_v48  ;;  %v2301_v42 = vld [vmem:[%s5046_s2 + $0x138] sm:$0xf0]  ;;  %v3156_v48 = vld [vmem:[%s5046_s2 + $0x4] sm:$0xf] }
  0x74   :  { %1741 = vmatpush.bf16.msrb.mxu0 %v2940_v58  ;;  %v3200_v58 = vld [vmem:[%s5046_s2 + $0x164] sm:$0xf]  ;;  %v2157_v43 = vld [vmem:[%s5046_s2 + $0x18] sm:$0xf0] }
  0x75   :  { %1754 = vmatpush.bf16.msrb.mxu1 %v3004_v59  ;;  %v2325_v59 = vld [vmem:[%s5046_s2 + $0x168] sm:$0xf0] }
  0x76   :  { %1767 = vmatpush.bf16.msrb.mxu2 %v3068_v61  ;;  %v2181_v61 = vld [vmem:[%s5046_s2 + $0x48] sm:$0xf0]  ;;  %v2328_v7 = vor.u32 %v3200_v58, %v2325_v59  ;;  %v3234_v58 = vld [vmem:[%s5046_s2 + $0x274] sm:$0xf]  ;;  %v2461_v59 = vld [vmem:[%s5046_s2 + $0x278] sm:$0xf0] }
  0x77   :  { %1782 = vmatpush.bf16.msrb.mxu3 %v3116_v4  ;;  %v301_v4 = vld [vmem:[#allocation1 + $0x36] sm:$0xff] }
  0x78   :  { %1742 = vmatpush.bf16.msrb.mxu0 %v2932_v10  ;;  %v2184_v10 = vor.u32 %v3164_v53, %v2181_v61  ;;  %v3192_v53 = vld [vmem:[%s5046_s2 + $0x124] sm:$0xf] }
  0x79   :  { %1755 = vmatpush.bf16.msrb.mxu1 %v2996_v13  ;;  %v3198_v13 = vld [vmem:[%s5046_s2 + $0x154] sm:$0xf]  ;;  %v2296_v62 = vor.u32 %v3192_v53, %v2293_v54  ;;  %v2509_v54 = vld [vmem:[%s5046_s2 + $0x2d8] sm:$0xf0] }
  0x7a   :  { %1768 = vmatpush.bf16.msrb.mxu2 %v3060_v14  ;;  %v2317_v14 = vld [vmem:[%s5046_s2 + $0x158] sm:$0xf0]  ;;  %v3246_v53 = vld [vmem:[%s5046_s2 + $0x2d4] sm:$0xf] }
  0x7b   :  { %1783 = vmatpush.bf16.msrb.mxu3 %v3108_v18  ;;  %v2256_v18 = vor.u32 %v3182_v9, %v2253_v12  ;;  %v2320_v19 = vor.u32 %v3198_v13, %v2317_v14  ;;  %v3206_v9 = vld [vmem:[%s5046_s2 + $0x194] sm:$0xf]  ;;  %v2453_v12 = vld [vmem:[%s5046_s2 + $0x268] sm:$0xf0] }
  0x7c   :  { %1743 = vmatpush.bf16.msrb.mxu0 %v2924_v29  ;;  %v3196_v29 = vld [vmem:[%s5046_s2 + $0x144] sm:$0xf] }
  0x7d   :  { %1756 = vmatpush.bf16.msrb.mxu1 %v2988_v33  ;;  %v2373_v33 = vld [vmem:[%s5046_s2 + $0x1c8] sm:$0xf0]  ;;  %v2312_v35 = vor.u32 %v3196_v29, %v2309_v30  ;;  %v2525_v29 = vld [vmem:[%s5046_s2 + $0x2f8] sm:$0xf0] }
  0x7e   :  { %1769 = vmatpush.bf16.msrb.mxu2 %v3052_v34  ;;  %3153 = vmatmul.msk.bf16.vlgmr.msrb.gmra.mxu3 %vm1578_vm0, %v302_v44  ;;  %v2248_v34 = vor.u32 %v3180_v24, %v2245_v28  ;;  %v2376_v39 = vor.u32 %v3212_v32, %v2373_v33  ;;  %v3210_v44 = vld [vmem:[%s5046_s2 + $0x1b4] sm:$0xf]  ;;  %v2341_v24 = vld [vmem:[%s5046_s2 + $0x188] sm:$0xf0]  ;;  %v2445_v30 = vld [vmem:[%s5046_s2 + $0x258] sm:$0xf0] }
  0x7f   :  { %1789 = vmatpush.bf16.msra.mxu3 %v2208_v25  ;;  %v2176_v25 = vor.u32 %v3162_v8, %v2173_v15  ;;  %v2464_v8 = vor.u32 %v3234_v58, %v2461_v59  ;;  %v3172_v15 = vld [vmem:[%s5046_s2 + $0x84] sm:$0xf]  ;;  %v3250_v28 = vld [vmem:[%s5046_s2 + $0x2f4] sm:$0xf]  ;;  %v2589_v32 = vld [vmem:[%s5046_s2 + $0x378] sm:$0xf0]  ;;  %v2344_v37 = vor.u32 %v3204_v23, %v2341_v24 }
  0x80   :  { %1744 = vmatpush.bf16.msrb.mxu0 %v2916_v45  ;;  %v2365_v45 = vld [vmem:[%s5046_s2 + $0x1b8] sm:$0xf0]  ;;  %v2216_v33 = vor.u32 %v3172_v15, %v2213_v16  ;;  %v2592_v40 = vor.u32 %v3266_v31, %v2589_v32  ;;  %v3278_v59 = vld [vmem:[%s5046_s2 + $0x3d4] sm:$0xf]  ;;  %v3240_v32 = vld [vmem:[%s5046_s2 + $0x2a4] sm:$0xf] }
  0x81   :  { %1757 = vmatpush.bf16.msrb.mxu1 %v2980_v49  ;;  %v3176_v49 = vld [vmem:[%s5046_s2 + $0xa4] sm:$0xf]  ;;  %v2573_v58 = vld [vmem:[%s5046_s2 + $0x358] sm:$0xf0]  ;;  %v3274_v23 = vld [vmem:[%s5046_s2 + $0x3b4] sm:$0xf] }
  0x82   :  { %1770 = vmatpush.bf16.msrb.mxu2 %v3044_v50  ;;  %v2160_v50 = vor.u32 %v3158_v36, %v2157_v43  ;;  %v2653_v36 = vld [vmem:[%s5046_s2 + $0x3f8] sm:$0xf0]  ;;  %v2517_v43 = vld [vmem:[%s5046_s2 + $0x2e8] sm:$0xf0] }
  0x83   :  { %1790 = vmatpush.bf16.msra.mxu3 %v2200_v41  ;;  %1745 = vmatmul.bf16.vlgmr.msrb.gmra.mxu0 %v299_v3  ;;  %v3194_v41 = vld [vmem:[%s5046_s2 + $0x134] sm:$0xf]  ;;  %v2493_v15 = vld [vmem:[%s5046_s2 + $0x2b8] sm:$0xf0] }
  0x84   :  { %1802 = vmatpush.bf16.msra.mxu0 %v2272_v51  ;;  %1758 = vmatmul.bf16.vlgmr.msrb.gmra.mxu1 %v300_v5  ;;  %v2304_v47 = vor.u32 %v3194_v41, %v2301_v42  ;;  %v2368_v51 = vor.u32 %v3210_v44, %v2365_v45  ;;  %v2221_v5 = vld [vmem:[%s5046_s2 + $0x98] sm:$0xf0]  ;;  %v3228_v41 = vld [vmem:[%s5046_s2 + $0x244] sm:$0xf] }
  0x85   :  { %1815 = vmatpush.bf16.msra.mxu1 %v2336_v52  ;;  %1771 = vmatmul.bf16.vlgmr.msrb.gmra.mxu2 %v301_v4  ;;  %v2229_v52 = vld [vmem:[%s5046_s2 + $0xa8] sm:$0xf0]  ;;  %v2224_v13 = vor.u32 %v3174_v63, %v2221_v5  ;;  %v3248_v42 = vld [vmem:[%s5046_s2 + $0x2e4] sm:$0xf]  ;;  %v2621_v24 = vld [vmem:[%s5046_s2 + $0x3b8] sm:$0xf0] }
  0x86   :  { %1828 = vmatpush.bf16.msra.mxu2 %v2400_v56  ;;  %v3208_v56 = vld [vmem:[%s5046_s2 + $0x1a4] sm:$0xf]  ;;  %v2232_v61 = vor.u32 %v3176_v49, %v2229_v52  ;;  %v2520_v49 = vor.u32 %v3248_v42, %v2517_v43  ;;  %v3226_v52 = vld [vmem:[%s5046_s2 + $0x234] sm:$0xf]  ;;  %v2421_v5 = vld [vmem:[%s5046_s2 + $0x228] sm:$0xf0] }
  0x87   :  { %1791 = vmatpush.bf16.msra.mxu3 %v2192_v55  ;;  %v2149_v55 = vld [vmem:[%s5046_s2 + $0x8] sm:$0xf0]  ;;  %v2360_v4 = vor.u32 %v3208_v56, %v2357_v57  ;;  %v3264_v45 = vld [vmem:[%s5046_s2 + $0x364] sm:$0xf]  ;;  %v2429_v56 = vld [vmem:[%s5046_s2 + $0x238] sm:$0xf0] }
  0x88   :  { %1803 = vmatpush.bf16.msra.mxu0 %v2264_v6  ;;  %v2152_v3 = vor.u32 %v3156_v48, %v2149_v55  ;;  %v3190_v6 = vld [vmem:[%s5046_s2 + $0x114] sm:$0xf]  ;;  %v2645_v48 = vld [vmem:[%s5046_s2 + $0x3e8] sm:$0xf0]  ;;  %v2432_v63 = vor.u32 %v3226_v52, %v2429_v56 }
  0x89   :  { %1816 = vmatpush.bf16.msra.mxu1 %v2328_v7  ;;  %v2285_v7 = vld [vmem:[%s5046_s2 + $0x118] sm:$0xf0]  ;;  %v3262_v57 = vld [vmem:[%s5046_s2 + $0x354] sm:$0xf]  ;;  %v2709_v56 = vld [vmem:[%s5046_s2 + $0x468] sm:$0xf0] }
  0x8a   :  { %1829 = vmatpush.bf16.msra.mxu2 %v2392_v11  ;;  %v3232_v11 = vld [vmem:[%s5046_s2 + $0x264] sm:$0xf]  ;;  %v2288_v14 = vor.u32 %v3190_v6, %v2285_v7  ;;  %v2565_v7 = vld [vmem:[%s5046_s2 + $0x348] sm:$0xf0] }
  0x8b   :  { %1792 = vmatpush.bf16.msra.mxu3 %v2184_v10  ;;  %v2349_v10 = vld [vmem:[%s5046_s2 + $0x198] sm:$0xf0]  ;;  %v3260_v6 = vld [vmem:[%s5046_s2 + $0x344] sm:$0xf] }
  0x8c   :  { %1804 = vmatpush.bf16.msra.mxu0 %v2256_v18  ;;  %v2352_v18 = vor.u32 %v3206_v9, %v2349_v10  ;;  %v2629_v9 = vld [vmem:[%s5046_s2 + $0x3c8] sm:$0xf0] }
  0x8d   :  { %1817 = vmatpush.bf16.msra.mxu1 %v2320_v19  ;;  %v2277_v19 = vld [vmem:[%s5046_s2 + $0x108] sm:$0xf0] }
  0x8e   :  { %1830 = vmatpush.bf16.msra.mxu2 %v2384_v27  ;;  %v3230_v27 = vld [vmem:[%s5046_s2 + $0x254] sm:$0xf] }
  0x8f   :  { %1793 = vmatpush.bf16.msra.mxu3 %v2176_v25  ;;  %v2456_v25 = vor.u32 %v3232_v11, %v2453_v12  ;;  %v2568_v12 = vor.u32 %v3260_v6, %v2565_v7  ;;  %v2781_v6 = vld [vmem:[%s5046_s2 + $0x4f8] sm:$0xf0] }
  0x90   :  { %1805 = vmatpush.bf16.msra.mxu0 %v2248_v34  ;;  %v2280_v34 = vor.u32 %v3188_v17, %v2277_v19  ;;  %v2413_v17 = vld [vmem:[%s5046_s2 + $0x218] sm:$0xf0] }
  0x91   :  { %1818 = vmatpush.bf16.msra.mxu1 %v2312_v35  ;;  %v3282_v35 = vld [vmem:[%s5046_s2 + $0x3f4] sm:$0xf]  ;;  %v2557_v19 = vld [vmem:[%s5046_s2 + $0x338] sm:$0xf0] }
  0x92   :  { %1831 = vmatpush.bf16.msra.mxu2 %v2376_v39  ;;  %v2448_v39 = vor.u32 %v3230_v27, %v2445_v30  ;;  %v2656_v44 = vor.u32 %v3282_v35, %v2653_v36  ;;  %v2624_v35 = vor.u32 %v3274_v23, %v2621_v24  ;;  %v2549_v36 = vld [vmem:[%s5046_s2 + $0x328] sm:$0xf0] }
  0x93   :  { %1794 = vmatpush.bf16.msra.mxu3 %v2168_v38  ;;  %v2528_v38 = vor.u32 %v3250_v28, %v2525_v29  ;;  %v3220_v28 = vld [vmem:[%s5046_s2 + $0x204] sm:$0xf]  ;;  %v2405_v29 = vld [vmem:[%s5046_s2 + $0x208] sm:$0xf0] }
  0x94   :  { %1806 = vmatpush.bf16.msra.mxu0 %v2240_v46  ;;  %v2581_v46 = vld [vmem:[%s5046_s2 + $0x368] sm:$0xf0]  ;;  %v2408_v43 = vor.u32 %v3220_v28, %v2405_v29 }
  0x95   :  { %1819 = vmatpush.bf16.msra.mxu1 %v2304_v47  ;;  %v3280_v47 = vld [vmem:[%s5046_s2 + $0x3e4] sm:$0xf]  ;;  %v2773_v28 = vld [vmem:[%s5046_s2 + $0x4e8] sm:$0xf0] }
  0x96   :  { %1832 = vmatpush.bf16.msra.mxu2 %v2368_v51  ;;  %v2584_v51 = vor.u32 %v3264_v45, %v2581_v46  ;;  %v2648_v55 = vor.u32 %v3280_v47, %v2645_v48  ;;  %v2477_v45 = vld [vmem:[%s5046_s2 + $0x298] sm:$0xf0] }
  0x97   :  { %1795 = vmatpush.bf16.msra.mxu3 %v2160_v50 }
  0x98   :  { %1807 = vmatpush.bf16.msra.mxu0 %v2232_v61  ;;  %v2637_v61 = vld [vmem:[%s5046_s2 + $0x3d8] sm:$0xf0] }
  0x99   :  { %1820 = vmatpush.bf16.msra.mxu1 %v2296_v62  ;;  %v2512_v62 = vor.u32 %v3246_v53, %v2509_v54  ;;  %v2605_v54 = vld [vmem:[%s5046_s2 + $0x398] sm:$0xf0] }
  0x9a   :  { %1833 = vmatpush.bf16.msra.mxu2 %v2360_v4  ;;  %v3244_v4 = vld [vmem:[%s5046_s2 + $0x2c4] sm:$0xf] }
  0x9b   :  { %1796 = vmatpush.bf16.msra.mxu3 %v2152_v3  ;;  %v2576_v3 = vor.u32 %v3262_v57, %v2573_v58  ;;  %v3236_v58 = vld [vmem:[%s5046_s2 + $0x284] sm:$0xf] }
  0x9c   :  { %1808 = vmatpush.bf16.msra.mxu0 %v2224_v13  ;;  %v3222_v13 = vld [vmem:[%s5046_s2 + $0x214] sm:$0xf] }
  0x9d   :  { %1821 = vmatpush.bf16.msra.mxu1 %v2288_v14  ;;  %v3242_v14 = vld [vmem:[%s5046_s2 + $0x2b4] sm:$0xf]  ;;  %v2416_v30 = vor.u32 %v3222_v13, %v2413_v17 }
  0x9e   :  { %1834 = vmatpush.bf16.msra.mxu2 %v2352_v18  ;;  %1797 = vmatmul.bf16.vlgmr.msra.gmra.mxu3 %v3760_v21  ;;  %v2437_v21 = vld [vmem:[%s5046_s2 + $0x248] sm:$0xf0]  ;;  %v3258_v18 = vld [vmem:[%s5046_s2 + $0x334] sm:$0xf]  ;;  %v2496_v27 = vor.u32 %v3242_v14, %v2493_v15  ;;  %v2845_v14 = vld [vmem:[%s5046_s2 + $0x578] sm:$0xf0] }
  0x9f   :  { %1841 = vmatpush.bf16.msrb.mxu3 %v2464_v8  ;;  %v2440_v50 = vor.u32 %v3228_v41, %v2437_v21  ;;  %v3276_v8 = vld [vmem:[%s5046_s2 + $0x3c4] sm:$0xf]  ;;  %v2560_v31 = vor.u32 %v3258_v18, %v2557_v19  ;;  %v2717_v41 = vld [vmem:[%s5046_s2 + $0x478] sm:$0xf0]  ;;  %v3238_v21 = vld [vmem:[%s5046_s2 + $0x294] sm:$0xf] }
  0xa0   :  { %1809 = vmatpush.bf16.msra.mxu0 %v2216_v33  ;;  %v2632_v16 = vor.u32 %v3276_v8, %v2629_v9  ;;  %v2485_v33 = vld [vmem:[%s5046_s2 + $0x2a8] sm:$0xf0]  ;;  %v2480_v57 = vor.u32 %v3238_v21, %v2477_v45  ;;  %v3294_v8 = vld [vmem:[%s5046_s2 + $0x454] sm:$0xf]  ;;  %v2701_v9 = vld [vmem:[%s5046_s2 + $0x458] sm:$0xf0] }
  0xa1   :  { %1822 = vmatpush.bf16.msra.mxu1 %v2280_v34  ;;  %v3256_v34 = vld [vmem:[%s5046_s2 + $0x324] sm:$0xf]  ;;  %v2488_v42 = vor.u32 %v3240_v32, %v2485_v33  ;;  %v3346_v15 = vld [vmem:[%s5046_s2 + $0x5f4] sm:$0xf]  ;;  %v2704_v24 = vor.u32 %v3294_v8, %v2701_v9  ;;  %v2693_v33 = vld [vmem:[%s5046_s2 + $0x448] sm:$0xf0] }
  0xa2   :  { %1835 = vmatpush.bf16.msra.mxu2 %v2344_v37  ;;  %v3272_v37 = vld [vmem:[%s5046_s2 + $0x3a4] sm:$0xf]  ;;  %v3290_v21 = vld [vmem:[%s5046_s2 + $0x434] sm:$0xf]  ;;  %v2685_v45 = vld [vmem:[%s5046_s2 + $0x438] sm:$0xf0] }
  0xa3   :  { %1842 = vmatpush.bf16.msrb.mxu3 %v2456_v25  ;;  %1810 = vmatmul.bf16.vlgmr.msra.gmra.mxu0 %v3771_v26  ;;  %v3224_v26 = vld [vmem:[%s5046_s2 + $0x224] sm:$0xf]  ;;  %v4573_v25 = vld [vmem:[%s5047_s3] sm:$0x3]  ;;  %v1590_v46 = vpop.f32.mrf.mxu0  ;;  %v3338_v8 = vld [vmem:[%s5046_s2 + $0x5b4] sm:$0xf] }
  0xa4   :  { %1854 = vmatpush.bf16.msrb.mxu0 %v2528_v38  ;;  %1823 = vmatmul.bf16.vlgmr.msra.gmra.mxu1 %v3758_v20  ;;  %v2640_v20 = vor.u32 %v3278_v59, %v2637_v61  ;;  %v2424_v11 = vor.u32 %v3224_v26, %v2421_v5  ;;  %v279_v38 = vperm.slane %v4573_v25, 0  ;;  %v2469_v59 = vld [vmem:[%s5046_s2 + $0x288] sm:$0xf0]  ;;  %v3268_v26 = vld [vmem:[%s5046_s2 + $0x384] sm:$0xf] }
  0xa5   :  { %1867 = vmatpush.bf16.msrb.mxu1 %v2592_v40  ;;  %1836 = vmatmul.bf16.vlgmr.msra.gmra.mxu2 %v3762_v22  ;;  %v2501_v22 = vld [vmem:[%s5046_s2 + $0x2c8] sm:$0xf0]  ;;  %v3298_v40 = vld [vmem:[%s5046_s2 + $0x474] sm:$0xf]  ;;  %v2472_v13 = vor.u32 %v3236_v58, %v2469_v59  ;;  %v3292_v32 = vld [vmem:[%s5046_s2 + $0x444] sm:$0xf] }
  0xa6   :  { %1880 = vmatpush.bf16.msrb.mxu2 %v2656_v44  ;;  %v2504_v10 = vor.u32 %v3244_v4, %v2501_v22  ;;  %v2552_v44 = vor.u32 %v3256_v34, %v2549_v36  ;;  %v2720_v48 = vor.u32 %v3298_v40, %v2717_v41  ;;  %v1591_v52 = vadd.f32 %v1590_v46, %v279_v38  ;;  %v3314_v5 = vld [vmem:[%s5046_s2 + $0x4f4] sm:$0xf]  ;;  %v3328_v34 = vld [vmem:[%s5046_s2 + $0x564] sm:$0xf]  ;;  %v2765_v41 = vld [vmem:[%s5046_s2 + $0x4d8] sm:$0xf0] }
  0xa7   :  { %1843 = vmatpush.bf16.msrb.mxu3 %v2448_v39  ;;  %v2613_v39 = vld [vmem:[%s5046_s2 + $0x3a8] sm:$0xf0]  ;;  %v1603_v53 = vpop.f32.mrf.mxu1  ;;  %v2784_v18 = vor.u32 %v3314_v5, %v2781_v6  ;;  %v3344_v36 = vld [vmem:[%s5046_s2 + $0x5e4] sm:$0xf]  ;;  %v3310_v40 = vld [vmem:[%s5046_s2 + $0x4d4] sm:$0xf] }
  0xa8   :  { %1855 = vmatpush.bf16.msrb.mxu0 %v2520_v49  ;;  %v2616_v47 = vor.u32 %v3272_v37, %v2613_v39  ;;  %v3254_v49 = vld [vmem:[%s5046_s2 + $0x314] sm:$0xf]  ;;  %v1604_v61 = vadd.f32 %v1603_v53, %v1591_v52  ;;  %v2901_v37 = vld [vmem:[%s5046_s2 + $0x5e8] sm:$0xf0]  ;;  %v2696_v39 = vor.u32 %v3292_v32, %v2693_v33  ;;  %v3308_v52 = vld [vmem:[%s5046_s2 + $0x4c4] sm:$0xf] }
  0xa9   :  { %1868 = vmatpush.bf16.msrb.mxu1 %v2584_v51  ;;  %v3270_v51 = vld [vmem:[%s5046_s2 + $0x394] sm:$0xf]  ;;  %v2757_v53 = vld [vmem:[%s5046_s2 + $0x4c8] sm:$0xf0]  ;;  %v3340_v58 = vld [vmem:[%s5046_s2 + $0x5c4] sm:$0xf] }
  0xaa   :  { %1881 = vmatpush.bf16.msrb.mxu2 %v2648_v55  ;;  %v3296_v55 = vld [vmem:[%s5046_s2 + $0x464] sm:$0xf]  ;;  %v2608_v4 = vor.u32 %v3270_v51, %v2605_v54  ;;  %v1616_v7 = vpop.f32.mrf.mxu2  ;;  %v3326_v46 = vld [vmem:[%s5046_s2 + $0x554] sm:$0xf]  ;;  %v2768_v51 = vor.u32 %v3310_v40, %v2765_v41  ;;  %v2885_v59 = vld [vmem:[%s5046_s2 + $0x5c8] sm:$0xf0] }
  0xab   :  { %1844 = vmatpush.bf16.msrb.mxu3 %v2440_v50  ;;  %v2541_v50 = vld [vmem:[%s5046_s2 + $0x318] sm:$0xf0]  ;;  %v2712_v22 = vor.u32 %v3296_v55, %v2709_v56  ;;  %v1592_v23 = vpop.f32.mrf.mxu0  ;;  %v3324_v56 = vld [vmem:[%s5046_s2 + $0x544] sm:$0xf]  ;;  %v3322_v5 = vld [vmem:[%s5046_s2 + $0x534] sm:$0xf] }
  0xac   :  { %1856 = vmatpush.bf16.msrb.mxu0 %v2512_v62  ;;  %v2544_v62 = vor.u32 %v3254_v49, %v2541_v50  ;;  %v3342_v49 = vld [vmem:[%s5046_s2 + $0x5d4] sm:$0xf]  ;;  %v2893_v50 = vld [vmem:[%s5046_s2 + $0x5d8] sm:$0xf0]  ;;  %v2661_v23 = vld [vmem:[%s5046_s2 + $0x408] sm:$0xf0] }
  0xad   :  { %1869 = vmatpush.bf16.msrb.mxu1 %v2576_v3  ;;  %v2533_v3 = vld [vmem:[%s5046_s2 + $0x308] sm:$0xf0]  ;;  %v2896_v55 = vor.u32 %v3342_v49, %v2893_v50  ;;  %v2877_v9 = vld [vmem:[%s5046_s2 + $0x5b8] sm:$0xf0]  ;;  %v3362_v32 = vld [vmem:[%s5046_s2 + $0x674] sm:$0xf] }
  0xae   :  { %1882 = vmatpush.bf16.msrb.mxu2 %v2640_v20  ;;  %v2597_v20 = vld [vmem:[%s5046_s2 + $0x388] sm:$0xf0]  ;;  %v2973_v33 = vld [vmem:[%s5046_s2 + $0x678] sm:$0xf0]  ;;  %v3318_v41 = vld [vmem:[%s5046_s2 + $0x514] sm:$0xf] }
  0xaf   :  { %1845 = vmatpush.bf16.msrb.mxu3 %v2432_v63  ;;  %v3252_v63 = vld [vmem:[%s5046_s2 + $0x304] sm:$0xf]  ;;  %v1605_v29 = vpop.f32.mrf.mxu1  ;;  %v2965_v49 = vld [vmem:[%s5046_s2 + $0x668] sm:$0xf0] }
  0xb0   :  { %1857 = vmatpush.bf16.msrb.mxu0 %v2504_v10  ;;  %v3330_v10 = vld [vmem:[%s5046_s2 + $0x574] sm:$0xf]  ;;  %v2536_v17 = vor.u32 %v3252_v63, %v2533_v3  ;;  %v2749_v3 = vld [vmem:[%s5046_s2 + $0x4b8] sm:$0xf0]  ;;  %v3300_v50 = vld [vmem:[%s5046_s2 + $0x484] sm:$0xf] }
  0xb1   :  { %1870 = vmatpush.bf16.msrb.mxu1 %v2568_v12  ;;  %v1629_v12 = vpop.f32.mrf.mxu3  ;;  %v3306_v63 = vld [vmem:[%s5046_s2 + $0x4b4] sm:$0xf] }
  0xb2   :  { %1883 = vmatpush.bf16.msrb.mxu2 %v2632_v16  ;;  %v2909_v16 = vld [vmem:[%s5046_s2 + $0x5f8] sm:$0xf0] }
  0xb3   :  { %1846 = vmatpush.bf16.msrb.mxu3 %v2424_v11  ;;  %v1617_v11 = vadd.f32 %v1616_v7, %v1604_v61  ;;  %v2760_v61 = vor.u32 %v3308_v52, %v2757_v53  ;;  %v2813_v7 = vld [vmem:[%s5046_s2 + $0x538] sm:$0xf0] }
  0xb4   :  { %1858 = vmatpush.bf16.msrb.mxu0 %v2496_v27  ;;  %v3312_v27 = vld [vmem:[%s5046_s2 + $0x4e4] sm:$0xf] }
  0xb5   :  { %1871 = vmatpush.bf16.msrb.mxu1 %v2560_v31  ;;  %v4673_v19 = vadd.f32 %v1629_v12, %v1617_v11  ;;  %v2912_v31 = vor.u32 %v3346_v15, %v2909_v16  ;;  %v2776_v38 = vor.u32 %v3312_v27, %v2773_v28  ;;  %v2752_v12 = vor.u32 %v3306_v63, %v2749_v3  ;;  %v3304_v15 = vld [vmem:[%s5046_s2 + $0x4a4] sm:$0xf]  ;;  %v2741_v16 = vld [vmem:[%s5046_s2 + $0x4a8] sm:$0xf0]  ;;  %v2957_v63 = vld [vmem:[%s5046_s2 + $0x658] sm:$0xf0] }
  0xb6   :  { %1884 = vmatpush.bf16.msrb.mxu2 %v2624_v35  ;;  %v2837_v35 = vld [vmem:[%s5046_s2 + $0x568] sm:$0xf0]  ;;  %v3336_v27 = vld [vmem:[%s5046_s2 + $0x5a4] sm:$0xf]  ;;  %v3394_v3 = vld [vmem:[%s5046_s2 + $0x774] sm:$0xf] }
  0xb7   :  { %1847 = vmatpush.bf16.msrb.mxu3 %v2416_v30  ;;  %v2848_v30 = vor.u32 %v3330_v10, %v2845_v14  ;;  %v2869_v28 = vld [vmem:[%s5046_s2 + $0x5a8] sm:$0xf0] }
  0xb8   :  { %1859 = vmatpush.bf16.msrb.mxu0 %v2488_v42  ;;  %v1618_v42 = vpop.f32.mrf.mxu2 }
  0xb9   :  { %1872 = vmatpush.bf16.msrb.mxu1 %v2552_v44  ;;  %v2904_v44 = vor.u32 %v3344_v36, %v2901_v37  ;;  %v3302_v36 = vld [vmem:[%s5046_s2 + $0x494] sm:$0xf]  ;;  %v2733_v37 = vld [vmem:[%s5046_s2 + $0x498] sm:$0xf0] }
  0xba   :  { %1885 = vmatpush.bf16.msrb.mxu2 %v2616_v47  ;;  %v1631_v47 = vpop.f32.mrf.mxu3 }
  0xbb   :  { %1848 = vmatpush.bf16.msrb.mxu3 %v2408_v43  ;;  %v2840_v43 = vor.u32 %v3328_v34, %v2837_v35  ;;  %v2736_v47 = vor.u32 %v3302_v36, %v2733_v37  ;;  %v3402_v36 = vld [vmem:[%s5046_s2 + $0x7b4] sm:$0xf]  ;;  %v3133_v37 = vld [vmem:[%s5046_s2 + $0x7b8] sm:$0xf0] }
  0xbc   :  { %1860 = vmatpush.bf16.msrb.mxu0 %v2480_v57  ;;  %v2821_v57 = vld [vmem:[%s5046_s2 + $0x548] sm:$0xf0] }
  0xbd   :  { %1873 = vmatpush.bf16.msrb.mxu1 %v2544_v62 }
  0xbe   :  { %1849 = vmatmul.bf16.vlgmr.msrb.gmra.mxu3 %v3853_v0  ;;  %1886 = vmatpush.bf16.msrb.mxu2 %v2608_v4  ;;  %v2600_v0 = vor.u32 %v3268_v26, %v2597_v20  ;;  %v2824_v26 = vor.u32 %v3324_v56, %v2821_v57  ;;  %v2888_v4 = vor.u32 %v3340_v58, %v2885_v59  ;;  %v2669_v20 = vld [vmem:[%s5046_s2 + $0x418] sm:$0xf0]  ;;  %v3332_v56 = vld [vmem:[%s5046_s2 + $0x584] sm:$0xf]  ;;  %v2853_v57 = vld [vmem:[%s5046_s2 + $0x588] sm:$0xf0] }
  0xbf   :  { %1893 = vmatpush.bf16.msra.mxu3 %v2720_v48  ;;  %v2829_v48 = vld [vmem:[%s5046_s2 + $0x558] sm:$0xf0]  ;;  %v3358_v58 = vld [vmem:[%s5046_s2 + $0x654] sm:$0xf] }
  0xc0   :  { %1861 = vmatpush.bf16.msrb.mxu0 %v2472_v13  ;;  %v2832_v54 = vor.u32 %v3326_v46, %v2829_v48  ;;  %v1642_v6 = vpop.f32.mrf.mxu0  ;;  %v3360_v48 = vld [vmem:[%s5046_s2 + $0x664] sm:$0xf] }
  0xc1   :  { %1874 = vmatpush.bf16.msrb.mxu1 %v2536_v17  ;;  %v1643_v10 = vadd.f32 %v1642_v6, %v4673_v19  ;;  %v1655_v11 = vpop.f32.mrf.mxu1  ;;  %v2816_v17 = vor.u32 %v3322_v5, %v2813_v7  ;;  %v3284_v19 = vld [vmem:[%s5046_s2 + $0x404] sm:$0xf]  ;;  %v3149_v5 = vld [vmem:[%s5046_s2 + $0x7d8] sm:$0xf0]  ;;  %v2856_v7 = vor.u32 %v3332_v56, %v2853_v57 }
  0xc2   :  { %1887 = vmatpush.bf16.msrb.mxu2 %v2600_v0  ;;  %v3320_v0 = vld [vmem:[%s5046_s2 + $0x524] sm:$0xf]  ;;  %v2664_v35 = vor.u32 %v3284_v19, %v2661_v23  ;;  %v2925_v57 = vld [vmem:[%s5046_s2 + $0x618] sm:$0xf0] }
  0xc3   :  { %1894 = vmatpush.bf16.msra.mxu3 %v2712_v22  ;;  %1862 = vmatmul.bf16.vlgmr.msrb.gmra.mxu0 %v3857_v2  ;;  %v2688_v2 = vor.u32 %v3290_v21, %v2685_v45  ;;  %v3286_v22 = vld [vmem:[%s5046_s2 + $0x414] sm:$0xf]  ;;  %v1656_v14 = vadd.f32 %v1655_v11, %v1643_v10  ;;  %v2861_v45 = vld [vmem:[%s5046_s2 + $0x598] sm:$0xf0]  ;;  %v3356_v10 = vld [vmem:[%s5046_s2 + $0x644] sm:$0xf] }
  0xc4   :  { %1906 = vmatpush.bf16.msra.mxu0 %v2784_v18  ;;  %1875 = vmatmul.bf16.vlgmr.msrb.gmra.mxu1 %v3848_v60  ;;  %v3288_v60 = vld [vmem:[%s5046_s2 + $0x424] sm:$0xf]  ;;  %v2672_v13 = vor.u32 %v3286_v22, %v2669_v20  ;;  %v2880_v18 = vor.u32 %v3338_v8, %v2877_v9  ;;  %v3334_v21 = vld [vmem:[%s5046_s2 + $0x594] sm:$0xf]  ;;  %v2960_v8 = vor.u32 %v3358_v58, %v2957_v63 }
  0xc5   :  { %1919 = vmatpush.bf16.msra.mxu1 %v2848_v30  ;;  %1888 = vmatmul.bf16.vlgmr.msrb.gmra.mxu2 %v3855_v1  ;;  %v2677_v1 = vld [vmem:[%s5046_s2 + $0x428] sm:$0xf0]  ;;  %v2744_v30 = vor.u32 %v3304_v15, %v2741_v16  ;;  %v2864_v53 = vor.u32 %v3334_v21, %v2861_v45  ;;  %v3406_v20 = vld [vmem:[%s5046_s2 + $0x7d4] sm:$0xf]  ;;  %v3376_v11 = vld [vmem:[%s5046_s2 + $0x6e4] sm:$0xf]  ;;  %v3136_v21 = vor.u32 %v3402_v36, %v3133_v37 }
  0xc6   :  { %1932 = vmatpush.bf16.msra.mxu2 %v2912_v31  ;;  %v2680_v62 = vor.u32 %v3288_v60, %v2677_v1  ;;  %v3037_v60 = vld [vmem:[%s5046_s2 + $0x6f8] sm:$0xf0]  ;;  %v2968_v1 = vor.u32 %v3360_v48, %v2965_v49  ;;  %v3392_v15 = vld [vmem:[%s5046_s2 + $0x764] sm:$0xf]  ;;  %v3093_v16 = vld [vmem:[%s5046_s2 + $0x768] sm:$0xf0] }
  0xc7   :  { %1895 = vmatpush.bf16.msra.mxu3 %v2704_v24  ;;  %v2805_v24 = vld [vmem:[%s5046_s2 + $0x528] sm:$0xf0]  ;;  %v3400_v48 = vld [vmem:[%s5046_s2 + $0x7a4] sm:$0xf]  ;;  %v3386_v58 = vld [vmem:[%s5046_s2 + $0x734] sm:$0xf] }
  0xc8   :  { %1907 = vmatpush.bf16.msra.mxu0 %v2776_v38  ;;  %v1668_v29 = vpop.f32.mrf.mxu2  ;;  %v2808_v38 = vor.u32 %v3320_v0, %v2805_v24  ;;  %v1644_v42 = vpop.f32.mrf.mxu0  ;;  %v3096_v0 = vor.u32 %v3392_v15, %v3093_v16  ;;  %v3354_v24 = vld [vmem:[%s5046_s2 + $0x634] sm:$0xf]  ;;  %v2933_v45 = vld [vmem:[%s5046_s2 + $0x628] sm:$0xf0] }
  0xc9   :  { %1920 = vmatpush.bf16.msra.mxu1 %v2840_v43  ;;  %v1669_v31 = vadd.f32 %v1668_v29, %v1656_v14  ;;  %v1681_v34 = vpop.f32.mrf.mxu3  ;;  %v2976_v43 = vor.u32 %v3362_v32, %v2973_v33  ;;  %v1657_v46 = vpop.f32.mrf.mxu1  ;;  %v2949_v14 = vld [vmem:[%s5046_s2 + $0x648] sm:$0xf0]  ;;  %v3390_v32 = vld [vmem:[%s5046_s2 + $0x754] sm:$0xf]  ;;  %v3085_v33 = vld [vmem:[%s5046_s2 + $0x758] sm:$0xf0] }
  0xca   :  { %1933 = vmatpush.bf16.msra.mxu2 %v2904_v44  ;;  %v2797_v44 = vld [vmem:[%s5046_s2 + $0x518] sm:$0xf0]  ;;  %v2952_v23 = vor.u32 %v3356_v10, %v2949_v14  ;;  %v3413_v29 = vld [vmem:[#allocation1 + $0x9] sm:$0xff]  ;;  %v3352_v42 = vld [vmem:[%s5046_s2 + $0x624] sm:$0xf] }
  0xcb   :  { %1896 = vmatpush.bf16.msra.mxu3 %v2696_v39  ;;  %v2872_v39 = vor.u32 %v3336_v27, %v2869_v28  ;;  %v4811_v40 = vadd.f32 %v1681_v34, %v1669_v31  ;;  %v2800_v52 = vor.u32 %v3318_v41, %v2797_v44  ;;  %v3374_v27 = vld [vmem:[%s5046_s2 + $0x6d4] sm:$0xf]  ;;  %v3021_v28 = vld [vmem:[%s5046_s2 + $0x6d8] sm:$0xf0]  ;;  %v3088_v41 = vor.u32 %v3390_v32, %v3085_v33  ;;  %v3013_v44 = vld [vmem:[%s5046_s2 + $0x6c8] sm:$0xf0] }
  0xcc   :  { %1908 = vmatpush.bf16.msra.mxu0 %v2768_v51  ;;  %v2725_v51 = vld [vmem:[%s5046_s2 + $0x488] sm:$0xf0]  ;;  %v2941_v31 = vld [vmem:[%s5046_s2 + $0x638] sm:$0xf0]  ;;  %v3388_v46 = vld [vmem:[%s5046_s2 + $0x744] sm:$0xf] }
  0xcd   :  { %1921 = vmatpush.bf16.msra.mxu1 %v2832_v54  ;;  %v2789_v54 = vld [vmem:[%s5046_s2 + $0x508] sm:$0xf0]  ;;  %v3414_v34 = vld [vmem:[#allocation1 + $0x1b] sm:$0xff]  ;;  %v3380_v33 = vld [vmem:[%s5046_s2 + $0x704] sm:$0xf] }
  0xce   :  { %1934 = vmatpush.bf16.msra.mxu2 %v2896_v55  ;;  %v3378_v55 = vld [vmem:[%s5046_s2 + $0x6f4] sm:$0xf]  ;;  %v3125_v49 = vld [vmem:[%s5046_s2 + $0x7a8] sm:$0xf0] }
  0xcf   :  { %1897 = vmatpush.bf16.msra.mxu3 %v2688_v2  ;;  %v3316_v2 = vld [vmem:[%s5046_s2 + $0x504] sm:$0xf]  ;;  %v3040_v22 = vor.u32 %v3378_v55, %v3037_v60  ;;  %v3005_v55 = vld [vmem:[%s5046_s2 + $0x6b8] sm:$0xf0]  ;;  %v3109_v10 = vld [vmem:[%s5046_s2 + $0x788] sm:$0xf0] }
  0xd0   :  { %1909 = vmatpush.bf16.msra.mxu0 %v2760_v61  ;;  %v1670_v59 = vpop.f32.mrf.mxu2  ;;  %v3412_v61 = vld [vmem:[#allocation1] sm:$0xff]  ;;  %v2792_v6 = vor.u32 %v3316_v2, %v2789_v54  ;;  %v2936_v2 = vor.u32 %v3352_v42, %v2933_v45  ;;  %v3370_v54 = vld [vmem:[%s5046_s2 + $0x6b4] sm:$0xf]  ;;  %v2981_v32 = vld [vmem:[%s5046_s2 + $0x688] sm:$0xf0] }
  0xd1   :  { %1922 = vmatpush.bf16.msra.mxu1 %v2824_v26  ;;  %v3101_v26 = vld [vmem:[%s5046_s2 + $0x778] sm:$0xf0]  ;;  %v3008_v63 = vor.u32 %v3370_v54, %v3005_v55  ;;  %v3418_v42 = vld [vmem:[#allocation1 + $0x2d] sm:$0xff]  ;;  %v280_v54 = vperm.slane %v4573_v25, 1 }
  0xd2   :  { %1935 = vmatpush.bf16.msra.mxu2 %v2888_v4  ;;  %v1683_v4 = vpop.f32.mrf.mxu3  ;;  %v3104_v9 = vor.u32 %v3394_v3, %v3101_v26  ;;  %v3069_v59 = vld [vmem:[%s5046_s2 + $0x738] sm:$0xf0] }
  0xd3   :  { %1898 = vmatpush.bf16.msra.mxu3 %v2680_v62  ;;  %v2728_v62 = vor.u32 %v3300_v50, %v2725_v51  ;;  %v3072_v26 = vor.u32 %v3386_v58, %v3069_v59  ;;  %v3348_v4 = vld [vmem:[%s5046_s2 + $0x604] sm:$0xf] }
  0xd4   :  { %1910 = vmatpush.bf16.msra.mxu0 %v2752_v12  ;;  %v3029_v12 = vld [vmem:[%s5046_s2 + $0x6e8] sm:$0xf0] }
  0xd5   :  { %1923 = vmatpush.bf16.msra.mxu1 %v2816_v17  ;;  %v3404_v17 = vld [vmem:[%s5046_s2 + $0x7c4] sm:$0xf]  ;;  %v3032_v19 = vor.u32 %v3376_v11, %v3029_v12 }
  0xd6   :  { %1936 = vmatpush.bf16.msra.mxu2 %v2880_v18  ;;  %v3141_v18 = vld [vmem:[%s5046_s2 + $0x7c8] sm:$0xf0] }
  0xd7   :  { %1899 = vmatpush.bf16.msra.mxu3 %v2672_v13  ;;  %v3152_v13 = vor.u32 %v3406_v20, %v3149_v5  ;;  %v2997_v20 = vld [vmem:[%s5046_s2 + $0x6a8] sm:$0xf0] }
  0xd8   :  { %1911 = vmatpush.bf16.msra.mxu0 %v2744_v30  ;;  %v3144_v30 = vor.u32 %v3404_v17, %v3141_v18  ;;  %v3366_v17 = vld [vmem:[%s5046_s2 + $0x694] sm:$0xf]  ;;  %v2989_v18 = vld [vmem:[%s5046_s2 + $0x698] sm:$0xf0] }
  0xd9   :  { %1924 = vmatpush.bf16.msra.mxu1 %v2808_v38  ;;  %v3024_v38 = vor.u32 %v3374_v27, %v3021_v28 }
  0xda   :  { %1937 = vmatpush.bf16.msra.mxu2 %v2872_v39  ;;  %v2944_v39 = vor.u32 %v3354_v24, %v2941_v31  ;;  %v3053_v24 = vld [vmem:[%s5046_s2 + $0x718] sm:$0xf0]  ;;  %v3364_v31 = vld [vmem:[%s5046_s2 + $0x684] sm:$0xf] }
  0xdb   :  { %1900 = vmatpush.bf16.msra.mxu3 %v2664_v35  ;;  %v3415_v35 = vld [vmem:[#allocation1 + $0x12] sm:$0xff]  ;;  %v2984_v36 = vor.u32 %v3364_v31, %v2981_v32 }
  0xdc   :  { %1912 = vmatpush.bf16.msra.mxu0 %v2736_v47  ;;  %v3077_v47 = vld [vmem:[%s5046_s2 + $0x748] sm:$0xf0] }
  0xdd   :  { %1925 = vmatpush.bf16.msra.mxu1 %v2800_v52  ;;  %v3080_v52 = vor.u32 %v3388_v46, %v3077_v47 }
  0xde   :  { %1901 = vmatmul.bf16.vlgmr.msra.gmra.mxu3 %v3412_v61  ;;  %1938 = vmatpush.bf16.msra.mxu2 %v2864_v53  ;;  %v3350_v53 = vld [vmem:[%s5046_s2 + $0x614] sm:$0xf] }
  0xdf   :  { %1945 = vmatpush.bf16.msrb.mxu3 %v2976_v43  ;;  %v3372_v43 = vld [vmem:[%s5046_s2 + $0x6c4] sm:$0xf]  ;;  %v3398_v61 = vld [vmem:[%s5046_s2 + $0x794] sm:$0xf]  ;;  %v2928_v3 = vor.u32 %v3350_v53, %v2925_v57 }
  0xe0   :  { %1913 = vmatpush.bf16.msra.mxu0 %v2728_v62  ;;  %v3016_v50 = vor.u32 %v3372_v43, %v3013_v44  ;;  %v1694_v51 = vpop.f32.mrf.mxu0  ;;  %v3419_v43 = vld [vmem:[#allocation1 + $0x36] sm:$0xff] }
  0xe1   :  { %1926 = vmatpush.bf16.msra.mxu1 %v2792_v6  ;;  %v1695_v60 = vadd.f32 %v1694_v51, %v4811_v40  ;;  %v1707_v56 = vpop.f32.mrf.mxu1  ;;  %v3117_v40 = vld [vmem:[%s5046_s2 + $0x798] sm:$0xf0]  ;;  %v2917_v6 = vld [vmem:[%s5046_s2 + $0x608] sm:$0xf0] }
  0xe2   :  { %1939 = vmatpush.bf16.msra.mxu2 %v2856_v7  ;;  %v3120_v5 = vor.u32 %v3398_v61, %v3117_v40  ;;  %v3384_v7 = vld [vmem:[%s5046_s2 + $0x724] sm:$0xf]  ;;  %v2920_v15 = vor.u32 %v3348_v4, %v2917_v6 }
  0xe3   :  { %1946 = vmatpush.bf16.msrb.mxu3 %v2968_v1  ;;  %1914 = vmatmul.bf16.vlgmr.msra.gmra.mxu0 %v3413_v29  ;;  %v3128_v1 = vor.u32 %v3400_v48, %v3125_v49  ;;  %v1708_v62 = vadd.f32 %v1707_v56, %v1695_v60  ;;  %v2992_v29 = vor.u32 %v3366_v17, %v2989_v18 }
  0xe4   :  { %1958 = vmatpush.bf16.msrb.mxu0 %v3040_v22  ;;  %1927 = vmatmul.bf16.vlgmr.msra.gmra.mxu1 %v3415_v35  ;;  %v3368_v22 = vld [vmem:[%s5046_s2 + $0x6a4] sm:$0xf] }
  0xe5   :  { %1971 = vmatpush.bf16.msrb.mxu1 %v3104_v9  ;;  %1940 = vmatmul.bf16.vlgmr.msra.gmra.mxu2 %v3414_v34  ;;  %v3396_v9 = vld [vmem:[%s5046_s2 + $0x784] sm:$0xf]  ;;  %v3000_v12 = vor.u32 %v3368_v22, %v2997_v20  ;;  %v3045_v34 = vld [vmem:[%s5046_s2 + $0x708] sm:$0xf0] }
  0xe6   :  { %1986 = vmatpush.bf16.msrb.mxu2 %v3152_v13  ;;  %v3416_v35 = vld [vmem:[#allocation1 + $0x24] sm:$0xff] }
  0xe7   :  { %1947 = vmatpush.bf16.msrb.mxu3 %v2960_v8  ;;  %v3061_v8 = vld [vmem:[%s5046_s2 + $0x728] sm:$0xf0] }
  0xe8   :  { %1959 = vmatpush.bf16.msrb.mxu0 %v3032_v19  ;;  %v1720_v11 = vpop.f32.mrf.mxu2  ;;  %v3064_v16 = vor.u32 %v3384_v7, %v3061_v8  ;;  %v1696_v19 = vpop.f32.mrf.mxu0 }
  0xe9   :  { %1972 = vmatpush.bf16.msrb.mxu1 %v3096_v0  ;;  %v1721_v13 = vadd.f32 %v1720_v11, %v1708_v62  ;;  %v1733_v14 = vpop.f32.mrf.mxu3  ;;  %v3382_v0 = vld [vmem:[%s5046_s2 + $0x714] sm:$0xf]  ;;  %v1709_v27 = vpop.f32.mrf.mxu1 }
  0xea   :  { %1987 = vmatpush.bf16.msrb.mxu2 %v3144_v30  ;;  %v3056_v30 = vor.u32 %v3382_v0, %v3053_v24 }
  0xeb   :  { %1948 = vmatpush.bf16.msrb.mxu3 %v2952_v23  ;;  %v3112_v23 = vor.u32 %v3396_v9, %v3109_v10  ;;  %v1734_v28 = vadd.f32 %v1733_v14, %v1721_v13 }
  0xec   :  { %1960 = vmatpush.bf16.msrb.mxu0 %v3024_v38  ;;  %v3417_v38 = vld [vmem:[#allocation1 + $0x3f] sm:$0xff] }
  0xed   :  { %1973 = vmatpush.bf16.msrb.mxu1 %v3088_v41 }
  0xee   :  { %1988 = vmatpush.bf16.msrb.mxu2 %v3136_v21 }
  0xef   :  { %1949 = vmatpush.bf16.msrb.mxu3 %v2944_v39  ;;  %v3048_v39 = vor.u32 %v3380_v33, %v3045_v34 }
  0xf0   :  { %1961 = vmatpush.bf16.msrb.mxu0 %v3016_v50  ;;  %v1722_v37 = vpop.f32.mrf.mxu2 }
  0xf1   :  { %1974 = vmatpush.bf16.msrb.mxu1 %v3080_v52  ;;  %v1735_v41 = vpop.f32.mrf.mxu3 }
  0xf2   :  { %1989 = vmatpush.bf16.msrb.mxu2 %v3128_v1 }
  0xf3   :  { %1950 = vmatpush.bf16.msrb.mxu3 %v2936_v2 }
  0xf4   :  { %1962 = vmatpush.bf16.msrb.mxu0 %v3008_v63 }
  0xf5   :  { %1975 = vmatpush.bf16.msrb.mxu1 %v3072_v26 }
  0xf6   :  { %1990 = vmatpush.bf16.msrb.mxu2 %v3120_v5 }
  0xf7   :  { %1951 = vmatpush.bf16.msrb.mxu3 %v2928_v3 }
  0xf8   :  { %1963 = vmatpush.bf16.msrb.mxu0 %v3000_v12 }
  0xf9   :  { %1976 = vmatpush.bf16.msrb.mxu1 %v3064_v16 }
  0xfa   :  { %1991 = vmatpush.bf16.msrb.mxu2 %v3112_v23 }
  0xfb   :  { %1952 = vmatpush.bf16.msrb.mxu3 %v2920_v15 }
  0xfc   :  { %1964 = vmatpush.bf16.msrb.mxu0 %v2992_v29 }
  0xfd   :  { %3154 = vmatmul.msk.bf16.vlgmr.msrb.gmra.mxu2 %vm1578_vm0, %v3417_v38  ;;  %1977 = vmatpush.bf16.msrb.mxu1 %v3056_v30 }
  0xfe   :  { %1953 = vmatmul.bf16.vlgmr.msrb.gmra.mxu3 %v3416_v35 }
 0x100   :  { %1965 = vmatpush.bf16.msrb.mxu0 %v2984_v36  ;;  %v1746_v44 = vpop.f32.mrf.mxu0 }
 0x101   :  { %1978 = vmatpush.bf16.msrb.mxu1 %v3048_v39  ;;  %v1785_v21 = vpop.f32.mrf.mxu3  ;;  %v1747_v45 = vadd.f32 %v1746_v44, %v1734_v28  ;;  %v1759_v46 = vpop.f32.mrf.mxu1 }
 0x103   :  { %1966 = vmatmul.bf16.vlgmr.msrb.gmra.mxu0 %v3418_v42  ;;  %v1760_v47 = vadd.f32 %v1759_v46, %v1747_v45 }
 0x104   :  { %1979 = vmatmul.bf16.vlgmr.msrb.gmra.mxu1 %v3419_v43 }
 0x108   :  { %v1772_v48 = vpop.f32.mrf.mxu2  ;;  %v1748_v51 = vpop.f32.mrf.mxu0 }
 0x109   :  { %v1773_v49 = vadd.f32 %v1772_v48, %v1760_v47  ;;  %v1787_v50 = vpop.f32.mrf.mxu3  ;;  %v1761_v52 = vpop.f32.mrf.mxu1 }
 0x10b   :  { %v5019_v2 = vadd.f32 %v1785_v21, %v1773_v49 }
 0x10d   :  { %v1998_v11 = vsel %vm1997_vm1, %v5019_v2, 0.0  ;;  %v2013_v12 = vmul.f32 %v5019_v2, %v5019_v2 }
 0x10e   :  { %v1999_v14 = vrot.slane %v1998_v11, 4 }
 0x10f   :  { %v2015_v16 = vsel %vm1997_vm1, %v2013_v12, 0.0 }
 0x110   :  { %v1774_v53 = vpop.f32.mrf.mxu2  ;;  %v2000_v0 = vadd.f32 %v1999_v14, %v1998_v11  ;;  %v2016_v24 = vrot.slane %v2015_v16, 4 }
 0x112   :  { %v2001_v28 = vrot.slane %v2000_v0, 2  ;;  %v2017_v29 = vadd.f32 %v2016_v24, %v2015_v16 }
 0x114   :  { %v2002_v33 = vadd.f32 %v2001_v28, %v2000_v0  ;;  %v2018_v34 = vrot.slane %v2017_v29, 2 }
 0x116   :  { %v2003_v36 = vrot.slane %v2002_v33, 1  ;;  %v2019_v37 = vadd.f32 %v2018_v34, %v2017_v29 }
 0x118   :  { %v2004_v39 = vadd.f32 %v2003_v36, %v2002_v33  ;;  %v2020_v41 = vrot.slane %v2019_v37, 1 }
 0x11a   :  { %v2021_v46 = vadd.f32 %v2020_v41, %v2019_v37  ;;  %v5025_v47 = vmul.f32 0.5, %v2004_v39 }
 0x11c   :  { %v2031_v51 = vmul.f32 0.5, %v2021_v46  ;;  %v2033_v52 = vmul.f32 %v5025_v47, %v5025_v47 }
 0x120   :  { %v1811_v60 = vpop.f32.mrf.mxu0 }
 0x121   :  { %v1798_v55 = vpop.f32.mrf.mxu3  ;;  %v1824_v56 = vpop.f32.mrf.mxu1 }
 0x122   :  { %v1799_v1 = vadd.f32 %v1798_v55, %v280_v54 }
 0x124   :  { %v1812_v57 = vadd.f32 %v1811_v60, %v1799_v1 }
 0x126   :  { %v1825_v58 = vadd.f32 %v1824_v56, %v1812_v57  ;;  %v2035_v57 = vsub.f32 %v2031_v51, %v2033_v52 }
 0x128   :  { %v1837_v59 = vpop.f32.mrf.mxu2  ;;  %v1813_v40 = vpop.f32.mrf.mxu0 }
 0x129   :  { %v1800_v61 = vpop.f32.mrf.mxu3  ;;  %v1826_v62 = vpop.f32.mrf.mxu1  ;;  %v1838_v8 = vadd.f32 %v1837_v59, %v1825_v58 }
 0x130   :  { %v1839_v63 = vpop.f32.mrf.mxu2 }
 0x131   :  { %v2037_v63 = vmax.f32 %v2035_v57, 0.0 }
 0x140   :  { %v1863_v26 = vpop.f32.mrf.mxu0 }
 0x141   :  { %v1850_v3 = vpop.f32.mrf.mxu3  ;;  %v1876_v4 = vpop.f32.mrf.mxu1 }
 0x142   :  { %v1851_v13 = vadd.f32 %v1850_v3, %v1838_v8 }
 0x144   :  { %v1864_v17 = vadd.f32 %v1863_v26, %v1851_v13 }
 0x146   :  { %v1877_v27 = vadd.f32 %v1876_v4, %v1864_v17 }
 0x148   :  { %v1889_v20 = vpop.f32.mrf.mxu2  ;;  %v1865_v5 = vpop.f32.mrf.mxu0 }
 0x149   :  { %v1852_v22 = vpop.f32.mrf.mxu3  ;;  %v1878_v6 = vpop.f32.mrf.mxu1  ;;  %v1890_v30 = vadd.f32 %v1889_v20, %v1877_v27  ;;  %v2040_v20 = vadd.f32 1e-05, %v2037_v63 }
 0x14b   :  { %3408 = vrsqrt.f32 %v2040_v20  ;;  %vm2048_vm7 = vweird.f32 %v2040_v20 }
 0x150   :  { %v1891_v7 = vpop.f32.mrf.mxu2 }
 0x151   :  { %v3409_v13 = vpop.eup %3408 }
 0x152   :  { %v2043_v16 = vmul.f32 %v3409_v13, %v2040_v20  ;;  %vm2049_vm4 = vweird.f32 %v3409_v13 }
 0x153   :  { %vm2050_vm9 = vmor %vm2048_vm7, %vm2049_vm4 }
 0x154   :  { %v2044_v17 = vmul.f32 %v3409_v13, %v2043_v16 }
 0x160   :  { %v1915_v9 = vpop.f32.mrf.mxu0 }
 0x161   :  { %v1902_v25 = vpop.f32.mrf.mxu3  ;;  %v1928_v10 = vpop.f32.mrf.mxu1 }
 0x162   :  { %v1903_v32 = vadd.f32 %v1902_v25, %v1890_v30 }
 0x164   :  { %v1916_v35 = vadd.f32 %v1915_v9, %v1903_v32  ;;  %v2039_v32 = vld [vmem:[%s5048_s4] sm:$0x3] }
 0x166   :  { %v1929_v38 = vadd.f32 %v1928_v10, %v1916_v35 }
 0x168   :  { %v1941_v18 = vpop.f32.mrf.mxu2  ;;  %v1917_v19 = vpop.f32.mrf.mxu0 }
 0x169   :  { %v1904_v15 = vpop.f32.mrf.mxu3  ;;  %v1930_v23 = vpop.f32.mrf.mxu1  ;;  %v1942_v42 = vadd.f32 %v1941_v18, %v1929_v38  ;;  %v2045_v19 = vmul.f32 0.5, %v2044_v17 }
 0x16b   :  { %v2046_v24 = vsub.f32 1.5, %v2045_v19 }
 0x16d   :  { %v2047_v29 = vmul.f32 %v3409_v13, %v2046_v24 }
 0x16f   :  { %v2051_v34 = vsel %vm2050_vm9, %v3409_v13, %v2047_v29 }
 0x170   :  { %v1943_v31 = vpop.f32.mrf.mxu2 }
 0x180   :  { %v1993_v21 = vpop.f32.mrf.mxu2  ;;  %v1967_v45 = vpop.f32.mrf.mxu0 }
 0x181   :  { %v1954_v43 = vpop.f32.mrf.mxu3  ;;  %v1980_v48 = vpop.f32.mrf.mxu1 }
 0x182   :  { %v1955_v44 = vadd.f32 %v1954_v43, %v1942_v42 }
 0x184   :  { %v1968_v49 = vadd.f32 %v1967_v45, %v1955_v44  ;;  %v2069_v44 = vld [vmem:[%s5049_s5] sm:$0x3] }
 0x186   :  { %v1981_v50 = vadd.f32 %v1980_v48, %v1968_v49 }
 0x188   :  { %v1994_v53 = vadd.f32 %v1993_v21, %v1981_v50  ;;  %v1995_v1 = vpop.f32.mrf.mxu2  ;;  %v1969_v56 = vpop.f32.mrf.mxu0 }
 0x189   :  { %v1956_v54 = vpop.f32.mrf.mxu3  ;;  %v1982_v59 = vpop.f32.mrf.mxu1 }
 0x18a   :  { %v2006_v55 = vsel %vm2005_vm2, %v1994_v53, 0.0  ;;  %v2014_v60 = vmul.f32 %v1994_v53, %v1994_v53 }
 0x18b   :  { %v2007_v58 = vrot.slane %v2006_v55, 4 }
 0x18c   :  { %v2022_v61 = vsel %vm2005_vm2, %v2014_v60, 0.0 }
 0x18d   :  { %v2008_v40 = vadd.f32 %v2007_v58, %v2006_v55  ;;  %v2023_v62 = vrot.slane %v2022_v61, 4 }
 0x18f   :  { %v2009_v3 = vrot.slane %v2008_v40, 2  ;;  %v2024_v26 = vadd.f32 %v2023_v62, %v2022_v61 }
 0x191   :  { %v2010_v4 = vadd.f32 %v2009_v3, %v2008_v40  ;;  %v2025_v22 = vrot.slane %v2024_v26, 2 }
 0x193   :  { %v2011_v5 = vrot.slane %v2010_v4, 1  ;;  %v2026_v6 = vadd.f32 %v2025_v22, %v2024_v26 }
 0x195   :  { %v2012_v7 = vadd.f32 %v2011_v5, %v2010_v4  ;;  %v2027_v25 = vrot.slane %v2026_v6, 1 }
 0x197   :  { %v2028_v8 = vadd.f32 %v2027_v25, %v2026_v6  ;;  %v2030_v9 = vmul.f32 0.5, %v2012_v7 }
 0x199   :  { %v2032_v10 = vmul.f32 0.5, %v2028_v8  ;;  %v2034_v11 = vmul.f32 %v2030_v9, %v2030_v9 }
 0x19b   :  { %v2036_v12 = vsub.f32 %v2032_v10, %v2034_v11 }
 0x19d   :  { %v2038_v14 = vmax.f32 %v2036_v12, 0.0 }
 0x19f   :  { %v2041_v15 = vadd.f32 1e-05, %v2038_v14 }
 0x1a1   :  { %3410 = vrsqrt.f32 %v2041_v15  ;;  %vm2058_vm5 = vweird.f32 %v2041_v15 }
 0x1a7   :  { %v3411_v18 = vpop.eup %3410 }
 0x1a8   :  { %v2053_v23 = vmul.f32 %v3411_v18, %v2041_v15  ;;  %vm2059_vm3 = vweird.f32 %v3411_v18 }
 0x1a9   :  { %vm2060_vm6 = vmor %vm2058_vm5, %vm2059_vm3 }
 0x1aa   :  { %v2054_v0 = vmul.f32 %v3411_v18, %v2053_v23 }
 0x1ac   :  { %v2055_v27 = vmul.f32 0.5, %v2054_v0 }
 0x1ae   :  { %v2056_v28 = vsub.f32 1.5, %v2055_v27 }
 0x1b0   :  { %v2057_v30 = vmul.f32 %v3411_v18, %v2056_v28 }
 0x1b2   :  { %v2061_v31 = vsel %vm2060_vm6, %v3411_v18, %v2057_v30 }
 0x1b3   :  { %v2064_v33 = vrot.slane %v2061_v31, 7 }
 0x1b5   :  { %v2066_v35 = vsel %vm2065_vm8, %v2051_v34, %v2064_v33 }
 0x1b6   :  { %v2068_v36 = vmul.f32 %v2066_v35, %v2039_v32 }
 0x1b8   :  { %v2071_v37 = vperm.slane %v2068_v36, 0  ;;  %v2072_v38 = vperm.slane %v2068_v36, 1 }
 0x1ba   :  { %v2075_v39 = vmul.f32 %v2071_v37, %v5025_v47  ;;  %v2076_v41 = vmul.f32 %v2072_v38, %v2030_v9  ;;  %v2083_v42 = vmul.f32 %v2071_v37, %v5019_v2  ;;  %v2084_v43 = vmul.f32 %v2072_v38, %v1994_v53 }
 0x1bc   :  { %v2079_v21 = vrot.slane %v2076_v41, 7 }
 0x1be   :  { %v2080_v45 = vsel %vm2065_vm8, %v2075_v39, %v2079_v21 }
 0x1bf   :  { %v2082_v46 = vsub.f32 %v2069_v44, %v2080_v45 }
 0x1c1   :  { %v2086_v48 = vperm.slane %v2082_v46, 0  ;;  %v2087_v49 = vperm.slane %v2082_v46, 1 }
 0x1c3   :  { %v2090_v50 = vadd.f32 %v2086_v48, %v2083_v42  ;;  %v2091_v51 = vadd.f32 %v2087_v49, %v2084_v43 }
 0x1c5   :  { %v2092_v52 = vmax.f32 %v2090_v50, 0.0  ;;  %v2093_v54 = vmax.f32 %v2091_v51, 0.0 }
 0x1c7   :  { %v2094_v47 = vpack.c.bf16 %v2093_v54, %v2092_v52 }
 0x1c9   :  { %v2096_v55 = vrot.slane %v2094_v47, 3 }
 0x1cb   :  { %v2099_v2 = vsel %vm2065_vm8, %v2094_v47, %v2096_v55 }
 0x1cc   :  { %2103 = vst.msk [vmem:[#allocation2] sm:$0x3] %vm2102_vm11, %v2099_v2 }
 0x1d3   :  { %v2122_v53 = vld [vmem:[#allocation2] sm:$0x3] }
 0x1d4   :  { %3155 = vst [vmem:[%s5050_s6 + $0x8] sm:$0x3] %v2122_v53 }

// kernel: keypoint_forward.28
= control target key start
LH: loop header
LB: loop body
LE: loop exit
PB: predicated region body
PF: predicated region fallthrough
CT: control target
= control target key end

     0   :  { %vm1579_vm0 = vcmask 785408   ;;  %vm1998_vm1 = vcmask 1041408   ;;  %vm2006_vm2 = vcmask 779264   ;;  %vm2066_vm8 = vcmask 1040384   ;;  %s5038_s1 = inlined_call_operand.vmem [shape: bf16[2016,224], index: 1, kind: input, shape index: {}]   ;;  %s5039_s0 = inlined_call_operand.vmem [shape: bf16[2,2016], index: 0, kind: input, shape index: {}]   ;;  %s5040_s5 = inlined_call_operand.vmem [shape: bf16[2,224], index: 5, kind: input, shape index: {}]   ;;  %s5041_s2 = inlined_call_operand.vmem [shape: f32[1,224], index: 2, kind: input, shape index: {}]   ;;  %s5042_s3 = inlined_call_operand.vmem [shape: f32[1,224], index: 3, kind: input, shape index: {}]   ;;  %s5043_s4 = inlined_call_operand.vmem [shape: f32[1,224], index: 4, kind: input, shape index: {}]   ;;  %s5044_s6 = inlined_call_operand.vmem [shape: bf16[2,224], index: 6, kind: output, shape index: {}]  }
   0x1   :  { %v2177_v0 = vld [vmem:[%s5038_s1 + $0x70] sm:$0xf]  ;;  %v3144_v1 = vld [vmem:[%s5038_s1 + $0x74] sm:$0xf0]  ;;  %v2169_v11 = vld [vmem:[%s5038_s1 + $0x60] sm:$0xf] }
   0x2   :  { %v2241_v2 = vld [vmem:[%s5038_s1 + $0xf0] sm:$0xf]  ;;  %v2178_v3 = vor.u32 %v3144_v1, %v2177_v0  ;;  %v3160_v4 = vld [vmem:[%s5038_s1 + $0xf4] sm:$0xf0]  ;;  %v3142_v13 = vld [vmem:[%s5038_s1 + $0x64] sm:$0xf0] }
   0x3   :  { %v2305_v5 = vld [vmem:[%s5038_s1 + $0x170] sm:$0xf]  ;;  %v3176_v6 = vld [vmem:[%s5038_s1 + $0x174] sm:$0xf0]  ;;  %v2242_v7 = vor.u32 %v3160_v4, %v2241_v2  ;;  %v2233_v14 = vld [vmem:[%s5038_s1 + $0xe0] sm:$0xf]  ;;  %v2170_v16 = vor.u32 %v3142_v13, %v2169_v11 }
   0x4   :  { %v2306_v8 = vor.u32 %v3176_v6, %v2305_v5  ;;  %v2369_v9 = vld [vmem:[%s5038_s1 + $0x1f0] sm:$0xf]  ;;  %v3192_v10 = vld [vmem:[%s5038_s1 + $0x1f4] sm:$0xf0]  ;;  %1582 = vmatpush.bf16.msra.mxu0 %v2178_v3  ;;  %v3158_v15 = vld [vmem:[%s5038_s1 + $0xe4] sm:$0xf0] }
   0x5   :  { %v2370_v12 = vor.u32 %v3192_v10, %v2369_v9  ;;  %1595 = vmatpush.bf16.msra.mxu1 %v2242_v7  ;;  %v2234_v17 = vor.u32 %v3158_v15, %v2233_v14  ;;  %v2297_v18 = vld [vmem:[%s5038_s1 + $0x160] sm:$0xf]  ;;  %v3174_v19 = vld [vmem:[%s5038_s1 + $0x164] sm:$0xf0]  ;;  %v2161_v23 = vld [vmem:[%s5038_s1 + $0x50] sm:$0xf] }
   0x6   :  { %1608 = vmatpush.bf16.msra.mxu2 %v2306_v8  ;;  %v2361_v20 = vld [vmem:[%s5038_s1 + $0x1e0] sm:$0xf]  ;;  %v2298_v21 = vor.u32 %v3174_v19, %v2297_v18  ;;  %v3190_v22 = vld [vmem:[%s5038_s1 + $0x1e4] sm:$0xf0]  ;;  %v3140_v24 = vld [vmem:[%s5038_s1 + $0x54] sm:$0xf0] }
   0x7   :  { %1621 = vmatpush.bf16.msra.mxu3 %v2370_v12  ;;  %v2362_v25 = vor.u32 %v3190_v22, %v2361_v20  ;;  %v2225_v26 = vld [vmem:[%s5038_s1 + $0xd0] sm:$0xf]  ;;  %v3156_v27 = vld [vmem:[%s5038_s1 + $0xd4] sm:$0xf0]  ;;  %v2162_v29 = vor.u32 %v3140_v24, %v2161_v23  ;;  %v2153_v35 = vld [vmem:[%s5038_s1 + $0x40] sm:$0xf] }
   0x8   :  { %v2289_v28 = vld [vmem:[%s5038_s1 + $0x150] sm:$0xf]  ;;  %1583 = vmatpush.bf16.msra.mxu0 %v2170_v16  ;;  %v3172_v30 = vld [vmem:[%s5038_s1 + $0x154] sm:$0xf0]  ;;  %v2226_v33 = vor.u32 %v3156_v27, %v2225_v26  ;;  %v3138_v36 = vld [vmem:[%s5038_s1 + $0x44] sm:$0xf0] }
   0x9   :  { %v2353_v31 = vld [vmem:[%s5038_s1 + $0x1d0] sm:$0xf]  ;;  %v3188_v32 = vld [vmem:[%s5038_s1 + $0x1d4] sm:$0xf0]  ;;  %1596 = vmatpush.bf16.msra.mxu1 %v2234_v17  ;;  %v2290_v34 = vor.u32 %v3172_v30, %v2289_v28  ;;  %v2217_v37 = vld [vmem:[%s5038_s1 + $0xc0] sm:$0xf]  ;;  %v2154_v44 = vor.u32 %v3138_v36, %v2153_v35 }
   0xa   :  { %1609 = vmatpush.bf16.msra.mxu2 %v2298_v21  ;;  %v2354_v38 = vor.u32 %v3188_v32, %v2353_v31  ;;  %v3154_v39 = vld [vmem:[%s5038_s1 + $0xc4] sm:$0xf0]  ;;  %v2281_v40 = vld [vmem:[%s5038_s1 + $0x140] sm:$0xf]  ;;  %v2145_v47 = vld [vmem:[%s5038_s1 + $0x30] sm:$0xf] }
   0xb   :  { %1622 = vmatpush.bf16.msra.mxu3 %v2362_v25  ;;  %v3170_v41 = vld [vmem:[%s5038_s1 + $0x144] sm:$0xf0]  ;;  %v2345_v42 = vld [vmem:[%s5038_s1 + $0x1c0] sm:$0xf]  ;;  %v2218_v45 = vor.u32 %v3154_v39, %v2217_v37  ;;  %v3136_v48 = vld [vmem:[%s5038_s1 + $0x34] sm:$0xf0] }
   0xc   :  { %v3186_v43 = vld [vmem:[%s5038_s1 + $0x1c4] sm:$0xf0]  ;;  %1584 = vmatpush.bf16.msra.mxu0 %v2162_v29  ;;  %v2282_v46 = vor.u32 %v3170_v41, %v2281_v40  ;;  %v2209_v49 = vld [vmem:[%s5038_s1 + $0xb0] sm:$0xf]  ;;  %v3152_v51 = vld [vmem:[%s5038_s1 + $0xb4] sm:$0xf0]  ;;  %v2146_v56 = vor.u32 %v3136_v48, %v2145_v47 }
   0xd   :  { %1597 = vmatpush.bf16.msra.mxu1 %v2226_v33  ;;  %v2346_v50 = vor.u32 %v3186_v43, %v2345_v42  ;;  %v2273_v52 = vld [vmem:[%s5038_s1 + $0x130] sm:$0xf]  ;;  %v3168_v53 = vld [vmem:[%s5038_s1 + $0x134] sm:$0xf0]  ;;  %v2210_v57 = vor.u32 %v3152_v51, %v2209_v49  ;;  %v2137_v59 = vld [vmem:[%s5038_s1 + $0x20] sm:$0xf] }
   0xe   :  { %1610 = vmatpush.bf16.msra.mxu2 %v2290_v34  ;;  %v2337_v54 = vld [vmem:[%s5038_s1 + $0x1b0] sm:$0xf]  ;;  %v3184_v55 = vld [vmem:[%s5038_s1 + $0x1b4] sm:$0xf0]  ;;  %v2274_v58 = vor.u32 %v3168_v53, %v2273_v52  ;;  %v3134_v60 = vld [vmem:[%s5038_s1 + $0x24] sm:$0xf0] }
   0xf   :  { %1623 = vmatpush.bf16.msra.mxu3 %v2354_v38  ;;  %v2201_v61 = vld [vmem:[%s5038_s1 + $0xa0] sm:$0xf]  ;;  %v2338_v62 = vor.u32 %v3184_v55, %v2337_v54  ;;  %v3150_v63 = vld [vmem:[%s5038_s1 + $0xa4] sm:$0xf0]  ;;  %v2138_v4 = vor.u32 %v3134_v60, %v2137_v59  ;;  %v2129_v7 = vld [vmem:[%s5038_s1 + $0x10] sm:$0xf] }
  0x10   :  { %1585 = vmatpush.bf16.msra.mxu0 %v2154_v44  ;;  %v2265_v0 = vld [vmem:[%s5038_s1 + $0x120] sm:$0xf]  ;;  %v3166_v1 = vld [vmem:[%s5038_s1 + $0x124] sm:$0xf0]  ;;  %v2202_v5 = vor.u32 %v3150_v63, %v2201_v61  ;;  %v3132_v8 = vld [vmem:[%s5038_s1 + $0x14] sm:$0xf0] }
  0x11   :  { %1598 = vmatpush.bf16.msra.mxu1 %v2218_v45  ;;  %v2329_v2 = vld [vmem:[%s5038_s1 + $0x1a0] sm:$0xf]  ;;  %v3182_v3 = vld [vmem:[%s5038_s1 + $0x1a4] sm:$0xf0]  ;;  %v2266_v6 = vor.u32 %v3166_v1, %v2265_v0  ;;  %v2193_v9 = vld [vmem:[%s5038_s1 + $0x90] sm:$0xf]  ;;  %v2130_v16 = vor.u32 %v3132_v8, %v2129_v7 }
  0x12   :  { %1611 = vmatpush.bf16.msra.mxu2 %v2282_v46  ;;  %v2330_v10 = vor.u32 %v3182_v3, %v2329_v2  ;;  %v3148_v11 = vld [vmem:[%s5038_s1 + $0x94] sm:$0xf0]  ;;  %v2257_v12 = vld [vmem:[%s5038_s1 + $0x110] sm:$0xf]  ;;  %v2121_v17 = vld [vmem:[%s5038_s1] sm:$0xf] }
  0x13   :  { %1624 = vmatpush.bf16.msra.mxu3 %v2346_v50  ;;  %v3164_v13 = vld [vmem:[%s5038_s1 + $0x114] sm:$0xf0]  ;;  %v2321_v14 = vld [vmem:[%s5038_s1 + $0x190] sm:$0xf]  ;;  %v3130_v18 = vld [vmem:[%s5038_s1 + $0x4] sm:$0xf0]  ;;  %v2194_v19 = vor.u32 %v3148_v11, %v2193_v9 }
  0x14   :  { %1586 = vmatpush.bf16.msra.mxu0 %v2146_v56  ;;  %v3180_v15 = vld [vmem:[%s5038_s1 + $0x194] sm:$0xf0]  ;;  %v2258_v20 = vor.u32 %v3164_v13, %v2257_v12  ;;  %v2185_v21 = vld [vmem:[%s5038_s1 + $0x80] sm:$0xf]  ;;  %v3146_v22 = vld [vmem:[%s5038_s1 + $0x84] sm:$0xf0]  ;;  %v2122_v31 = vor.u32 %v3130_v18, %v2121_v17 }
  0x15   :  { %1599 = vmatpush.bf16.msra.mxu1 %v2210_v57  ;;  %v2249_v23 = vld [vmem:[%s5038_s1 + $0x100] sm:$0xf]  ;;  %v2322_v24 = vor.u32 %v3180_v15, %v2321_v14  ;;  %v3162_v25 = vld [vmem:[%s5038_s1 + $0x104] sm:$0xf0]  ;;  %v2433_v28 = vld [vmem:[%s5038_s1 + $0x270] sm:$0xf]  ;;  %v2186_v35 = vor.u32 %v3146_v22, %v2185_v21 }
  0x16   :  { %1612 = vmatpush.bf16.msra.mxu2 %v2274_v58  ;;  %v2313_v26 = vld [vmem:[%s5038_s1 + $0x180] sm:$0xf]  ;;  %v3178_v27 = vld [vmem:[%s5038_s1 + $0x184] sm:$0xf0]  ;;  %v3208_v29 = vld [vmem:[%s5038_s1 + $0x274] sm:$0xf0]  ;;  %v2250_v36 = vor.u32 %v3162_v25, %v2249_v23 }
  0x17   :  { %1625 = vmatpush.bf16.msra.mxu3 %v2338_v62  ;;  %v2497_v30 = vld [vmem:[%s5038_s1 + $0x2f0] sm:$0xf]  ;;  %v3224_v32 = vld [vmem:[%s5038_s1 + $0x2f4] sm:$0xf0]  ;;  %v2314_v39 = vor.u32 %v3178_v27, %v2313_v26  ;;  %v2434_v40 = vor.u32 %v3208_v29, %v2433_v28  ;;  %v2425_v43 = vld [vmem:[%s5038_s1 + $0x260] sm:$0xf] }
  0x18   :  { %1587 = vmatpush.bf16.msra.mxu0 %v2138_v4  ;;  %v2561_v33 = vld [vmem:[%s5038_s1 + $0x370] sm:$0xf]  ;;  %v3240_v34 = vld [vmem:[%s5038_s1 + $0x374] sm:$0xf0]  ;;  %v2498_v41 = vor.u32 %v3224_v32, %v2497_v30  ;;  %v3206_v44 = vld [vmem:[%s5038_s1 + $0x264] sm:$0xf0] }
  0x19   :  { %1600 = vmatpush.bf16.msra.mxu1 %v2202_v5  ;;  %v2625_v37 = vld [vmem:[%s5038_s1 + $0x3f0] sm:$0xf]  ;;  %v3256_v38 = vld [vmem:[%s5038_s1 + $0x3f4] sm:$0xf0]  ;;  %v2562_v42 = vor.u32 %v3240_v34, %v2561_v33  ;;  %v2489_v45 = vld [vmem:[%s5038_s1 + $0x2e0] sm:$0xf]  ;;  %v2426_v52 = vor.u32 %v3206_v44, %v2425_v43 }
  0x1a   :  { %1613 = vmatpush.bf16.msra.mxu2 %v2266_v6  ;;  %v2626_v46 = vor.u32 %v3256_v38, %v2625_v37  ;;  %v3222_v47 = vld [vmem:[%s5038_s1 + $0x2e4] sm:$0xf0]  ;;  %v2553_v48 = vld [vmem:[%s5038_s1 + $0x360] sm:$0xf]  ;;  %v2417_v53 = vld [vmem:[%s5038_s1 + $0x250] sm:$0xf] }
  0x1b   :  { %1626 = vmatpush.bf16.msra.mxu3 %v2330_v10  ;;  %v3238_v49 = vld [vmem:[%s5038_s1 + $0x364] sm:$0xf0]  ;;  %v2617_v50 = vld [vmem:[%s5038_s1 + $0x3e0] sm:$0xf]  ;;  %v3204_v54 = vld [vmem:[%s5038_s1 + $0x254] sm:$0xf0]  ;;  %v2490_v55 = vor.u32 %v3222_v47, %v2489_v45 }
  0x1c   :  { %1588 = vmatpush.bf16.msra.mxu0 %v2130_v16  ;;  %v3254_v51 = vld [vmem:[%s5038_s1 + $0x3e4] sm:$0xf0]  ;;  %v2554_v56 = vor.u32 %v3238_v49, %v2553_v48  ;;  %v2481_v57 = vld [vmem:[%s5038_s1 + $0x2d0] sm:$0xf]  ;;  %v3220_v58 = vld [vmem:[%s5038_s1 + $0x2d4] sm:$0xf0]  ;;  %v2418_v1 = vor.u32 %v3204_v54, %v2417_v53 }
  0x1d   :  { %1601 = vmatpush.bf16.msra.mxu1 %v2194_v19  ;;  %v24_v59 = vld [vmem:[%s5039_s0] sm:$0xff]  ;;  %v2618_v60 = vor.u32 %v3254_v51, %v2617_v50  ;;  %v2545_v61 = vld [vmem:[%s5038_s1 + $0x350] sm:$0xf]  ;;  %v3236_v62 = vld [vmem:[%s5038_s1 + $0x354] sm:$0xf0]  ;;  %v2482_v2 = vor.u32 %v3220_v58, %v2481_v57  ;;  %vm2112_vm10 = vcmask 779265  }
  0x1e   :  { %1614 = vmatpush.bf16.msra.mxu2 %v2258_v20  ;;  %285 = vst [vmem:[#allocation1] ss:$9 sm:$0xff] %v24_v59  ;;  %v2609_v63 = vld [vmem:[%s5038_s1 + $0x3d0] sm:$0xf]  ;;  %v3252_v0 = vld [vmem:[%s5038_s1 + $0x3d4] sm:$0xf0]  ;;  %v2546_v3 = vor.u32 %v3236_v62, %v2545_v61  ;;  %vm2113_vm11 = vmor %vm2112_vm10, %vm2066_vm8 }
  0x1f   :  { %1627 = vmatpush.bf16.msra.mxu3 %v2322_v24  ;;  %v2409_v4 = vld [vmem:[%s5038_s1 + $0x240] sm:$0xf]  ;;  %v3202_v5 = vld [vmem:[%s5038_s1 + $0x244] sm:$0xf0]  ;;  %v2610_v7 = vor.u32 %v3252_v0, %v2609_v63  ;;  %v2401_v13 = vld [vmem:[%s5038_s1 + $0x230] sm:$0xf] }
  0x20   :  { %1589 = vmatpush.bf16.msra.mxu0 %v2122_v31  ;;  %v2473_v6 = vld [vmem:[%s5038_s1 + $0x2c0] sm:$0xf]  ;;  %v3218_v8 = vld [vmem:[%s5038_s1 + $0x2c4] sm:$0xf0]  ;;  %v2410_v14 = vor.u32 %v3202_v5, %v2409_v4  ;;  %v3200_v15 = vld [vmem:[%s5038_s1 + $0x234] sm:$0xf0] }
  0x21   :  { %1602 = vmatpush.bf16.msra.mxu1 %v2186_v35  ;;  %v2537_v9 = vld [vmem:[%s5038_s1 + $0x340] sm:$0xf]  ;;  %v3234_v10 = vld [vmem:[%s5038_s1 + $0x344] sm:$0xf0]  ;;  %v2465_v16 = vld [vmem:[%s5038_s1 + $0x2b0] sm:$0xf]  ;;  %v2474_v18 = vor.u32 %v3218_v8, %v2473_v6  ;;  %v2402_v29 = vor.u32 %v3200_v15, %v2401_v13 }
  0x22   :  { %1615 = vmatpush.bf16.msra.mxu2 %v2250_v36  ;;  %v2601_v11 = vld [vmem:[%s5038_s1 + $0x3c0] sm:$0xf]  ;;  %v3250_v12 = vld [vmem:[%s5038_s1 + $0x3c4] sm:$0xf0]  ;;  %v3216_v17 = vld [vmem:[%s5038_s1 + $0x2b4] sm:$0xf0]  ;;  %v2538_v19 = vor.u32 %v3234_v10, %v2537_v9 }
  0x23   :  { %1628 = vmatpush.bf16.msra.mxu3 %v2314_v39  ;;  %v2602_v23 = vor.u32 %v3250_v12, %v2601_v11  ;;  %v2529_v24 = vld [vmem:[%s5038_s1 + $0x330] sm:$0xf]  ;;  %v3232_v25 = vld [vmem:[%s5038_s1 + $0x334] sm:$0xf0]  ;;  %v2466_v30 = vor.u32 %v3216_v17, %v2465_v16  ;;  %v2393_v32 = vld [vmem:[%s5038_s1 + $0x220] sm:$0xf] }
  0x24   :  { %1634 = vmatpush.bf16.msrb.mxu0 %v2434_v40  ;;  %v2593_v27 = vld [vmem:[%s5038_s1 + $0x3b0] sm:$0xf]  ;;  %v3248_v28 = vld [vmem:[%s5038_s1 + $0x3b4] sm:$0xf0]  ;;  %v2530_v31 = vor.u32 %v3232_v25, %v2529_v24  ;;  %v3198_v33 = vld [vmem:[%s5038_s1 + $0x224] sm:$0xf0] }
  0x25   :  { %1647 = vmatpush.bf16.msrb.mxu1 %v2498_v41  ;;  %v3727_v20 = vld [vmem:[#allocation1 + $0x12] sm:$0xff]  ;;  %v3729_v21 = vld [vmem:[#allocation1] sm:$0xff]  ;;  %v3740_v26 = vld [vmem:[#allocation1 + $0x9] sm:$0xff]  ;;  %v2594_v35 = vor.u32 %v3248_v28, %v2593_v27  ;;  %v2394_v41 = vor.u32 %v3198_v33, %v2393_v32 }
  0x26   :  { %1660 = vmatpush.bf16.msrb.mxu2 %v2562_v42  ;;  %v3731_v22 = vld [vmem:[#allocation1 + $0x1b] sm:$0xff]  ;;  %1590 = vmatmul.bf16.vlgmr.msra.gmra.mxu0 %v3729_v21  ;;  %v3214_v36 = vld [vmem:[%s5038_s1 + $0x2a4] sm:$0xf0]  ;;  %v2385_v42 = vld [vmem:[%s5038_s1 + $0x210] sm:$0xf] }
  0x27   :  { %1673 = vmatpush.bf16.msrb.mxu3 %v2626_v46  ;;  %1616 = vmatmul.bf16.vlgmr.msra.gmra.mxu2 %v3727_v20  ;;  %v2457_v34 = vld [vmem:[%s5038_s1 + $0x2a0] sm:$0xf]  ;;  %v3230_v38 = vld [vmem:[%s5038_s1 + $0x324] sm:$0xf0]  ;;  %v3196_v46 = vld [vmem:[%s5038_s1 + $0x214] sm:$0xf0] }
  0x28   :  { %1635 = vmatpush.bf16.msrb.mxu0 %v2426_v52  ;;  %1629 = vmatmul.bf16.vlgmr.msra.gmra.mxu3 %v3731_v22  ;;  %v2521_v37 = vld [vmem:[%s5038_s1 + $0x320] sm:$0xf]  ;;  %v3246_v40 = vld [vmem:[%s5038_s1 + $0x3a4] sm:$0xf0]  ;;  %v2458_v44 = vor.u32 %v3214_v36, %v2457_v34  ;;  %v2449_v47 = vld [vmem:[%s5038_s1 + $0x290] sm:$0xf] }
  0x29   :  { %1648 = vmatpush.bf16.msrb.mxu1 %v2490_v55  ;;  %v2585_v39 = vld [vmem:[%s5038_s1 + $0x3a0] sm:$0xf]  ;;  %v25_v43 = vld [vmem:[%s5039_s0 + $0x8] sm:$0xff]  ;;  %v2522_v45 = vor.u32 %v3230_v38, %v2521_v37  ;;  %v3212_v48 = vld [vmem:[%s5038_s1 + $0x294] sm:$0xf0] }
  0x2a   :  { %1661 = vmatpush.bf16.msrb.mxu2 %v2554_v56  ;;  %1603 = vmatmul.bf16.vlgmr.msra.gmra.mxu1 %v3740_v26  ;;  %v2586_v49 = vor.u32 %v3246_v40, %v2585_v39  ;;  %v2513_v50 = vld [vmem:[%s5038_s1 + $0x310] sm:$0xf]  ;;  %v3228_v51 = vld [vmem:[%s5038_s1 + $0x314] sm:$0xf0]  ;;  %v2377_v54 = vld [vmem:[%s5038_s1 + $0x200] sm:$0xf]  ;;  %v2386_v56 = vor.u32 %v3196_v46, %v2385_v42  ;;  %v2450_v62 = vor.u32 %v3212_v48, %v2449_v47 }
  0x2b   :  { %1674 = vmatpush.bf16.msrb.mxu3 %v2618_v60  ;;  %v2577_v52 = vld [vmem:[%s5038_s1 + $0x390] sm:$0xf]  ;;  %v3244_v53 = vld [vmem:[%s5038_s1 + $0x394] sm:$0xf0]  ;;  %v3194_v55 = vld [vmem:[%s5038_s1 + $0x204] sm:$0xf0]  ;;  %v2514_v63 = vor.u32 %v3228_v51, %v2513_v50 }
  0x2c   :  { %1636 = vmatpush.bf16.msrb.mxu0 %v2418_v1  ;;  %v2441_v57 = vld [vmem:[%s5038_s1 + $0x280] sm:$0xf]  ;;  %v3210_v58 = vld [vmem:[%s5038_s1 + $0x284] sm:$0xf0]  ;;  %v3820_v61 = vld [vmem:[#allocation1 + $0x36] sm:$0xff]  ;;  %v2378_v9 = vor.u32 %v3194_v55, %v2377_v54 }
  0x2d   :  { %1649 = vmatpush.bf16.msrb.mxu1 %v2482_v2  ;;  %v2505_v59 = vld [vmem:[%s5038_s1 + $0x300] sm:$0xf]  ;;  %v3226_v60 = vld [vmem:[%s5038_s1 + $0x304] sm:$0xf0]  ;;  %v3826_v2 = vld [vmem:[#allocation1 + $0x2d] sm:$0xff]  ;;  %v2442_v13 = vor.u32 %v3210_v58, %v2441_v57 }
  0x2e   :  { %1662 = vmatpush.bf16.msrb.mxu2 %v2546_v3  ;;  %v3822_v0 = vld [vmem:[#allocation1 + $0x24] sm:$0xff]  ;;  %v2578_v3 = vor.u32 %v3244_v53, %v2577_v52  ;;  %v2569_v4 = vld [vmem:[%s5038_s1 + $0x380] sm:$0xf]  ;;  %v2689_v6 = vld [vmem:[%s5038_s1 + $0x470] sm:$0xf] }
  0x2f   :  { %1675 = vmatpush.bf16.msrb.mxu3 %v2610_v7  ;;  %v3824_v1 = vld [vmem:[#allocation1 + $0x3f] sm:$0xff]  ;;  %v3242_v5 = vld [vmem:[%s5038_s1 + $0x384] sm:$0xf0]  ;;  %v3272_v7 = vld [vmem:[%s5038_s1 + $0x474] sm:$0xf0] }
  0x30   :  { %1637 = vmatpush.bf16.msrb.mxu0 %v2410_v14  ;;  %295 = vst [vmem:[#allocation1] ss:$9 sm:$0xff] %v25_v43  ;;  %v2753_v8 = vld [vmem:[%s5038_s1 + $0x4f0] sm:$0xf]  ;;  %v3288_v10 = vld [vmem:[%s5038_s1 + $0x4f4] sm:$0xf0]  ;;  %v2506_v14 = vor.u32 %v3226_v60, %v2505_v59  ;;  %v2570_v17 = vor.u32 %v3242_v5, %v2569_v4 }
  0x31   :  { %1650 = vmatpush.bf16.msrb.mxu1 %v2474_v18  ;;  %v2817_v11 = vld [vmem:[%s5038_s1 + $0x570] sm:$0xf]  ;;  %v3304_v12 = vld [vmem:[%s5038_s1 + $0x574] sm:$0xf0]  ;;  %v2690_v18 = vor.u32 %v3272_v7, %v2689_v6  ;;  %v2681_v24 = vld [vmem:[%s5038_s1 + $0x460] sm:$0xf] }
  0x32   :  { %1663 = vmatpush.bf16.msrb.mxu2 %v2538_v19  ;;  %v2881_v15 = vld [vmem:[%s5038_s1 + $0x5f0] sm:$0xf]  ;;  %v3320_v16 = vld [vmem:[%s5038_s1 + $0x5f4] sm:$0xf0]  ;;  %v2754_v19 = vor.u32 %v3288_v10, %v2753_v8  ;;  %v3270_v25 = vld [vmem:[%s5038_s1 + $0x464] sm:$0xf0] }
  0x33   :  { %1676 = vmatpush.bf16.msrb.mxu3 %v2602_v23  ;;  %v2818_v23 = vor.u32 %v3304_v12, %v2817_v11  ;;  %v2745_v27 = vld [vmem:[%s5038_s1 + $0x4e0] sm:$0xf]  ;;  %v2882_v28 = vor.u32 %v3320_v16, %v2881_v15  ;;  %v3318_v33 = vld [vmem:[%s5038_s1 + $0x5e4] sm:$0xf0]  ;;  %v2682_v34 = vor.u32 %v3270_v25, %v2681_v24  ;;  %v2673_v37 = vld [vmem:[%s5038_s1 + $0x450] sm:$0xf] }
  0x34   :  { %1638 = vmatpush.bf16.msrb.mxu0 %v2402_v29  ;;  %v3286_v29 = vld [vmem:[%s5038_s1 + $0x4e4] sm:$0xf0]  ;;  %v2873_v32 = vld [vmem:[%s5038_s1 + $0x5e0] sm:$0xf]  ;;  %v3268_v38 = vld [vmem:[%s5038_s1 + $0x454] sm:$0xf0] }
  0x35   :  { %1651 = vmatpush.bf16.msrb.mxu1 %v2466_v30  ;;  %v2809_v30 = vld [vmem:[%s5038_s1 + $0x560] sm:$0xf]  ;;  %v2737_v39 = vld [vmem:[%s5038_s1 + $0x4d0] sm:$0xf]  ;;  %v2874_v40 = vor.u32 %v3318_v33, %v2873_v32  ;;  %v3300_v43 = vld [vmem:[%s5038_s1 + $0x554] sm:$0xf0]  ;;  %v2674_v46 = vor.u32 %v3268_v38, %v2673_v37 }
  0x36   :  { %1664 = vmatpush.bf16.msrb.mxu2 %v2530_v31  ;;  %v3302_v31 = vld [vmem:[%s5038_s1 + $0x564] sm:$0xf0]  ;;  %v2801_v42 = vld [vmem:[%s5038_s1 + $0x550] sm:$0xf]  ;;  %v2729_v51 = vld [vmem:[%s5038_s1 + $0x4c0] sm:$0xf] }
  0x37   :  { %1677 = vmatpush.bf16.msrb.mxu3 %v2594_v35  ;;  %v2746_v35 = vor.u32 %v3286_v29, %v2745_v27  ;;  %v2810_v36 = vor.u32 %v3302_v31, %v2809_v30  ;;  %v2802_v48 = vor.u32 %v3300_v43, %v2801_v42  ;;  %v3266_v50 = vld [vmem:[%s5038_s1 + $0x444] sm:$0xf0]  ;;  %v2793_v54 = vld [vmem:[%s5038_s1 + $0x540] sm:$0xf]  ;;  %v2657_v58 = vld [vmem:[%s5038_s1 + $0x430] sm:$0xf] }
  0x38   :  { %1639 = vmatpush.bf16.msrb.mxu0 %v2394_v41  ;;  %v3284_v41 = vld [vmem:[%s5038_s1 + $0x4d4] sm:$0xf0]  ;;  %v3282_v53 = vld [vmem:[%s5038_s1 + $0x4c4] sm:$0xf0]  ;;  %v2785_v5 = vld [vmem:[%s5038_s1 + $0x530] sm:$0xf] }
  0x39   :  { %1652 = vmatpush.bf16.msrb.mxu1 %v2458_v44  ;;  %v2865_v44 = vld [vmem:[%s5038_s1 + $0x5d0] sm:$0xf]  ;;  %v2738_v47 = vor.u32 %v3284_v41, %v2737_v39  ;;  %v3298_v55 = vld [vmem:[%s5038_s1 + $0x544] sm:$0xf0]  ;;  %v3264_v60 = vld [vmem:[%s5038_s1 + $0x434] sm:$0xf0] }
  0x3a   :  { %1665 = vmatpush.bf16.msrb.mxu2 %v2522_v45  ;;  %v3316_v45 = vld [vmem:[%s5038_s1 + $0x5d4] sm:$0xf0]  ;;  %v3314_v57 = vld [vmem:[%s5038_s1 + $0x5c4] sm:$0xf0]  ;;  %v2794_v4 = vor.u32 %v3298_v55, %v2793_v54  ;;  %v2093_v7 = vld [vmem:[%s5040_s5] sm:$0x3]  ;;  %v2658_v16 = vor.u32 %v3264_v60, %v2657_v58 }
  0x3b   :  { %1678 = vmatpush.bf16.msrb.mxu3 %v2586_v49  ;;  %v2665_v49 = vld [vmem:[%s5038_s1 + $0x440] sm:$0xf]  ;;  %v2866_v52 = vor.u32 %v3316_v45, %v2865_v44  ;;  %v3296_v6 = vld [vmem:[%s5038_s1 + $0x534] sm:$0xf0]  ;;  %v2094_v12 = vunpack.c.l.bf16 %v2093_v7  ;;  %v3278_v27 = vld [vmem:[%s5038_s1 + $0x4a4] sm:$0xf0] }
  0x3c   :  { %1640 = vmatpush.bf16.msrb.mxu0 %v2386_v56  ;;  %v2857_v56 = vld [vmem:[%s5038_s1 + $0x5c0] sm:$0xf]  ;;  %v2666_v59 = vor.u32 %v3266_v50, %v2665_v49  ;;  %v3312_v10 = vld [vmem:[%s5038_s1 + $0x5b4] sm:$0xf0]  ;;  %v3294_v29 = vld [vmem:[%s5038_s1 + $0x524] sm:$0xf0] }
  0x3d   :  { %1653 = vmatpush.bf16.msrb.mxu1 %v2450_v62  ;;  %v2721_v62 = vld [vmem:[%s5038_s1 + $0x4b0] sm:$0xf]  ;;  %v2858_v8 = vor.u32 %v3314_v57, %v2857_v56  ;;  %v3961_v11 = vld [vmem:[#allocation1] sm:$0xff]  ;;  %v3310_v31 = vld [vmem:[%s5038_s1 + $0x5a4] sm:$0xf0] }
  0x3e   :  { %1666 = vmatpush.bf16.msrb.mxu2 %v2514_v63  ;;  %v3280_v63 = vld [vmem:[%s5038_s1 + $0x4b4] sm:$0xf0]  ;;  %v2713_v24 = vld [vmem:[%s5038_s1 + $0x4a0] sm:$0xf]  ;;  %v2705_v37 = vld [vmem:[%s5038_s1 + $0x490] sm:$0xf] }
  0x3f   :  { %1679 = vmatpush.bf16.msrb.mxu3 %v2578_v3  ;;  %v2730_v3 = vor.u32 %v3282_v53, %v2729_v51  ;;  %v3967_v15 = vld [vmem:[#allocation1 + $0x1b] sm:$0xff]  ;;  %v2714_v33 = vor.u32 %v3278_v27, %v2713_v24  ;;  %v2833_v42 = vld [vmem:[%s5038_s1 + $0x590] sm:$0xf]  ;;  %v3274_v50 = vld [vmem:[%s5038_s1 + $0x484] sm:$0xf0] }
  0x40   :  { %1641 = vmatpush.bf16.msrb.mxu0 %v2378_v9  ;;  %v2849_v9 = vld [vmem:[%s5038_s1 + $0x5b0] sm:$0xf]  ;;  %v2841_v30 = vld [vmem:[%s5038_s1 + $0x5a0] sm:$0xf]  ;;  %v3276_v39 = vld [vmem:[%s5038_s1 + $0x494] sm:$0xf0] }
  0x41   :  { %1654 = vmatpush.bf16.msrb.mxu1 %v2442_v13  ;;  %v3963_v13 = vld [vmem:[#allocation1 + $0x12] sm:$0xff]  ;;  %v2850_v25 = vor.u32 %v3312_v10, %v2849_v9  ;;  %v2842_v38 = vor.u32 %v3310_v31, %v2841_v30  ;;  %v2633_v45 = vld [vmem:[%s5038_s1 + $0x400] sm:$0xf]  ;;  %v3290_v53 = vld [vmem:[%s5038_s1 + $0x504] sm:$0xf0] }
  0x42   :  { %1667 = vmatpush.bf16.msrb.mxu2 %v2506_v14  ;;  %v3965_v14 = vld [vmem:[#allocation1 + $0x9] sm:$0xff]  ;;  %v3292_v41 = vld [vmem:[%s5038_s1 + $0x514] sm:$0xf0]  ;;  %v2697_v49 = vld [vmem:[%s5038_s1 + $0x480] sm:$0xf] }
  0x43   :  { %1680 = vmatpush.bf16.msrb.mxu3 %v2570_v17  ;;  %1642 = vmatmul.bf16.vlgmr.msrb.gmra.mxu0 %v3822_v0  ;;  %2096 = vst [vmem:[#allocation1] ss:$4 sm:$0xff] %v2094_v12  ;;  %v2722_v17 = vor.u32 %v3280_v63, %v2721_v62  ;;  %v3308_v43 = vld [vmem:[%s5038_s1 + $0x594] sm:$0xf0]  ;;  %v2761_v51 = vld [vmem:[%s5038_s1 + $0x500] sm:$0xf] }
  0x44   :  { %1686 = vmatpush.bf16.msra.mxu0 %v2690_v18  ;;  %1655 = vmatmul.bf16.vlgmr.msrb.gmra.mxu1 %v3826_v2  ;;  %v2786_v18 = vor.u32 %v3296_v6, %v2785_v5  ;;  %v2825_v54 = vld [vmem:[%s5038_s1 + $0x580] sm:$0xf]  ;;  %v3306_v55 = vld [vmem:[%s5038_s1 + $0x584] sm:$0xf0]  ;;  %v2945_v56 = vld [vmem:[%s5038_s1 + $0x670] sm:$0xf] }
  0x45   :  { %1699 = vmatpush.bf16.msra.mxu1 %v2754_v19  ;;  %1668 = vmatmul.bf16.vlgmr.msrb.gmra.mxu2 %v3820_v61  ;;  %v2649_v19 = vld [vmem:[%s5038_s1 + $0x420] sm:$0xf]  ;;  %v3336_v57 = vld [vmem:[%s5038_s1 + $0x674] sm:$0xf0]  ;;  %v3009_v58 = vld [vmem:[%s5038_s1 + $0x6f0] sm:$0xf]  ;;  %v2826_v7 = vor.u32 %v3306_v55, %v2825_v54 }
  0x46   :  { %1712 = vmatpush.bf16.msra.mxu2 %v2818_v23  ;;  %1681 = vmatmul.bf16.vlgmr.msrb.gmra.mxu3 %v3824_v1  ;;  %v3262_v23 = vld [vmem:[%s5038_s1 + $0x424] sm:$0xf0]  ;;  %v3352_v60 = vld [vmem:[%s5038_s1 + $0x6f4] sm:$0xf0]  ;;  %v3073_v62 = vld [vmem:[%s5038_s1 + $0x770] sm:$0xf] }
  0x47   :  { %1725 = vmatpush.bf16.msra.mxu3 %v2882_v28  ;;  %v2777_v28 = vld [vmem:[%s5038_s1 + $0x520] sm:$0xf]  ;;  %v2650_v32 = vor.u32 %v3262_v23, %v2649_v19  ;;  %v3368_v63 = vld [vmem:[%s5038_s1 + $0x774] sm:$0xf0]  ;;  %v3121_v5 = vld [vmem:[%s5038_s1 + $0x7d0] sm:$0xf]  ;;  %v3010_v9 = vor.u32 %v3352_v60, %v3009_v58 }
  0x48   :  { %1687 = vmatpush.bf16.msra.mxu0 %v2682_v34  ;;  %v2778_v34 = vor.u32 %v3294_v29, %v2777_v28  ;;  %v3380_v6 = vld [vmem:[%s5038_s1 + $0x7d4] sm:$0xf0]  ;;  %v3074_v10 = vor.u32 %v3368_v63, %v3073_v62  ;;  %v2937_v12 = vld [vmem:[%s5038_s1 + $0x660] sm:$0xf]  ;;  %v3350_v19 = vld [vmem:[%s5038_s1 + $0x6e4] sm:$0xf0] }
  0x49   :  { %1700 = vmatpush.bf16.msra.mxu1 %v2746_v35  ;;  %v2641_v35 = vld [vmem:[%s5038_s1 + $0x410] sm:$0xf]  ;;  %v3065_v23 = vld [vmem:[%s5038_s1 + $0x760] sm:$0xf]  ;;  %v3366_v24 = vld [vmem:[%s5038_s1 + $0x764] sm:$0xf0] }
  0x4a   :  { %1713 = vmatpush.bf16.msra.mxu2 %v2810_v36  ;;  %v3260_v36 = vld [vmem:[%s5038_s1 + $0x414] sm:$0xf0]  ;;  %v3378_v27 = vld [vmem:[%s5038_s1 + $0x7c4] sm:$0xf0]  ;;  %v3066_v30 = vor.u32 %v3366_v24, %v3065_v23  ;;  %v2929_v31 = vld [vmem:[%s5038_s1 + $0x650] sm:$0xf] }
  0x4b   :  { %1726 = vmatpush.bf16.msra.mxu3 %v2874_v40  ;;  %v2769_v40 = vld [vmem:[%s5038_s1 + $0x510] sm:$0xf]  ;;  %v2642_v44 = vor.u32 %v3260_v36, %v2641_v35  ;;  %v3348_v35 = vld [vmem:[%s5038_s1 + $0x6d4] sm:$0xf0]  ;;  %v3143_v24 = vld [vmem:[%s5038_s1 + $0x74] sm:$0xf] }
  0x4c   :  { %1688 = vmatpush.bf16.msra.mxu0 %v2674_v46  ;;  %v3258_v46 = vld [vmem:[%s5038_s1 + $0x404] sm:$0xf0]  ;;  %v3057_v36 = vld [vmem:[%s5038_s1 + $0x750] sm:$0xf]  ;;  %v3360_v62 = vld [vmem:[%s5038_s1 + $0x734] sm:$0xf0] }
  0x4d   :  { %1701 = vmatpush.bf16.msra.mxu1 %v2738_v47  ;;  %v2706_v47 = vor.u32 %v3276_v39, %v2705_v37  ;;  %v3364_v37 = vld [vmem:[%s5038_s1 + $0x754] sm:$0xf0]  ;;  %v2913_v55 = vld [vmem:[%s5038_s1 + $0x630] sm:$0xf] }
  0x4e   :  { %1714 = vmatpush.bf16.msra.mxu2 %v2802_v48  ;;  %v2770_v48 = vor.u32 %v3292_v41, %v2769_v40  ;;  %v3376_v39 = vld [vmem:[%s5038_s1 + $0x7b4] sm:$0xf0]  ;;  %v3041_v60 = vld [vmem:[%s5038_s1 + $0x730] sm:$0xf] }
  0x4f   :  { %1727 = vmatpush.bf16.msra.mxu3 %v2866_v52  ;;  %v2834_v52 = vor.u32 %v3308_v43, %v2833_v42  ;;  %v3058_v42 = vor.u32 %v3364_v37, %v3057_v36  ;;  %v2921_v43 = vld [vmem:[%s5038_s1 + $0x640] sm:$0xf]  ;;  %v3089_v63 = vld [vmem:[%s5038_s1 + $0x790] sm:$0xf]  ;;  %v3141_v37 = vld [vmem:[%s5038_s1 + $0x64] sm:$0xf] }
  0x50   :  { %1689 = vmatpush.bf16.msra.mxu0 %v2666_v59  ;;  %v2634_v59 = vor.u32 %v3258_v46, %v2633_v45  ;;  %v2985_v45 = vld [vmem:[%s5038_s1 + $0x6c0] sm:$0xf] }
  0x51   :  { %1702 = vmatpush.bf16.msra.mxu1 %v2730_v3  ;;  %v2698_v3 = vor.u32 %v3274_v50, %v2697_v49  ;;  %v3362_v49 = vld [vmem:[%s5038_s1 + $0x744] sm:$0xf0]  ;;  %v3097_v50 = vld [vmem:[%s5038_s1 + $0x7a0] sm:$0xf] }
  0x52   :  { %1715 = vmatpush.bf16.msra.mxu2 %v2794_v4  ;;  %v2762_v4 = vor.u32 %v3290_v53, %v2761_v51  ;;  %v3374_v51 = vld [vmem:[%s5038_s1 + $0x7a4] sm:$0xf0] }
  0x53   :  { %1728 = vmatpush.bf16.msra.mxu3 %v2858_v8  ;;  %v2946_v8 = vor.u32 %v3336_v57, %v2945_v56  ;;  %v3328_v56 = vld [vmem:[%s5038_s1 + $0x634] sm:$0xf0]  ;;  %v2977_v57 = vld [vmem:[%s5038_s1 + $0x6b0] sm:$0xf]  ;;  %v3098_v58 = vor.u32 %v3374_v51, %v3097_v50  ;;  %v2243_v50 = vld [vmem:[%s5038_s1 + $0xf8] sm:$0xf0] }
  0x54   :  { %1690 = vmatpush.bf16.msra.mxu0 %v2658_v16  ;;  %v3334_v16 = vld [vmem:[%s5038_s1 + $0x664] sm:$0xf0] }
  0x55   :  { %1703 = vmatpush.bf16.msra.mxu1 %v2722_v17  ;;  %v3001_v17 = vld [vmem:[%s5038_s1 + $0x6e0] sm:$0xf]  ;;  %v2938_v28 = vor.u32 %v3334_v16, %v2937_v12  ;;  %v3342_v12 = vld [vmem:[%s5038_s1 + $0x6a4] sm:$0xf0] }
  0x56   :  { %1716 = vmatpush.bf16.msra.mxu2 %v2786_v18  ;;  %v3122_v18 = vor.u32 %v3380_v6, %v3121_v5  ;;  %v3002_v29 = vor.u32 %v3350_v19, %v3001_v17  ;;  %v3042_v6 = vor.u32 %v3360_v62, %v3041_v60  ;;  %v3033_v16 = vld [vmem:[%s5038_s1 + $0x720] sm:$0xf]  ;;  %v3358_v17 = vld [vmem:[%s5038_s1 + $0x724] sm:$0xf0] }
  0x57   :  { %1729 = vmatpush.bf16.msra.mxu3 %v2850_v25  ;;  %v3113_v25 = vld [vmem:[%s5038_s1 + $0x7c0] sm:$0xf]  ;;  %v3370_v19 = vld [vmem:[%s5038_s1 + $0x784] sm:$0xf0] }
  0x58   :  { %1691 = vmatpush.bf16.msra.mxu0 %v2650_v32  ;;  %v3332_v32 = vld [vmem:[%s5038_s1 + $0x654] sm:$0xf0] }
  0x59   :  { %1704 = vmatpush.bf16.msra.mxu1 %v2714_v33  ;;  %v2993_v33 = vld [vmem:[%s5038_s1 + $0x6d0] sm:$0xf]  ;;  %v2930_v40 = vor.u32 %v3332_v32, %v2929_v31 }
  0x5a   :  { %1717 = vmatpush.bf16.msra.mxu2 %v2778_v34  ;;  %v3114_v34 = vor.u32 %v3378_v27, %v3113_v25  ;;  %v2994_v41 = vor.u32 %v3348_v35, %v2993_v33  ;;  %v2179_v25 = vld [vmem:[%s5038_s1 + $0x78] sm:$0xf0]  ;;  %v2961_v31 = vld [vmem:[%s5038_s1 + $0x690] sm:$0xf]  ;;  %v3340_v33 = vld [vmem:[%s5038_s1 + $0x694] sm:$0xf0] }
  0x5b   :  { %1730 = vmatpush.bf16.msra.mxu3 %v2842_v38  ;;  %v3105_v38 = vld [vmem:[%s5038_s1 + $0x7b0] sm:$0xf]  ;;  %v3356_v35 = vld [vmem:[%s5038_s1 + $0x714] sm:$0xf0]  ;;  %v2182_v36 = vor.u32 %v3143_v24, %v2179_v25  ;;  %v3135_v25 = vld [vmem:[%s5038_s1 + $0x34] sm:$0xf] }
  0x5c   :  { %1692 = vmatpush.bf16.msra.mxu0 %v2642_v44  ;;  %v3330_v44 = vld [vmem:[%s5038_s1 + $0x644] sm:$0xf0]  ;;  %v3106_v46 = vor.u32 %v3376_v39, %v3105_v38  ;;  %v2171_v38 = vld [vmem:[%s5038_s1 + $0x68] sm:$0xf0] }
  0x5d   :  { %1705 = vmatpush.bf16.msra.mxu1 %v2706_v47  ;;  %v3346_v47 = vld [vmem:[%s5038_s1 + $0x6c4] sm:$0xf0]  ;;  %v2174_v51 = vor.u32 %v3141_v37, %v2171_v38  ;;  %v3133_v38 = vld [vmem:[%s5038_s1 + $0x24] sm:$0xf] }
  0x5e   :  { %1718 = vmatpush.bf16.msra.mxu2 %v2770_v48  ;;  %v3049_v48 = vld [vmem:[%s5038_s1 + $0x740] sm:$0xf]  ;;  %v2986_v53 = vor.u32 %v3346_v47, %v2985_v45  ;;  %v3338_v45 = vld [vmem:[%s5038_s1 + $0x684] sm:$0xf0] }
  0x5f   :  { %1731 = vmatpush.bf16.msra.mxu3 %v2834_v52  ;;  %v2922_v52 = vor.u32 %v3330_v44, %v2921_v43  ;;  %v3050_v54 = vor.u32 %v3362_v49, %v3049_v48  ;;  %v2962_v43 = vor.u32 %v3340_v33, %v2961_v31  ;;  %v3354_v47 = vld [vmem:[%s5038_s1 + $0x704] sm:$0xf0]  ;;  %v3139_v48 = vld [vmem:[%s5038_s1 + $0x54] sm:$0xf]  ;;  %v2147_v33 = vld [vmem:[%s5038_s1 + $0x38] sm:$0xf0] }
  0x60   :  { %1693 = vmatpush.bf16.msra.mxu0 %v2634_v59  ;;  %v3344_v59 = vld [vmem:[%s5038_s1 + $0x6b4] sm:$0xf0]  ;;  %v3159_v49 = vld [vmem:[%s5038_s1 + $0xf4] sm:$0xf] }
  0x61   :  { %1706 = vmatpush.bf16.msra.mxu1 %v2698_v3  ;;  %v3372_v3 = vld [vmem:[%s5038_s1 + $0x794] sm:$0xf0]  ;;  %v2978_v5 = vor.u32 %v3344_v59, %v2977_v57  ;;  %v3191_v57 = vld [vmem:[%s5038_s1 + $0x1f4] sm:$0xf]  ;;  %v2246_v62 = vor.u32 %v3159_v49, %v2243_v50 }
  0x62   :  { %1719 = vmatpush.bf16.msra.mxu2 %v2762_v4  ;;  %v2914_v4 = vor.u32 %v3328_v56, %v2913_v55  ;;  %v2163_v56 = vld [vmem:[%s5038_s1 + $0x58] sm:$0xf0]  ;;  %v3171_v31 = vld [vmem:[%s5038_s1 + $0x154] sm:$0xf] }
  0x63   :  { %1732 = vmatpush.bf16.msra.mxu3 %v2826_v7  ;;  %1694 = vmatmul.bf16.vlgmr.msra.gmra.mxu0 %v3961_v11  ;;  %v2905_v7 = vld [vmem:[%s5038_s1 + $0x620] sm:$0xf]  ;;  %v3131_v50 = vld [vmem:[%s5038_s1 + $0x14] sm:$0xf] }
  0x64   :  { %1738 = vmatpush.bf16.msrb.mxu0 %v2946_v8  ;;  %1707 = vmatmul.bf16.vlgmr.msra.gmra.mxu1 %v3965_v14  ;;  %v3326_v8 = vld [vmem:[%s5038_s1 + $0x624] sm:$0xf0] }
  0x65   :  { %1751 = vmatpush.bf16.msrb.mxu1 %v3010_v9  ;;  %1720 = vmatmul.bf16.vlgmr.msra.gmra.mxu2 %v3963_v13  ;;  %v2969_v9 = vld [vmem:[%s5038_s1 + $0x6a0] sm:$0xf]  ;;  %v2906_v23 = vor.u32 %v3326_v8, %v2905_v7  ;;  %v2235_v7 = vld [vmem:[%s5038_s1 + $0xe8] sm:$0xf0]  ;;  %v3173_v8 = vld [vmem:[%s5038_s1 + $0x164] sm:$0xf] }
  0x66   :  { %1764 = vmatpush.bf16.msrb.mxu2 %v3074_v10  ;;  %1733 = vmatmul.bf16.vlgmr.msra.gmra.mxu3 %v3967_v15  ;;  %v3090_v10 = vor.u32 %v3372_v3, %v3089_v63  ;;  %v2970_v27 = vor.u32 %v3342_v12, %v2969_v9  ;;  %v3137_v3 = vld [vmem:[%s5038_s1 + $0x44] sm:$0xf]  ;;  %v2299_v9 = vld [vmem:[%s5038_s1 + $0x168] sm:$0xf0] }
  0x67   :  { %1779 = vmatpush.bf16.msrb.mxu3 %v3122_v18  ;;  %v3081_v18 = vld [vmem:[%s5038_s1 + $0x780] sm:$0xf]  ;;  %v3189_v12 = vld [vmem:[%s5038_s1 + $0x1e4] sm:$0xf]  ;;  %v2302_v24 = vor.u32 %v3173_v8, %v2299_v9  ;;  %v2267_v8 = vld [vmem:[%s5038_s1 + $0x128] sm:$0xf0] }
  0x68   :  { %1739 = vmatpush.bf16.msrb.mxu0 %v2938_v28  ;;  %v3034_v28 = vor.u32 %v3358_v17, %v3033_v16  ;;  %v3082_v32 = vor.u32 %v3370_v19, %v3081_v18  ;;  %v2363_v16 = vld [vmem:[%s5038_s1 + $0x1e8] sm:$0xf0]  ;;  %v300_v17 = vld [vmem:[#allocation1 + $0x24] sm:$0xff]  ;;  %v302_v18 = vld [vmem:[#allocation1 + $0x36] sm:$0xff] }
  0x69   :  { %1752 = vmatpush.bf16.msrb.mxu1 %v3002_v29  ;;  %v2897_v29 = vld [vmem:[%s5038_s1 + $0x610] sm:$0xf]  ;;  %v2123_v9 = vld [vmem:[%s5038_s1 + $0x8] sm:$0xf0] }
  0x6a   :  { %1765 = vmatpush.bf16.msrb.mxu2 %v3066_v30  ;;  %v3324_v30 = vld [vmem:[%s5038_s1 + $0x614] sm:$0xf0]  ;;  %v301_v19 = vld [vmem:[#allocation1 + $0x2d] sm:$0xff] }
  0x6b   :  { %1780 = vmatpush.bf16.msrb.mxu3 %v3114_v34  ;;  %v3025_v34 = vld [vmem:[%s5038_s1 + $0x710] sm:$0xf]  ;;  %v2898_v39 = vor.u32 %v3324_v30, %v2897_v29  ;;  %v2366_v29 = vor.u32 %v3189_v12, %v2363_v16  ;;  %v2227_v30 = vld [vmem:[%s5038_s1 + $0xd8] sm:$0xf0]  ;;  %v2331_v12 = vld [vmem:[%s5038_s1 + $0x1a8] sm:$0xf0] }
  0x6c   :  { %1740 = vmatpush.bf16.msrb.mxu0 %v2930_v40  ;;  %v2889_v40 = vld [vmem:[%s5038_s1 + $0x600] sm:$0xf]  ;;  %v3026_v44 = vor.u32 %v3356_v35, %v3025_v34  ;;  %v3187_v34 = vld [vmem:[%s5038_s1 + $0x1d4] sm:$0xf]  ;;  %v2355_v35 = vld [vmem:[%s5038_s1 + $0x1d8] sm:$0xf0] }
  0x6d   :  { %1753 = vmatpush.bf16.msrb.mxu1 %v2994_v41  ;;  %v3322_v41 = vld [vmem:[%s5038_s1 + $0x604] sm:$0xf0]  ;;  %v3207_v16 = vld [vmem:[%s5038_s1 + $0x274] sm:$0xf] }
  0x6e   :  { %1766 = vmatpush.bf16.msrb.mxu2 %v3058_v42  ;;  %v2953_v42 = vld [vmem:[%s5038_s1 + $0x680] sm:$0xf]  ;;  %v2890_v55 = vor.u32 %v3322_v41, %v2889_v40  ;;  %v2150_v40 = vor.u32 %v3135_v25, %v2147_v33  ;;  %v2358_v41 = vor.u32 %v3187_v34, %v2355_v35  ;;  %v3205_v33 = vld [vmem:[%s5038_s1 + $0x264] sm:$0xf]  ;;  %v2427_v34 = vld [vmem:[%s5038_s1 + $0x268] sm:$0xf0] }
  0x6f   :  { %1781 = vmatpush.bf16.msrb.mxu3 %v3106_v46  ;;  %v3017_v46 = vld [vmem:[%s5038_s1 + $0x700] sm:$0xf]  ;;  %v2954_v59 = vor.u32 %v3338_v45, %v2953_v42  ;;  %v2219_v42 = vld [vmem:[%s5038_s1 + $0xc8] sm:$0xf0] }
  0x70   :  { %1741 = vmatpush.bf16.msrb.mxu0 %v2922_v52  ;;  %v3175_v52 = vld [vmem:[%s5038_s1 + $0x174] sm:$0xf]  ;;  %v3018_v60 = vor.u32 %v3354_v47, %v3017_v46  ;;  %v2139_v45 = vld [vmem:[%s5038_s1 + $0x28] sm:$0xf0]  ;;  %v3185_v46 = vld [vmem:[%s5038_s1 + $0x1c4] sm:$0xf] }
  0x71   :  { %1754 = vmatpush.bf16.msrb.mxu1 %v2986_v53  ;;  %v2307_v53 = vld [vmem:[%s5038_s1 + $0x178] sm:$0xf0]  ;;  %v2347_v47 = vld [vmem:[%s5038_s1 + $0x1c8] sm:$0xf0] }
  0x72   :  { %1767 = vmatpush.bf16.msrb.mxu2 %v3050_v54  ;;  %v303_v54 = vld [vmem:[#allocation1 + $0x3f] sm:$0xff]  ;;  %v2310_v63 = vor.u32 %v3175_v52, %v2307_v53  ;;  %v2142_v52 = vor.u32 %v3133_v38, %v2139_v45  ;;  %v2350_v53 = vor.u32 %v3185_v46, %v2347_v47  ;;  %v2187_v38 = vld [vmem:[%s5038_s1 + $0x88] sm:$0xf0]  ;;  %v3203_v45 = vld [vmem:[%s5038_s1 + $0x254] sm:$0xf] }
  0x73   :  { %1782 = vmatpush.bf16.msrb.mxu3 %v3098_v58  ;;  %v2371_v58 = vld [vmem:[%s5038_s1 + $0x1f8] sm:$0xf0]  ;;  %v3223_v46 = vld [vmem:[%s5038_s1 + $0x2f4] sm:$0xf] }
  0x74   :  { %1742 = vmatpush.bf16.msrb.mxu0 %v2914_v4  ;;  %v3157_v4 = vld [vmem:[%s5038_s1 + $0xe4] sm:$0xf]  ;;  %v2499_v47 = vld [vmem:[%s5038_s1 + $0x2f8] sm:$0xf0] }
  0x75   :  { %1755 = vmatpush.bf16.msrb.mxu1 %v2978_v5  ;;  %v2166_v5 = vor.u32 %v3139_v48, %v2163_v56  ;;  %v2275_v56 = vld [vmem:[%s5038_s1 + $0x138] sm:$0xf0] }
  0x76   :  { %1768 = vmatpush.bf16.msrb.mxu2 %v3042_v6  ;;  %v2374_v6 = vor.u32 %v3191_v57, %v2371_v58  ;;  %v2131_v57 = vld [vmem:[%s5038_s1 + $0x18] sm:$0xf0]  ;;  %v3183_v58 = vld [vmem:[%s5038_s1 + $0x1b4] sm:$0xf] }
  0x77   :  { %1783 = vmatpush.bf16.msrb.mxu3 %v3090_v10  ;;  %v2155_v10 = vld [vmem:[%s5038_s1 + $0x48] sm:$0xf0] }
  0x78   :  { %1743 = vmatpush.bf16.msrb.mxu0 %v2906_v23  ;;  %v2238_v23 = vor.u32 %v3157_v4, %v2235_v7  ;;  %v2134_v4 = vor.u32 %v3131_v50, %v2131_v57  ;;  %v3165_v7 = vld [vmem:[%s5038_s1 + $0x124] sm:$0xf]  ;;  %v2563_v50 = vld [vmem:[%s5038_s1 + $0x378] sm:$0xf0] }
  0x79   :  { %1756 = vmatpush.bf16.msrb.mxu1 %v2970_v27  ;;  %v3155_v27 = vld [vmem:[%s5038_s1 + $0xd4] sm:$0xf] }
  0x7a   :  { %1769 = vmatpush.bf16.msrb.mxu2 %v3034_v28  ;;  %v2158_v28 = vor.u32 %v3137_v3, %v2155_v10  ;;  %v3149_v3 = vld [vmem:[%s5038_s1 + $0xa4] sm:$0xf] }
  0x7b   :  { %1784 = vmatpush.bf16.msrb.mxu3 %v3082_v32  ;;  %v2291_v32 = vld [vmem:[%s5038_s1 + $0x158] sm:$0xf0]  ;;  %v3181_v10 = vld [vmem:[%s5038_s1 + $0x1a4] sm:$0xf] }
  0x7c   :  { %1744 = vmatpush.bf16.msrb.mxu0 %v2898_v39  ;;  %v2294_v37 = vor.u32 %v3171_v31, %v2291_v32  ;;  %v3153_v39 = vld [vmem:[%s5038_s1 + $0xc4] sm:$0xf]  ;;  %v2334_v25 = vor.u32 %v3181_v10, %v2331_v12  ;;  %v3179_v31 = vld [vmem:[%s5038_s1 + $0x194] sm:$0xf]  ;;  %v2323_v32 = vld [vmem:[%s5038_s1 + $0x198] sm:$0xf0] }
  0x7d   :  { %1757 = vmatpush.bf16.msrb.mxu1 %v2962_v43  ;;  %v3169_v43 = vld [vmem:[%s5038_s1 + $0x144] sm:$0xf]  ;;  %v2222_v48 = vor.u32 %v3153_v39, %v2219_v42  ;;  %v3199_v10 = vld [vmem:[%s5038_s1 + $0x234] sm:$0xf] }
  0x7e   :  { %1770 = vmatpush.bf16.msrb.mxu2 %v3026_v44  ;;  %3127 = vmatmul.msk.bf16.vlgmr.msrb.gmra.mxu3 %vm1579_vm0, %v303_v54  ;;  %v2283_v44 = vld [vmem:[%s5038_s1 + $0x148] sm:$0xf0]  ;;  %v2211_v54 = vld [vmem:[%s5038_s1 + $0xb8] sm:$0xf0]  ;;  %v3161_v39 = vld [vmem:[%s5038_s1 + $0x104] sm:$0xf] }
  0x7f   :  { %1790 = vmatpush.bf16.msra.mxu3 %v2182_v36  ;;  %v2230_v36 = vor.u32 %v3155_v27, %v2227_v30  ;;  %v2286_v49 = vor.u32 %v3169_v43, %v2283_v44  ;;  %v2195_v27 = vld [vmem:[%s5038_s1 + $0x98] sm:$0xf0]  ;;  %v3177_v42 = vld [vmem:[%s5038_s1 + $0x184] sm:$0xf]  ;;  %v2315_v43 = vld [vmem:[%s5038_s1 + $0x188] sm:$0xf0]  ;;  %v2430_v44 = vor.u32 %v3205_v33, %v2427_v34 }
  0x80   :  { %1745 = vmatpush.bf16.msrb.mxu0 %v2890_v55  ;;  %v3167_v55 = vld [vmem:[%s5038_s1 + $0x134] sm:$0xf]  ;;  %v2539_v33 = vld [vmem:[%s5038_s1 + $0x348] sm:$0xf0]  ;;  %v3249_v34 = vld [vmem:[%s5038_s1 + $0x3c4] sm:$0xf] }
  0x81   :  { %1758 = vmatpush.bf16.msrb.mxu1 %v2954_v59  ;;  %v2339_v59 = vld [vmem:[%s5038_s1 + $0x1b8] sm:$0xf0]  ;;  %v3219_v12 = vld [vmem:[%s5038_s1 + $0x2d4] sm:$0xf] }
  0x82   :  { %1771 = vmatpush.bf16.msrb.mxu2 %v3018_v60 }
  0x83   :  { %1791 = vmatpush.bf16.msra.mxu3 %v2174_v51  ;;  %1746 = vmatmul.bf16.vlgmr.msrb.gmra.mxu0 %v300_v17  ;;  %v3151_v51 = vld [vmem:[%s5038_s1 + $0xb4] sm:$0xf]  ;;  %v2435_v17 = vld [vmem:[%s5038_s1 + $0x278] sm:$0xf0] }
  0x84   :  { %1803 = vmatpush.bf16.msra.mxu0 %v2246_v62  ;;  %1759 = vmatmul.bf16.vlgmr.msrb.gmra.mxu1 %v301_v19  ;;  %v2214_v60 = vor.u32 %v3151_v51, %v2211_v54  ;;  %v2278_v62 = vor.u32 %v3167_v55, %v2275_v56  ;;  %v2270_v19 = vor.u32 %v3165_v7, %v2267_v8  ;;  %v2627_v54 = vld [vmem:[%s5038_s1 + $0x3f8] sm:$0xf0] }
  0x85   :  { %1816 = vmatpush.bf16.msra.mxu1 %v2310_v63  ;;  %1772 = vmatmul.bf16.vlgmr.msrb.gmra.mxu2 %v302_v18  ;;  %v3129_v63 = vld [vmem:[%s5038_s1 + $0x4] sm:$0xf]  ;;  %v2438_v30 = vor.u32 %v3207_v16, %v2435_v17  ;;  %v2318_v55 = vor.u32 %v3177_v42, %v2315_v43  ;;  %v2502_v56 = vor.u32 %v3223_v46, %v2499_v47  ;;  %v2483_v16 = vld [vmem:[%s5038_s1 + $0x2d8] sm:$0xf0]  ;;  %v3247_v46 = vld [vmem:[%s5038_s1 + $0x3b4] sm:$0xf] }
  0x86   :  { %1829 = vmatpush.bf16.msra.mxu2 %v2374_v6  ;;  %v2203_v6 = vld [vmem:[%s5038_s1 + $0xa8] sm:$0xf0]  ;;  %v2387_v43 = vld [vmem:[%s5038_s1 + $0x218] sm:$0xf0] }
  0x87   :  { %1792 = vmatpush.bf16.msra.mxu3 %v2166_v5  ;;  %v2342_v5 = vor.u32 %v3183_v58, %v2339_v59  ;;  %v2206_v18 = vor.u32 %v3149_v3, %v2203_v6  ;;  %v3201_v59 = vld [vmem:[%s5038_s1 + $0x244] sm:$0xf]  ;;  %v2619_v6 = vld [vmem:[%s5038_s1 + $0x3e8] sm:$0xf0]  ;;  %v2595_v47 = vld [vmem:[%s5038_s1 + $0x3b8] sm:$0xf0] }
  0x88   :  { %1804 = vmatpush.bf16.msra.mxu0 %v2238_v23  ;;  %v3147_v23 = vld [vmem:[%s5038_s1 + $0x94] sm:$0xf]  ;;  %v3237_v3 = vld [vmem:[%s5038_s1 + $0x364] sm:$0xf] }
  0x89   :  { %1817 = vmatpush.bf16.msra.mxu1 %v2302_v24  ;;  %v2126_v24 = vor.u32 %v3129_v63, %v2123_v9  ;;  %v2198_v35 = vor.u32 %v3147_v23, %v2195_v27  ;;  %v2547_v23 = vld [vmem:[%s5038_s1 + $0x358] sm:$0xf0]  ;;  %v2486_v27 = vor.u32 %v3219_v12, %v2483_v16  ;;  %v3227_v12 = vld [vmem:[%s5038_s1 + $0x314] sm:$0xf] }
  0x8a   :  { %1830 = vmatpush.bf16.msra.mxu2 %v2366_v29  ;;  %v2259_v29 = vld [vmem:[%s5038_s1 + $0x118] sm:$0xf0] }
  0x8b   :  { %1793 = vmatpush.bf16.msra.mxu3 %v2158_v28  ;;  %v3163_v28 = vld [vmem:[%s5038_s1 + $0x114] sm:$0xf]  ;;  %v2515_v16 = vld [vmem:[%s5038_s1 + $0x318] sm:$0xf0] }
  0x8c   :  { %1805 = vmatpush.bf16.msra.mxu0 %v2230_v36  ;;  %v2262_v36 = vor.u32 %v3163_v28, %v2259_v29 }
  0x8d   :  { %1818 = vmatpush.bf16.msra.mxu1 %v2294_v37  ;;  %v3145_v37 = vld [vmem:[%s5038_s1 + $0x84] sm:$0xf] }
  0x8e   :  { %1831 = vmatpush.bf16.msra.mxu2 %v2358_v41  ;;  %v2251_v41 = vld [vmem:[%s5038_s1 + $0x108] sm:$0xf0]  ;;  %v2190_v51 = vor.u32 %v3145_v37, %v2187_v38 }
  0x8f   :  { %1794 = vmatpush.bf16.msra.mxu3 %v2150_v40  ;;  %v2326_v40 = vor.u32 %v3179_v31, %v2323_v32  ;;  %v2395_v31 = vld [vmem:[%s5038_s1 + $0x228] sm:$0xf0]  ;;  %v3233_v32 = vld [vmem:[%s5038_s1 + $0x344] sm:$0xf] }
  0x90   :  { %1806 = vmatpush.bf16.msra.mxu0 %v2222_v48  ;;  %v2419_v48 = vld [vmem:[%s5038_s1 + $0x258] sm:$0xf0]  ;;  %v2542_v38 = vor.u32 %v3233_v32, %v2539_v33 }
  0x91   :  { %1819 = vmatpush.bf16.msra.mxu1 %v2286_v49  ;;  %v3239_v49 = vld [vmem:[%s5038_s1 + $0x374] sm:$0xf]  ;;  %v2422_v57 = vor.u32 %v3203_v45, %v2419_v48  ;;  %v2531_v45 = vld [vmem:[%s5038_s1 + $0x338] sm:$0xf0]  ;;  %v4557_v48 = vld [vmem:[%s5041_s2] sm:$0x3] }
  0x92   :  { %1832 = vmatpush.bf16.msra.mxu2 %v2350_v53  ;;  %v3255_v53 = vld [vmem:[%s5038_s1 + $0x3f4] sm:$0xf]  ;;  %v2566_v58 = vor.u32 %v3239_v49, %v2563_v50  ;;  %v3193_v50 = vld [vmem:[%s5038_s1 + $0x204] sm:$0xf] }
  0x93   :  { %1795 = vmatpush.bf16.msra.mxu3 %v2142_v52  ;;  %v2254_v52 = vor.u32 %v3161_v39, %v2251_v41  ;;  %v2630_v63 = vor.u32 %v3255_v53, %v2627_v54  ;;  %v3195_v39 = vld [vmem:[%s5038_s1 + $0x214] sm:$0xf]  ;;  %v2467_v41 = vld [vmem:[%s5038_s1 + $0x2b8] sm:$0xf0]  ;;  %v3213_v54 = vld [vmem:[%s5038_s1 + $0x2a4] sm:$0xf] }
  0x94   :  { %1807 = vmatpush.bf16.msra.mxu0 %v2214_v60  ;;  %v3221_v60 = vld [vmem:[%s5038_s1 + $0x2e4] sm:$0xf] }
  0x95   :  { %1820 = vmatpush.bf16.msra.mxu1 %v2278_v62  ;;  %v2491_v62 = vld [vmem:[%s5038_s1 + $0x2e8] sm:$0xf0] }
  0x96   :  { %1833 = vmatpush.bf16.msra.mxu2 %v2342_v5  ;;  %v3253_v5 = vld [vmem:[%s5038_s1 + $0x3e4] sm:$0xf]  ;;  %v2494_v7 = vor.u32 %v3221_v60, %v2491_v62  ;;  %v280_v60 = vperm.slane %v4557_v48, 0  ;;  %v2587_v62 = vld [vmem:[%s5038_s1 + $0x3a8] sm:$0xf0] }
  0x97   :  { %1796 = vmatpush.bf16.msra.mxu3 %v2134_v4  ;;  %v2555_v4 = vld [vmem:[%s5038_s1 + $0x368] sm:$0xf0]  ;;  %v2622_v17 = vor.u32 %v3253_v5, %v2619_v6  ;;  %v3211_v6 = vld [vmem:[%s5038_s1 + $0x294] sm:$0xf] }
  0x98   :  { %1808 = vmatpush.bf16.msra.mxu0 %v2206_v18  ;;  %v2558_v9 = vor.u32 %v3237_v3, %v2555_v4  ;;  %v2403_v18 = vld [vmem:[%s5038_s1 + $0x238] sm:$0xf0] }
  0x99   :  { %1821 = vmatpush.bf16.msra.mxu1 %v2270_v19  ;;  %v3235_v19 = vld [vmem:[%s5038_s1 + $0x354] sm:$0xf]  ;;  %v2406_v28 = vor.u32 %v3199_v10, %v2403_v18 }
  0x9a   :  { %1834 = vmatpush.bf16.msra.mxu2 %v2334_v25  ;;  %v2611_v25 = vld [vmem:[%s5038_s1 + $0x3d8] sm:$0xf0]  ;;  %v2550_v29 = vor.u32 %v3235_v19, %v2547_v23 }
  0x9b   :  { %1797 = vmatpush.bf16.msra.mxu3 %v2126_v24  ;;  %v3251_v24 = vld [vmem:[%s5038_s1 + $0x3d4] sm:$0xf]  ;;  %v2579_v23 = vld [vmem:[%s5038_s1 + $0x398] sm:$0xf0] }
  0x9c   :  { %1809 = vmatpush.bf16.msra.mxu0 %v2198_v35  ;;  %v2603_v35 = vld [vmem:[%s5038_s1 + $0x3c8] sm:$0xf0] }
  0x9d   :  { %1822 = vmatpush.bf16.msra.mxu1 %v2262_v36  ;;  %v2606_v42 = vor.u32 %v3249_v34, %v2603_v35  ;;  %v2571_v34 = vld [vmem:[%s5038_s1 + $0x388] sm:$0xf0]  ;;  %v3287_v35 = vld [vmem:[%s5038_s1 + $0x4f4] sm:$0xf] }
  0x9e   :  { %1835 = vmatpush.bf16.msra.mxu2 %v2326_v40  ;;  %1798 = vmatmul.bf16.vlgmr.msra.gmra.mxu3 %v3729_v21  ;;  %v2411_v21 = vld [vmem:[%s5038_s1 + $0x248] sm:$0xf0]  ;;  %v3215_v40 = vld [vmem:[%s5038_s1 + $0x2b4] sm:$0xf] }
  0x9f   :  { %1842 = vmatpush.bf16.msrb.mxu3 %v2438_v30  ;;  %v2414_v8 = vor.u32 %v3201_v59, %v2411_v21  ;;  %v3217_v30 = vld [vmem:[%s5038_s1 + $0x2c4] sm:$0xf]  ;;  %v2470_v49 = vor.u32 %v3215_v40, %v2467_v41  ;;  %v2691_v21 = vld [vmem:[%s5038_s1 + $0x478] sm:$0xf0]  ;;  %v3303_v40 = vld [vmem:[%s5038_s1 + $0x574] sm:$0xf] }
  0xa0   :  { %1810 = vmatpush.bf16.msra.mxu0 %v2190_v51  ;;  %v2379_v51 = vld [vmem:[%s5038_s1 + $0x208] sm:$0xf0]  ;;  %v3245_v59 = vld [vmem:[%s5038_s1 + $0x3a4] sm:$0xf] }
  0xa1   :  { %1823 = vmatpush.bf16.msra.mxu1 %v2254_v52  ;;  %v2390_v52 = vor.u32 %v3195_v39, %v2387_v43  ;;  %v2382_v4 = vor.u32 %v3193_v50, %v2379_v51  ;;  %v2675_v39 = vld [vmem:[%s5038_s1 + $0x458] sm:$0xf0] }
  0xa2   :  { %1836 = vmatpush.bf16.msra.mxu2 %v2318_v55  ;;  %v2459_v55 = vld [vmem:[%s5038_s1 + $0x2a8] sm:$0xf0] }
  0xa3   :  { %1843 = vmatpush.bf16.msrb.mxu3 %v2430_v44  ;;  %1811 = vmatmul.bf16.vlgmr.msra.gmra.mxu0 %v3740_v26  ;;  %v3197_v26 = vld [vmem:[%s5038_s1 + $0x224] sm:$0xf]  ;;  %v3231_v44 = vld [vmem:[%s5038_s1 + $0x334] sm:$0xf]  ;;  %v2462_v3 = vor.u32 %v3213_v54, %v2459_v55  ;;  %v2747_v54 = vld [vmem:[%s5038_s1 + $0x4e8] sm:$0xf0] }
  0xa4   :  { %1855 = vmatpush.bf16.msrb.mxu0 %v2502_v56  ;;  %1824 = vmatmul.bf16.vlgmr.msra.gmra.mxu1 %v3727_v20  ;;  %v2614_v20 = vor.u32 %v3251_v24, %v2611_v25  ;;  %v2398_v37 = vor.u32 %v3197_v26, %v2395_v31  ;;  %v2534_v53 = vor.u32 %v3231_v44, %v2531_v45  ;;  %v3229_v56 = vld [vmem:[%s5038_s1 + $0x324] sm:$0xf]  ;;  %v2683_v25 = vld [vmem:[%s5038_s1 + $0x468] sm:$0xf0]  ;;  %v2819_v44 = vld [vmem:[%s5038_s1 + $0x578] sm:$0xf0] }
  0xa5   :  { %1868 = vmatpush.bf16.msrb.mxu1 %v2566_v58  ;;  %1837 = vmatmul.bf16.vlgmr.msra.gmra.mxu2 %v3731_v22  ;;  %v2475_v22 = vld [vmem:[%s5038_s1 + $0x2c8] sm:$0xf0]  ;;  %v3269_v24 = vld [vmem:[%s5038_s1 + $0x464] sm:$0xf]  ;;  %v3319_v45 = vld [vmem:[%s5038_s1 + $0x5f4] sm:$0xf] }
  0xa6   :  { %1881 = vmatpush.bf16.msrb.mxu2 %v2630_v63  ;;  %v2478_v36 = vor.u32 %v3217_v30, %v2475_v22  ;;  %v2523_v58 = vld [vmem:[%s5038_s1 + $0x328] sm:$0xf0]  ;;  %v3271_v63 = vld [vmem:[%s5038_s1 + $0x474] sm:$0xf]  ;;  %v2518_v30 = vor.u32 %v3227_v12, %v2515_v16  ;;  %v3225_v22 = vld [vmem:[%s5038_s1 + $0x304] sm:$0xf]  ;;  %v2686_v33 = vor.u32 %v3269_v24, %v2683_v25 }
  0xa7   :  { %1844 = vmatpush.bf16.msrb.mxu3 %v2422_v57  ;;  %v2598_v57 = vor.u32 %v3247_v46, %v2595_v47  ;;  %v2526_v5 = vor.u32 %v3229_v56, %v2523_v58  ;;  %v2694_v10 = vor.u32 %v3271_v63, %v2691_v21  ;;  %v1604_v19 = vpop.f32.mrf.mxu1  ;;  %v3241_v31 = vld [vmem:[%s5038_s1 + $0x384] sm:$0xf]  ;;  %v2883_v46 = vld [vmem:[%s5038_s1 + $0x5f8] sm:$0xf0]  ;;  %v2822_v56 = vor.u32 %v3303_v40, %v2819_v44  ;;  %v2875_v21 = vld [vmem:[%s5038_s1 + $0x5e8] sm:$0xf0] }
  0xa8   :  { %1856 = vmatpush.bf16.msrb.mxu0 %v2494_v7  ;;  %v2451_v7 = vld [vmem:[%s5038_s1 + $0x298] sm:$0xf0]  ;;  %v3265_v58 = vld [vmem:[%s5038_s1 + $0x444] sm:$0xf]  ;;  %v3299_v16 = vld [vmem:[%s5038_s1 + $0x554] sm:$0xf] }
  0xa9   :  { %1869 = vmatpush.bf16.msrb.mxu1 %v2558_v9  ;;  %v2590_v9 = vor.u32 %v3245_v59, %v2587_v62  ;;  %v2667_v59 = vld [vmem:[%s5038_s1 + $0x448] sm:$0xf0]  ;;  %v3317_v63 = vld [vmem:[%s5038_s1 + $0x5e4] sm:$0xf]  ;;  %v2659_v12 = vld [vmem:[%s5038_s1 + $0x438] sm:$0xf0] }
  0xaa   :  { %1882 = vmatpush.bf16.msrb.mxu2 %v2622_v17  ;;  %v3243_v17 = vld [vmem:[%s5038_s1 + $0x394] sm:$0xf]  ;;  %v2811_v62 = vld [vmem:[%s5038_s1 + $0x568] sm:$0xf0]  ;;  %v3281_v25 = vld [vmem:[%s5038_s1 + $0x4c4] sm:$0xf] }
  0xab   :  { %1845 = vmatpush.bf16.msrb.mxu3 %v2414_v8  ;;  %v1591_v8 = vpop.f32.mrf.mxu0  ;;  %v2582_v32 = vor.u32 %v3243_v17, %v2579_v23  ;;  %v2867_v23 = vld [vmem:[%s5038_s1 + $0x5d8] sm:$0xf0] }
  0xac   :  { %1857 = vmatpush.bf16.msrb.mxu0 %v2486_v27  ;;  %v1592_v18 = vadd.f32 %v1591_v8, %v280_v60  ;;  %v2454_v27 = vor.u32 %v3211_v6, %v2451_v7  ;;  %v3301_v60 = vld [vmem:[%s5038_s1 + $0x564] sm:$0xf]  ;;  %v2739_v6 = vld [vmem:[%s5038_s1 + $0x4d8] sm:$0xf0] }
  0xad   :  { %1870 = vmatpush.bf16.msrb.mxu1 %v2550_v29  ;;  %v2443_v29 = vld [vmem:[%s5038_s1 + $0x288] sm:$0xf0]  ;;  %v2814_v8 = vor.u32 %v3301_v60, %v2811_v62 }
  0xae   :  { %1883 = vmatpush.bf16.msrb.mxu2 %v2614_v20  ;;  %v1605_v26 = vadd.f32 %v1604_v19, %v1592_v18  ;;  %v2507_v20 = vld [vmem:[%s5038_s1 + $0x308] sm:$0xf0]  ;;  %v2803_v18 = vld [vmem:[%s5038_s1 + $0x558] sm:$0xf0]  ;;  %v3315_v19 = vld [vmem:[%s5038_s1 + $0x5d4] sm:$0xf] }
  0xaf   :  { %1846 = vmatpush.bf16.msrb.mxu3 %v2406_v28  ;;  %v3209_v28 = vld [vmem:[%s5038_s1 + $0x284] sm:$0xf]  ;;  %v2510_v47 = vor.u32 %v3225_v22, %v2507_v20  ;;  %v1606_v55 = vpop.f32.mrf.mxu1  ;;  %v2859_v20 = vld [vmem:[%s5038_s1 + $0x5c8] sm:$0xf0] }
  0xb0   :  { %1858 = vmatpush.bf16.msrb.mxu0 %v2478_v36  ;;  %v2755_v36 = vld [vmem:[%s5038_s1 + $0x4f8] sm:$0xf0]  ;;  %v2446_v43 = vor.u32 %v3209_v28, %v2443_v29  ;;  %v2806_v28 = vor.u32 %v3299_v16, %v2803_v18  ;;  %v2870_v29 = vor.u32 %v3315_v19, %v2867_v23  ;;  %v3313_v22 = vld [vmem:[%s5038_s1 + $0x5c4] sm:$0xf]  ;;  %v3307_v18 = vld [vmem:[%s5038_s1 + $0x594] sm:$0xf] }
  0xb1   :  { %1871 = vmatpush.bf16.msrb.mxu1 %v2542_v38  ;;  %v3267_v38 = vld [vmem:[%s5038_s1 + $0x454] sm:$0xf]  ;;  %v3293_v55 = vld [vmem:[%s5038_s1 + $0x524] sm:$0xf]  ;;  %v2835_v19 = vld [vmem:[%s5038_s1 + $0x598] sm:$0xf0] }
  0xb2   :  { %1884 = vmatpush.bf16.msrb.mxu2 %v2606_v42  ;;  %v1630_v42 = vpop.f32.mrf.mxu3 }
  0xb3   :  { %1847 = vmatpush.bf16.msrb.mxu3 %v2398_v37  ;;  %v1617_v37 = vpop.f32.mrf.mxu2  ;;  %v1593_v51 = vpop.f32.mrf.mxu0 }
  0xb4   :  { %1859 = vmatpush.bf16.msrb.mxu0 %v2470_v49  ;;  %v1618_v41 = vadd.f32 %v1617_v37, %v1605_v26  ;;  %v2758_v49 = vor.u32 %v3287_v35, %v2755_v36  ;;  %v3297_v26 = vld [vmem:[%s5038_s1 + $0x544] sm:$0xf]  ;;  %v2862_v36 = vor.u32 %v3313_v22, %v2859_v20  ;;  %v3259_v37 = vld [vmem:[%s5038_s1 + $0x414] sm:$0xf]  ;;  %v3011_v22 = vld [vmem:[%s5038_s1 + $0x6f8] sm:$0xf0] }
  0xb5   :  { %1872 = vmatpush.bf16.msrb.mxu1 %v2534_v53  ;;  %v3285_v53 = vld [vmem:[%s5038_s1 + $0x4e4] sm:$0xf] }
  0xb6   :  { %1885 = vmatpush.bf16.msrb.mxu2 %v2598_v57  ;;  %v4657_v50 = vadd.f32 %v1630_v42, %v1618_v41  ;;  %v2886_v57 = vor.u32 %v3319_v45, %v2883_v46  ;;  %v2787_v41 = vld [vmem:[%s5038_s1 + $0x538] sm:$0xf0]  ;;  %v3311_v42 = vld [vmem:[%s5038_s1 + $0x5b4] sm:$0xf]  ;;  %v3277_v51 = vld [vmem:[%s5038_s1 + $0x4a4] sm:$0xf] }
  0xb7   :  { %1848 = vmatpush.bf16.msrb.mxu3 %v2390_v52  ;;  %v2678_v52 = vor.u32 %v3267_v38, %v2675_v39  ;;  %v2643_v38 = vld [vmem:[%s5038_s1 + $0x418] sm:$0xf0]  ;;  %v3295_v39 = vld [vmem:[%s5038_s1 + $0x534] sm:$0xf] }
  0xb8   :  { %1860 = vmatpush.bf16.msrb.mxu0 %v2462_v3  ;;  %v2750_v3 = vor.u32 %v3285_v53, %v2747_v54  ;;  %v2635_v54 = vld [vmem:[%s5038_s1 + $0x408] sm:$0xf0] }
  0xb9   :  { %1873 = vmatpush.bf16.msrb.mxu1 %v2526_v5  ;;  %v3283_v5 = vld [vmem:[%s5038_s1 + $0x4d4] sm:$0xf] }
  0xba   :  { %1886 = vmatpush.bf16.msrb.mxu2 %v2590_v9  ;;  %v2878_v9 = vor.u32 %v3317_v63, %v2875_v21  ;;  %v1632_v17 = vpop.f32.mrf.mxu3  ;;  %v2742_v24 = vor.u32 %v3283_v5, %v2739_v6  ;;  %v3335_v63 = vld [vmem:[%s5038_s1 + $0x674] sm:$0xf]  ;;  %v2947_v21 = vld [vmem:[%s5038_s1 + $0x678] sm:$0xf0] }
  0xbb   :  { %1849 = vmatpush.bf16.msrb.mxu3 %v2382_v4  ;;  %v2670_v4 = vor.u32 %v3265_v58, %v2667_v59  ;;  %v1619_v7 = vpop.f32.mrf.mxu2  ;;  %v2843_v58 = vld [vmem:[%s5038_s1 + $0x5a8] sm:$0xf0]  ;;  %v3275_v5 = vld [vmem:[%s5038_s1 + $0x494] sm:$0xf]  ;;  %v2707_v6 = vld [vmem:[%s5038_s1 + $0x498] sm:$0xf0]  ;;  %v2950_v16 = vor.u32 %v3335_v63, %v2947_v21 }
  0xbc   :  { %1861 = vmatpush.bf16.msrb.mxu0 %v2454_v27  ;;  %v2731_v27 = vld [vmem:[%s5038_s1 + $0x4c8] sm:$0xf0]  ;;  %v2771_v17 = vld [vmem:[%s5038_s1 + $0x518] sm:$0xf0]  ;;  %v3363_v21 = vld [vmem:[%s5038_s1 + $0x754] sm:$0xf] }
  0xbd   :  { %1874 = vmatpush.bf16.msrb.mxu1 %v2518_v30  ;;  %v2795_v30 = vld [vmem:[%s5038_s1 + $0x548] sm:$0xf0]  ;;  %v2915_v63 = vld [vmem:[%s5038_s1 + $0x638] sm:$0xf0] }
  0xbe   :  { %1850 = vmatmul.bf16.vlgmr.msrb.gmra.mxu3 %v3822_v0  ;;  %1887 = vmatpush.bf16.msrb.mxu2 %v2582_v32  ;;  %v2574_v0 = vor.u32 %v3241_v31, %v2571_v34  ;;  %v2734_v31 = vor.u32 %v3281_v25, %v2731_v27  ;;  %v2723_v34 = vld [vmem:[%s5038_s1 + $0x4b8] sm:$0xf0]  ;;  %v2798_v35 = vor.u32 %v3297_v26, %v2795_v30  ;;  %v2939_v25 = vld [vmem:[%s5038_s1 + $0x668] sm:$0xf0]  ;;  %v3273_v27 = vld [vmem:[%s5038_s1 + $0x484] sm:$0xf] }
  0xbf   :  { %1894 = vmatpush.bf16.msra.mxu3 %v2694_v10  ;;  %v3263_v10 = vld [vmem:[%s5038_s1 + $0x434] sm:$0xf]  ;;  %v2763_v26 = vld [vmem:[%s5038_s1 + $0x508] sm:$0xf0] }
  0xc0   :  { %1862 = vmatpush.bf16.msrb.mxu0 %v2446_v43  ;;  %v1643_v40 = vpop.f32.mrf.mxu0  ;;  %v2851_v43 = vld [vmem:[%s5038_s1 + $0x5b8] sm:$0xf0]  ;;  %v3351_v30 = vld [vmem:[%s5038_s1 + $0x6f4] sm:$0xf] }
  0xc1   :  { %1875 = vmatpush.bf16.msrb.mxu1 %v2510_v47  ;;  %v1644_v44 = vadd.f32 %v1643_v40, %v4657_v50  ;;  %v1656_v45 = vpop.f32.mrf.mxu1  ;;  %v2646_v47 = vor.u32 %v3259_v37, %v2643_v38  ;;  %v2854_v53 = vor.u32 %v3311_v42, %v2851_v43  ;;  %v3257_v50 = vld [vmem:[%s5038_s1 + $0x404] sm:$0xf]  ;;  %v3367_v37 = vld [vmem:[%s5038_s1 + $0x774] sm:$0xf]  ;;  %v3075_v38 = vld [vmem:[%s5038_s1 + $0x778] sm:$0xf0]  ;;  %v3014_v40 = vor.u32 %v3351_v30, %v3011_v22 }
  0xc2   :  { %1888 = vmatpush.bf16.msrb.mxu2 %v2574_v0  ;;  %v2715_v0 = vld [vmem:[%s5038_s1 + $0x4a8] sm:$0xf0]  ;;  %v2899_v30 = vld [vmem:[%s5038_s1 + $0x618] sm:$0xf0]  ;;  %v3359_v22 = vld [vmem:[%s5038_s1 + $0x734] sm:$0xf] }
  0xc3   :  { %1895 = vmatpush.bf16.msra.mxu3 %v2686_v33  ;;  %1863 = vmatmul.bf16.vlgmr.msrb.gmra.mxu0 %v3826_v2  ;;  %v2662_v2 = vor.u32 %v3263_v10, %v2659_v12  ;;  %v3279_v33 = vld [vmem:[%s5038_s1 + $0x4b4] sm:$0xf]  ;;  %v2718_v60 = vor.u32 %v3277_v51, %v2715_v0  ;;  %v2923_v0 = vld [vmem:[%s5038_s1 + $0x648] sm:$0xf0] }
  0xc4   :  { %1907 = vmatpush.bf16.msra.mxu0 %v2758_v49  ;;  %1876 = vmatmul.bf16.vlgmr.msrb.gmra.mxu1 %v3820_v61  ;;  %v3261_v61 = vld [vmem:[%s5038_s1 + $0x424] sm:$0xf]  ;;  %v2726_v46 = vor.u32 %v3279_v33, %v2723_v34  ;;  %v1657_v49 = vadd.f32 %v1656_v45, %v1644_v44  ;;  %v3291_v10 = vld [vmem:[%s5038_s1 + $0x514] sm:$0xf]  ;;  %v3078_v45 = vor.u32 %v3367_v37, %v3075_v38  ;;  %v2971_v38 = vld [vmem:[%s5038_s1 + $0x6a8] sm:$0xf0] }
  0xc5   :  { %1920 = vmatpush.bf16.msra.mxu1 %v2822_v56  ;;  %1889 = vmatmul.bf16.vlgmr.msrb.gmra.mxu2 %v3824_v1  ;;  %v2651_v1 = vld [vmem:[%s5038_s1 + $0x428] sm:$0xf0]  ;;  %v3331_v33 = vld [vmem:[%s5038_s1 + $0x654] sm:$0xf]  ;;  %v3341_v37 = vld [vmem:[%s5038_s1 + $0x6a4] sm:$0xf] }
  0xc6   :  { %1933 = vmatpush.bf16.msra.mxu2 %v2886_v57  ;;  %v2654_v32 = vor.u32 %v3261_v61, %v2651_v1  ;;  %v2779_v56 = vld [vmem:[%s5038_s1 + $0x528] sm:$0xf0]  ;;  %v3309_v57 = vld [vmem:[%s5038_s1 + $0x5a4] sm:$0xf]  ;;  %v2774_v61 = vor.u32 %v3291_v10, %v2771_v17  ;;  %v2838_v1 = vor.u32 %v3307_v18, %v2835_v19 }
  0xc7   :  { %1896 = vmatpush.bf16.msra.mxu3 %v2678_v52  ;;  %v2790_v52 = vor.u32 %v3295_v39, %v2787_v41  ;;  %v2782_v7 = vor.u32 %v3293_v55, %v2779_v56  ;;  %v3123_v41 = vld [vmem:[%s5038_s1 + $0x7d8] sm:$0xf0]  ;;  %v3051_v17 = vld [vmem:[%s5038_s1 + $0x748] sm:$0xf0]  ;;  %v3373_v18 = vld [vmem:[%s5038_s1 + $0x7a4] sm:$0xf] }
  0xc8   :  { %1908 = vmatpush.bf16.msra.mxu0 %v2750_v3  ;;  %v1669_v59 = vpop.f32.mrf.mxu2  ;;  %v1645_v12 = vpop.f32.mrf.mxu0  ;;  %v3099_v19 = vld [vmem:[%s5038_s1 + $0x7a8] sm:$0xf0] }
  0xc9   :  { %1921 = vmatpush.bf16.msra.mxu1 %v2814_v8  ;;  %v1670_v62 = vadd.f32 %v1669_v59, %v1657_v49  ;;  %v1682_v3 = vpop.f32.mrf.mxu3  ;;  %v2846_v8 = vor.u32 %v3309_v57, %v2843_v58  ;;  %v1658_v23 = vpop.f32.mrf.mxu1  ;;  %v3003_v49 = vld [vmem:[%s5038_s1 + $0x6e8] sm:$0xf0]  ;;  %v3327_v58 = vld [vmem:[%s5038_s1 + $0x634] sm:$0xf] }
  0xca   :  { %1934 = vmatpush.bf16.msra.mxu2 %v2878_v9  ;;  %v3347_v59 = vld [vmem:[%s5038_s1 + $0x6d4] sm:$0xf]  ;;  %v2907_v12 = vld [vmem:[%s5038_s1 + $0x628] sm:$0xf0] }
  0xcb   :  { %1897 = vmatpush.bf16.msra.mxu3 %v2670_v4  ;;  %v2638_v4 = vor.u32 %v3257_v50, %v2635_v54  ;;  %v4795_v9 = vadd.f32 %v1682_v3, %v1670_v62  ;;  %v3377_v50 = vld [vmem:[%s5038_s1 + $0x7c4] sm:$0xf]  ;;  %v3115_v54 = vld [vmem:[%s5038_s1 + $0x7c8] sm:$0xf0]  ;;  %v3059_v3 = vld [vmem:[%s5038_s1 + $0x758] sm:$0xf0] }
  0xcc   :  { %1909 = vmatpush.bf16.msra.mxu0 %v2742_v24  ;;  %v2710_v24 = vor.u32 %v3275_v5, %v2707_v6  ;;  %v3118_v62 = vor.u32 %v3377_v50, %v3115_v54  ;;  %v2918_v6 = vor.u32 %v3327_v58, %v2915_v63  ;;  %v3355_v54 = vld [vmem:[%s5038_s1 + $0x714] sm:$0xf]  ;;  %v3353_v63 = vld [vmem:[%s5038_s1 + $0x704] sm:$0xf] }
  0xcd   :  { %1922 = vmatpush.bf16.msra.mxu1 %v2806_v28  ;;  %v2699_v28 = vld [vmem:[%s5038_s1 + $0x488] sm:$0xf0] }
  0xce   :  { %1935 = vmatpush.bf16.msra.mxu2 %v2870_v29  ;;  %v3289_v29 = vld [vmem:[%s5038_s1 + $0x504] sm:$0xf] }
  0xcf   :  { %1898 = vmatpush.bf16.msra.mxu3 %v2662_v2  ;;  %v3333_v2 = vld [vmem:[%s5038_s1 + $0x664] sm:$0xf]  ;;  %v2766_v42 = vor.u32 %v3289_v29, %v2763_v26  ;;  %v2979_v29 = vld [vmem:[%s5038_s1 + $0x6b8] sm:$0xf0] }
  0xd0   :  { %1910 = vmatpush.bf16.msra.mxu0 %v2734_v31  ;;  %v2942_v20 = vor.u32 %v3333_v2, %v2939_v25  ;;  %v3305_v31 = vld [vmem:[%s5038_s1 + $0x584] sm:$0xf]  ;;  %v1671_v34 = vpop.f32.mrf.mxu2 }
  0xd1   :  { %1923 = vmatpush.bf16.msra.mxu1 %v2798_v35  ;;  %v2702_v35 = vor.u32 %v3273_v27, %v2699_v28  ;;  %v1684_v39 = vpop.f32.mrf.mxu3  ;;  %v3323_v27 = vld [vmem:[%s5038_s1 + $0x614] sm:$0xf] }
  0xd2   :  { %1936 = vmatpush.bf16.msra.mxu2 %v2862_v36  ;;  %v2931_v36 = vld [vmem:[%s5038_s1 + $0x658] sm:$0xf0]  ;;  %v3343_v28 = vld [vmem:[%s5038_s1 + $0x6b4] sm:$0xf]  ;;  %v2902_v34 = vor.u32 %v3323_v27, %v2899_v30 }
  0xd3   :  { %1899 = vmatpush.bf16.msra.mxu3 %v2654_v32  ;;  %v2827_v32 = vld [vmem:[%s5038_s1 + $0x588] sm:$0xf0]  ;;  %v2934_v44 = vor.u32 %v3331_v33, %v2931_v36  ;;  %v2982_v33 = vor.u32 %v3343_v28, %v2979_v29  ;;  %v3321_v36 = vld [vmem:[%s5038_s1 + $0x604] sm:$0xf]  ;;  %v281_v28 = vperm.slane %v4557_v48, 1 }
  0xd4   :  { %1911 = vmatpush.bf16.msra.mxu0 %v2726_v46  ;;  %v2830_v43 = vor.u32 %v3305_v31, %v2827_v32  ;;  %v3329_v46 = vld [vmem:[%s5038_s1 + $0x644] sm:$0xf]  ;;  %v3371_v31 = vld [vmem:[%s5038_s1 + $0x794] sm:$0xf] }
  0xd5   :  { %1924 = vmatpush.bf16.msra.mxu1 %v2790_v52  ;;  %v3365_v52 = vld [vmem:[%s5038_s1 + $0x764] sm:$0xf]  ;;  %v2926_v56 = vor.u32 %v3329_v46, %v2923_v0  ;;  %v3339_v0 = vld [vmem:[%s5038_s1 + $0x694] sm:$0xf] }
  0xd6   :  { %1937 = vmatpush.bf16.msra.mxu2 %v2854_v53  ;;  %v3067_v53 = vld [vmem:[%s5038_s1 + $0x768] sm:$0xf0] }
  0xd7   :  { %1900 = vmatpush.bf16.msra.mxu3 %v2646_v47  ;;  %v3349_v47 = vld [vmem:[%s5038_s1 + $0x6e4] sm:$0xf]  ;;  %v3070_v57 = vor.u32 %v3365_v52, %v3067_v53  ;;  %v2963_v52 = vld [vmem:[%s5038_s1 + $0x698] sm:$0xf0] }
  0xd8   :  { %1912 = vmatpush.bf16.msra.mxu0 %v2718_v60  ;;  %v3006_v55 = vor.u32 %v3349_v47, %v3003_v49  ;;  %v2995_v60 = vld [vmem:[%s5038_s1 + $0x6d8] sm:$0xf0]  ;;  %v2966_v58 = vor.u32 %v3339_v0, %v2963_v52 }
  0xd9   :  { %1925 = vmatpush.bf16.msra.mxu1 %v2782_v7  ;;  %v2998_v5 = vor.u32 %v3347_v59, %v2995_v60  ;;  %v3062_v7 = vor.u32 %v3363_v21, %v3059_v3  ;;  %v3337_v60 = vld [vmem:[%s5038_s1 + $0x684] sm:$0xf]  ;;  %v3019_v21 = vld [vmem:[%s5038_s1 + $0x708] sm:$0xf0] }
  0xda   :  { %1938 = vmatpush.bf16.msra.mxu2 %v2846_v8  ;;  %v2987_v8 = vld [vmem:[%s5038_s1 + $0x6c8] sm:$0xf0]  ;;  %v3385_v3 = vld [vmem:[#allocation1 + $0x24] sm:$0xff] }
  0xdb   :  { %1901 = vmatpush.bf16.msra.mxu3 %v2638_v4  ;;  %v3107_v4 = vld [vmem:[%s5038_s1 + $0x7b8] sm:$0xf0] }
  0xdc   :  { %1913 = vmatpush.bf16.msra.mxu0 %v2710_v24 }
  0xdd   :  { %1926 = vmatpush.bf16.msra.mxu1 %v2774_v61 }
  0xde   :  { %1902 = vmatmul.bf16.vlgmr.msra.gmra.mxu3 %v3961_v11  ;;  %v3379_v11 = vld [vmem:[%s5038_s1 + $0x7d4] sm:$0xf]  ;;  %1939 = vmatpush.bf16.msra.mxu2 %v2838_v1  ;;  %v3102_v1 = vor.u32 %v3373_v18, %v3099_v19 }
  0xdf   :  { %1946 = vmatpush.bf16.msrb.mxu3 %v2950_v16  ;;  %v3126_v51 = vor.u32 %v3379_v11, %v3123_v41  ;;  %v3361_v16 = vld [vmem:[%s5038_s1 + $0x744] sm:$0xf]  ;;  %v3035_v41 = vld [vmem:[%s5038_s1 + $0x728] sm:$0xf0] }
  0xe0   :  { %1914 = vmatpush.bf16.msra.mxu0 %v2702_v35  ;;  %v1695_v24 = vpop.f32.mrf.mxu0  ;;  %v3054_v25 = vor.u32 %v3361_v16, %v3051_v17  ;;  %v3357_v11 = vld [vmem:[%s5038_s1 + $0x724] sm:$0xf] }
  0xe1   :  { %1927 = vmatpush.bf16.msra.mxu1 %v2766_v42  ;;  %v1696_v61 = vadd.f32 %v1695_v24, %v4795_v9  ;;  %v1708_v26 = vpop.f32.mrf.mxu1  ;;  %v3091_v9 = vld [vmem:[%s5038_s1 + $0x798] sm:$0xf0]  ;;  %v3369_v42 = vld [vmem:[%s5038_s1 + $0x784] sm:$0xf] }
  0xe2   :  { %1940 = vmatpush.bf16.msra.mxu2 %v2830_v43  ;;  %v3094_v39 = vor.u32 %v3371_v31, %v3091_v9  ;;  %v3083_v43 = vld [vmem:[%s5038_s1 + $0x788] sm:$0xf0] }
  0xe3   :  { %1947 = vmatpush.bf16.msrb.mxu3 %v2942_v20  ;;  %1915 = vmatmul.bf16.vlgmr.msra.gmra.mxu0 %v3965_v14  ;;  %v3375_v14 = vld [vmem:[%s5038_s1 + $0x7b4] sm:$0xf]  ;;  %v3043_v20 = vld [vmem:[%s5038_s1 + $0x738] sm:$0xf0]  ;;  %v1709_v32 = vadd.f32 %v1708_v26, %v1696_v61  ;;  %v3086_v50 = vor.u32 %v3369_v42, %v3083_v43 }
  0xe4   :  { %1959 = vmatpush.bf16.msrb.mxu0 %v3014_v40  ;;  %1928 = vmatmul.bf16.vlgmr.msra.gmra.mxu1 %v3963_v13  ;;  %v3345_v13 = vld [vmem:[%s5038_s1 + $0x6c4] sm:$0xf]  ;;  %v3110_v10 = vor.u32 %v3375_v14, %v3107_v4  ;;  %v3046_v35 = vor.u32 %v3359_v22, %v3043_v20  ;;  %v2891_v40 = vld [vmem:[%s5038_s1 + $0x608] sm:$0xf0] }
  0xe5   :  { %1972 = vmatpush.bf16.msrb.mxu1 %v3078_v45  ;;  %1941 = vmatmul.bf16.vlgmr.msra.gmra.mxu2 %v3967_v15  ;;  %v3325_v15 = vld [vmem:[%s5038_s1 + $0x624] sm:$0xf]  ;;  %v2990_v23 = vor.u32 %v3345_v13, %v2987_v8  ;;  %v2974_v45 = vor.u32 %v3341_v37, %v2971_v38  ;;  %v2894_v49 = vor.u32 %v3321_v36, %v2891_v40  ;;  %v3388_v13 = vld [vmem:[#allocation1 + $0x36] sm:$0xff] }
  0xe6   :  { %1987 = vmatpush.bf16.msrb.mxu2 %v3126_v51  ;;  %v2910_v2 = vor.u32 %v3325_v15, %v2907_v12  ;;  %v3038_v51 = vor.u32 %v3357_v11, %v3035_v41  ;;  %v3387_v15 = vld [vmem:[#allocation1 + $0x2d] sm:$0xff] }
  0xe7   :  { %1948 = vmatpush.bf16.msrb.mxu3 %v2934_v44 }
  0xe8   :  { %1960 = vmatpush.bf16.msrb.mxu0 %v3006_v55  ;;  %v1721_v44 = vpop.f32.mrf.mxu2  ;;  %v1697_v53 = vpop.f32.mrf.mxu0  ;;  %v3027_v55 = vld [vmem:[%s5038_s1 + $0x718] sm:$0xf0] }
  0xe9   :  { %1973 = vmatpush.bf16.msrb.mxu1 %v3070_v57  ;;  %v1722_v46 = vadd.f32 %v1721_v44, %v1709_v32  ;;  %v1734_v47 = vpop.f32.mrf.mxu3  ;;  %v3030_v59 = vor.u32 %v3355_v54, %v3027_v55 }
  0xea   :  { %1988 = vmatpush.bf16.msrb.mxu2 %v3118_v62  ;;  %v2955_v62 = vld [vmem:[%s5038_s1 + $0x688] sm:$0xf0] }
  0xeb   :  { %1949 = vmatpush.bf16.msrb.mxu3 %v2926_v56  ;;  %v1710_v56 = vpop.f32.mrf.mxu1  ;;  %v1735_v57 = vadd.f32 %v1734_v47, %v1722_v46  ;;  %v2958_v14 = vor.u32 %v3337_v60, %v2955_v62 }
  0xec   :  { %1961 = vmatpush.bf16.msrb.mxu0 %v2998_v5  ;;  %v3386_v5 = vld [vmem:[#allocation1 + $0x3f] sm:$0xff] }
  0xed   :  { %1974 = vmatpush.bf16.msrb.mxu1 %v3062_v7 }
  0xee   :  { %1989 = vmatpush.bf16.msrb.mxu2 %v3110_v10 }
  0xef   :  { %1950 = vmatpush.bf16.msrb.mxu3 %v2918_v6  ;;  %v3022_v6 = vor.u32 %v3353_v63, %v3019_v21 }
  0xf0   :  { %1962 = vmatpush.bf16.msrb.mxu0 %v2990_v23  ;;  %v1723_v4 = vpop.f32.mrf.mxu2 }
  0xf1   :  { %1975 = vmatpush.bf16.msrb.mxu1 %v3054_v25  ;;  %v1736_v7 = vpop.f32.mrf.mxu3 }
  0xf2   :  { %1990 = vmatpush.bf16.msrb.mxu2 %v3102_v1 }
  0xf3   :  { %1951 = vmatpush.bf16.msrb.mxu3 %v2910_v2 }
  0xf4   :  { %1963 = vmatpush.bf16.msrb.mxu0 %v2982_v33 }
  0xf5   :  { %1976 = vmatpush.bf16.msrb.mxu1 %v3046_v35 }
  0xf6   :  { %1991 = vmatpush.bf16.msrb.mxu2 %v3094_v39 }
  0xf7   :  { %1952 = vmatpush.bf16.msrb.mxu3 %v2902_v34 }
  0xf8   :  { %1964 = vmatpush.bf16.msrb.mxu0 %v2974_v45 }
  0xf9   :  { %1977 = vmatpush.bf16.msrb.mxu1 %v3038_v51 }
  0xfa   :  { %1992 = vmatpush.bf16.msrb.mxu2 %v3086_v50 }
  0xfb   :  { %1953 = vmatpush.bf16.msrb.mxu3 %v2894_v49 }
  0xfc   :  { %1965 = vmatpush.bf16.msrb.mxu0 %v2966_v58 }
  0xfd   :  { %3128 = vmatmul.msk.bf16.vlgmr.msrb.gmra.mxu2 %vm1579_vm0, %v3386_v5  ;;  %1978 = vmatpush.bf16.msrb.mxu1 %v3030_v59 }
  0xfe   :  { %1954 = vmatmul.bf16.vlgmr.msrb.gmra.mxu3 %v3385_v3 }
 0x100   :  { %1966 = vmatpush.bf16.msrb.mxu0 %v2958_v14  ;;  %v1747_v8 = vpop.f32.mrf.mxu0 }
 0x101   :  { %1979 = vmatpush.bf16.msrb.mxu1 %v3022_v6  ;;  %v1786_v10 = vpop.f32.mrf.mxu3  ;;  %v1748_v12 = vadd.f32 %v1747_v8, %v1735_v57  ;;  %v1760_v16 = vpop.f32.mrf.mxu1 }
 0x103   :  { %1967 = vmatmul.bf16.vlgmr.msrb.gmra.mxu0 %v3387_v15  ;;  %v1761_v17 = vadd.f32 %v1760_v16, %v1748_v12 }
 0x104   :  { %1980 = vmatmul.bf16.vlgmr.msrb.gmra.mxu1 %v3388_v13 }
 0x108   :  { %v1773_v18 = vpop.f32.mrf.mxu2  ;;  %v1749_v24 = vpop.f32.mrf.mxu0 }
 0x109   :  { %v1774_v19 = vadd.f32 %v1773_v18, %v1761_v17  ;;  %v1788_v23 = vpop.f32.mrf.mxu3  ;;  %v1762_v25 = vpop.f32.mrf.mxu1 }
 0x10b   :  { %v5007_v2 = vadd.f32 %v1786_v10, %v1774_v19 }
 0x10d   :  { %v1999_v44 = vsel %vm1998_vm1, %v5007_v2, 0.0  ;;  %v2014_v45 = vmul.f32 %v5007_v2, %v5007_v2 }
 0x10e   :  { %v2000_v47 = vrot.slane %v1999_v44, 4 }
 0x10f   :  { %v2016_v51 = vsel %vm1998_vm1, %v2014_v45, 0.0 }
 0x110   :  { %v1775_v27 = vpop.f32.mrf.mxu2  ;;  %v2001_v54 = vadd.f32 %v2000_v47, %v1999_v44  ;;  %v2017_v55 = vrot.slane %v2016_v51, 4 }
 0x112   :  { %v2002_v57 = vrot.slane %v2001_v54, 2  ;;  %v2018_v58 = vadd.f32 %v2017_v55, %v2016_v51 }
 0x114   :  { %v2003_v63 = vadd.f32 %v2002_v57, %v2001_v54  ;;  %v2019_v21 = vrot.slane %v2018_v58, 2 }
 0x116   :  { %v2004_v14 = vrot.slane %v2003_v63, 1  ;;  %v2020_v4 = vadd.f32 %v2019_v21, %v2018_v58 }
 0x118   :  { %v2005_v6 = vadd.f32 %v2004_v14, %v2003_v63  ;;  %v2021_v7 = vrot.slane %v2020_v4, 1 }
 0x11a   :  { %v2022_v16 = vadd.f32 %v2021_v7, %v2020_v4  ;;  %v5013_v17 = vmul.f32 0.5, %v2005_v6 }
 0x11c   :  { %v2032_v24 = vmul.f32 0.5, %v2022_v16  ;;  %v2034_v25 = vmul.f32 %v5013_v17, %v5013_v17 }
 0x120   :  { %v1812_v61 = vpop.f32.mrf.mxu0 }
 0x121   :  { %v1799_v29 = vpop.f32.mrf.mxu3  ;;  %v1825_v26 = vpop.f32.mrf.mxu1 }
 0x122   :  { %v1800_v1 = vadd.f32 %v1799_v29, %v281_v28 }
 0x124   :  { %v1813_v30 = vadd.f32 %v1812_v61, %v1800_v1 }
 0x126   :  { %v1826_v22 = vadd.f32 %v1825_v26, %v1813_v30  ;;  %v2036_v30 = vsub.f32 %v2032_v24, %v2034_v25  ;;  %v2098_v24 = vld.sshfl [vmem:[#allocation1 + $0x8] sm:$0xff pattern:$0x73625140] }
 0x128   :  { %v1838_v20 = vpop.f32.mrf.mxu2  ;;  %v1814_v9 = vpop.f32.mrf.mxu0 }
 0x129   :  { %v1801_v31 = vpop.f32.mrf.mxu3  ;;  %v1827_v32 = vpop.f32.mrf.mxu1  ;;  %v1839_v41 = vadd.f32 %v1838_v20, %v1826_v22 }
 0x130   :  { %v1840_v33 = vpop.f32.mrf.mxu2 }
 0x131   :  { %v2038_v33 = vmax.f32 %v2036_v30, 0.0 }
 0x140   :  { %v1864_v35 = vpop.f32.mrf.mxu0 }
 0x141   :  { %v1851_v34 = vpop.f32.mrf.mxu3  ;;  %v1877_v36 = vpop.f32.mrf.mxu1 }
 0x142   :  { %v1852_v46 = vadd.f32 %v1851_v34, %v1839_v41 }
 0x144   :  { %v1865_v0 = vadd.f32 %v1864_v35, %v1852_v46 }
 0x146   :  { %v1878_v56 = vadd.f32 %v1877_v36, %v1865_v0 }
 0x148   :  { %v1890_v38 = vpop.f32.mrf.mxu2  ;;  %v1866_v39 = vpop.f32.mrf.mxu0 }
 0x149   :  { %v1853_v37 = vpop.f32.mrf.mxu3  ;;  %v1879_v40 = vpop.f32.mrf.mxu1  ;;  %v1891_v59 = vadd.f32 %v1890_v38, %v1878_v56  ;;  %v2041_v38 = vadd.f32 1e-05, %v2038_v33 }
 0x14b   :  { %3381 = vrsqrt.f32 %v2041_v38  ;;  %vm2049_vm7 = vweird.f32 %v2041_v38 }
 0x150   :  { %v1892_v11 = vpop.f32.mrf.mxu2 }
 0x151   :  { %v3382_v46 = vpop.eup %3381 }
 0x152   :  { %v2044_v51 = vmul.f32 %v3382_v46, %v2041_v38  ;;  %vm2050_vm4 = vweird.f32 %v3382_v46 }
 0x153   :  { %vm2051_vm9 = vmor %vm2049_vm7, %vm2050_vm4 }
 0x154   :  { %v2045_v0 = vmul.f32 %v3382_v46, %v2044_v51 }
 0x160   :  { %v1916_v42 = vpop.f32.mrf.mxu0 }
 0x161   :  { %v1903_v48 = vpop.f32.mrf.mxu3  ;;  %v1929_v43 = vpop.f32.mrf.mxu1 }
 0x162   :  { %v1904_v62 = vadd.f32 %v1903_v48, %v1891_v59 }
 0x164   :  { %v1917_v3 = vadd.f32 %v1916_v42, %v1904_v62  ;;  %v2040_v62 = vld [vmem:[%s5042_s3] sm:$0x3] }
 0x166   :  { %v1930_v5 = vadd.f32 %v1929_v43, %v1917_v3 }
 0x168   :  { %v1942_v52 = vpop.f32.mrf.mxu2  ;;  %v1918_v53 = vpop.f32.mrf.mxu0 }
 0x169   :  { %v1905_v49 = vpop.f32.mrf.mxu3  ;;  %v1931_v50 = vpop.f32.mrf.mxu1  ;;  %v1943_v15 = vadd.f32 %v1942_v52, %v1930_v5  ;;  %v2046_v53 = vmul.f32 0.5, %v2045_v0 }
 0x16b   :  { %v2047_v55 = vsub.f32 1.5, %v2046_v53 }
 0x16d   :  { %v2048_v58 = vmul.f32 %v3382_v46, %v2047_v55 }
 0x16f   :  { %v2052_v21 = vsel %vm2051_vm9, %v3382_v46, %v2048_v58 }
 0x170   :  { %v1944_v60 = vpop.f32.mrf.mxu2 }
 0x180   :  { %v1994_v10 = vpop.f32.mrf.mxu2  ;;  %v1968_v12 = vpop.f32.mrf.mxu0 }
 0x181   :  { %v1955_v13 = vpop.f32.mrf.mxu3  ;;  %v1981_v18 = vpop.f32.mrf.mxu1 }
 0x182   :  { %v1956_v8 = vadd.f32 %v1955_v13, %v1943_v15 }
 0x184   :  { %v1969_v19 = vadd.f32 %v1968_v12, %v1956_v8  ;;  %v2070_v8 = vld [vmem:[%s5043_s4] sm:$0x3] }
 0x186   :  { %v1982_v23 = vadd.f32 %v1981_v18, %v1969_v19 }
 0x188   :  { %v5017_v27 = vadd.f32 %v1994_v10, %v1982_v23  ;;  %v1996_v1 = vpop.f32.mrf.mxu2  ;;  %v1970_v26 = vpop.f32.mrf.mxu0  ;;  %v2097_v23 = vld.sshfl [vmem:[#allocation1] sm:$0xff pattern:$0x73625140] }
 0x189   :  { %v1957_v28 = vpop.f32.mrf.mxu3  ;;  %v1983_v20 = vpop.f32.mrf.mxu1 }
 0x18a   :  { %v2007_v29 = vsel %vm2006_vm2, %v5017_v27, 0.0  ;;  %v2015_v61 = vmul.f32 %v5017_v27, %v5017_v27 }
 0x18b   :  { %v2008_v22 = vrot.slane %v2007_v29, 4 }
 0x18c   :  { %v2023_v31 = vsel %vm2006_vm2, %v2015_v61, 0.0 }
 0x18d   :  { %v2009_v9 = vadd.f32 %v2008_v22, %v2007_v29  ;;  %v2024_v32 = vrot.slane %v2023_v31, 4 }
 0x18f   :  { %v2010_v34 = vrot.slane %v2009_v9, 2  ;;  %v2025_v35 = vadd.f32 %v2024_v32, %v2023_v31 }
 0x191   :  { %v2011_v36 = vadd.f32 %v2010_v34, %v2009_v9  ;;  %v2026_v37 = vrot.slane %v2025_v35, 2 }
 0x193   :  { %v2012_v39 = vrot.slane %v2011_v36, 1  ;;  %v2027_v40 = vadd.f32 %v2026_v37, %v2025_v35 }
 0x195   :  { %v2013_v11 = vadd.f32 %v2012_v39, %v2011_v36  ;;  %v2028_v48 = vrot.slane %v2027_v40, 1 }
 0x197   :  { %v2029_v41 = vadd.f32 %v2028_v48, %v2027_v40  ;;  %v2031_v42 = vmul.f32 0.5, %v2013_v11 }
 0x199   :  { %v2033_v43 = vmul.f32 0.5, %v2029_v41  ;;  %v2035_v44 = vmul.f32 %v2031_v42, %v2031_v42 }
 0x19b   :  { %v2037_v45 = vsub.f32 %v2033_v43, %v2035_v44 }
 0x19d   :  { %v2039_v47 = vmax.f32 %v2037_v45, 0.0 }
 0x19f   :  { %v2042_v49 = vadd.f32 1e-05, %v2039_v47 }
 0x1a1   :  { %3383 = vrsqrt.f32 %v2042_v49  ;;  %vm2059_vm5 = vweird.f32 %v2042_v49 }
 0x1a7   :  { %v3384_v52 = vpop.eup %3383 }
 0x1a8   :  { %v2054_v50 = vmul.f32 %v3384_v52, %v2042_v49  ;;  %vm2060_vm3 = vweird.f32 %v3384_v52 }
 0x1a9   :  { %vm2061_vm6 = vmor %vm2059_vm5, %vm2060_vm3 }
 0x1aa   :  { %v2055_v54 = vmul.f32 %v3384_v52, %v2054_v50 }
 0x1ac   :  { %v2056_v56 = vmul.f32 0.5, %v2055_v54 }
 0x1ae   :  { %v2057_v57 = vsub.f32 1.5, %v2056_v56 }
 0x1b0   :  { %v2058_v59 = vmul.f32 %v3384_v52, %v2057_v57 }
 0x1b2   :  { %v2062_v60 = vsel %vm2061_vm6, %v3384_v52, %v2058_v59 }
 0x1b3   :  { %v2065_v63 = vrot.slane %v2062_v60, 7 }
 0x1b5   :  { %v2067_v3 = vsel %vm2066_vm8, %v2052_v21, %v2065_v63 }
 0x1b6   :  { %v2069_v14 = vmul.f32 %v2067_v3, %v2040_v62 }
 0x1b8   :  { %v2072_v4 = vperm.slane %v2069_v14, 0  ;;  %v2073_v5 = vperm.slane %v2069_v14, 1 }
 0x1ba   :  { %v2076_v6 = vmul.f32 %v2072_v4, %v5013_v17  ;;  %v2077_v7 = vmul.f32 %v2073_v5, %v2031_v42  ;;  %v2084_v15 = vmul.f32 %v2072_v4, %v5007_v2  ;;  %v2085_v13 = vmul.f32 %v2073_v5, %v5017_v27 }
 0x1bc   :  { %v2080_v10 = vrot.slane %v2077_v7, 7 }
 0x1be   :  { %v2081_v12 = vsel %vm2066_vm8, %v2076_v6, %v2080_v10 }
 0x1bf   :  { %v2083_v16 = vsub.f32 %v2070_v8, %v2081_v12 }
 0x1c1   :  { %v2087_v18 = vperm.slane %v2083_v16, 0  ;;  %v2088_v19 = vperm.slane %v2083_v16, 1 }
 0x1c3   :  { %v2091_v25 = vadd.f32 %v2087_v18, %v2084_v15  ;;  %v2092_v28 = vadd.f32 %v2088_v19, %v2085_v13 }
 0x1c5   :  { %v2101_v17 = vadd.f32 %v2097_v23, %v2091_v25  ;;  %v2102_v29 = vadd.f32 %v2098_v24, %v2092_v28 }
 0x1c7   :  { %v2103_v61 = vmax.f32 %v2101_v17, 0.0  ;;  %v2104_v2 = vmax.f32 %v2102_v29, 0.0 }
 0x1c9   :  { %v2105_v27 = vpack.c.bf16 %v2104_v2, %v2103_v61 }
 0x1cb   :  { %v2107_v1 = vrot.slane %v2105_v27, 3 }
 0x1cd   :  { %v2110_v26 = vsel %vm2066_vm8, %v2105_v27, %v2107_v1 }
 0x1ce   :  { %2114 = vst.msk [vmem:[%s5044_s6] sm:$0x3] %vm2113_vm11, %v2110_v26 }

</bundles_post_ra>
